<compile_context>
chip_gen: v6e
topology: v6e:2x2x1
jax: 0.10.0
libtpu: 0.0.40
codegen_flags: <defaults>
</compile_context>

<pallas_src>
import functools
import math

import jax
import jax.numpy as jnp
from jax.experimental import pallas as pl
from jax.experimental.pallas import tpu as pltpu


_LN_EPS = 1e-5                      # nn.TransformerEncoderLayer default layer_norm_eps
_VMEM_LIMIT = 48 * 1024 * 1024      # ~75% of v7x per-core VMEM; fine on v5e/v6e


def _row_tile(m):
    """Row tile: multiple of 8, as large as possible while keeping >=2 grid steps."""
    for tm in (512, 256, 128, 64, 32, 16, 8):
        if m % tm == 0 and m // tm >= 2:
            return tm
    return m


def _layernorm(y, g, beta, eps):
    mean = jnp.mean(y, axis=-1, keepdims=True)
    yc = y - mean
    var = jnp.mean(yc * yc, axis=-1, keepdims=True)
    return yc * jax.lax.rsqrt(var + eps) * g + beta


# --------------------- fused attention sub-layer (qkv + MHA + out-proj + LN1) ---------------------

def _attn_block_kernel(x_ref, wq_ref, wk_ref, wv_ref, bq_ref, bk_ref, bv_ref,
                       wo_ref, bo_ref, g_ref, beta_ref, o_ref, *, n_heads, eps):
    """out = LayerNorm(x + MHA(x) @ Wo + bo) for one batch element, all in VMEM."""
    x = x_ref[...].astype(jnp.float32)                              # (S, D)
    xb = x.astype(jnp.bfloat16)
    acc = jnp.zeros(x.shape, jnp.float32)                           # sum_h (attn_h @ Wo_h)
    for h in range(n_heads):                                        # head-major weights: no lane slicing
        q = jnp.dot(xb, wq_ref[h], preferred_element_type=jnp.float32) + bq_ref[h]   # scale pre-folded
        k = jnp.dot(xb, wk_ref[h], preferred_element_type=jnp.float32) + bk_ref[h]
        v = jnp.dot(xb, wv_ref[h], preferred_element_type=jnp.float32) + bv_ref[h]
        s = jax.lax.dot_general(q.astype(jnp.bfloat16), k.astype(jnp.bfloat16),
                                (((1,), (1,)), ((), ())),
                                preferred_element_type=jnp.float32)                    # (S, S)
        m = jnp.max(s, axis=-1, keepdims=True)
        p = jnp.exp(s - m)
        l = jnp.sum(p, axis=-1, keepdims=True)
        o_h = jnp.dot(p.astype(jnp.bfloat16), v.astype(jnp.bfloat16),
                      preferred_element_type=jnp.float32)                              # (S, dh)
        o_h = o_h * pl.reciprocal(l, approx=True)
        acc = acc + jnp.dot(o_h.astype(jnp.bfloat16), wo_ref[h],
                            preferred_element_type=jnp.float32)                        # (S, D)
    y = x + acc + bo_ref[...].astype(jnp.float32)
    o_ref[...] = _layernorm(y, g_ref[...].astype(jnp.float32),
                            beta_ref[...].astype(jnp.float32), eps).astype(o_ref.dtype)


def attn_block(x, p, eps=_LN_EPS):
    B, S, D = x.shape
    H, _, dh = p["wq"].shape
    # NOTE: grid=(B,).  If B == 1 in deployment, add a second "parallel" axis over
    # query rows so both v7x TensorCores are used.
    wspec = pl.BlockSpec((H, D, dh), lambda b: (0, 0, 0))
    bspec = pl.BlockSpec((H, 1, dh), lambda b: (0, 0, 0))
    vspec = pl.BlockSpec((1, D), lambda b: (0, 0))
    return pl.pallas_call(
        functools.partial(_attn_block_kernel, n_heads=H, eps=eps),
        out_shape=jax.ShapeDtypeStruct((B, S, D), x.dtype),
        grid=(B,),
        in_specs=[
            pl.BlockSpec((None, S, D), lambda b: (b, 0, 0)),
            wspec, wspec, wspec, bspec, bspec, bspec,
            pl.BlockSpec((H, dh, D), lambda b: (0, 0, 0)),
            vspec, vspec, vspec,
        ],
        out_specs=pl.BlockSpec((None, S, D), lambda b: (b, 0, 0)),
        compiler_params=pltpu.CompilerParams(
            dimension_semantics=("parallel",),
            vmem_limit_bytes=_VMEM_LIMIT),
    )(x, p["wq"], p["wk"], p["wv"], p["bq"], p["bk"], p["bv"],
      p["wo"], p["bo"], p["ln1_g"], p["ln1_b"])


# --------------------------- fused FFN + residual + LN2 (+ optional maxpool) ---------------------------

def _ffn_core(h_ref, w1_ref, b1_ref, w2_ref, b2_ref, g_ref, beta_ref, eps):
    h = h_ref[...].astype(jnp.float32)
    a = jnp.dot(h.astype(jnp.bfloat16), w1_ref[...],
                preferred_element_type=jnp.float32) + b1_ref[...].astype(jnp.float32)
    a = jnp.maximum(a, 0.0)
    f = jnp.dot(a.astype(jnp.bfloat16), w2_ref[...],
                preferred_element_type=jnp.float32) + b2_ref[...].astype(jnp.float32)
    return _layernorm(h + f, g_ref[...].astype(jnp.float32),
                      beta_ref[...].astype(jnp.float32), eps)


def _ffn_add_ln_kernel(h_ref, w1_ref, b1_ref, w2_ref, b2_ref, g_ref, beta_ref,
                       o_ref, *, eps):
    o_ref[...] = _ffn_core(h_ref, w1_ref, b1_ref, w2_ref, b2_ref,
                           g_ref, beta_ref, eps).astype(o_ref.dtype)


def _ffn_add_ln_pool_kernel(h_ref, w1_ref, b1_ref, w2_ref, b2_ref, g_ref, beta_ref,
                            u_ref, *, eps, win, n_win):
    """Last layer: FFN+LN2 fused with MaxPool2d((1, win)); only the pooled u is stored."""
    out = _ffn_core(h_ref, w1_ref, b1_ref, w2_ref, b2_ref, g_ref, beta_ref, eps)
    cols = [jnp.max(out[:, l * win:(l + 1) * win], axis=-1, keepdims=True)
            for l in range(n_win)]
    u_ref[...] = jnp.concatenate(cols, axis=-1).astype(u_ref.dtype)


def ffn_add_ln(h, p, *, pool=None, eps=_LN_EPS):
    """LayerNorm(h + relu(h @ w1 + b1) @ w2 + b2), row-tiled; the (tm, d_ff)
    intermediate never leaves VMEM.  With pool=(win, n_win) it instead returns the
    max-pooled features of the result (used only for the last encoder layer)."""
    M, D = h.shape
    F = p["ff1_w"].shape[1]
    tm = _row_tile(M)
    in_specs = [
        pl.BlockSpec((tm, D), lambda i: (i, 0)),
        pl.BlockSpec((D, F), lambda i: (0, 0)),
        pl.BlockSpec((1, F), lambda i: (0, 0)),
        pl.BlockSpec((F, D), lambda i: (0, 0)),
        pl.BlockSpec((1, D), lambda i: (0, 0)),
        pl.BlockSpec((1, D), lambda i: (0, 0)),
        pl.BlockSpec((1, D), lambda i: (0, 0)),
    ]
    if pool is None:
        kernel = functools.partial(_ffn_add_ln_kernel, eps=eps)
        out_shape = jax.ShapeDtypeStruct((M, D), h.dtype)
        out_specs = pl.BlockSpec((tm, D), lambda i: (i, 0))
    else:
        win, n_win = pool
        kernel = functools.partial(_ffn_add_ln_pool_kernel, eps=eps, win=win, n_win=n_win)
        out_shape = jax.ShapeDtypeStruct((M, n_win), h.dtype)
        out_specs = pl.BlockSpec((tm, n_win), lambda i: (i, 0))
    return pl.pallas_call(
        kernel,
        out_shape=out_shape,
        grid=(M // tm,),
        in_specs=in_specs,
        out_specs=out_specs,
        compiler_params=pltpu.CompilerParams(
            dimension_semantics=("parallel",),
            vmem_limit_bytes=_VMEM_LIMIT),
    )(h, p["ff1_w"], p["ff1_b"], p["ff2_w"], p["ff2_b"], p["ln2_g"], p["ln2_b"])


# --------------------------- reconstruction x_hat = x u pinv(u) ---------------------------

def _recon_kernel(x_ref, u_ref, w_ref, o_ref):
    """x_hat = (x @ u) @ (u @ Ginv)^T for one row tile; Ginv already folded into w."""
    x = x_ref[...].astype(jnp.float32)                             # (tm, D)
    u = u_ref[...].astype(jnp.float32)                             # (S, L)   (D == S)
    w = w_ref[...].astype(jnp.float32)                             # (S, L) = u @ Ginv
    t = jax.lax.dot_general(x, u, (((1,), (0,)), ((), ())),
                            preferred_element_type=jnp.float32)    # (tm, L)
    o_ref[...] = jax.lax.dot_general(t, w, (((1,), (1,)), ((), ())),
                                     preferred_element_type=jnp.float32
                                     ).astype(o_ref.dtype)         # (tm, S)  lane-dense


def recon(x, u, w):
    B, S, D = x.shape
    L = u.shape[2]
    tm = _row_tile(S)
    return pl.pallas_call(
        _recon_kernel,
        out_shape=jax.ShapeDtypeStruct((B, S, S), x.dtype),
        grid=(B, S // tm),
        in_specs=[
            pl.BlockSpec((None, tm, D), lambda b, i: (b, i, 0)),
            pl.BlockSpec((None, S, L), lambda b, i: (b, 0, 0)),
            pl.BlockSpec((None, S, L), lambda b, i: (b, 0, 0)),
        ],
        out_specs=pl.BlockSpec((None, tm, S), lambda b, i: (b, i, 0)),
        compiler_params=pltpu.CompilerParams(
            dimension_semantics=("parallel", "parallel"),
            vmem_limit_bytes=_VMEM_LIMIT),
    )(x, u, w)


# --------------------------- tiny SPD inverse (plain JAX) ---------------------------

def _inv_spd_small(G):
    """Batched inverse of tiny SPD matrices via unrolled Gauss-Jordan (pure jnp)."""
    L = G.shape[-1]
    eye = jnp.broadcast_to(jnp.eye(L, dtype=G.dtype), G.shape)
    A = jnp.concatenate([G, eye], axis=-1)                         # (B, L, 2L)
    for i in range(L):
        piv = A[:, i:i + 1, i:i + 1]
        row = A[:, i:i + 1, :] / piv
        A = A - A[:, :, i:i + 1] * row
        mask = (jnp.arange(L) == i)[None, :, None]
        A = jnp.where(mask, row, A)
    return A[:, :, L:]


# --------------------------- model (glue) ---------------------------

def seedlm_forward(layers, x, *, u_length):
    B, S, D = x.shape
    win = D // u_length
    h = x
    for p in layers[:-1]:
        h = attn_block(h, p)                                       # fused qkv+MHA+out-proj+LN1
        h = ffn_add_ln(h.reshape(B * S, D), p).reshape(B, S, D)    # fused FFN+LN2
    p = layers[-1]
    h = attn_block(h, p)
    u = ffn_add_ln(h.reshape(B * S, D), p,
                   pool=(win, u_length)).reshape(B, S, u_length)   # FFN+LN2+maxpool fused

    # TODO(synk): torch.linalg.pinv (SVD) replaced by a ridge-regularized
    # normal-equations pseudo-inverse inv(u^T u + eps I) u^T; exact for
    # full-column-rank u, differs for rank-deficient u.
    G = jnp.einsum("bsl,bsm->blm", u, u)                           # (B, L, L), tiny
    ridge = 1e-6 * jnp.trace(G, axis1=-2, axis2=-1)[:, None, None] / u_length + 1e-12
    Ginv = _inv_spd_small(G + ridge * jnp.eye(u_length, dtype=G.dtype))
    w = jnp.einsum("bsl,blm->bsm", u, Ginv)                        # u @ Ginv, (B, S, L), tiny
    x_hat = recon(x, u, w)                                         # t = x @ u ; x_hat = t @ w^T
    return {"x": x, "x_hat": x_hat}


def init_params(key, d_model, n_layers, d_ff):
    """Random f32 parameters in the PyTorch TransformerEncoderLayer structure."""
    layers = []
    scale = 0.05
    for _ in range(n_layers):
        key, k0, k1, k2, k3 = jax.random.split(key, 5)
        layers.append({
            "in_proj_w": jax.random.normal(k0, (d_model, 3 * d_model), jnp.float32) * scale,
            "in_proj_b": jnp.zeros((3 * d_model,), jnp.float32),
            "out_proj_w": jax.random.normal(k1, (d_model, d_model), jnp.float32) * scale,
            "out_proj_b": jnp.zeros((d_model,), jnp.float32),
            "ln1_g": jnp.ones((d_model,), jnp.float32),
            "ln1_b": jnp.zeros((d_model,), jnp.float32),
            "ff1_w": jax.random.normal(k2, (d_model, d_ff), jnp.float32) * scale,
            "ff1_b": jnp.zeros((d_ff,), jnp.float32),
            "ff2_w": jax.random.normal(k3, (d_ff, d_model), jnp.float32) * scale,
            "ff2_b": jnp.zeros((d_model,), jnp.float32),
            "ln2_g": jnp.ones((d_model,), jnp.float32),
            "ln2_b": jnp.zeros((d_model,), jnp.float32),
        })
    return layers


def prepare_params(layers, n_heads):
    """One-time HBM prep: head-major bf16 weight layouts, softmax scale folded
    into the q projection, biases / LN params reshaped to (1, D) lane rows."""
    prepared = []
    for p in layers:
        D = p["out_proj_w"].shape[0]
        dh = D // n_heads
        scale = 1.0 / math.sqrt(dh)
        wqkv = p["in_proj_w"].reshape(D, 3, n_heads, dh)           # columns: [q | k | v], heads contiguous
        bqkv = p["in_proj_b"].reshape(3, n_heads, 1, dh)
        prepared.append({
            "wq": (jnp.transpose(wqkv[:, 0], (1, 0, 2)) * scale).astype(jnp.bfloat16),
            "wk": jnp.transpose(wqkv[:, 1], (1, 0, 2)).astype(jnp.bfloat16),
            "wv": jnp.transpose(wqkv[:, 2], (1, 0, 2)).astype(jnp.bfloat16),
            "bq": bqkv[0] * scale,
            "bk": bqkv[1],
            "bv": bqkv[2],
            "wo": p["out_proj_w"].reshape(n_heads, dh, D).astype(jnp.bfloat16),
            "bo": p["out_proj_b"].reshape(1, D),
            "ln1_g": p["ln1_g"].reshape(1, D),
            "ln1_b": p["ln1_b"].reshape(1, D),
            "ff1_w": p["ff1_w"].astype(jnp.bfloat16),
            "ff1_b": p["ff1_b"].reshape(1, -1),
            "ff2_w": p["ff2_w"].astype(jnp.bfloat16),
            "ff2_b": p["ff2_b"].reshape(1, D),
            "ln2_g": p["ln2_g"].reshape(1, D),
            "ln2_b": p["ln2_b"].reshape(1, D),
        })
    return prepared


if __name__ == "__main__":
    INPUT_DIM = 64        # small stand-in for the default 512 (head_dim = 8)
    U_LENGTH = 4
    N_HEADS = 8           # PyTorch default nhead=8 (must divide INPUT_DIM)
    N_LAYERS = 6
    D_FF = 2048           # PyTorch TransformerEncoderLayer default dim_feedforward
    B = 2

    key = jax.random.PRNGKey(0)
    kp, kx = jax.random.split(key)
    torch_like = init_params(kp, INPUT_DIM, N_LAYERS, D_FF)
    params = prepare_params(torch_like, N_HEADS)        # one-time bf16 / head-major HBM prep
    # x must be (B, input_dim, input_dim) for torch.matmul(x, u) to type-check.
    x = jax.random.normal(kx, (B, INPUT_DIM, INPUT_DIM), jnp.float32)

    fwd = jax.jit(lambda ps, xx: seedlm_forward(ps, xx, u_length=U_LENGTH))
    out = fwd(params, x)
    jax.block_until_ready(out)

    assert out["x"].shape == (B, INPUT_DIM, INPUT_DIM)
    assert out["x_hat"].shape == (B, INPUT_DIM, INPUT_DIM)
    assert bool(jnp.all(jnp.isfinite(out["x_hat"])))
    print("KERNEL_OK")
</pallas_src>

<mosaic_0001>
module attributes {stable_mosaic.version = 11 : i64} {
  func.func @_attn_block_kernel(%arg0: i32, %arg1: memref<1x64x64xf32, #tpu.memory_space<vmem>>, %arg2: memref<8x64x8xbf16, #tpu.memory_space<vmem>>, %arg3: memref<8x64x8xbf16, #tpu.memory_space<vmem>>, %arg4: memref<8x64x8xbf16, #tpu.memory_space<vmem>>, %arg5: memref<8x1x8xf32, #tpu.memory_space<vmem>>, %arg6: memref<8x1x8xf32, #tpu.memory_space<vmem>>, %arg7: memref<8x1x8xf32, #tpu.memory_space<vmem>>, %arg8: memref<8x8x64xbf16, #tpu.memory_space<vmem>>, %arg9: memref<1x64xf32, #tpu.memory_space<vmem>>, %arg10: memref<1x64xf32, #tpu.memory_space<vmem>>, %arg11: memref<1x64xf32, #tpu.memory_space<vmem>>, %arg12: memref<1x64x64xf32, #tpu.memory_space<vmem>>) attributes {dimension_semantics = [#tpu.dimension_semantics<parallel>], iteration_bounds = array<i64: 2>, scalar_prefetch = 0 : i64, scratch_operands = 0 : i64, tpu.core_type = #tpu.core_type<tc>, window_params = [{transform_indices = @transform_0, window_bounds = array<i64: 1, 64, 64>}, {pipeline_mode = #tpu.pipeline_mode<synchronous>, transform_indices = @transform_1, window_bounds = array<i64: 8, 64, 8>}, {pipeline_mode = #tpu.pipeline_mode<synchronous>, transform_indices = @transform_2, window_bounds = array<i64: 8, 64, 8>}, {pipeline_mode = #tpu.pipeline_mode<synchronous>, transform_indices = @transform_3, window_bounds = array<i64: 8, 64, 8>}, {pipeline_mode = #tpu.pipeline_mode<synchronous>, transform_indices = @transform_4, window_bounds = array<i64: 8, 1, 8>}, {pipeline_mode = #tpu.pipeline_mode<synchronous>, transform_indices = @transform_5, window_bounds = array<i64: 8, 1, 8>}, {pipeline_mode = #tpu.pipeline_mode<synchronous>, transform_indices = @transform_6, window_bounds = array<i64: 8, 1, 8>}, {pipeline_mode = #tpu.pipeline_mode<synchronous>, transform_indices = @transform_7, window_bounds = array<i64: 8, 8, 64>}, {pipeline_mode = #tpu.pipeline_mode<synchronous>, transform_indices = @transform_8, window_bounds = array<i64: 1, 64>}, {pipeline_mode = #tpu.pipeline_mode<synchronous>, transform_indices = @transform_9, window_bounds = array<i64: 1, 64>}, {pipeline_mode = #tpu.pipeline_mode<synchronous>, transform_indices = @transform_10, window_bounds = array<i64: 1, 64>}, {transform_indices = @transform_11, window_bounds = array<i64: 1, 64, 64>}]} {
    %c0 = arith.constant 0 : index
    %c0_0 = arith.constant 0 : index
    %c0_1 = arith.constant 0 : index
    %0 = vector.load %arg1[%c0, %c0_0, %c0_1] : memref<1x64x64xf32, #tpu.memory_space<vmem>>, vector<1x64x64xf32>
    %1 = vector.shape_cast %0 : vector<1x64x64xf32> to vector<64x64xf32>
    %2 = arith.truncf %1 : vector<64x64xf32> to vector<64x64xbf16>
    %cst = arith.constant 0.000000e+00 : f32
    %3 = vector.broadcast %cst : f32 to vector<64x64xf32>
    %c0_2 = arith.constant 0 : index
    %c0_3 = arith.constant 0 : index
    %c0_4 = arith.constant 0 : index
    %4 = vector.load %arg2[%c0_2, %c0_3, %c0_4] : memref<8x64x8xbf16, #tpu.memory_space<vmem>>, vector<1x64x8xbf16>
    %5 = vector.shape_cast %4 : vector<1x64x8xbf16> to vector<64x8xbf16>
    %cst_5 = arith.constant dense<0.000000e+00> : vector<64x8xf32>
    %6 = tpu.matmul %2, %5, %cst_5 {dimension_numbers = #tpu.dot_dimension_numbers<[1], [0], [0], [1], [0, 0, 1, 1], [], []>} : vector<64x64xbf16>, vector<64x8xbf16>, vector<64x8xf32> -> vector<64x8xf32>
    %c0_6 = arith.constant 0 : index
    %c0_7 = arith.constant 0 : index
    %c0_8 = arith.constant 0 : index
    %7 = vector.load %arg5[%c0_6, %c0_7, %c0_8] : memref<8x1x8xf32, #tpu.memory_space<vmem>>, vector<1x1x8xf32>
    %8 = vector.shape_cast %7 : vector<1x1x8xf32> to vector<1x8xf32>
    %9 = vector.broadcast %8 : vector<1x8xf32> to vector<64x8xf32>
    %10 = arith.addf %6, %9 : vector<64x8xf32>
    %c0_9 = arith.constant 0 : index
    %c0_10 = arith.constant 0 : index
    %c0_11 = arith.constant 0 : index
    %11 = vector.load %arg3[%c0_9, %c0_10, %c0_11] : memref<8x64x8xbf16, #tpu.memory_space<vmem>>, vector<1x64x8xbf16>
    %12 = vector.shape_cast %11 : vector<1x64x8xbf16> to vector<64x8xbf16>
    %cst_12 = arith.constant dense<0.000000e+00> : vector<64x8xf32>
    %13 = tpu.matmul %2, %12, %cst_12 {dimension_numbers = #tpu.dot_dimension_numbers<[1], [0], [0], [1], [0, 0, 1, 1], [], []>} : vector<64x64xbf16>, vector<64x8xbf16>, vector<64x8xf32> -> vector<64x8xf32>
    %c0_13 = arith.constant 0 : index
    %c0_14 = arith.constant 0 : index
    %c0_15 = arith.constant 0 : index
    %14 = vector.load %arg6[%c0_13, %c0_14, %c0_15] : memref<8x1x8xf32, #tpu.memory_space<vmem>>, vector<1x1x8xf32>
    %15 = vector.shape_cast %14 : vector<1x1x8xf32> to vector<1x8xf32>
    %16 = vector.broadcast %15 : vector<1x8xf32> to vector<64x8xf32>
    %17 = arith.addf %13, %16 : vector<64x8xf32>
    %c0_16 = arith.constant 0 : index
    %c0_17 = arith.constant 0 : index
    %c0_18 = arith.constant 0 : index
    %18 = vector.load %arg4[%c0_16, %c0_17, %c0_18] : memref<8x64x8xbf16, #tpu.memory_space<vmem>>, vector<1x64x8xbf16>
    %19 = vector.shape_cast %18 : vector<1x64x8xbf16> to vector<64x8xbf16>
    %cst_19 = arith.constant dense<0.000000e+00> : vector<64x8xf32>
    %20 = tpu.matmul %2, %19, %cst_19 {dimension_numbers = #tpu.dot_dimension_numbers<[1], [0], [0], [1], [0, 0, 1, 1], [], []>} : vector<64x64xbf16>, vector<64x8xbf16>, vector<64x8xf32> -> vector<64x8xf32>
    %c0_20 = arith.constant 0 : index
    %c0_21 = arith.constant 0 : index
    %c0_22 = arith.constant 0 : index
    %21 = vector.load %arg7[%c0_20, %c0_21, %c0_22] : memref<8x1x8xf32, #tpu.memory_space<vmem>>, vector<1x1x8xf32>
    %22 = vector.shape_cast %21 : vector<1x1x8xf32> to vector<1x8xf32>
    %23 = vector.broadcast %22 : vector<1x8xf32> to vector<64x8xf32>
    %24 = arith.addf %20, %23 : vector<64x8xf32>
    %25 = arith.truncf %10 : vector<64x8xf32> to vector<64x8xbf16>
    %26 = arith.truncf %17 : vector<64x8xf32> to vector<64x8xbf16>
    %cst_23 = arith.constant dense<0.000000e+00> : vector<64x64xf32>
    %27 = tpu.matmul %25, %26, %cst_23 {dimension_numbers = #tpu.dot_dimension_numbers<[1], [1], [0], [0], [0, 0, 1, 0], [], []>} : vector<64x8xbf16>, vector<64x8xbf16>, vector<64x64xf32> -> vector<64x64xf32>
    %cst_24 = arith.constant dense<0xFF800000> : vector<64xf32>
    %28 = vector.multi_reduction <maximumf>, %27, %cst_24 [1] : vector<64x64xf32> to vector<64xf32>
    %29 = vector.shape_cast %28 : vector<64xf32> to vector<64x1xf32>
    %30 = vector.broadcast %29 : vector<64x1xf32> to vector<64x64xf32>
    %31 = arith.subf %27, %30 : vector<64x64xf32>
    %32 = math.exp %31 : vector<64x64xf32>
    %cst_25 = arith.constant dense<0.000000e+00> : vector<64xf32>
    %33 = vector.multi_reduction <add>, %32, %cst_25 [1] : vector<64x64xf32> to vector<64xf32>
    %34 = vector.shape_cast %33 : vector<64xf32> to vector<64x1xf32>
    %35 = arith.truncf %32 : vector<64x64xf32> to vector<64x64xbf16>
    %36 = arith.truncf %24 : vector<64x8xf32> to vector<64x8xbf16>
    %cst_26 = arith.constant dense<0.000000e+00> : vector<64x8xf32>
    %37 = tpu.matmul %35, %36, %cst_26 {dimension_numbers = #tpu.dot_dimension_numbers<[1], [0], [0], [1], [0, 0, 1, 1], [], []>} : vector<64x64xbf16>, vector<64x8xbf16>, vector<64x8xf32> -> vector<64x8xf32>
    %38 = tpu.reciprocal %34 {approx = true} : vector<64x1xf32> -> vector<64x1xf32>
    %39 = vector.broadcast %38 : vector<64x1xf32> to vector<64x8xf32>
    %40 = arith.mulf %37, %39 : vector<64x8xf32>
    %41 = arith.truncf %40 : vector<64x8xf32> to vector<64x8xbf16>
    %c0_27 = arith.constant 0 : index
    %c0_28 = arith.constant 0 : index
    %c0_29 = arith.constant 0 : index
    %42 = vector.load %arg8[%c0_27, %c0_28, %c0_29] : memref<8x8x64xbf16, #tpu.memory_space<vmem>>, vector<1x8x64xbf16>
    %43 = vector.shape_cast %42 : vector<1x8x64xbf16> to vector<8x64xbf16>
    %cst_30 = arith.constant dense<0.000000e+00> : vector<64x64xf32>
    %44 = tpu.matmul %41, %43, %cst_30 {dimension_numbers = #tpu.dot_dimension_numbers<[1], [0], [0], [1], [0, 0, 1, 1], [], []>} : vector<64x8xbf16>, vector<8x64xbf16>, vector<64x64xf32> -> vector<64x64xf32>
    %45 = arith.addf %3, %44 : vector<64x64xf32>
    %c1 = arith.constant 1 : index
    %c0_31 = arith.constant 0 : index
    %c0_32 = arith.constant 0 : index
    %46 = vector.load %arg2[%c1, %c0_31, %c0_32] : memref<8x64x8xbf16, #tpu.memory_space<vmem>>, vector<1x64x8xbf16>
    %47 = vector.shape_cast %46 : vector<1x64x8xbf16> to vector<64x8xbf16>
    %cst_33 = arith.constant dense<0.000000e+00> : vector<64x8xf32>
    %48 = tpu.matmul %2, %47, %cst_33 {dimension_numbers = #tpu.dot_dimension_numbers<[1], [0], [0], [1], [0, 0, 1, 1], [], []>} : vector<64x64xbf16>, vector<64x8xbf16>, vector<64x8xf32> -> vector<64x8xf32>
    %c1_34 = arith.constant 1 : index
    %c0_35 = arith.constant 0 : index
    %c0_36 = arith.constant 0 : index
    %49 = vector.load %arg5[%c1_34, %c0_35, %c0_36] : memref<8x1x8xf32, #tpu.memory_space<vmem>>, vector<1x1x8xf32>
    %50 = vector.shape_cast %49 : vector<1x1x8xf32> to vector<1x8xf32>
    %51 = vector.broadcast %50 : vector<1x8xf32> to vector<64x8xf32>
    %52 = arith.addf %48, %51 : vector<64x8xf32>
    %c1_37 = arith.constant 1 : index
    %c0_38 = arith.constant 0 : index
    %c0_39 = arith.constant 0 : index
    %53 = vector.load %arg3[%c1_37, %c0_38, %c0_39] : memref<8x64x8xbf16, #tpu.memory_space<vmem>>, vector<1x64x8xbf16>
    %54 = vector.shape_cast %53 : vector<1x64x8xbf16> to vector<64x8xbf16>
    %cst_40 = arith.constant dense<0.000000e+00> : vector<64x8xf32>
    %55 = tpu.matmul %2, %54, %cst_40 {dimension_numbers = #tpu.dot_dimension_numbers<[1], [0], [0], [1], [0, 0, 1, 1], [], []>} : vector<64x64xbf16>, vector<64x8xbf16>, vector<64x8xf32> -> vector<64x8xf32>
    %c1_41 = arith.constant 1 : index
    %c0_42 = arith.constant 0 : index
    %c0_43 = arith.constant 0 : index
    %56 = vector.load %arg6[%c1_41, %c0_42, %c0_43] : memref<8x1x8xf32, #tpu.memory_space<vmem>>, vector<1x1x8xf32>
    %57 = vector.shape_cast %56 : vector<1x1x8xf32> to vector<1x8xf32>
    %58 = vector.broadcast %57 : vector<1x8xf32> to vector<64x8xf32>
    %59 = arith.addf %55, %58 : vector<64x8xf32>
    %c1_44 = arith.constant 1 : index
    %c0_45 = arith.constant 0 : index
    %c0_46 = arith.constant 0 : index
    %60 = vector.load %arg4[%c1_44, %c0_45, %c0_46] : memref<8x64x8xbf16, #tpu.memory_space<vmem>>, vector<1x64x8xbf16>
    %61 = vector.shape_cast %60 : vector<1x64x8xbf16> to vector<64x8xbf16>
    %cst_47 = arith.constant dense<0.000000e+00> : vector<64x8xf32>
    %62 = tpu.matmul %2, %61, %cst_47 {dimension_numbers = #tpu.dot_dimension_numbers<[1], [0], [0], [1], [0, 0, 1, 1], [], []>} : vector<64x64xbf16>, vector<64x8xbf16>, vector<64x8xf32> -> vector<64x8xf32>
    %c1_48 = arith.constant 1 : index
    %c0_49 = arith.constant 0 : index
    %c0_50 = arith.constant 0 : index
    %63 = vector.load %arg7[%c1_48, %c0_49, %c0_50] : memref<8x1x8xf32, #tpu.memory_space<vmem>>, vector<1x1x8xf32>
    %64 = vector.shape_cast %63 : vector<1x1x8xf32> to vector<1x8xf32>
    %65 = vector.broadcast %64 : vector<1x8xf32> to vector<64x8xf32>
    %66 = arith.addf %62, %65 : vector<64x8xf32>
    %67 = arith.truncf %52 : vector<64x8xf32> to vector<64x8xbf16>
    %68 = arith.truncf %59 : vector<64x8xf32> to vector<64x8xbf16>
    %cst_51 = arith.constant dense<0.000000e+00> : vector<64x64xf32>
    %69 = tpu.matmul %67, %68, %cst_51 {dimension_numbers = #tpu.dot_dimension_numbers<[1], [1], [0], [0], [0, 0, 1, 0], [], []>} : vector<64x8xbf16>, vector<64x8xbf16>, vector<64x64xf32> -> vector<64x64xf32>
    %cst_52 = arith.constant dense<0xFF800000> : vector<64xf32>
    %70 = vector.multi_reduction <maximumf>, %69, %cst_52 [1] : vector<64x64xf32> to vector<64xf32>
    %71 = vector.shape_cast %70 : vector<64xf32> to vector<64x1xf32>
    %72 = vector.broadcast %71 : vector<64x1xf32> to vector<64x64xf32>
    %73 = arith.subf %69, %72 : vector<64x64xf32>
    %74 = math.exp %73 : vector<64x64xf32>
    %cst_53 = arith.constant dense<0.000000e+00> : vector<64xf32>
    %75 = vector.multi_reduction <add>, %74, %cst_53 [1] : vector<64x64xf32> to vector<64xf32>
    %76 = vector.shape_cast %75 : vector<64xf32> to vector<64x1xf32>
    %77 = arith.truncf %74 : vector<64x64xf32> to vector<64x64xbf16>
    %78 = arith.truncf %66 : vector<64x8xf32> to vector<64x8xbf16>
    %cst_54 = arith.constant dense<0.000000e+00> : vector<64x8xf32>
    %79 = tpu.matmul %77, %78, %cst_54 {dimension_numbers = #tpu.dot_dimension_numbers<[1], [0], [0], [1], [0, 0, 1, 1], [], []>} : vector<64x64xbf16>, vector<64x8xbf16>, vector<64x8xf32> -> vector<64x8xf32>
    %80 = tpu.reciprocal %76 {approx = true} : vector<64x1xf32> -> vector<64x1xf32>
    %81 = vector.broadcast %80 : vector<64x1xf32> to vector<64x8xf32>
    %82 = arith.mulf %79, %81 : vector<64x8xf32>
    %83 = arith.truncf %82 : vector<64x8xf32> to vector<64x8xbf16>
    %c1_55 = arith.constant 1 : index
    %c0_56 = arith.constant 0 : index
    %c0_57 = arith.constant 0 : index
    %84 = vector.load %arg8[%c1_55, %c0_56, %c0_57] : memref<8x8x64xbf16, #tpu.memory_space<vmem>>, vector<1x8x64xbf16>
    %85 = vector.shape_cast %84 : vector<1x8x64xbf16> to vector<8x64xbf16>
    %cst_58 = arith.constant dense<0.000000e+00> : vector<64x64xf32>
    %86 = tpu.matmul %83, %85, %cst_58 {dimension_numbers = #tpu.dot_dimension_numbers<[1], [0], [0], [1], [0, 0, 1, 1], [], []>} : vector<64x8xbf16>, vector<8x64xbf16>, vector<64x64xf32> -> vector<64x64xf32>
    %87 = arith.addf %45, %86 : vector<64x64xf32>
    %c2 = arith.constant 2 : index
    %c0_59 = arith.constant 0 : index
    %c0_60 = arith.constant 0 : index
    %88 = vector.load %arg2[%c2, %c0_59, %c0_60] : memref<8x64x8xbf16, #tpu.memory_space<vmem>>, vector<1x64x8xbf16>
    %89 = vector.shape_cast %88 : vector<1x64x8xbf16> to vector<64x8xbf16>
    %cst_61 = arith.constant dense<0.000000e+00> : vector<64x8xf32>
    %90 = tpu.matmul %2, %89, %cst_61 {dimension_numbers = #tpu.dot_dimension_numbers<[1], [0], [0], [1], [0, 0, 1, 1], [], []>} : vector<64x64xbf16>, vector<64x8xbf16>, vector<64x8xf32> -> vector<64x8xf32>
    %c2_62 = arith.constant 2 : index
    %c0_63 = arith.constant 0 : index
    %c0_64 = arith.constant 0 : index
    %91 = vector.load %arg5[%c2_62, %c0_63, %c0_64] : memref<8x1x8xf32, #tpu.memory_space<vmem>>, vector<1x1x8xf32>
    %92 = vector.shape_cast %91 : vector<1x1x8xf32> to vector<1x8xf32>
    %93 = vector.broadcast %92 : vector<1x8xf32> to vector<64x8xf32>
    %94 = arith.addf %90, %93 : vector<64x8xf32>
    %c2_65 = arith.constant 2 : index
    %c0_66 = arith.constant 0 : index
    %c0_67 = arith.constant 0 : index
    %95 = vector.load %arg3[%c2_65, %c0_66, %c0_67] : memref<8x64x8xbf16, #tpu.memory_space<vmem>>, vector<1x64x8xbf16>
    %96 = vector.shape_cast %95 : vector<1x64x8xbf16> to vector<64x8xbf16>
    %cst_68 = arith.constant dense<0.000000e+00> : vector<64x8xf32>
    %97 = tpu.matmul %2, %96, %cst_68 {dimension_numbers = #tpu.dot_dimension_numbers<[1], [0], [0], [1], [0, 0, 1, 1], [], []>} : vector<64x64xbf16>, vector<64x8xbf16>, vector<64x8xf32> -> vector<64x8xf32>
    %c2_69 = arith.constant 2 : index
    %c0_70 = arith.constant 0 : index
    %c0_71 = arith.constant 0 : index
    %98 = vector.load %arg6[%c2_69, %c0_70, %c0_71] : memref<8x1x8xf32, #tpu.memory_space<vmem>>, vector<1x1x8xf32>
    %99 = vector.shape_cast %98 : vector<1x1x8xf32> to vector<1x8xf32>
    %100 = vector.broadcast %99 : vector<1x8xf32> to vector<64x8xf32>
    %101 = arith.addf %97, %100 : vector<64x8xf32>
    %c2_72 = arith.constant 2 : index
    %c0_73 = arith.constant 0 : index
    %c0_74 = arith.constant 0 : index
    %102 = vector.load %arg4[%c2_72, %c0_73, %c0_74] : memref<8x64x8xbf16, #tpu.memory_space<vmem>>, vector<1x64x8xbf16>
    %103 = vector.shape_cast %102 : vector<1x64x8xbf16> to vector<64x8xbf16>
    %cst_75 = arith.constant dense<0.000000e+00> : vector<64x8xf32>
    %104 = tpu.matmul %2, %103, %cst_75 {dimension_numbers = #tpu.dot_dimension_numbers<[1], [0], [0], [1], [0, 0, 1, 1], [], []>} : vector<64x64xbf16>, vector<64x8xbf16>, vector<64x8xf32> -> vector<64x8xf32>
    %c2_76 = arith.constant 2 : index
    %c0_77 = arith.constant 0 : index
    %c0_78 = arith.constant 0 : index
    %105 = vector.load %arg7[%c2_76, %c0_77, %c0_78] : memref<8x1x8xf32, #tpu.memory_space<vmem>>, vector<1x1x8xf32>
    %106 = vector.shape_cast %105 : vector<1x1x8xf32> to vector<1x8xf32>
    %107 = vector.broadcast %106 : vector<1x8xf32> to vector<64x8xf32>
    %108 = arith.addf %104, %107 : vector<64x8xf32>
    %109 = arith.truncf %94 : vector<64x8xf32> to vector<64x8xbf16>
    %110 = arith.truncf %101 : vector<64x8xf32> to vector<64x8xbf16>
    %cst_79 = arith.constant dense<0.000000e+00> : vector<64x64xf32>
    %111 = tpu.matmul %109, %110, %cst_79 {dimension_numbers = #tpu.dot_dimension_numbers<[1], [1], [0], [0], [0, 0, 1, 0], [], []>} : vector<64x8xbf16>, vector<64x8xbf16>, vector<64x64xf32> -> vector<64x64xf32>
    %cst_80 = arith.constant dense<0xFF800000> : vector<64xf32>
    %112 = vector.multi_reduction <maximumf>, %111, %cst_80 [1] : vector<64x64xf32> to vector<64xf32>
    %113 = vector.shape_cast %112 : vector<64xf32> to vector<64x1xf32>
    %114 = vector.broadcast %113 : vector<64x1xf32> to vector<64x64xf32>
    %115 = arith.subf %111, %114 : vector<64x64xf32>
    %116 = math.exp %115 : vector<64x64xf32>
    %cst_81 = arith.constant dense<0.000000e+00> : vector<64xf32>
    %117 = vector.multi_reduction <add>, %116, %cst_81 [1] : vector<64x64xf32> to vector<64xf32>
    %118 = vector.shape_cast %117 : vector<64xf32> to vector<64x1xf32>
    %119 = arith.truncf %116 : vector<64x64xf32> to vector<64x64xbf16>
    %120 = arith.truncf %108 : vector<64x8xf32> to vector<64x8xbf16>
    %cst_82 = arith.constant dense<0.000000e+00> : vector<64x8xf32>
    %121 = tpu.matmul %119, %120, %cst_82 {dimension_numbers = #tpu.dot_dimension_numbers<[1], [0], [0], [1], [0, 0, 1, 1], [], []>} : vector<64x64xbf16>, vector<64x8xbf16>, vector<64x8xf32> -> vector<64x8xf32>
    %122 = tpu.reciprocal %118 {approx = true} : vector<64x1xf32> -> vector<64x1xf32>
    %123 = vector.broadcast %122 : vector<64x1xf32> to vector<64x8xf32>
    %124 = arith.mulf %121, %123 : vector<64x8xf32>
    %125 = arith.truncf %124 : vector<64x8xf32> to vector<64x8xbf16>
    %c2_83 = arith.constant 2 : index
    %c0_84 = arith.constant 0 : index
    %c0_85 = arith.constant 0 : index
    %126 = vector.load %arg8[%c2_83, %c0_84, %c0_85] : memref<8x8x64xbf16, #tpu.memory_space<vmem>>, vector<1x8x64xbf16>
    %127 = vector.shape_cast %126 : vector<1x8x64xbf16> to vector<8x64xbf16>
    %cst_86 = arith.constant dense<0.000000e+00> : vector<64x64xf32>
    %128 = tpu.matmul %125, %127, %cst_86 {dimension_numbers = #tpu.dot_dimension_numbers<[1], [0], [0], [1], [0, 0, 1, 1], [], []>} : vector<64x8xbf16>, vector<8x64xbf16>, vector<64x64xf32> -> vector<64x64xf32>
    %129 = arith.addf %87, %128 : vector<64x64xf32>
    %c3 = arith.constant 3 : index
    %c0_87 = arith.constant 0 : index
    %c0_88 = arith.constant 0 : index
    %130 = vector.load %arg2[%c3, %c0_87, %c0_88] : memref<8x64x8xbf16, #tpu.memory_space<vmem>>, vector<1x64x8xbf16>
    %131 = vector.shape_cast %130 : vector<1x64x8xbf16> to vector<64x8xbf16>
    %cst_89 = arith.constant dense<0.000000e+00> : vector<64x8xf32>
    %132 = tpu.matmul %2, %131, %cst_89 {dimension_numbers = #tpu.dot_dimension_numbers<[1], [0], [0], [1], [0, 0, 1, 1], [], []>} : vector<64x64xbf16>, vector<64x8xbf16>, vector<64x8xf32> -> vector<64x8xf32>
    %c3_90 = arith.constant 3 : index
    %c0_91 = arith.constant 0 : index
    %c0_92 = arith.constant 0 : index
    %133 = vector.load %arg5[%c3_90, %c0_91, %c0_92] : memref<8x1x8xf32, #tpu.memory_space<vmem>>, vector<1x1x8xf32>
    %134 = vector.shape_cast %133 : vector<1x1x8xf32> to vector<1x8xf32>
    %135 = vector.broadcast %134 : vector<1x8xf32> to vector<64x8xf32>
    %136 = arith.addf %132, %135 : vector<64x8xf32>
    %c3_93 = arith.constant 3 : index
    %c0_94 = arith.constant 0 : index
    %c0_95 = arith.constant 0 : index
    %137 = vector.load %arg3[%c3_93, %c0_94, %c0_95] : memref<8x64x8xbf16, #tpu.memory_space<vmem>>, vector<1x64x8xbf16>
    %138 = vector.shape_cast %137 : vector<1x64x8xbf16> to vector<64x8xbf16>
    %cst_96 = arith.constant dense<0.000000e+00> : vector<64x8xf32>
    %139 = tpu.matmul %2, %138, %cst_96 {dimension_numbers = #tpu.dot_dimension_numbers<[1], [0], [0], [1], [0, 0, 1, 1], [], []>} : vector<64x64xbf16>, vector<64x8xbf16>, vector<64x8xf32> -> vector<64x8xf32>
    %c3_97 = arith.constant 3 : index
    %c0_98 = arith.constant 0 : index
    %c0_99 = arith.constant 0 : index
    %140 = vector.load %arg6[%c3_97, %c0_98, %c0_99] : memref<8x1x8xf32, #tpu.memory_space<vmem>>, vector<1x1x8xf32>
    %141 = vector.shape_cast %140 : vector<1x1x8xf32> to vector<1x8xf32>
    %142 = vector.broadcast %141 : vector<1x8xf32> to vector<64x8xf32>
    %143 = arith.addf %139, %142 : vector<64x8xf32>
    %c3_100 = arith.constant 3 : index
    %c0_101 = arith.constant 0 : index
    %c0_102 = arith.constant 0 : index
    %144 = vector.load %arg4[%c3_100, %c0_101, %c0_102] : memref<8x64x8xbf16, #tpu.memory_space<vmem>>, vector<1x64x8xbf16>
    %145 = vector.shape_cast %144 : vector<1x64x8xbf16> to vector<64x8xbf16>
    %cst_103 = arith.constant dense<0.000000e+00> : vector<64x8xf32>
    %146 = tpu.matmul %2, %145, %cst_103 {dimension_numbers = #tpu.dot_dimension_numbers<[1], [0], [0], [1], [0, 0, 1, 1], [], []>} : vector<64x64xbf16>, vector<64x8xbf16>, vector<64x8xf32> -> vector<64x8xf32>
    %c3_104 = arith.constant 3 : index
    %c0_105 = arith.constant 0 : index
    %c0_106 = arith.constant 0 : index
    %147 = vector.load %arg7[%c3_104, %c0_105, %c0_106] : memref<8x1x8xf32, #tpu.memory_space<vmem>>, vector<1x1x8xf32>
    %148 = vector.shape_cast %147 : vector<1x1x8xf32> to vector<1x8xf32>
    %149 = vector.broadcast %148 : vector<1x8xf32> to vector<64x8xf32>
    %150 = arith.addf %146, %149 : vector<64x8xf32>
    %151 = arith.truncf %136 : vector<64x8xf32> to vector<64x8xbf16>
    %152 = arith.truncf %143 : vector<64x8xf32> to vector<64x8xbf16>
    %cst_107 = arith.constant dense<0.000000e+00> : vector<64x64xf32>
    %153 = tpu.matmul %151, %152, %cst_107 {dimension_numbers = #tpu.dot_dimension_numbers<[1], [1], [0], [0], [0, 0, 1, 0], [], []>} : vector<64x8xbf16>, vector<64x8xbf16>, vector<64x64xf32> -> vector<64x64xf32>
    %cst_108 = arith.constant dense<0xFF800000> : vector<64xf32>
    %154 = vector.multi_reduction <maximumf>, %153, %cst_108 [1] : vector<64x64xf32> to vector<64xf32>
    %155 = vector.shape_cast %154 : vector<64xf32> to vector<64x1xf32>
    %156 = vector.broadcast %155 : vector<64x1xf32> to vector<64x64xf32>
    %157 = arith.subf %153, %156 : vector<64x64xf32>
    %158 = math.exp %157 : vector<64x64xf32>
    %cst_109 = arith.constant dense<0.000000e+00> : vector<64xf32>
    %159 = vector.multi_reduction <add>, %158, %cst_109 [1] : vector<64x64xf32> to vector<64xf32>
    %160 = vector.shape_cast %159 : vector<64xf32> to vector<64x1xf32>
    %161 = arith.truncf %158 : vector<64x64xf32> to vector<64x64xbf16>
    %162 = arith.truncf %150 : vector<64x8xf32> to vector<64x8xbf16>
    %cst_110 = arith.constant dense<0.000000e+00> : vector<64x8xf32>
    %163 = tpu.matmul %161, %162, %cst_110 {dimension_numbers = #tpu.dot_dimension_numbers<[1], [0], [0], [1], [0, 0, 1, 1], [], []>} : vector<64x64xbf16>, vector<64x8xbf16>, vector<64x8xf32> -> vector<64x8xf32>
    %164 = tpu.reciprocal %160 {approx = true} : vector<64x1xf32> -> vector<64x1xf32>
    %165 = vector.broadcast %164 : vector<64x1xf32> to vector<64x8xf32>
    %166 = arith.mulf %163, %165 : vector<64x8xf32>
    %167 = arith.truncf %166 : vector<64x8xf32> to vector<64x8xbf16>
    %c3_111 = arith.constant 3 : index
    %c0_112 = arith.constant 0 : index
    %c0_113 = arith.constant 0 : index
    %168 = vector.load %arg8[%c3_111, %c0_112, %c0_113] : memref<8x8x64xbf16, #tpu.memory_space<vmem>>, vector<1x8x64xbf16>
    %169 = vector.shape_cast %168 : vector<1x8x64xbf16> to vector<8x64xbf16>
    %cst_114 = arith.constant dense<0.000000e+00> : vector<64x64xf32>
    %170 = tpu.matmul %167, %169, %cst_114 {dimension_numbers = #tpu.dot_dimension_numbers<[1], [0], [0], [1], [0, 0, 1, 1], [], []>} : vector<64x8xbf16>, vector<8x64xbf16>, vector<64x64xf32> -> vector<64x64xf32>
    %171 = arith.addf %129, %170 : vector<64x64xf32>
    %c4 = arith.constant 4 : index
    %c0_115 = arith.constant 0 : index
    %c0_116 = arith.constant 0 : index
    %172 = vector.load %arg2[%c4, %c0_115, %c0_116] : memref<8x64x8xbf16, #tpu.memory_space<vmem>>, vector<1x64x8xbf16>
    %173 = vector.shape_cast %172 : vector<1x64x8xbf16> to vector<64x8xbf16>
    %cst_117 = arith.constant dense<0.000000e+00> : vector<64x8xf32>
    %174 = tpu.matmul %2, %173, %cst_117 {dimension_numbers = #tpu.dot_dimension_numbers<[1], [0], [0], [1], [0, 0, 1, 1], [], []>} : vector<64x64xbf16>, vector<64x8xbf16>, vector<64x8xf32> -> vector<64x8xf32>
    %c4_118 = arith.constant 4 : index
    %c0_119 = arith.constant 0 : index
    %c0_120 = arith.constant 0 : index
    %175 = vector.load %arg5[%c4_118, %c0_119, %c0_120] : memref<8x1x8xf32, #tpu.memory_space<vmem>>, vector<1x1x8xf32>
    %176 = vector.shape_cast %175 : vector<1x1x8xf32> to vector<1x8xf32>
    %177 = vector.broadcast %176 : vector<1x8xf32> to vector<64x8xf32>
    %178 = arith.addf %174, %177 : vector<64x8xf32>
    %c4_121 = arith.constant 4 : index
    %c0_122 = arith.constant 0 : index
    %c0_123 = arith.constant 0 : index
    %179 = vector.load %arg3[%c4_121, %c0_122, %c0_123] : memref<8x64x8xbf16, #tpu.memory_space<vmem>>, vector<1x64x8xbf16>
    %180 = vector.shape_cast %179 : vector<1x64x8xbf16> to vector<64x8xbf16>
    %cst_124 = arith.constant dense<0.000000e+00> : vector<64x8xf32>
    %181 = tpu.matmul %2, %180, %cst_124 {dimension_numbers = #tpu.dot_dimension_numbers<[1], [0], [0], [1], [0, 0, 1, 1], [], []>} : vector<64x64xbf16>, vector<64x8xbf16>, vector<64x8xf32> -> vector<64x8xf32>
    %c4_125 = arith.constant 4 : index
    %c0_126 = arith.constant 0 : index
    %c0_127 = arith.constant 0 : index
    %182 = vector.load %arg6[%c4_125, %c0_126, %c0_127] : memref<8x1x8xf32, #tpu.memory_space<vmem>>, vector<1x1x8xf32>
    %183 = vector.shape_cast %182 : vector<1x1x8xf32> to vector<1x8xf32>
    %184 = vector.broadcast %183 : vector<1x8xf32> to vector<64x8xf32>
    %185 = arith.addf %181, %184 : vector<64x8xf32>
    %c4_128 = arith.constant 4 : index
    %c0_129 = arith.constant 0 : index
    %c0_130 = arith.constant 0 : index
    %186 = vector.load %arg4[%c4_128, %c0_129, %c0_130] : memref<8x64x8xbf16, #tpu.memory_space<vmem>>, vector<1x64x8xbf16>
    %187 = vector.shape_cast %186 : vector<1x64x8xbf16> to vector<64x8xbf16>
    %cst_131 = arith.constant dense<0.000000e+00> : vector<64x8xf32>
    %188 = tpu.matmul %2, %187, %cst_131 {dimension_numbers = #tpu.dot_dimension_numbers<[1], [0], [0], [1], [0, 0, 1, 1], [], []>} : vector<64x64xbf16>, vector<64x8xbf16>, vector<64x8xf32> -> vector<64x8xf32>
    %c4_132 = arith.constant 4 : index
    %c0_133 = arith.constant 0 : index
    %c0_134 = arith.constant 0 : index
    %189 = vector.load %arg7[%c4_132, %c0_133, %c0_134] : memref<8x1x8xf32, #tpu.memory_space<vmem>>, vector<1x1x8xf32>
    %190 = vector.shape_cast %189 : vector<1x1x8xf32> to vector<1x8xf32>
    %191 = vector.broadcast %190 : vector<1x8xf32> to vector<64x8xf32>
    %192 = arith.addf %188, %191 : vector<64x8xf32>
    %193 = arith.truncf %178 : vector<64x8xf32> to vector<64x8xbf16>
    %194 = arith.truncf %185 : vector<64x8xf32> to vector<64x8xbf16>
    %cst_135 = arith.constant dense<0.000000e+00> : vector<64x64xf32>
    %195 = tpu.matmul %193, %194, %cst_135 {dimension_numbers = #tpu.dot_dimension_numbers<[1], [1], [0], [0], [0, 0, 1, 0], [], []>} : vector<64x8xbf16>, vector<64x8xbf16>, vector<64x64xf32> -> vector<64x64xf32>
    %cst_136 = arith.constant dense<0xFF800000> : vector<64xf32>
    %196 = vector.multi_reduction <maximumf>, %195, %cst_136 [1] : vector<64x64xf32> to vector<64xf32>
    %197 = vector.shape_cast %196 : vector<64xf32> to vector<64x1xf32>
    %198 = vector.broadcast %197 : vector<64x1xf32> to vector<64x64xf32>
    %199 = arith.subf %195, %198 : vector<64x64xf32>
    %200 = math.exp %199 : vector<64x64xf32>
    %cst_137 = arith.constant dense<0.000000e+00> : vector<64xf32>
    %201 = vector.multi_reduction <add>, %200, %cst_137 [1] : vector<64x64xf32> to vector<64xf32>
    %202 = vector.shape_cast %201 : vector<64xf32> to vector<64x1xf32>
    %203 = arith.truncf %200 : vector<64x64xf32> to vector<64x64xbf16>
    %204 = arith.truncf %192 : vector<64x8xf32> to vector<64x8xbf16>
    %cst_138 = arith.constant dense<0.000000e+00> : vector<64x8xf32>
    %205 = tpu.matmul %203, %204, %cst_138 {dimension_numbers = #tpu.dot_dimension_numbers<[1], [0], [0], [1], [0, 0, 1, 1], [], []>} : vector<64x64xbf16>, vector<64x8xbf16>, vector<64x8xf32> -> vector<64x8xf32>
    %206 = tpu.reciprocal %202 {approx = true} : vector<64x1xf32> -> vector<64x1xf32>
    %207 = vector.broadcast %206 : vector<64x1xf32> to vector<64x8xf32>
    %208 = arith.mulf %205, %207 : vector<64x8xf32>
    %209 = arith.truncf %208 : vector<64x8xf32> to vector<64x8xbf16>
    %c4_139 = arith.constant 4 : index
    %c0_140 = arith.constant 0 : index
    %c0_141 = arith.constant 0 : index
    %210 = vector.load %arg8[%c4_139, %c0_140, %c0_141] : memref<8x8x64xbf16, #tpu.memory_space<vmem>>, vector<1x8x64xbf16>
    %211 = vector.shape_cast %210 : vector<1x8x64xbf16> to vector<8x64xbf16>
    %cst_142 = arith.constant dense<0.000000e+00> : vector<64x64xf32>
    %212 = tpu.matmul %209, %211, %cst_142 {dimension_numbers = #tpu.dot_dimension_numbers<[1], [0], [0], [1], [0, 0, 1, 1], [], []>} : vector<64x8xbf16>, vector<8x64xbf16>, vector<64x64xf32> -> vector<64x64xf32>
    %213 = arith.addf %171, %212 : vector<64x64xf32>
    %c5 = arith.constant 5 : index
    %c0_143 = arith.constant 0 : index
    %c0_144 = arith.constant 0 : index
    %214 = vector.load %arg2[%c5, %c0_143, %c0_144] : memref<8x64x8xbf16, #tpu.memory_space<vmem>>, vector<1x64x8xbf16>
    %215 = vector.shape_cast %214 : vector<1x64x8xbf16> to vector<64x8xbf16>
    %cst_145 = arith.constant dense<0.000000e+00> : vector<64x8xf32>
    %216 = tpu.matmul %2, %215, %cst_145 {dimension_numbers = #tpu.dot_dimension_numbers<[1], [0], [0], [1], [0, 0, 1, 1], [], []>} : vector<64x64xbf16>, vector<64x8xbf16>, vector<64x8xf32> -> vector<64x8xf32>
    %c5_146 = arith.constant 5 : index
    %c0_147 = arith.constant 0 : index
    %c0_148 = arith.constant 0 : index
    %217 = vector.load %arg5[%c5_146, %c0_147, %c0_148] : memref<8x1x8xf32, #tpu.memory_space<vmem>>, vector<1x1x8xf32>
    %218 = vector.shape_cast %217 : vector<1x1x8xf32> to vector<1x8xf32>
    %219 = vector.broadcast %218 : vector<1x8xf32> to vector<64x8xf32>
    %220 = arith.addf %216, %219 : vector<64x8xf32>
    %c5_149 = arith.constant 5 : index
    %c0_150 = arith.constant 0 : index
    %c0_151 = arith.constant 0 : index
    %221 = vector.load %arg3[%c5_149, %c0_150, %c0_151] : memref<8x64x8xbf16, #tpu.memory_space<vmem>>, vector<1x64x8xbf16>
    %222 = vector.shape_cast %221 : vector<1x64x8xbf16> to vector<64x8xbf16>
    %cst_152 = arith.constant dense<0.000000e+00> : vector<64x8xf32>
    %223 = tpu.matmul %2, %222, %cst_152 {dimension_numbers = #tpu.dot_dimension_numbers<[1], [0], [0], [1], [0, 0, 1, 1], [], []>} : vector<64x64xbf16>, vector<64x8xbf16>, vector<64x8xf32> -> vector<64x8xf32>
    %c5_153 = arith.constant 5 : index
    %c0_154 = arith.constant 0 : index
    %c0_155 = arith.constant 0 : index
    %224 = vector.load %arg6[%c5_153, %c0_154, %c0_155] : memref<8x1x8xf32, #tpu.memory_space<vmem>>, vector<1x1x8xf32>
    %225 = vector.shape_cast %224 : vector<1x1x8xf32> to vector<1x8xf32>
    %226 = vector.broadcast %225 : vector<1x8xf32> to vector<64x8xf32>
    %227 = arith.addf %223, %226 : vector<64x8xf32>
    %c5_156 = arith.constant 5 : index
    %c0_157 = arith.constant 0 : index
    %c0_158 = arith.constant 0 : index
    %228 = vector.load %arg4[%c5_156, %c0_157, %c0_158] : memref<8x64x8xbf16, #tpu.memory_space<vmem>>, vector<1x64x8xbf16>
    %229 = vector.shape_cast %228 : vector<1x64x8xbf16> to vector<64x8xbf16>
    %cst_159 = arith.constant dense<0.000000e+00> : vector<64x8xf32>
    %230 = tpu.matmul %2, %229, %cst_159 {dimension_numbers = #tpu.dot_dimension_numbers<[1], [0], [0], [1], [0, 0, 1, 1], [], []>} : vector<64x64xbf16>, vector<64x8xbf16>, vector<64x8xf32> -> vector<64x8xf32>
    %c5_160 = arith.constant 5 : index
    %c0_161 = arith.constant 0 : index
    %c0_162 = arith.constant 0 : index
    %231 = vector.load %arg7[%c5_160, %c0_161, %c0_162] : memref<8x1x8xf32, #tpu.memory_space<vmem>>, vector<1x1x8xf32>
    %232 = vector.shape_cast %231 : vector<1x1x8xf32> to vector<1x8xf32>
    %233 = vector.broadcast %232 : vector<1x8xf32> to vector<64x8xf32>
    %234 = arith.addf %230, %233 : vector<64x8xf32>
    %235 = arith.truncf %220 : vector<64x8xf32> to vector<64x8xbf16>
    %236 = arith.truncf %227 : vector<64x8xf32> to vector<64x8xbf16>
    %cst_163 = arith.constant dense<0.000000e+00> : vector<64x64xf32>
    %237 = tpu.matmul %235, %236, %cst_163 {dimension_numbers = #tpu.dot_dimension_numbers<[1], [1], [0], [0], [0, 0, 1, 0], [], []>} : vector<64x8xbf16>, vector<64x8xbf16>, vector<64x64xf32> -> vector<64x64xf32>
    %cst_164 = arith.constant dense<0xFF800000> : vector<64xf32>
    %238 = vector.multi_reduction <maximumf>, %237, %cst_164 [1] : vector<64x64xf32> to vector<64xf32>
    %239 = vector.shape_cast %238 : vector<64xf32> to vector<64x1xf32>
    %240 = vector.broadcast %239 : vector<64x1xf32> to vector<64x64xf32>
    %241 = arith.subf %237, %240 : vector<64x64xf32>
    %242 = math.exp %241 : vector<64x64xf32>
    %cst_165 = arith.constant dense<0.000000e+00> : vector<64xf32>
    %243 = vector.multi_reduction <add>, %242, %cst_165 [1] : vector<64x64xf32> to vector<64xf32>
    %244 = vector.shape_cast %243 : vector<64xf32> to vector<64x1xf32>
    %245 = arith.truncf %242 : vector<64x64xf32> to vector<64x64xbf16>
    %246 = arith.truncf %234 : vector<64x8xf32> to vector<64x8xbf16>
    %cst_166 = arith.constant dense<0.000000e+00> : vector<64x8xf32>
    %247 = tpu.matmul %245, %246, %cst_166 {dimension_numbers = #tpu.dot_dimension_numbers<[1], [0], [0], [1], [0, 0, 1, 1], [], []>} : vector<64x64xbf16>, vector<64x8xbf16>, vector<64x8xf32> -> vector<64x8xf32>
    %248 = tpu.reciprocal %244 {approx = true} : vector<64x1xf32> -> vector<64x1xf32>
    %249 = vector.broadcast %248 : vector<64x1xf32> to vector<64x8xf32>
    %250 = arith.mulf %247, %249 : vector<64x8xf32>
    %251 = arith.truncf %250 : vector<64x8xf32> to vector<64x8xbf16>
    %c5_167 = arith.constant 5 : index
    %c0_168 = arith.constant 0 : index
    %c0_169 = arith.constant 0 : index
    %252 = vector.load %arg8[%c5_167, %c0_168, %c0_169] : memref<8x8x64xbf16, #tpu.memory_space<vmem>>, vector<1x8x64xbf16>
    %253 = vector.shape_cast %252 : vector<1x8x64xbf16> to vector<8x64xbf16>
    %cst_170 = arith.constant dense<0.000000e+00> : vector<64x64xf32>
    %254 = tpu.matmul %251, %253, %cst_170 {dimension_numbers = #tpu.dot_dimension_numbers<[1], [0], [0], [1], [0, 0, 1, 1], [], []>} : vector<64x8xbf16>, vector<8x64xbf16>, vector<64x64xf32> -> vector<64x64xf32>
    %255 = arith.addf %213, %254 : vector<64x64xf32>
    %c6 = arith.constant 6 : index
    %c0_171 = arith.constant 0 : index
    %c0_172 = arith.constant 0 : index
    %256 = vector.load %arg2[%c6, %c0_171, %c0_172] : memref<8x64x8xbf16, #tpu.memory_space<vmem>>, vector<1x64x8xbf16>
    %257 = vector.shape_cast %256 : vector<1x64x8xbf16> to vector<64x8xbf16>
    %cst_173 = arith.constant dense<0.000000e+00> : vector<64x8xf32>
    %258 = tpu.matmul %2, %257, %cst_173 {dimension_numbers = #tpu.dot_dimension_numbers<[1], [0], [0], [1], [0, 0, 1, 1], [], []>} : vector<64x64xbf16>, vector<64x8xbf16>, vector<64x8xf32> -> vector<64x8xf32>
    %c6_174 = arith.constant 6 : index
    %c0_175 = arith.constant 0 : index
    %c0_176 = arith.constant 0 : index
    %259 = vector.load %arg5[%c6_174, %c0_175, %c0_176] : memref<8x1x8xf32, #tpu.memory_space<vmem>>, vector<1x1x8xf32>
    %260 = vector.shape_cast %259 : vector<1x1x8xf32> to vector<1x8xf32>
    %261 = vector.broadcast %260 : vector<1x8xf32> to vector<64x8xf32>
    %262 = arith.addf %258, %261 : vector<64x8xf32>
    %c6_177 = arith.constant 6 : index
    %c0_178 = arith.constant 0 : index
    %c0_179 = arith.constant 0 : index
    %263 = vector.load %arg3[%c6_177, %c0_178, %c0_179] : memref<8x64x8xbf16, #tpu.memory_space<vmem>>, vector<1x64x8xbf16>
    %264 = vector.shape_cast %263 : vector<1x64x8xbf16> to vector<64x8xbf16>
    %cst_180 = arith.constant dense<0.000000e+00> : vector<64x8xf32>
    %265 = tpu.matmul %2, %264, %cst_180 {dimension_numbers = #tpu.dot_dimension_numbers<[1], [0], [0], [1], [0, 0, 1, 1], [], []>} : vector<64x64xbf16>, vector<64x8xbf16>, vector<64x8xf32> -> vector<64x8xf32>
    %c6_181 = arith.constant 6 : index
    %c0_182 = arith.constant 0 : index
    %c0_183 = arith.constant 0 : index
    %266 = vector.load %arg6[%c6_181, %c0_182, %c0_183] : memref<8x1x8xf32, #tpu.memory_space<vmem>>, vector<1x1x8xf32>
    %267 = vector.shape_cast %266 : vector<1x1x8xf32> to vector<1x8xf32>
    %268 = vector.broadcast %267 : vector<1x8xf32> to vector<64x8xf32>
    %269 = arith.addf %265, %268 : vector<64x8xf32>
    %c6_184 = arith.constant 6 : index
    %c0_185 = arith.constant 0 : index
    %c0_186 = arith.constant 0 : index
    %270 = vector.load %arg4[%c6_184, %c0_185, %c0_186] : memref<8x64x8xbf16, #tpu.memory_space<vmem>>, vector<1x64x8xbf16>
    %271 = vector.shape_cast %270 : vector<1x64x8xbf16> to vector<64x8xbf16>
    %cst_187 = arith.constant dense<0.000000e+00> : vector<64x8xf32>
    %272 = tpu.matmul %2, %271, %cst_187 {dimension_numbers = #tpu.dot_dimension_numbers<[1], [0], [0], [1], [0, 0, 1, 1], [], []>} : vector<64x64xbf16>, vector<64x8xbf16>, vector<64x8xf32> -> vector<64x8xf32>
    %c6_188 = arith.constant 6 : index
    %c0_189 = arith.constant 0 : index
    %c0_190 = arith.constant 0 : index
    %273 = vector.load %arg7[%c6_188, %c0_189, %c0_190] : memref<8x1x8xf32, #tpu.memory_space<vmem>>, vector<1x1x8xf32>
    %274 = vector.shape_cast %273 : vector<1x1x8xf32> to vector<1x8xf32>
    %275 = vector.broadcast %274 : vector<1x8xf32> to vector<64x8xf32>
    %276 = arith.addf %272, %275 : vector<64x8xf32>
    %277 = arith.truncf %262 : vector<64x8xf32> to vector<64x8xbf16>
    %278 = arith.truncf %269 : vector<64x8xf32> to vector<64x8xbf16>
    %cst_191 = arith.constant dense<0.000000e+00> : vector<64x64xf32>
    %279 = tpu.matmul %277, %278, %cst_191 {dimension_numbers = #tpu.dot_dimension_numbers<[1], [1], [0], [0], [0, 0, 1, 0], [], []>} : vector<64x8xbf16>, vector<64x8xbf16>, vector<64x64xf32> -> vector<64x64xf32>
    %cst_192 = arith.constant dense<0xFF800000> : vector<64xf32>
    %280 = vector.multi_reduction <maximumf>, %279, %cst_192 [1] : vector<64x64xf32> to vector<64xf32>
    %281 = vector.shape_cast %280 : vector<64xf32> to vector<64x1xf32>
    %282 = vector.broadcast %281 : vector<64x1xf32> to vector<64x64xf32>
    %283 = arith.subf %279, %282 : vector<64x64xf32>
    %284 = math.exp %283 : vector<64x64xf32>
    %cst_193 = arith.constant dense<0.000000e+00> : vector<64xf32>
    %285 = vector.multi_reduction <add>, %284, %cst_193 [1] : vector<64x64xf32> to vector<64xf32>
    %286 = vector.shape_cast %285 : vector<64xf32> to vector<64x1xf32>
    %287 = arith.truncf %284 : vector<64x64xf32> to vector<64x64xbf16>
    %288 = arith.truncf %276 : vector<64x8xf32> to vector<64x8xbf16>
    %cst_194 = arith.constant dense<0.000000e+00> : vector<64x8xf32>
    %289 = tpu.matmul %287, %288, %cst_194 {dimension_numbers = #tpu.dot_dimension_numbers<[1], [0], [0], [1], [0, 0, 1, 1], [], []>} : vector<64x64xbf16>, vector<64x8xbf16>, vector<64x8xf32> -> vector<64x8xf32>
    %290 = tpu.reciprocal %286 {approx = true} : vector<64x1xf32> -> vector<64x1xf32>
    %291 = vector.broadcast %290 : vector<64x1xf32> to vector<64x8xf32>
    %292 = arith.mulf %289, %291 : vector<64x8xf32>
    %293 = arith.truncf %292 : vector<64x8xf32> to vector<64x8xbf16>
    %c6_195 = arith.constant 6 : index
    %c0_196 = arith.constant 0 : index
    %c0_197 = arith.constant 0 : index
    %294 = vector.load %arg8[%c6_195, %c0_196, %c0_197] : memref<8x8x64xbf16, #tpu.memory_space<vmem>>, vector<1x8x64xbf16>
    %295 = vector.shape_cast %294 : vector<1x8x64xbf16> to vector<8x64xbf16>
    %cst_198 = arith.constant dense<0.000000e+00> : vector<64x64xf32>
    %296 = tpu.matmul %293, %295, %cst_198 {dimension_numbers = #tpu.dot_dimension_numbers<[1], [0], [0], [1], [0, 0, 1, 1], [], []>} : vector<64x8xbf16>, vector<8x64xbf16>, vector<64x64xf32> -> vector<64x64xf32>
    %297 = arith.addf %255, %296 : vector<64x64xf32>
    %c7 = arith.constant 7 : index
    %c0_199 = arith.constant 0 : index
    %c0_200 = arith.constant 0 : index
    %298 = vector.load %arg2[%c7, %c0_199, %c0_200] : memref<8x64x8xbf16, #tpu.memory_space<vmem>>, vector<1x64x8xbf16>
    %299 = vector.shape_cast %298 : vector<1x64x8xbf16> to vector<64x8xbf16>
    %cst_201 = arith.constant dense<0.000000e+00> : vector<64x8xf32>
    %300 = tpu.matmul %2, %299, %cst_201 {dimension_numbers = #tpu.dot_dimension_numbers<[1], [0], [0], [1], [0, 0, 1, 1], [], []>} : vector<64x64xbf16>, vector<64x8xbf16>, vector<64x8xf32> -> vector<64x8xf32>
    %c7_202 = arith.constant 7 : index
    %c0_203 = arith.constant 0 : index
    %c0_204 = arith.constant 0 : index
    %301 = vector.load %arg5[%c7_202, %c0_203, %c0_204] : memref<8x1x8xf32, #tpu.memory_space<vmem>>, vector<1x1x8xf32>
    %302 = vector.shape_cast %301 : vector<1x1x8xf32> to vector<1x8xf32>
    %303 = vector.broadcast %302 : vector<1x8xf32> to vector<64x8xf32>
    %304 = arith.addf %300, %303 : vector<64x8xf32>
    %c7_205 = arith.constant 7 : index
    %c0_206 = arith.constant 0 : index
    %c0_207 = arith.constant 0 : index
    %305 = vector.load %arg3[%c7_205, %c0_206, %c0_207] : memref<8x64x8xbf16, #tpu.memory_space<vmem>>, vector<1x64x8xbf16>
    %306 = vector.shape_cast %305 : vector<1x64x8xbf16> to vector<64x8xbf16>
    %cst_208 = arith.constant dense<0.000000e+00> : vector<64x8xf32>
    %307 = tpu.matmul %2, %306, %cst_208 {dimension_numbers = #tpu.dot_dimension_numbers<[1], [0], [0], [1], [0, 0, 1, 1], [], []>} : vector<64x64xbf16>, vector<64x8xbf16>, vector<64x8xf32> -> vector<64x8xf32>
    %c7_209 = arith.constant 7 : index
    %c0_210 = arith.constant 0 : index
    %c0_211 = arith.constant 0 : index
    %308 = vector.load %arg6[%c7_209, %c0_210, %c0_211] : memref<8x1x8xf32, #tpu.memory_space<vmem>>, vector<1x1x8xf32>
    %309 = vector.shape_cast %308 : vector<1x1x8xf32> to vector<1x8xf32>
    %310 = vector.broadcast %309 : vector<1x8xf32> to vector<64x8xf32>
    %311 = arith.addf %307, %310 : vector<64x8xf32>
    %c7_212 = arith.constant 7 : index
    %c0_213 = arith.constant 0 : index
    %c0_214 = arith.constant 0 : index
    %312 = vector.load %arg4[%c7_212, %c0_213, %c0_214] : memref<8x64x8xbf16, #tpu.memory_space<vmem>>, vector<1x64x8xbf16>
    %313 = vector.shape_cast %312 : vector<1x64x8xbf16> to vector<64x8xbf16>
    %cst_215 = arith.constant dense<0.000000e+00> : vector<64x8xf32>
    %314 = tpu.matmul %2, %313, %cst_215 {dimension_numbers = #tpu.dot_dimension_numbers<[1], [0], [0], [1], [0, 0, 1, 1], [], []>} : vector<64x64xbf16>, vector<64x8xbf16>, vector<64x8xf32> -> vector<64x8xf32>
    %c7_216 = arith.constant 7 : index
    %c0_217 = arith.constant 0 : index
    %c0_218 = arith.constant 0 : index
    %315 = vector.load %arg7[%c7_216, %c0_217, %c0_218] : memref<8x1x8xf32, #tpu.memory_space<vmem>>, vector<1x1x8xf32>
    %316 = vector.shape_cast %315 : vector<1x1x8xf32> to vector<1x8xf32>
    %317 = vector.broadcast %316 : vector<1x8xf32> to vector<64x8xf32>
    %318 = arith.addf %314, %317 : vector<64x8xf32>
    %319 = arith.truncf %304 : vector<64x8xf32> to vector<64x8xbf16>
    %320 = arith.truncf %311 : vector<64x8xf32> to vector<64x8xbf16>
    %cst_219 = arith.constant dense<0.000000e+00> : vector<64x64xf32>
    %321 = tpu.matmul %319, %320, %cst_219 {dimension_numbers = #tpu.dot_dimension_numbers<[1], [1], [0], [0], [0, 0, 1, 0], [], []>} : vector<64x8xbf16>, vector<64x8xbf16>, vector<64x64xf32> -> vector<64x64xf32>
    %cst_220 = arith.constant dense<0xFF800000> : vector<64xf32>
    %322 = vector.multi_reduction <maximumf>, %321, %cst_220 [1] : vector<64x64xf32> to vector<64xf32>
    %323 = vector.shape_cast %322 : vector<64xf32> to vector<64x1xf32>
    %324 = vector.broadcast %323 : vector<64x1xf32> to vector<64x64xf32>
    %325 = arith.subf %321, %324 : vector<64x64xf32>
    %326 = math.exp %325 : vector<64x64xf32>
    %cst_221 = arith.constant dense<0.000000e+00> : vector<64xf32>
    %327 = vector.multi_reduction <add>, %326, %cst_221 [1] : vector<64x64xf32> to vector<64xf32>
    %328 = vector.shape_cast %327 : vector<64xf32> to vector<64x1xf32>
    %329 = arith.truncf %326 : vector<64x64xf32> to vector<64x64xbf16>
    %330 = arith.truncf %318 : vector<64x8xf32> to vector<64x8xbf16>
    %cst_222 = arith.constant dense<0.000000e+00> : vector<64x8xf32>
    %331 = tpu.matmul %329, %330, %cst_222 {dimension_numbers = #tpu.dot_dimension_numbers<[1], [0], [0], [1], [0, 0, 1, 1], [], []>} : vector<64x64xbf16>, vector<64x8xbf16>, vector<64x8xf32> -> vector<64x8xf32>
    %332 = tpu.reciprocal %328 {approx = true} : vector<64x1xf32> -> vector<64x1xf32>
    %333 = vector.broadcast %332 : vector<64x1xf32> to vector<64x8xf32>
    %334 = arith.mulf %331, %333 : vector<64x8xf32>
    %335 = arith.truncf %334 : vector<64x8xf32> to vector<64x8xbf16>
    %c7_223 = arith.constant 7 : index
    %c0_224 = arith.constant 0 : index
    %c0_225 = arith.constant 0 : index
    %336 = vector.load %arg8[%c7_223, %c0_224, %c0_225] : memref<8x8x64xbf16, #tpu.memory_space<vmem>>, vector<1x8x64xbf16>
    %337 = vector.shape_cast %336 : vector<1x8x64xbf16> to vector<8x64xbf16>
    %cst_226 = arith.constant dense<0.000000e+00> : vector<64x64xf32>
    %338 = tpu.matmul %335, %337, %cst_226 {dimension_numbers = #tpu.dot_dimension_numbers<[1], [0], [0], [1], [0, 0, 1, 1], [], []>} : vector<64x8xbf16>, vector<8x64xbf16>, vector<64x64xf32> -> vector<64x64xf32>
    %339 = arith.addf %297, %338 : vector<64x64xf32>
    %340 = arith.addf %1, %339 : vector<64x64xf32>
    %c0_227 = arith.constant 0 : index
    %c0_228 = arith.constant 0 : index
    %341 = vector.load %arg9[%c0_227, %c0_228] : memref<1x64xf32, #tpu.memory_space<vmem>>, vector<1x64xf32>
    %342 = vector.broadcast %341 : vector<1x64xf32> to vector<64x64xf32>
    %343 = arith.addf %340, %342 : vector<64x64xf32>
    %c0_229 = arith.constant 0 : index
    %c0_230 = arith.constant 0 : index
    %344 = vector.load %arg10[%c0_229, %c0_230] : memref<1x64xf32, #tpu.memory_space<vmem>>, vector<1x64xf32>
    %c0_231 = arith.constant 0 : index
    %c0_232 = arith.constant 0 : index
    %345 = vector.load %arg11[%c0_231, %c0_232] : memref<1x64xf32, #tpu.memory_space<vmem>>, vector<1x64xf32>
    %cst_233 = arith.constant dense<0.000000e+00> : vector<64xf32>
    %346 = vector.multi_reduction <add>, %343, %cst_233 [1] : vector<64x64xf32> to vector<64xf32>
    %347 = vector.shape_cast %346 : vector<64xf32> to vector<64x1xf32>
    %cst_234 = arith.constant 6.400000e+01 : f32
    %348 = vector.broadcast %cst_234 : f32 to vector<64x1xf32>
    %349 = arith.divf %347, %348 : vector<64x1xf32>
    %350 = vector.broadcast %349 : vector<64x1xf32> to vector<64x64xf32>
    %351 = arith.subf %343, %350 : vector<64x64xf32>
    %352 = arith.mulf %351, %351 : vector<64x64xf32>
    %cst_235 = arith.constant dense<0.000000e+00> : vector<64xf32>
    %353 = vector.multi_reduction <add>, %352, %cst_235 [1] : vector<64x64xf32> to vector<64xf32>
    %354 = vector.shape_cast %353 : vector<64xf32> to vector<64x1xf32>
    %cst_236 = arith.constant 6.400000e+01 : f32
    %355 = vector.broadcast %cst_236 : f32 to vector<64x1xf32>
    %356 = arith.divf %354, %355 : vector<64x1xf32>
    %cst_237 = arith.constant 9.99999974E-6 : f32
    %357 = vector.broadcast %cst_237 : f32 to vector<64x1xf32>
    %358 = arith.addf %356, %357 : vector<64x1xf32>
    %359 = math.rsqrt %358 : vector<64x1xf32>
    %360 = vector.broadcast %359 : vector<64x1xf32> to vector<64x64xf32>
    %361 = arith.mulf %351, %360 : vector<64x64xf32>
    %362 = vector.broadcast %344 : vector<1x64xf32> to vector<64x64xf32>
    %363 = arith.mulf %361, %362 : vector<64x64xf32>
    %364 = vector.broadcast %345 : vector<1x64xf32> to vector<64x64xf32>
    %365 = arith.addf %363, %364 : vector<64x64xf32>
    %c0_238 = arith.constant 0 : index
    %c0_239 = arith.constant 0 : index
    %c0_240 = arith.constant 0 : index
    %366 = vector.load %arg12[%c0_238, %c0_239, %c0_240] : memref<1x64x64xf32, #tpu.memory_space<vmem>>, vector<1x64x64xf32>
    %367 = vector.shape_cast %366 : vector<1x64x64xf32> to vector<64x64xf32>
    %368 = vector.shape_cast %365 : vector<64x64xf32> to vector<1x64x64xf32>
    tpu.vector_store %arg12[%c0_238, %c0_239, %c0_240], %368 {strides = array<i32>} : memref<1x64x64xf32, #tpu.memory_space<vmem>>, vector<1x64x64xf32>,
    return
  }
  func.func @transform_0(%arg0: i32) -> (i32, i32, i32) {
    %c0_i32 = arith.constant 0 : i32
    %c0_i32_0 = arith.constant 0 : i32
    %c0_i32_1 = arith.constant 0 : i32
    return %arg0, %c0_i32, %c0_i32_0 : i32, i32, i32
  }
  func.func @transform_1(%arg0: i32) -> (i32, i32, i32) {
    %c0_i32 = arith.constant 0 : i32
    %c0_i32_0 = arith.constant 0 : i32
    %c0_i32_1 = arith.constant 0 : i32
    %c0_i32_2 = arith.constant 0 : i32
    return %c0_i32, %c0_i32_0, %c0_i32_1 : i32, i32, i32
  }
  func.func @transform_2(%arg0: i32) -> (i32, i32, i32) {
    %c0_i32 = arith.constant 0 : i32
    %c0_i32_0 = arith.constant 0 : i32
    %c0_i32_1 = arith.constant 0 : i32
    %c0_i32_2 = arith.constant 0 : i32
    return %c0_i32, %c0_i32_0, %c0_i32_1 : i32, i32, i32
  }
  func.func @transform_3(%arg0: i32) -> (i32, i32, i32) {
    %c0_i32 = arith.constant 0 : i32
    %c0_i32_0 = arith.constant 0 : i32
    %c0_i32_1 = arith.constant 0 : i32
    %c0_i32_2 = arith.constant 0 : i32
    return %c0_i32, %c0_i32_0, %c0_i32_1 : i32, i32, i32
  }
  func.func @transform_4(%arg0: i32) -> (i32, i32, i32) {
    %c0_i32 = arith.constant 0 : i32
    %c0_i32_0 = arith.constant 0 : i32
    %c0_i32_1 = arith.constant 0 : i32
    %c0_i32_2 = arith.constant 0 : i32
    return %c0_i32, %c0_i32_0, %c0_i32_1 : i32, i32, i32
  }
  func.func @transform_5(%arg0: i32) -> (i32, i32, i32) {
    %c0_i32 = arith.constant 0 : i32
    %c0_i32_0 = arith.constant 0 : i32
    %c0_i32_1 = arith.constant 0 : i32
    %c0_i32_2 = arith.constant 0 : i32
    return %c0_i32, %c0_i32_0, %c0_i32_1 : i32, i32, i32
  }
  func.func @transform_6(%arg0: i32) -> (i32, i32, i32) {
    %c0_i32 = arith.constant 0 : i32
    %c0_i32_0 = arith.constant 0 : i32
    %c0_i32_1 = arith.constant 0 : i32
    %c0_i32_2 = arith.constant 0 : i32
    return %c0_i32, %c0_i32_0, %c0_i32_1 : i32, i32, i32
  }
  func.func @transform_7(%arg0: i32) -> (i32, i32, i32) {
    %c0_i32 = arith.constant 0 : i32
    %c0_i32_0 = arith.constant 0 : i32
    %c0_i32_1 = arith.constant 0 : i32
    %c0_i32_2 = arith.constant 0 : i32
    return %c0_i32, %c0_i32_0, %c0_i32_1 : i32, i32, i32
  }
  func.func @transform_8(%arg0: i32) -> (i32, i32) {
    %c0_i32 = arith.constant 0 : i32
    %c0_i32_0 = arith.constant 0 : i32
    %c0_i32_1 = arith.constant 0 : i32
    return %c0_i32, %c0_i32_0 : i32, i32
  }
  func.func @transform_9(%arg0: i32) -> (i32, i32) {
    %c0_i32 = arith.constant 0 : i32
    %c0_i32_0 = arith.constant 0 : i32
    %c0_i32_1 = arith.constant 0 : i32
    return %c0_i32, %c0_i32_0 : i32, i32
  }
  func.func @transform_10(%arg0: i32) -> (i32, i32) {
    %c0_i32 = arith.constant 0 : i32
    %c0_i32_0 = arith.constant 0 : i32
    %c0_i32_1 = arith.constant 0 : i32
    return %c0_i32, %c0_i32_0 : i32, i32
  }
  func.func @transform_11(%arg0: i32) -> (i32, i32, i32) {
    %c0_i32 = arith.constant 0 : i32
    %c0_i32_0 = arith.constant 0 : i32
    %c0_i32_1 = arith.constant 0 : i32
    return %arg0, %c0_i32, %c0_i32_0 : i32, i32, i32
  }
}

module attributes {stable_mosaic.version = 11 : i64} {
  func.func @_ffn_add_ln_kernel(%arg0: i32, %arg1: memref<64x64xf32, #tpu.memory_space<vmem>>, %arg2: memref<64x2048xbf16, #tpu.memory_space<vmem>>, %arg3: memref<1x2048xf32, #tpu.memory_space<vmem>>, %arg4: memref<2048x64xbf16, #tpu.memory_space<vmem>>, %arg5: memref<1x64xf32, #tpu.memory_space<vmem>>, %arg6: memref<1x64xf32, #tpu.memory_space<vmem>>, %arg7: memref<1x64xf32, #tpu.memory_space<vmem>>, %arg8: memref<64x64xf32, #tpu.memory_space<vmem>>) attributes {dimension_semantics = [#tpu.dimension_semantics<parallel>], iteration_bounds = array<i64: 2>, scalar_prefetch = 0 : i64, scratch_operands = 0 : i64, tpu.core_type = #tpu.core_type<tc>, window_params = [{transform_indices = @transform_0, window_bounds = array<i64: 64, 64>}, {pipeline_mode = #tpu.pipeline_mode<synchronous>, transform_indices = @transform_1, window_bounds = array<i64: 64, 2048>}, {pipeline_mode = #tpu.pipeline_mode<synchronous>, transform_indices = @transform_2, window_bounds = array<i64: 1, 2048>}, {pipeline_mode = #tpu.pipeline_mode<synchronous>, transform_indices = @transform_3, window_bounds = array<i64: 2048, 64>}, {pipeline_mode = #tpu.pipeline_mode<synchronous>, transform_indices = @transform_4, window_bounds = array<i64: 1, 64>}, {pipeline_mode = #tpu.pipeline_mode<synchronous>, transform_indices = @transform_5, window_bounds = array<i64: 1, 64>}, {pipeline_mode = #tpu.pipeline_mode<synchronous>, transform_indices = @transform_6, window_bounds = array<i64: 1, 64>}, {transform_indices = @transform_7, window_bounds = array<i64: 64, 64>}]} {
    %c0 = arith.constant 0 : index
    %c0_0 = arith.constant 0 : index
    %0 = vector.load %arg1[%c0, %c0_0] : memref<64x64xf32, #tpu.memory_space<vmem>>, vector<64x64xf32>
    %1 = arith.truncf %0 : vector<64x64xf32> to vector<64x64xbf16>
    %c0_1 = arith.constant 0 : index
    %c0_2 = arith.constant 0 : index
    %2 = vector.load %arg2[%c0_1, %c0_2] : memref<64x2048xbf16, #tpu.memory_space<vmem>>, vector<64x2048xbf16>
    %cst = arith.constant dense<0.000000e+00> : vector<64x2048xf32>
    %3 = tpu.matmul %1, %2, %cst {dimension_numbers = #tpu.dot_dimension_numbers<[1], [0], [0], [1], [0, 0, 1, 1], [], []>} : vector<64x64xbf16>, vector<64x2048xbf16>, vector<64x2048xf32> -> vector<64x2048xf32>
    %c0_3 = arith.constant 0 : index
    %c0_4 = arith.constant 0 : index
    %4 = vector.load %arg3[%c0_3, %c0_4] : memref<1x2048xf32, #tpu.memory_space<vmem>>, vector<1x2048xf32>
    %5 = vector.broadcast %4 : vector<1x2048xf32> to vector<64x2048xf32>
    %6 = arith.addf %3, %5 : vector<64x2048xf32>
    %cst_5 = arith.constant 0.000000e+00 : f32
    %7 = vector.broadcast %cst_5 : f32 to vector<64x2048xf32>
    %8 = arith.maximumf %6, %7 : vector<64x2048xf32>
    %9 = arith.truncf %8 : vector<64x2048xf32> to vector<64x2048xbf16>
    %c0_6 = arith.constant 0 : index
    %c0_7 = arith.constant 0 : index
    %10 = vector.load %arg4[%c0_6, %c0_7] : memref<2048x64xbf16, #tpu.memory_space<vmem>>, vector<2048x64xbf16>
    %cst_8 = arith.constant dense<0.000000e+00> : vector<64x64xf32>
    %11 = tpu.matmul %9, %10, %cst_8 {dimension_numbers = #tpu.dot_dimension_numbers<[1], [0], [0], [1], [0, 0, 1, 1], [], []>} : vector<64x2048xbf16>, vector<2048x64xbf16>, vector<64x64xf32> -> vector<64x64xf32>
    %c0_9 = arith.constant 0 : index
    %c0_10 = arith.constant 0 : index
    %12 = vector.load %arg5[%c0_9, %c0_10] : memref<1x64xf32, #tpu.memory_space<vmem>>, vector<1x64xf32>
    %13 = vector.broadcast %12 : vector<1x64xf32> to vector<64x64xf32>
    %14 = arith.addf %11, %13 : vector<64x64xf32>
    %15 = arith.addf %0, %14 : vector<64x64xf32>
    %c0_11 = arith.constant 0 : index
    %c0_12 = arith.constant 0 : index
    %16 = vector.load %arg6[%c0_11, %c0_12] : memref<1x64xf32, #tpu.memory_space<vmem>>, vector<1x64xf32>
    %c0_13 = arith.constant 0 : index
    %c0_14 = arith.constant 0 : index
    %17 = vector.load %arg7[%c0_13, %c0_14] : memref<1x64xf32, #tpu.memory_space<vmem>>, vector<1x64xf32>
    %cst_15 = arith.constant dense<0.000000e+00> : vector<64xf32>
    %18 = vector.multi_reduction <add>, %15, %cst_15 [1] : vector<64x64xf32> to vector<64xf32>
    %19 = vector.shape_cast %18 : vector<64xf32> to vector<64x1xf32>
    %cst_16 = arith.constant 6.400000e+01 : f32
    %20 = vector.broadcast %cst_16 : f32 to vector<64x1xf32>
    %21 = arith.divf %19, %20 : vector<64x1xf32>
    %22 = vector.broadcast %21 : vector<64x1xf32> to vector<64x64xf32>
    %23 = arith.subf %15, %22 : vector<64x64xf32>
    %24 = arith.mulf %23, %23 : vector<64x64xf32>
    %cst_17 = arith.constant dense<0.000000e+00> : vector<64xf32>
    %25 = vector.multi_reduction <add>, %24, %cst_17 [1] : vector<64x64xf32> to vector<64xf32>
    %26 = vector.shape_cast %25 : vector<64xf32> to vector<64x1xf32>
    %cst_18 = arith.constant 6.400000e+01 : f32
    %27 = vector.broadcast %cst_18 : f32 to vector<64x1xf32>
    %28 = arith.divf %26, %27 : vector<64x1xf32>
    %cst_19 = arith.constant 9.99999974E-6 : f32
    %29 = vector.broadcast %cst_19 : f32 to vector<64x1xf32>
    %30 = arith.addf %28, %29 : vector<64x1xf32>
    %31 = math.rsqrt %30 : vector<64x1xf32>
    %32 = vector.broadcast %31 : vector<64x1xf32> to vector<64x64xf32>
    %33 = arith.mulf %23, %32 : vector<64x64xf32>
    %34 = vector.broadcast %16 : vector<1x64xf32> to vector<64x64xf32>
    %35 = arith.mulf %33, %34 : vector<64x64xf32>
    %36 = vector.broadcast %17 : vector<1x64xf32> to vector<64x64xf32>
    %37 = arith.addf %35, %36 : vector<64x64xf32>
    %c0_20 = arith.constant 0 : index
    %c0_21 = arith.constant 0 : index
    %38 = vector.load %arg8[%c0_20, %c0_21] : memref<64x64xf32, #tpu.memory_space<vmem>>, vector<64x64xf32>
    tpu.vector_store %arg8[%c0_20, %c0_21], %37 {strides = array<i32>} : memref<64x64xf32, #tpu.memory_space<vmem>>, vector<64x64xf32>,
    return
  }
  func.func @transform_0(%arg0: i32) -> (i32, i32) {
    %c0_i32 = arith.constant 0 : i32
    %c0_i32_0 = arith.constant 0 : i32
    return %arg0, %c0_i32 : i32, i32
  }
  func.func @transform_1(%arg0: i32) -> (i32, i32) {
    %c0_i32 = arith.constant 0 : i32
    %c0_i32_0 = arith.constant 0 : i32
    %c0_i32_1 = arith.constant 0 : i32
    return %c0_i32, %c0_i32_0 : i32, i32
  }
  func.func @transform_2(%arg0: i32) -> (i32, i32) {
    %c0_i32 = arith.constant 0 : i32
    %c0_i32_0 = arith.constant 0 : i32
    %c0_i32_1 = arith.constant 0 : i32
    return %c0_i32, %c0_i32_0 : i32, i32
  }
  func.func @transform_3(%arg0: i32) -> (i32, i32) {
    %c0_i32 = arith.constant 0 : i32
    %c0_i32_0 = arith.constant 0 : i32
    %c0_i32_1 = arith.constant 0 : i32
    return %c0_i32, %c0_i32_0 : i32, i32
  }
  func.func @transform_4(%arg0: i32) -> (i32, i32) {
    %c0_i32 = arith.constant 0 : i32
    %c0_i32_0 = arith.constant 0 : i32
    %c0_i32_1 = arith.constant 0 : i32
    return %c0_i32, %c0_i32_0 : i32, i32
  }
  func.func @transform_5(%arg0: i32) -> (i32, i32) {
    %c0_i32 = arith.constant 0 : i32
    %c0_i32_0 = arith.constant 0 : i32
    %c0_i32_1 = arith.constant 0 : i32
    return %c0_i32, %c0_i32_0 : i32, i32
  }
  func.func @transform_6(%arg0: i32) -> (i32, i32) {
    %c0_i32 = arith.constant 0 : i32
    %c0_i32_0 = arith.constant 0 : i32
    %c0_i32_1 = arith.constant 0 : i32
    return %c0_i32, %c0_i32_0 : i32, i32
  }
  func.func @transform_7(%arg0: i32) -> (i32, i32) {
    %c0_i32 = arith.constant 0 : i32
    %c0_i32_0 = arith.constant 0 : i32
    return %arg0, %c0_i32 : i32, i32
  }
}

module attributes {stable_mosaic.version = 11 : i64} {
  func.func @_ffn_add_ln_pool_kernel(%arg0: i32, %arg1: memref<64x64xf32, #tpu.memory_space<vmem>>, %arg2: memref<64x2048xbf16, #tpu.memory_space<vmem>>, %arg3: memref<1x2048xf32, #tpu.memory_space<vmem>>, %arg4: memref<2048x64xbf16, #tpu.memory_space<vmem>>, %arg5: memref<1x64xf32, #tpu.memory_space<vmem>>, %arg6: memref<1x64xf32, #tpu.memory_space<vmem>>, %arg7: memref<1x64xf32, #tpu.memory_space<vmem>>, %arg8: memref<64x4xf32, #tpu.memory_space<vmem>>) attributes {dimension_semantics = [#tpu.dimension_semantics<parallel>], iteration_bounds = array<i64: 2>, scalar_prefetch = 0 : i64, scratch_operands = 0 : i64, tpu.core_type = #tpu.core_type<tc>, window_params = [{transform_indices = @transform_0, window_bounds = array<i64: 64, 64>}, {pipeline_mode = #tpu.pipeline_mode<synchronous>, transform_indices = @transform_1, window_bounds = array<i64: 64, 2048>}, {pipeline_mode = #tpu.pipeline_mode<synchronous>, transform_indices = @transform_2, window_bounds = array<i64: 1, 2048>}, {pipeline_mode = #tpu.pipeline_mode<synchronous>, transform_indices = @transform_3, window_bounds = array<i64: 2048, 64>}, {pipeline_mode = #tpu.pipeline_mode<synchronous>, transform_indices = @transform_4, window_bounds = array<i64: 1, 64>}, {pipeline_mode = #tpu.pipeline_mode<synchronous>, transform_indices = @transform_5, window_bounds = array<i64: 1, 64>}, {pipeline_mode = #tpu.pipeline_mode<synchronous>, transform_indices = @transform_6, window_bounds = array<i64: 1, 64>}, {transform_indices = @transform_7, window_bounds = array<i64: 64, 4>}]} {
    %c0 = arith.constant 0 : index
    %c0_0 = arith.constant 0 : index
    %0 = vector.load %arg1[%c0, %c0_0] : memref<64x64xf32, #tpu.memory_space<vmem>>, vector<64x64xf32>
    %1 = arith.truncf %0 : vector<64x64xf32> to vector<64x64xbf16>
    %c0_1 = arith.constant 0 : index
    %c0_2 = arith.constant 0 : index
    %2 = vector.load %arg2[%c0_1, %c0_2] : memref<64x2048xbf16, #tpu.memory_space<vmem>>, vector<64x2048xbf16>
    %cst = arith.constant dense<0.000000e+00> : vector<64x2048xf32>
    %3 = tpu.matmul %1, %2, %cst {dimension_numbers = #tpu.dot_dimension_numbers<[1], [0], [0], [1], [0, 0, 1, 1], [], []>} : vector<64x64xbf16>, vector<64x2048xbf16>, vector<64x2048xf32> -> vector<64x2048xf32>
    %c0_3 = arith.constant 0 : index
    %c0_4 = arith.constant 0 : index
    %4 = vector.load %arg3[%c0_3, %c0_4] : memref<1x2048xf32, #tpu.memory_space<vmem>>, vector<1x2048xf32>
    %5 = vector.broadcast %4 : vector<1x2048xf32> to vector<64x2048xf32>
    %6 = arith.addf %3, %5 : vector<64x2048xf32>
    %cst_5 = arith.constant 0.000000e+00 : f32
    %7 = vector.broadcast %cst_5 : f32 to vector<64x2048xf32>
    %8 = arith.maximumf %6, %7 : vector<64x2048xf32>
    %9 = arith.truncf %8 : vector<64x2048xf32> to vector<64x2048xbf16>
    %c0_6 = arith.constant 0 : index
    %c0_7 = arith.constant 0 : index
    %10 = vector.load %arg4[%c0_6, %c0_7] : memref<2048x64xbf16, #tpu.memory_space<vmem>>, vector<2048x64xbf16>
    %cst_8 = arith.constant dense<0.000000e+00> : vector<64x64xf32>
    %11 = tpu.matmul %9, %10, %cst_8 {dimension_numbers = #tpu.dot_dimension_numbers<[1], [0], [0], [1], [0, 0, 1, 1], [], []>} : vector<64x2048xbf16>, vector<2048x64xbf16>, vector<64x64xf32> -> vector<64x64xf32>
    %c0_9 = arith.constant 0 : index
    %c0_10 = arith.constant 0 : index
    %12 = vector.load %arg5[%c0_9, %c0_10] : memref<1x64xf32, #tpu.memory_space<vmem>>, vector<1x64xf32>
    %13 = vector.broadcast %12 : vector<1x64xf32> to vector<64x64xf32>
    %14 = arith.addf %11, %13 : vector<64x64xf32>
    %15 = arith.addf %0, %14 : vector<64x64xf32>
    %c0_11 = arith.constant 0 : index
    %c0_12 = arith.constant 0 : index
    %16 = vector.load %arg6[%c0_11, %c0_12] : memref<1x64xf32, #tpu.memory_space<vmem>>, vector<1x64xf32>
    %c0_13 = arith.constant 0 : index
    %c0_14 = arith.constant 0 : index
    %17 = vector.load %arg7[%c0_13, %c0_14] : memref<1x64xf32, #tpu.memory_space<vmem>>, vector<1x64xf32>
    %cst_15 = arith.constant dense<0.000000e+00> : vector<64xf32>
    %18 = vector.multi_reduction <add>, %15, %cst_15 [1] : vector<64x64xf32> to vector<64xf32>
    %19 = vector.shape_cast %18 : vector<64xf32> to vector<64x1xf32>
    %cst_16 = arith.constant 6.400000e+01 : f32
    %20 = vector.broadcast %cst_16 : f32 to vector<64x1xf32>
    %21 = arith.divf %19, %20 : vector<64x1xf32>
    %22 = vector.broadcast %21 : vector<64x1xf32> to vector<64x64xf32>
    %23 = arith.subf %15, %22 : vector<64x64xf32>
    %24 = arith.mulf %23, %23 : vector<64x64xf32>
    %cst_17 = arith.constant dense<0.000000e+00> : vector<64xf32>
    %25 = vector.multi_reduction <add>, %24, %cst_17 [1] : vector<64x64xf32> to vector<64xf32>
    %26 = vector.shape_cast %25 : vector<64xf32> to vector<64x1xf32>
    %cst_18 = arith.constant 6.400000e+01 : f32
    %27 = vector.broadcast %cst_18 : f32 to vector<64x1xf32>
    %28 = arith.divf %26, %27 : vector<64x1xf32>
    %cst_19 = arith.constant 9.99999974E-6 : f32
    %29 = vector.broadcast %cst_19 : f32 to vector<64x1xf32>
    %30 = arith.addf %28, %29 : vector<64x1xf32>
    %31 = math.rsqrt %30 : vector<64x1xf32>
    %32 = vector.broadcast %31 : vector<64x1xf32> to vector<64x64xf32>
    %33 = arith.mulf %23, %32 : vector<64x64xf32>
    %34 = vector.broadcast %16 : vector<1x64xf32> to vector<64x64xf32>
    %35 = arith.mulf %33, %34 : vector<64x64xf32>
    %36 = vector.broadcast %17 : vector<1x64xf32> to vector<64x64xf32>
    %37 = arith.addf %35, %36 : vector<64x64xf32>
    %38 = vector.extract_strided_slice %37 {offsets = [0, 0], sizes = [64, 16], strides = [1, 1]} : vector<64x64xf32> to vector<64x16xf32>
    %cst_20 = arith.constant dense<0xFF800000> : vector<64xf32>
    %39 = vector.multi_reduction <maximumf>, %38, %cst_20 [1] : vector<64x16xf32> to vector<64xf32>
    %40 = vector.shape_cast %39 : vector<64xf32> to vector<64x1xf32>
    %41 = vector.extract_strided_slice %37 {offsets = [0, 16], sizes = [64, 16], strides = [1, 1]} : vector<64x64xf32> to vector<64x16xf32>
    %cst_21 = arith.constant dense<0xFF800000> : vector<64xf32>
    %42 = vector.multi_reduction <maximumf>, %41, %cst_21 [1] : vector<64x16xf32> to vector<64xf32>
    %43 = vector.shape_cast %42 : vector<64xf32> to vector<64x1xf32>
    %44 = vector.extract_strided_slice %37 {offsets = [0, 32], sizes = [64, 16], strides = [1, 1]} : vector<64x64xf32> to vector<64x16xf32>
    %cst_22 = arith.constant dense<0xFF800000> : vector<64xf32>
    %45 = vector.multi_reduction <maximumf>, %44, %cst_22 [1] : vector<64x16xf32> to vector<64xf32>
    %46 = vector.shape_cast %45 : vector<64xf32> to vector<64x1xf32>
    %47 = vector.extract_strided_slice %37 {offsets = [0, 48], sizes = [64, 16], strides = [1, 1]} : vector<64x64xf32> to vector<64x16xf32>
    %cst_23 = arith.constant dense<0xFF800000> : vector<64xf32>
    %48 = vector.multi_reduction <maximumf>, %47, %cst_23 [1] : vector<64x16xf32> to vector<64xf32>
    %49 = vector.shape_cast %48 : vector<64xf32> to vector<64x1xf32>
    %50 = tpu.concatenate %40, %43, %46, %49 in 1 : vector<64x1xf32>, vector<64x1xf32>, vector<64x1xf32>, vector<64x1xf32> -> vector<64x4xf32>
    %c0_24 = arith.constant 0 : index
    %c0_25 = arith.constant 0 : index
    %51 = vector.load %arg8[%c0_24, %c0_25] : memref<64x4xf32, #tpu.memory_space<vmem>>, vector<64x4xf32>
    tpu.vector_store %arg8[%c0_24, %c0_25], %50 {strides = array<i32>} : memref<64x4xf32, #tpu.memory_space<vmem>>, vector<64x4xf32>,
    return
  }
  func.func @transform_0(%arg0: i32) -> (i32, i32) {
    %c0_i32 = arith.constant 0 : i32
    %c0_i32_0 = arith.constant 0 : i32
    return %arg0, %c0_i32 : i32, i32
  }
  func.func @transform_1(%arg0: i32) -> (i32, i32) {
    %c0_i32 = arith.constant 0 : i32
    %c0_i32_0 = arith.constant 0 : i32
    %c0_i32_1 = arith.constant 0 : i32
    return %c0_i32, %c0_i32_0 : i32, i32
  }
  func.func @transform_2(%arg0: i32) -> (i32, i32) {
    %c0_i32 = arith.constant 0 : i32
    %c0_i32_0 = arith.constant 0 : i32
    %c0_i32_1 = arith.constant 0 : i32
    return %c0_i32, %c0_i32_0 : i32, i32
  }
  func.func @transform_3(%arg0: i32) -> (i32, i32) {
    %c0_i32 = arith.constant 0 : i32
    %c0_i32_0 = arith.constant 0 : i32
    %c0_i32_1 = arith.constant 0 : i32
    return %c0_i32, %c0_i32_0 : i32, i32
  }
  func.func @transform_4(%arg0: i32) -> (i32, i32) {
    %c0_i32 = arith.constant 0 : i32
    %c0_i32_0 = arith.constant 0 : i32
    %c0_i32_1 = arith.constant 0 : i32
    return %c0_i32, %c0_i32_0 : i32, i32
  }
  func.func @transform_5(%arg0: i32) -> (i32, i32) {
    %c0_i32 = arith.constant 0 : i32
    %c0_i32_0 = arith.constant 0 : i32
    %c0_i32_1 = arith.constant 0 : i32
    return %c0_i32, %c0_i32_0 : i32, i32
  }
  func.func @transform_6(%arg0: i32) -> (i32, i32) {
    %c0_i32 = arith.constant 0 : i32
    %c0_i32_0 = arith.constant 0 : i32
    %c0_i32_1 = arith.constant 0 : i32
    return %c0_i32, %c0_i32_0 : i32, i32
  }
  func.func @transform_7(%arg0: i32) -> (i32, i32) {
    %c0_i32 = arith.constant 0 : i32
    %c0_i32_0 = arith.constant 0 : i32
    return %arg0, %c0_i32 : i32, i32
  }
}

module attributes {stable_mosaic.version = 11 : i64} {
  func.func @_recon_kernel(%arg0: i32, %arg1: i32, %arg2: memref<1x32x64xf32, #tpu.memory_space<vmem>>, %arg3: memref<1x64x4xf32, #tpu.memory_space<vmem>>, %arg4: memref<1x64x4xf32, #tpu.memory_space<vmem>>, %arg5: memref<1x32x64xf32, #tpu.memory_space<vmem>>) attributes {dimension_semantics = [#tpu.dimension_semantics<parallel>, #tpu.dimension_semantics<parallel>], iteration_bounds = array<i64: 2, 2>, scalar_prefetch = 0 : i64, scratch_operands = 0 : i64, tpu.core_type = #tpu.core_type<tc>, window_params = [{transform_indices = @transform_0, window_bounds = array<i64: 1, 32, 64>}, {transform_indices = @transform_1, window_bounds = array<i64: 1, 64, 4>}, {transform_indices = @transform_2, window_bounds = array<i64: 1, 64, 4>}, {transform_indices = @transform_3, window_bounds = array<i64: 1, 32, 64>}]} {
    %c0 = arith.constant 0 : index
    %c0_0 = arith.constant 0 : index
    %c0_1 = arith.constant 0 : index
    %0 = vector.load %arg2[%c0, %c0_0, %c0_1] : memref<1x32x64xf32, #tpu.memory_space<vmem>>, vector<1x32x64xf32>
    %1 = vector.shape_cast %0 : vector<1x32x64xf32> to vector<32x64xf32>
    %c0_2 = arith.constant 0 : index
    %c0_3 = arith.constant 0 : index
    %c0_4 = arith.constant 0 : index
    %2 = vector.load %arg3[%c0_2, %c0_3, %c0_4] : memref<1x64x4xf32, #tpu.memory_space<vmem>>, vector<1x64x4xf32>
    %3 = vector.shape_cast %2 : vector<1x64x4xf32> to vector<64x4xf32>
    %c0_5 = arith.constant 0 : index
    %c0_6 = arith.constant 0 : index
    %c0_7 = arith.constant 0 : index
    %4 = vector.load %arg4[%c0_5, %c0_6, %c0_7] : memref<1x64x4xf32, #tpu.memory_space<vmem>>, vector<1x64x4xf32>
    %5 = vector.shape_cast %4 : vector<1x64x4xf32> to vector<64x4xf32>
    %cst = arith.constant dense<0.000000e+00> : vector<32x4xf32>
    %6 = tpu.matmul %1, %3, %cst {dimension_numbers = #tpu.dot_dimension_numbers<[1], [0], [0], [1], [0, 0, 1, 1], [], []>} : vector<32x64xf32>, vector<64x4xf32>, vector<32x4xf32> -> vector<32x4xf32>
    %cst_8 = arith.constant dense<0.000000e+00> : vector<32x64xf32>
    %7 = tpu.matmul %6, %5, %cst_8 {dimension_numbers = #tpu.dot_dimension_numbers<[1], [1], [0], [0], [0, 0, 1, 0], [], []>} : vector<32x4xf32>, vector<64x4xf32>, vector<32x64xf32> -> vector<32x64xf32>
    %c0_9 = arith.constant 0 : index
    %c0_10 = arith.constant 0 : index
    %c0_11 = arith.constant 0 : index
    %8 = vector.load %arg5[%c0_9, %c0_10, %c0_11] : memref<1x32x64xf32, #tpu.memory_space<vmem>>, vector<1x32x64xf32>
    %9 = vector.shape_cast %8 : vector<1x32x64xf32> to vector<32x64xf32>
    %10 = vector.shape_cast %7 : vector<32x64xf32> to vector<1x32x64xf32>
    tpu.vector_store %arg5[%c0_9, %c0_10, %c0_11], %10 {strides = array<i32>} : memref<1x32x64xf32, #tpu.memory_space<vmem>>, vector<1x32x64xf32>,
    return
  }
  func.func @transform_0(%arg0: i32, %arg1: i32) -> (i32, i32, i32) {
    %c0_i32 = arith.constant 0 : i32
    %c0_i32_0 = arith.constant 0 : i32
    return %arg0, %arg1, %c0_i32 : i32, i32, i32
  }
  func.func @transform_1(%arg0: i32, %arg1: i32) -> (i32, i32, i32) {
    %c0_i32 = arith.constant 0 : i32
    %c0_i32_0 = arith.constant 0 : i32
    %c0_i32_1 = arith.constant 0 : i32
    return %arg0, %c0_i32, %c0_i32_0 : i32, i32, i32
  }
  func.func @transform_2(%arg0: i32, %arg1: i32) -> (i32, i32, i32) {
    %c0_i32 = arith.constant 0 : i32
    %c0_i32_0 = arith.constant 0 : i32
    %c0_i32_1 = arith.constant 0 : i32
    return %arg0, %c0_i32, %c0_i32_0 : i32, i32, i32
  }
  func.func @transform_3(%arg0: i32, %arg1: i32) -> (i32, i32, i32) {
    %c0_i32 = arith.constant 0 : i32
    %c0_i32_0 = arith.constant 0 : i32
    return %arg0, %arg1, %c0_i32 : i32, i32, i32
  }
}

</mosaic_0001>

<bundles_post_ra>
// kernel: mul.42
= control target key start
LH: loop header
LB: loop body
LE: loop exit
PB: predicated region body
PF: predicated region fallthrough
CT: control target
= control target key end

     0   :  { %s28_s0 = inlined_call_operand.vmem [shape: f32[4,4], index: 0, kind: input, shape index: {}]   ;;  %s29_s1 = inlined_call_operand.vmem [shape: f32[2,4,4], index: 1, kind: output, shape index: {}]  }
   0x1   :  { %v4_v0 = vld [vmem:[%s28_s0] sm:$0xf] }
   0x2   :  { %5 = vst [vmem:[%s29_s1] sm:$0xf] %v4_v0  ;;  %8 = vst [vmem:[%s29_s1 + $0x4] sm:$0xf] %v4_v0 }

// kernel: _lambda_.14
= control target key start
LH: loop header
LB: loop body
LE: loop exit
PB: predicated region body
PF: predicated region fallthrough
CT: control target
= control target key end

     0   :  { %s4078_s24 = smov 0   ;;  %s5280_s0 = inlined_call_operand.vmem [shape: f32[128,64], index: 0, kind: input, shape index: {}]   ;;  %s5281_s1 = inlined_call_operand.vmem [shape: bf16[64,2048], index: 1, kind: input, shape index: {}]   ;;  %s5282_s2 = inlined_call_operand.vmem [shape: f32[1,2048], index: 2, kind: input, shape index: {}]   ;;  %s5283_s3 = inlined_call_operand.vmem [shape: bf16[2048,64], index: 3, kind: input, shape index: {}]   ;;  %s5284_s4 = inlined_call_operand.vmem [shape: f32[1,64], index: 4, kind: input, shape index: {}]   ;;  %s5285_s5 = inlined_call_operand.vmem [shape: f32[1,64], index: 5, kind: input, shape index: {}]   ;;  %s5286_s6 = inlined_call_operand.vmem [shape: f32[1,64], index: 6, kind: input, shape index: {}]   ;;  %s5287_s7 = inlined_call_operand.vmem [shape: f32[128,64], index: 7, kind: output, shape index: {}]  }
   0x1 LB: > { %s3310_s25 = sadd.s32 4294967295, %s4035_s24   ;;  %p3314_p0 = scmp.ge.s32.totalorder %s4035_s24, 1  ;;  %s4035_s24 = sphi %s4078_s24, %s17_s24  }
   0x2   : > { %p238_p1 = scmp.lt.s32.totalorder %s4035_s24, 3 }
   0x4   : > { %p239_p2 = pnand %p3314_p0, %p238_p1 }
   0x6   : > { %242 = sbr.rel (%p239_p2) target bundleno = 873 (0x369), region = 48 }
   0xb   : > { %v343_v0 = vld [vmem:[%s5281_s1 + $0x180] sm:$0xff]  ;;  %v344_v2 = vld [vmem:[%s5281_s1 + $0x188] sm:$0xff]  ;;  %s3315_s9 = sshll.u32 %s3310_s25, 3  ;;  %v4037_v8 = vmov 0   ;;  %v345_v31 = vld [vmem:[%s5281_s1 + $0x190] sm:$0xff]  ;;  %vm763_vm0 = vcmask 523264  }
   0xc   : > { %v351_v1 = vld [vmem:[%s5281_s1 + $0x1c0] sm:$0xff]  ;;  %v352_v4 = vld [vmem:[%s5281_s1 + $0x1c8] sm:$0xff]  ;;  %808 = vmatprep.mubr.bf16.mxu0 %v4037_v8  ;;  %881 = vmatprep.mubr.bf16.mxu1 %v4037_v8  ;;  %p271_p3 = scmp.lt.s32.totalorder %s3315_s9, 15  ;;  %v353_v32 = vld [vmem:[%s5281_s1 + $0x1d0] sm:$0xff] }
   0xd   : > { %v3368_v3 = vcombine.high %v343_v0, %v351_v1  ;;  %v3367_v5 = vcombine.low %v343_v0, %v351_v1  ;;  %v327_v6 = vld [vmem:[%s5281_s1 + $0x100] sm:$0xff]  ;;  %v3370_v9 = vcombine.high %v344_v2, %v352_v4  ;;  %v3369_v10 = vcombine.low %v344_v2, %v352_v4  ;;  %v328_v12 = vld [vmem:[%s5281_s1 + $0x108] sm:$0xff]  ;;  %v346_v33 = vld [vmem:[%s5281_s1 + $0x198] sm:$0xff] }
   0xe   : > { %v335_v7 = vld [vmem:[%s5281_s1 + $0x140] sm:$0xff]  ;;  %v336_v13 = vld [vmem:[%s5281_s1 + $0x148] sm:$0xff]  ;;  %s5317_s9 = smov (!%p271_p3, %s3315_s9), 15  ;;  %v354_v34 = vld [vmem:[%s5281_s1 + $0x1d8] sm:$0xff]  ;;  %v3372_v39 = vcombine.high %v345_v31, %v353_v32  ;;  %v3371_v44 = vcombine.low %v345_v31, %v353_v32 }
   0xf   : > { %v3352_v11 = vcombine.high %v327_v6, %v335_v7  ;;  %v311_v14 = vld [vmem:[%s5281_s1 + $0x80] sm:$0xff]  ;;  %784 = vmatprep.subr.bf16.mxu0 %v3368_v3  ;;  %v3354_v15 = vcombine.high %v328_v12, %v336_v13  ;;  %v312_v17 = vld [vmem:[%s5281_s1 + $0x88] sm:$0xff]  ;;  %857 = vmatprep.subr.bf16.mxu1 %v3370_v9  ;;  %v3351_v19 = vcombine.low %v327_v6, %v335_v7  ;;  %s3316_s11 = sshll.u32 %s5317_s9, 3  ;;  %v329_v42 = vld [vmem:[%s5281_s1 + $0x110] sm:$0xff] }
  0x10   : > { %v319_v16 = vld [vmem:[%s5281_s1 + $0xc0] sm:$0xff]  ;;  %v320_v18 = vld [vmem:[%s5281_s1 + $0xc8] sm:$0xff]  ;;  %785 = vmatpush1.bf16.msra.mxu0 %v3367_v5  ;;  %858 = vmatpush1.bf16.msra.mxu1 %v3369_v10  ;;  %v3353_v20 = vcombine.low %v328_v12, %v336_v13  ;;  %s4144_s18 = scalar_lea.vmem %s5280_s0, %s3316_s11  ;;  %v3374_v40 = vcombine.high %v346_v33, %v354_v34  ;;  %v337_v43 = vld [vmem:[%s5281_s1 + $0x150] sm:$0xff]  ;;  %v3373_v47 = vcombine.low %v346_v33, %v354_v34  ;;  %s5252_s21 = scalar_lea.vmem %s5287_s7, %s3316_s11 }
  0x11   : > { %786 = vmatprep.subr.bf16.mxu0 %v3352_v11  ;;  %v3336_v21 = vcombine.high %v311_v14, %v319_v16  ;;  %859 = vmatprep.subr.bf16.mxu1 %v3354_v15  ;;  %v3338_v22 = vcombine.high %v312_v17, %v320_v18  ;;  %v295_v23 = vld [vmem:[%s5281_s1] sm:$0xff]  ;;  %v296_v25 = vld [vmem:[%s5281_s1 + $0x8] sm:$0xff]  ;;  %v3335_v27 = vcombine.low %v311_v14, %v319_v16  ;;  %v330_v45 = vld [vmem:[%s5281_s1 + $0x118] sm:$0xff] }
  0x12   : > { %v303_v24 = vld [vmem:[%s5281_s1 + $0x40] sm:$0xff]  ;;  %v304_v26 = vld [vmem:[%s5281_s1 + $0x48] sm:$0xff]  ;;  %v3337_v28 = vcombine.low %v312_v17, %v320_v18  ;;  %v338_v46 = vld [vmem:[%s5281_s1 + $0x158] sm:$0xff]  ;;  %v3356_v48 = vcombine.high %v329_v42, %v337_v43  ;;  %v3355_v56 = vcombine.low %v329_v42, %v337_v43 }
  0x13   : > { %v3320_v29 = vcombine.high %v295_v23, %v303_v24  ;;  %v3322_v30 = vcombine.high %v296_v25, %v304_v26  ;;  %v3319_v35 = vcombine.low %v295_v23, %v303_v24  ;;  %v283_v36 = vld [vmem:[%s4144_s18] sm:$0xff]  ;;  %v284_v37 = vld [vmem:[%s4144_s18 + $0x8] sm:$0xff]  ;;  %v3321_v38 = vcombine.low %v296_v25, %v304_v26  ;;  %v313_v49 = vld [vmem:[%s5281_s1 + $0x90] sm:$0xff] }
  0x14   : > { %787 = vmatpush1.bf16.msra.mxu0 %v3351_v19  ;;  %860 = vmatpush1.bf16.msra.mxu1 %v3353_v20  ;;  %v4160_v41 = vpack.c.bf16 %v284_v37, %v283_v36  ;;  %v321_v50 = vld [vmem:[%s5281_s1 + $0xd0] sm:$0xff]  ;;  %v3358_v51 = vcombine.high %v330_v45, %v338_v46  ;;  %v314_v52 = vld [vmem:[%s5281_s1 + $0x98] sm:$0xff]  ;;  %v3357_v57 = vcombine.low %v330_v45, %v338_v46  ;;  %v347_v2 = vld [vmem:[%s5281_s1 + $0x1a0] sm:$0xff] }
  0x15   : > { %788 = vmatprep.subr.bf16.mxu0 %v3336_v21  ;;  %861 = vmatprep.subr.bf16.mxu1 %v3338_v22  ;;  %v322_v53 = vld [vmem:[%s5281_s1 + $0xd8] sm:$0xff]  ;;  %v285_v54 = vld [vmem:[%s4144_s18 + $0x10] sm:$0xff]  ;;  %v3340_v58 = vcombine.high %v313_v49, %v321_v50  ;;  %v3339_v1 = vcombine.low %v313_v49, %v321_v50  ;;  %v287_v3 = vld [vmem:[%s4144_s18 + $0x20] sm:$0xff] }
  0x16   : > { %v286_v55 = vld [vmem:[%s4144_s18 + $0x18] sm:$0xff]  ;;  %v3342_v59 = vcombine.high %v314_v52, %v322_v53  ;;  %v297_v61 = vld [vmem:[%s5281_s1 + $0x10] sm:$0xff]  ;;  %v288_v4 = vld [vmem:[%s4144_s18 + $0x28] sm:$0xff]  ;;  %v3341_v5 = vcombine.low %v314_v52, %v322_v53 }
  0x17   : > { %v4194_v60 = vpack.c.bf16 %v286_v55, %v285_v54  ;;  %v305_v62 = vld [vmem:[%s5281_s1 + $0x50] sm:$0xff]  ;;  %v298_v63 = vld [vmem:[%s5281_s1 + $0x18] sm:$0xff]  ;;  %v355_v7 = vld [vmem:[%s5281_s1 + $0x1e0] sm:$0xff]  ;;  %v4228_v15 = vpack.c.bf16 %v288_v4, %v287_v3 }
  0x18   : > { %789 = vmatpush1.bf16.msra.mxu0 %v3335_v27  ;;  %862 = vmatpush1.bf16.msra.mxu1 %v3337_v28  ;;  %v306_v0 = vld [vmem:[%s5281_s1 + $0x58] sm:$0xff]  ;;  %v3324_v6 = vcombine.high %v297_v61, %v305_v62  ;;  %v348_v10 = vld [vmem:[%s5281_s1 + $0x1a8] sm:$0xff]  ;;  %v3323_v12 = vcombine.low %v297_v61, %v305_v62  ;;  %v3376_v14 = vcombine.high %v347_v2, %v355_v7  ;;  %v289_v17 = vld [vmem:[%s4144_s18 + $0x30] sm:$0xff] }
  0x19   : > { %790 = vmatprep.subr.bf16.mxu0 %v3320_v29  ;;  %863 = vmatprep.subr.bf16.mxu1 %v3322_v30  ;;  %v3326_v9 = vcombine.high %v298_v63, %v306_v0  ;;  %v356_v11 = vld [vmem:[%s5281_s1 + $0x1e8] sm:$0xff]  ;;  %v3325_v13 = vcombine.low %v298_v63, %v306_v0  ;;  %v290_v18 = vld [vmem:[%s4144_s18 + $0x38] sm:$0xff]  ;;  %v331_v20 = vld [vmem:[%s5281_s1 + $0x120] sm:$0xff]  ;;  %v3375_v24 = vcombine.low %v347_v2, %v355_v7 }
  0x1a   : > { %v3378_v16 = vcombine.high %v348_v10, %v356_v11  ;;  %v4238_v19 = vpack.c.bf16 %v290_v18, %v289_v17  ;;  %v339_v21 = vld [vmem:[%s5281_s1 + $0x160] sm:$0xff]  ;;  %v332_v22 = vld [vmem:[%s5281_s1 + $0x128] sm:$0xff]  ;;  %v3377_v27 = vcombine.low %v348_v10, %v356_v11  ;;  %v349_v42 = vld [vmem:[%s5281_s1 + $0x1b0] sm:$0xff] }
  0x1b   : > { %v340_v23 = vld [vmem:[%s5281_s1 + $0x168] sm:$0xff]  ;;  %v315_v25 = vld [vmem:[%s5281_s1 + $0xa0] sm:$0xff]  ;;  %v3360_v30 = vcombine.high %v331_v20, %v339_v21  ;;  %v3359_v32 = vcombine.low %v331_v20, %v339_v21  ;;  %v357_v43 = vld [vmem:[%s5281_s1 + $0x1f0] sm:$0xff] }
  0x1c   : > { %791 = vmatpush1.bf16.msra.mxu0 %v3319_v35  ;;  %864 = vmatpush1.bf16.msra.mxu1 %v3321_v38  ;;  %v323_v26 = vld [vmem:[%s5281_s1 + $0xe0] sm:$0xff]  ;;  %v316_v28 = vld [vmem:[%s5281_s1 + $0xa8] sm:$0xff]  ;;  %v3362_v31 = vcombine.high %v332_v22, %v340_v23  ;;  %v3361_v33 = vcombine.low %v332_v22, %v340_v23  ;;  %v350_v46 = vld [vmem:[%s5281_s1 + $0x1b8] sm:$0xff] }
  0x1d   : > { %930 = vmatprep.subr.bf16.mxu0 %v3372_v39  ;;  %1003 = vmatprep.subr.bf16.mxu1 %v3374_v40  ;;  %v324_v29 = vld [vmem:[%s5281_s1 + $0xe8] sm:$0xff]  ;;  %v3344_v34 = vcombine.high %v315_v25, %v323_v26  ;;  %v299_v35 = vld [vmem:[%s5281_s1 + $0x20] sm:$0xff]  ;;  %v3343_v40 = vcombine.low %v315_v25, %v323_v26  ;;  %v333_v53 = vld [vmem:[%s5281_s1 + $0x130] sm:$0xff] }
  0x1e   : > { %v307_v36 = vld [vmem:[%s5281_s1 + $0x60] sm:$0xff]  ;;  %v3346_v37 = vcombine.high %v316_v28, %v324_v29  ;;  %v300_v38 = vld [vmem:[%s5281_s1 + $0x28] sm:$0xff]  ;;  %v341_v54 = vld [vmem:[%s5281_s1 + $0x170] sm:$0xff] }
  0x1f   : > { %3383 = vmatmul.mubr.msk.bf16.vlgmr.msra.gmra.mxu0 %vm763_vm0, %v4160_v41  ;;  %3387 = vmatmul.mubr.msk.bf16.vlgmr.msra.gmra.mxu1 %vm763_vm0, %v4160_v41  ;;  %v308_v39 = vld [vmem:[%s5281_s1 + $0x68] sm:$0xff]  ;;  %v3328_v45 = vcombine.high %v299_v35, %v307_v36  ;;  %v3327_v49 = vcombine.low %v299_v35, %v307_v36  ;;  %v334_v55 = vld [vmem:[%s5281_s1 + $0x138] sm:$0xff]  ;;  %v3364_v62 = vcombine.high %v333_v53, %v341_v54  ;;  %v3881_v23 = vld [vmem:[%s5283_s3 + $0x70] sm:$0xff]  }
  0x20   : > { %931 = vmatpush1.bf16.msra.mxu0 %v3371_v44  ;;  %1004 = vmatpush1.bf16.msra.mxu1 %v3373_v47  ;;  %v3345_v44 = vcombine.low %v316_v28, %v324_v29  ;;  %v358_v47 = vld [vmem:[%s5281_s1 + $0x1f8] sm:$0xff]  ;;  %v3329_v50 = vcombine.low %v300_v38, %v308_v39  ;;  %v3363_v2 = vcombine.low %v333_v53, %v341_v54  ;;  %v3883_v25 = vld [vmem:[%s5283_s3 + $0x30] sm:$0xff]   ;;  %v3887_v28 = vld [vmem:[%s5283_s3 + $0x28] sm:$0xff]  }
  0x21   : > { %818 = vmatprep.mubr.bf16.mxu0 %v4037_v8  ;;  %891 = vmatprep.mubr.bf16.mxu1 %v4037_v8  ;;  %v3382_v52 = vcombine.high %v350_v46, %v358_v47  ;;  %v3381_v61 = vcombine.low %v350_v46, %v358_v47  ;;  %v318_v0 = vld [vmem:[%s5281_s1 + $0xb8] sm:$0xff]  ;;  %v3884_v26 = vld [vmem:[%s5283_s3 + $0xb0] sm:$0xff]   ;;  %v3888_v29 = vld [vmem:[%s5283_s3 + $0xa8] sm:$0xff]  }
  0x22   : > { %932 = vmatprep.subr.bf16.mxu0 %v3356_v48  ;;  %1005 = vmatprep.subr.bf16.mxu1 %v3358_v51  ;;  %v3330_v48 = vcombine.high %v300_v38, %v308_v39  ;;  %v3380_v51 = vcombine.high %v349_v42, %v357_v43  ;;  %v310_v10 = vld [vmem:[%s5281_s1 + $0x78] sm:$0xff]  ;;  %v3898_v38 = vld [vmem:[%s5283_s3 + $0xd0] sm:$0xff]   ;;  %v3907_v46 = vld [vmem:[%s5283_s3] sm:$0xff]  }
  0x23   : > { %v3877_v17 = vld [vmem:[%s5283_s3 + $0x78] sm:$0xff]   ;;  %v3899_v39 = vld [vmem:[%s5283_s3 + $0x10] sm:$0xff]   ;;  %v3908_v47 = vld [vmem:[%s5283_s3 + $0x80] sm:$0xff]  }
  0x24   : > { %933 = vmatpush1.bf16.msra.mxu0 %v3355_v56  ;;  %1006 = vmatpush1.bf16.msra.mxu1 %v3357_v57  ;;  %v342_v56 = vld [vmem:[%s5281_s1 + $0x178] sm:$0xff]  ;;  %v3379_v57 = vcombine.low %v349_v42, %v357_v43  ;;  %v3901_v42 = vld [vmem:[%s5283_s3 + $0x48] sm:$0xff]   ;;  %v4510_v54 = vld [vmem:[%s5282_s2] sm:$0xff] }
  0x25   : > { %934 = vmatprep.subr.bf16.mxu0 %v3340_v58  ;;  %1007 = vmatprep.subr.bf16.mxu1 %v3342_v59  ;;  %v317_v58 = vld [vmem:[%s5281_s1 + $0xb0] sm:$0xff]  ;;  %v3366_v63 = vcombine.high %v334_v55, %v342_v56  ;;  %v3365_v3 = vcombine.low %v334_v55, %v342_v56  ;;  %v3878_v18 = vld [vmem:[%s5283_s3 + $0xf8] sm:$0xff]   ;;  %v3904_v43 = vld [vmem:[%s5283_s3 + $0x88] sm:$0xff]  }
  0x26   : > { %v325_v59 = vld [vmem:[%s5281_s1 + $0xf0] sm:$0xff]  ;;  %v3879_v21 = vld [vmem:[%s5283_s3 + $0x38] sm:$0xff]  }
  0x27   : > { %3384 = vmatmul.mubr.msk.bf16.gmra.mxu0 %vm763_vm0, %v4194_v60  ;;  %3388 = vmatmul.mubr.msk.bf16.gmra.mxu1 %vm763_vm0, %v4194_v60  ;;  %v3348_v4 = vcombine.high %v317_v58, %v325_v59  ;;  %v3347_v11 = vcombine.low %v317_v58, %v325_v59  ;;  %v3880_v22 = vld [vmem:[%s5283_s3 + $0xb8] sm:$0xff]  }
  0x28   : > { %828 = vmatprep.mubr.bf16.mxu0 %v4037_v8  ;;  %901 = vmatprep.mubr.bf16.mxu1 %v4037_v8  ;;  %v3895_v35 = vld [vmem:[%s5283_s3 + $0x18] sm:$0xff]  }
  0x29   : > { %935 = vmatpush1.bf16.msra.mxu0 %v3339_v1  ;;  %1008 = vmatpush1.bf16.msra.mxu1 %v3341_v5  ;;  %v326_v1 = vld [vmem:[%s5281_s1 + $0xf8] sm:$0xff]  ;;  %v301_v5 = vld [vmem:[%s5281_s1 + $0x30] sm:$0xff] }
  0x2a   : > { %936 = vmatprep.subr.bf16.mxu0 %v3324_v6  ;;  %1009 = vmatprep.subr.bf16.mxu1 %v3326_v9  ;;  %v309_v6 = vld [vmem:[%s5281_s1 + $0x70] sm:$0xff]  ;;  %v3350_v7 = vcombine.high %v318_v0, %v326_v1  ;;  %v302_v9 = vld [vmem:[%s5281_s1 + $0x38] sm:$0xff] }
  0x2b   : > { %v3333_v20 = vcombine.low %v302_v9, %v310_v10  ;;  %v3896_v36 = vld [vmem:[%s5283_s3 + $0x98] sm:$0xff]  }
  0x2d   : > { %937 = vmatpush1.bf16.msra.mxu0 %v3323_v12  ;;  %1010 = vmatpush1.bf16.msra.mxu1 %v3325_v13  ;;  %v3349_v12 = vcombine.low %v318_v0, %v326_v1  ;;  %v3332_v13 = vcombine.high %v301_v5, %v309_v6 }
  0x2e   : > { %1076 = vmatprep.subr.bf16.mxu0 %v3376_v14  ;;  %1149 = vmatprep.subr.bf16.mxu1 %v3378_v16  ;;  %v3334_v14 = vcombine.high %v302_v9, %v310_v10  ;;  %v3331_v16 = vcombine.low %v301_v5, %v309_v6 }
  0x2f   : > { %3385 = vmatmul.mubr.msk.bf16.gmra.mxu0 %vm763_vm0, %v4228_v15  ;;  %3389 = vmatmul.mubr.msk.bf16.gmra.mxu1 %vm763_vm0, %v4228_v15 }
  0x30   : > { %838 = vmatprep.mubr.bf16.mxu0 %v4037_v8  ;;  %911 = vmatprep.mubr.bf16.mxu1 %v4037_v8 }
  0x37   : > { %3386 = vmatmul.mubr.msk.bf16.gmra.mxu0 %vm763_vm0, %v4238_v19  ;;  %3390 = vmatmul.mubr.msk.bf16.gmra.mxu1 %vm763_vm0, %v4238_v19 }
  0x38   : > { %954 = vmatprep.mubr.bf16.mxu0 %v4037_v8  ;;  %1027 = vmatprep.mubr.bf16.mxu1 %v4037_v8 }
  0x3f   : > { %3391 = vmatmul.mubr.msk.bf16.vlgmr.msra.gmra.mxu0 %vm763_vm0, %v4160_v41  ;;  %3395 = vmatmul.mubr.msk.bf16.vlgmr.msra.gmra.mxu1 %vm763_vm0, %v4160_v41 }
  0x40   : > { %1077 = vmatpush1.bf16.msra.mxu0 %v3375_v24  ;;  %1150 = vmatpush1.bf16.msra.mxu1 %v3377_v27  ;;  %v3882_v24 = vld [vmem:[%s5283_s3 + $0xf0] sm:$0xff]   ;;  %v3885_v27 = vld [vmem:[%s5283_s3 + $0x68] sm:$0xff]  }
  0x41   : > { %964 = vmatprep.mubr.bf16.mxu0 %v4037_v8  ;;  %1037 = vmatprep.mubr.bf16.mxu1 %v4037_v8 }
  0x42   : > { %1078 = vmatprep.subr.bf16.mxu0 %v3360_v30  ;;  %1151 = vmatprep.subr.bf16.mxu1 %v3362_v31  ;;  %v3889_v30 = vld [vmem:[%s5283_s3 + $0x60] sm:$0xff]  }
  0x43   : > { %v3890_v31 = vld [vmem:[%s5283_s3 + $0xe0] sm:$0xff]  }
  0x44   : > { %1079 = vmatpush1.bf16.msra.mxu0 %v3359_v32  ;;  %1152 = vmatpush1.bf16.msra.mxu1 %v3361_v33  ;;  %v3891_v32 = vld [vmem:[%s5283_s3 + $0x20] sm:$0xff]  }
  0x45   : > { %1080 = vmatprep.subr.bf16.mxu0 %v3344_v34  ;;  %1153 = vmatprep.subr.bf16.mxu1 %v3346_v37  ;;  %v3892_v33 = vld [vmem:[%s5283_s3 + $0xa0] sm:$0xff]   ;;  %v3893_v34 = vld [vmem:[%s5283_s3 + $0x58] sm:$0xff]   ;;  %v3897_v37 = vld [vmem:[%s5283_s3 + $0x50] sm:$0xff]  }
  0x47   : > { %3392 = vmatmul.mubr.msk.bf16.gmra.mxu0 %vm763_vm0, %v4194_v60  ;;  %3396 = vmatmul.mubr.msk.bf16.gmra.mxu1 %vm763_vm0, %v4194_v60 }
  0x48   : > { %974 = vmatprep.mubr.bf16.mxu0 %v4037_v8  ;;  %1047 = vmatprep.mubr.bf16.mxu1 %v4037_v8 }
  0x49   : > { %1081 = vmatpush1.bf16.msra.mxu0 %v3343_v40  ;;  %1154 = vmatpush1.bf16.msra.mxu1 %v3345_v44  ;;  %v3900_v40 = vld [vmem:[%s5283_s3 + $0x90] sm:$0xff]   ;;  %v3905_v44 = vld [vmem:[%s5283_s3 + $0x40] sm:$0xff]  }
  0x4a   : > { %1082 = vmatprep.subr.bf16.mxu0 %v3328_v45  ;;  %1155 = vmatprep.subr.bf16.mxu1 %v3330_v48  ;;  %v3906_v45 = vld [vmem:[%s5283_s3 + $0xc0] sm:$0xff]   ;;  %v3909_v48 = vld [vmem:[%s5283_s3 + $0x178] sm:$0xff]  }
  0x4d   : > { %1083 = vmatpush1.bf16.msra.mxu0 %v3327_v49  ;;  %1156 = vmatpush1.bf16.msra.mxu1 %v3329_v50  ;;  %v363_v49 = vlaneseq }
  0x4e   : > { %1222 = vmatprep.subr.bf16.mxu0 %v3380_v51  ;;  %1295 = vmatprep.subr.bf16.mxu1 %v3382_v52 }
  0x4f   : > { %3393 = vmatmul.mubr.msk.bf16.gmra.mxu0 %vm763_vm0, %v4228_v15  ;;  %3397 = vmatmul.mubr.msk.bf16.gmra.mxu1 %vm763_vm0, %v4228_v15  ;;  %v4502_v50 = vshrl.u32 %v363_v49, 7 }
  0x50   : > { %984 = vmatprep.mubr.bf16.mxu0 %v4037_v8  ;;  %1057 = vmatprep.mubr.bf16.mxu1 %v4037_v8 }
  0x51   : > { %v369_v51 = vsub.s32 1, %v4502_v50  ;;  %v365_v52 = vsub.s32 0, %v4502_v50  ;;  %v377_v53 = vsub.s32 3, %v4502_v50  ;;  %v373_v55 = vsub.s32 2, %v4502_v50 }
  0x53   : > { %v4516_v58 = vrot.slane %v4510_v54, %v369_v51  ;;  %v4521_v59 = vrot.slane %v4510_v54, %v365_v52 }
  0x57   : > { %3394 = vmatmul.mubr.msk.bf16.gmra.mxu0 %vm763_vm0, %v4238_v19  ;;  %3398 = vmatmul.mubr.msk.bf16.gmra.mxu1 %vm763_vm0, %v4238_v19 }
  0x58   : > { %1100 = vmatprep.mubr.bf16.mxu0 %v4037_v8  ;;  %1173 = vmatprep.mubr.bf16.mxu1 %v4037_v8 }
  0x5f   : > { %3399 = vmatmul.mubr.msk.bf16.vlgmr.msra.gmra.mxu0 %vm763_vm0, %v4160_v41  ;;  %3403 = vmatmul.mubr.msk.bf16.vlgmr.msra.gmra.mxu1 %vm763_vm0, %v4160_v41 }
  0x60   : > { %1223 = vmatpush1.bf16.msra.mxu0 %v3379_v57  ;;  %1296 = vmatpush1.bf16.msra.mxu1 %v3381_v61 }
  0x61   : > { %1110 = vmatprep.mubr.bf16.mxu0 %v4037_v8  ;;  %1183 = vmatprep.mubr.bf16.mxu1 %v4037_v8 }
  0x62   : > { %1224 = vmatprep.subr.bf16.mxu0 %v3364_v62  ;;  %1297 = vmatprep.subr.bf16.mxu1 %v3366_v63  ;;  %v4526_v62 = vrot.slane %v4510_v54, %v377_v53  ;;  %v4531_v63 = vrot.slane %v4510_v54, %v373_v55 }
  0x64   : > { %1225 = vmatpush1.bf16.msra.mxu0 %v3363_v2  ;;  %1298 = vmatpush1.bf16.msra.mxu1 %v3365_v3 }
  0x65   : > { %1226 = vmatprep.subr.bf16.mxu0 %v3348_v4  ;;  %1299 = vmatprep.subr.bf16.mxu1 %v3350_v7 }
  0x67   : > { %3400 = vmatmul.mubr.msk.bf16.gmra.mxu0 %vm763_vm0, %v4194_v60  ;;  %3404 = vmatmul.mubr.msk.bf16.gmra.mxu1 %vm763_vm0, %v4194_v60 }
  0x68   : > { %1120 = vmatprep.mubr.bf16.mxu0 %v4037_v8  ;;  %1193 = vmatprep.mubr.bf16.mxu1 %v4037_v8 }
  0x69   : > { %1227 = vmatpush1.bf16.msra.mxu0 %v3347_v11  ;;  %1300 = vmatpush1.bf16.msra.mxu1 %v3349_v12 }
  0x6a   : > { %1228 = vmatprep.subr.bf16.mxu0 %v3332_v13  ;;  %1301 = vmatprep.subr.bf16.mxu1 %v3334_v14 }
  0x6d   : > { %1229 = vmatpush1.bf16.msra.mxu0 %v3331_v16  ;;  %1302 = vmatpush1.bf16.msra.mxu1 %v3333_v20 }
  0x6e   : > { %3548 = vmatprep.subr.bf16.mxu0 %v3877_v17  ;;  %3588 = vmatprep.subr.bf16.mxu1 %v3878_v18 }
  0x6f   : > { %3401 = vmatmul.mubr.msk.bf16.gmra.mxu0 %vm763_vm0, %v4228_v15  ;;  %3405 = vmatmul.mubr.msk.bf16.gmra.mxu1 %vm763_vm0, %v4228_v15 }
  0x70   : > { %1130 = vmatprep.mubr.bf16.mxu0 %v4037_v8  ;;  %1203 = vmatprep.mubr.bf16.mxu1 %v4037_v8 }
  0x77   : > { %3402 = vmatmul.mubr.msk.bf16.gmra.mxu0 %vm763_vm0, %v4238_v19  ;;  %3406 = vmatmul.mubr.msk.bf16.gmra.mxu1 %vm763_vm0, %v4238_v19 }
  0x78   : > { %1246 = vmatprep.mubr.bf16.mxu0 %v4037_v8  ;;  %1319 = vmatprep.mubr.bf16.mxu1 %v4037_v8 }
  0x7f   : > { %3407 = vmatmul.mubr.msk.bf16.vlgmr.msra.gmra.mxu0 %vm763_vm0, %v4160_v41  ;;  %3411 = vmatmul.mubr.msk.bf16.vlgmr.msra.gmra.mxu1 %vm763_vm0, %v4160_v41  ;;  %v3886_v41 = vld [vmem:[%s5283_s3 + $0xe8] sm:$0xff]  }
  0x80   : > { %1256 = vmatprep.mubr.bf16.mxu0 %v4037_v8  ;;  %1329 = vmatprep.mubr.bf16.mxu1 %v4037_v8 }
  0x81   : > { %3549 = vmatpush3.bf16.msra.mxu0 %v3879_v21  ;;  %3589 = vmatpush3.bf16.msra.mxu1 %v3880_v22 }
  0x82   : > { %3550 = vmatprep.subr.bf16.mxu0 %v3881_v23  ;;  %3590 = vmatprep.subr.bf16.mxu1 %v3882_v24 }
  0x85   : > { %3551 = vmatpush3.bf16.msra.mxu0 %v3883_v25  ;;  %3591 = vmatpush3.bf16.msra.mxu1 %v3884_v26 }
  0x86   : > { %3552 = vmatprep.subr.bf16.mxu0 %v3885_v27  ;;  %3592 = vmatprep.subr.bf16.mxu1 %v3886_v41 }
  0x87   : > { %3408 = vmatmul.mubr.msk.bf16.gmra.mxu0 %vm763_vm0, %v4194_v60  ;;  %3412 = vmatmul.mubr.msk.bf16.gmra.mxu1 %vm763_vm0, %v4194_v60  ;;  %v3894_v60 = vld [vmem:[%s5283_s3 + $0xd8] sm:$0xff]  }
  0x88   : > { %1266 = vmatprep.mubr.bf16.mxu0 %v4037_v8  ;;  %1339 = vmatprep.mubr.bf16.mxu1 %v4037_v8 }
  0x89   : > { %3553 = vmatpush3.bf16.msra.mxu0 %v3887_v28  ;;  %3593 = vmatpush3.bf16.msra.mxu1 %v3888_v29  ;;  %v3911_v28 = vld [vmem:[%s5283_s3 + $0x138] sm:$0xff]  }
  0x8a   : > { %3554 = vmatprep.subr.bf16.mxu0 %v3889_v30  ;;  %3594 = vmatprep.subr.bf16.mxu1 %v3890_v31 }
  0x8d   : > { %3555 = vmatpush3.bf16.msra.mxu0 %v3891_v32  ;;  %3595 = vmatpush3.bf16.msra.mxu1 %v3892_v33  ;;  %v3912_v32 = vld [vmem:[%s5283_s3 + $0x1b8] sm:$0xff]   ;;  %v3913_v33 = vld [vmem:[%s5283_s3 + $0x170] sm:$0xff]  }
  0x8e   : > { %3556 = vmatprep.subr.bf16.mxu0 %v3893_v34  ;;  %3596 = vmatprep.subr.bf16.mxu1 %v3894_v60 }
  0x8f   : > { %3409 = vmatmul.mubr.msk.bf16.gmra.mxu0 %vm763_vm0, %v4228_v15  ;;  %3413 = vmatmul.mubr.msk.bf16.gmra.mxu1 %vm763_vm0, %v4228_v15  ;;  %v3902_v15 = vld [vmem:[%s5283_s3 + $0xc8] sm:$0xff]  }
  0x90   : > { %1276 = vmatprep.mubr.bf16.mxu0 %v4037_v8  ;;  %1349 = vmatprep.mubr.bf16.mxu1 %v4037_v8  ;;  %v3903_v8 = vld [vmem:[%s5283_s3 + $0x8] sm:$0xff]  }
  0x91   : > { %3557 = vmatpush3.bf16.msra.mxu0 %v3895_v35  ;;  %3597 = vmatpush3.bf16.msra.mxu1 %v3896_v36 }
  0x92   : > { %3558 = vmatprep.subr.bf16.mxu0 %v3897_v37  ;;  %3598 = vmatprep.subr.bf16.mxu1 %v3898_v38  ;;  %v3914_v37 = vld [vmem:[%s5283_s3 + $0x1f0] sm:$0xff]  }
  0x95   : > { %3559 = vmatpush3.bf16.msra.mxu0 %v3899_v39  ;;  %3599 = vmatpush3.bf16.msra.mxu1 %v3900_v40 }
  0x96   : > { %3560 = vmatprep.subr.bf16.mxu0 %v3901_v42  ;;  %3600 = vmatprep.subr.bf16.mxu1 %v3902_v15 }
  0x97   : > { %3410 = vmatmul.mubr.msk.bf16.gmra.mxu0 %vm763_vm0, %v4238_v19  ;;  %3414 = vmatmul.mubr.msk.bf16.gmra.mxu1 %vm763_vm0, %v4238_v19  ;;  %v3910_v19 = vld [vmem:[%s5283_s3 + $0x1f8] sm:$0xff]  }
  0x99   : > { %3561 = vmatpush3.bf16.msra.mxu0 %v3903_v8  ;;  %3601 = vmatpush3.bf16.msra.mxu1 %v3904_v43 }
  0x9a   : > { %3562 = vmatprep.subr.bf16.mxu0 %v3905_v44  ;;  %3602 = vmatprep.subr.bf16.mxu1 %v3906_v45  ;;  %v3915_v44 = vld [vmem:[%s5283_s3 + $0x130] sm:$0xff]  }
  0x9d   : > { %3563 = vmatpush3.bf16.msra.mxu0 %v3907_v46  ;;  %3603 = vmatpush3.bf16.msra.mxu1 %v3908_v47 }
  0x9e   : > { %3628 = vmatprep.subr.bf16.mxu0 %v3909_v48  ;;  %3668 = vmatprep.subr.bf16.mxu1 %v3910_v19  ;;  %v3916_v48 = vld [vmem:[%s5283_s3 + $0x1b0] sm:$0xff]   ;;  %v3917_v19 = vld [vmem:[%s5283_s3 + $0x168] sm:$0xff]  }
  0xdf   : > { %v810_v56 = vpop.f32.mrf.mxu0  ;;  %v883_v57 = vpop.f32.mrf.mxu1 }
  0xe0   : > { %v811_v5 = vadd.f32 %v810_v56, %v4521_v59  ;;  %v884_v10 = vadd.f32 %v883_v57, %v4531_v63 }
  0xe1   : > { %v812_v61 = vpop.f32.mrf.mxu0  ;;  %v885_v0 = vpop.f32.mrf.mxu1 }
  0xe2   : > { %v813_v2 = vadd.f32 %v812_v61, %v4516_v58  ;;  %v886_v6 = vadd.f32 %v885_v0, %v4526_v62  ;;  %v1360_v22 = vmax.f32 %v811_v5, 0.0  ;;  %v1362_v26 = vmax.f32 %v884_v10, 0.0  ;;  %v3918_v0 = vld [vmem:[%s5283_s3 + $0x1e8] sm:$0xff]  }
  0xe3   : > { %v814_v1 = vpop.f32.mrf.mxu0  ;;  %v887_v4 = vpop.f32.mrf.mxu1 }
  0xe4   : > { %v815_v3 = vadd.f32 %v814_v1, %v4521_v59  ;;  %v888_v7 = vadd.f32 %v887_v4, %v4531_v63  ;;  %v1361_v17 = vmax.f32 %v813_v2, 0.0  ;;  %v1363_v23 = vmax.f32 %v886_v6, 0.0 }
  0xe5   : > { %v816_v9 = vpop.f32.mrf.mxu0  ;;  %v889_v12 = vpop.f32.mrf.mxu1 }
  0xe6   : > { %v817_v11 = vadd.f32 %v816_v9, %v4516_v58  ;;  %v1376_v13 = vmax.f32 %v815_v3, 0.0  ;;  %v890_v14 = vadd.f32 %v889_v12, %v4526_v62  ;;  %v1378_v18 = vmax.f32 %v888_v7, 0.0  ;;  %v3919_v9 = vld [vmem:[%s5283_s3 + $0x128] sm:$0xff]  }
  0xe7   : > { %v820_v16 = vpop.f32.mrf.mxu0  ;;  %v893_v21 = vpop.f32.mrf.mxu1 }
  0xe8   : > { %v1377_v20 = vmax.f32 %v817_v11, 0.0  ;;  %v1379_v24 = vmax.f32 %v890_v14, 0.0  ;;  %v1488_v29 = vpack.c.bf16 %v1376_v13, %v1360_v22  ;;  %v1490_v34 = vpack.c.bf16 %v1378_v18, %v1362_v26  ;;  %v3920_v13 = vld [vmem:[%s5283_s3 + $0x1a8] sm:$0xff]   ;;  %v3921_v14 = vld [vmem:[%s5283_s3 + $0x160] sm:$0xff]  }
  0xe9   : > { %v822_v25 = vpop.f32.mrf.mxu0  ;;  %v895_v27 = vpop.f32.mrf.mxu1  ;;  %v821_v38 = vadd.f32 %v820_v16, %v4521_v59  ;;  %v894_v15 = vadd.f32 %v893_v21, %v4531_v63  ;;  %v3922_v21 = vld [vmem:[%s5283_s3 + $0x1e0] sm:$0xff]  }
  0xea   : > { %v1489_v41 = vpack.c.bf16 %v1377_v20, %v1361_v17  ;;  %v1491_v31 = vpack.c.bf16 %v1379_v24, %v1363_v23  ;;  %v823_v60 = vadd.f32 %v822_v25, %v4516_v58  ;;  %v896_v39 = vadd.f32 %v895_v27, %v4526_v62 }
  0xeb   : > { %v824_v30 = vpop.f32.mrf.mxu0  ;;  %v897_v36 = vpop.f32.mrf.mxu1  ;;  %v1392_v1 = vmax.f32 %v821_v38, 0.0  ;;  %v1394_v5 = vmax.f32 %v894_v15, 0.0 }
  0xec   : > { %v825_v35 = vadd.f32 %v824_v30, %v4521_v59  ;;  %2615 = vmatprep.mubr.bf16.mxu0 %v1489_v41  ;;  %v898_v40 = vadd.f32 %v897_v36, %v4531_v63  ;;  %2680 = vmatprep.mubr.bf16.mxu1 %v1491_v31  ;;  %v1393_v49 = vmax.f32 %v823_v60, 0.0  ;;  %v1395_v2 = vmax.f32 %v896_v39, 0.0 }
  0xed   : > { %v826_v42 = vpop.f32.mrf.mxu0  ;;  %2616 = vmatmul.mubr.bf16.vlgmr.msra.gmra.mxu0 %v1488_v29  ;;  %v899_v43 = vpop.f32.mrf.mxu1  ;;  %2681 = vmatmul.mubr.bf16.vlgmr.msra.gmra.mxu1 %v1490_v34 }
  0xee   : > { %v827_v8 = vadd.f32 %v826_v42, %v4516_v58  ;;  %3629 = vmatpush3.bf16.msra.mxu0 %v3911_v28  ;;  %v1408_v45 = vmax.f32 %v825_v35, 0.0  ;;  %v900_v46 = vadd.f32 %v899_v43, %v4526_v62  ;;  %3669 = vmatpush3.bf16.msra.mxu1 %v3912_v32  ;;  %v1410_v56 = vmax.f32 %v898_v40, 0.0  ;;  %v3923_v28 = vld [vmem:[%s5283_s3 + $0x120] sm:$0xff]  }
  0xef   : > { %v830_v47 = vpop.f32.mrf.mxu0  ;;  %3630 = vmatprep.subr.bf16.mxu0 %v3913_v33  ;;  %v903_v61 = vpop.f32.mrf.mxu1  ;;  %3670 = vmatprep.subr.bf16.mxu1 %v3914_v37  ;;  %v3924_v32 = vld [vmem:[%s5283_s3 + $0x1a0] sm:$0xff]   ;;  %v3925_v33 = vld [vmem:[%s5283_s3 + $0x158] sm:$0xff]  }
  0xf0   : > { %v1409_v57 = vmax.f32 %v827_v8, 0.0  ;;  %v1411_v3 = vmax.f32 %v900_v46, 0.0  ;;  %v1504_v10 = vpack.c.bf16 %v1408_v45, %v1392_v1  ;;  %v1506_v16 = vpack.c.bf16 %v1410_v56, %v1394_v5  ;;  %v3926_v37 = vld [vmem:[%s5283_s3 + $0x1d8] sm:$0xff]  }
  0xf1   : > { %v832_v4 = vpop.f32.mrf.mxu0  ;;  %v905_v6 = vpop.f32.mrf.mxu1  ;;  %v831_v22 = vadd.f32 %v830_v47, %v4521_v59  ;;  %v904_v26 = vadd.f32 %v903_v61, %v4531_v63  ;;  %v385_v1 = vsub.s32 5, %v4502_v50 }
  0xf2   : > { %3631 = vmatpush3.bf16.msra.mxu0 %v3915_v44  ;;  %v1505_v7 = vpack.c.bf16 %v1409_v57, %v1393_v49  ;;  %3671 = vmatpush3.bf16.msra.mxu1 %v3916_v48  ;;  %v1507_v12 = vpack.c.bf16 %v1411_v3, %v1395_v2  ;;  %v833_v17 = vadd.f32 %v832_v4, %v4516_v58  ;;  %v3927_v44 = vld [vmem:[%s5283_s3 + $0x118] sm:$0xff]   ;;  %v3929_v49 = vld [vmem:[%s5283_s3 + $0x150] sm:$0xff]  }
  0xf3   : > { %v834_v11 = vpop.f32.mrf.mxu0  ;;  %3632 = vmatprep.subr.bf16.mxu0 %v3917_v19  ;;  %v907_v20 = vpop.f32.mrf.mxu1  ;;  %3672 = vmatprep.subr.bf16.mxu1 %v3918_v0  ;;  %v906_v23 = vadd.f32 %v905_v6, %v4526_v62  ;;  %v1424_v38 = vmax.f32 %v831_v22, 0.0  ;;  %v1426_v15 = vmax.f32 %v904_v26, 0.0  ;;  %v3928_v48 = vld [vmem:[%s5283_s3 + $0x198] sm:$0xff]   ;;  %v381_v19 = vsub.s32 4, %v4502_v50  ;;  %v3930_v2 = vld [vmem:[%s5283_s3 + $0x1d0] sm:$0xff]  }
  0xf4   : > { %v835_v18 = vadd.f32 %v834_v11, %v4521_v59  ;;  %2623 = vmatprep.mubr.bf16.mxu0 %v1505_v7  ;;  %v908_v24 = vadd.f32 %v907_v20, %v4531_v63  ;;  %2688 = vmatprep.mubr.bf16.mxu1 %v1507_v12  ;;  %v1425_v34 = vmax.f32 %v833_v17, 0.0  ;;  %v393_v7 = vsub.s32 7, %v4502_v50  ;;  %v3933_v17 = vld [vmem:[%s5283_s3 + $0x148] sm:$0xff]  }
  0xf5   : > { %v836_v25 = vpop.f32.mrf.mxu0  ;;  %2624 = vmatmul.mubr.bf16.gmra.mxu0 %v1504_v10  ;;  %v909_v41 = vpop.f32.mrf.mxu1  ;;  %2689 = vmatmul.mubr.bf16.gmra.mxu1 %v1506_v16  ;;  %v1427_v39 = vmax.f32 %v906_v23, 0.0  ;;  %v389_v12 = vsub.s32 6, %v4502_v50  ;;  %v4635_v16 = vrot.slane %v4510_v54, %v381_v19  ;;  %v4646_v22 = vrot.slane %v4510_v54, %v385_v1  ;;  %v3934_v23 = vld [vmem:[%s5283_s3 + $0x1c8] sm:$0xff]   ;;  %v4001_v50 = vld [vmem:[%s5283_s3 + $0x340] sm:$0xff]  }
  0xf6   : > { %v837_v27 = vadd.f32 %v836_v25, %v4516_v58  ;;  %3633 = vmatpush3.bf16.msra.mxu0 %v3919_v9  ;;  %v1440_v29 = vmax.f32 %v835_v18, 0.0  ;;  %v910_v30 = vadd.f32 %v909_v41, %v4526_v62  ;;  %3673 = vmatpush3.bf16.msra.mxu1 %v3920_v13  ;;  %v1442_v60 = vmax.f32 %v908_v24, 0.0 }
  0xf7   : > { %v840_v31 = vpop.f32.mrf.mxu0  ;;  %3634 = vmatprep.subr.bf16.mxu0 %v3921_v14  ;;  %v913_v36 = vpop.f32.mrf.mxu1  ;;  %3674 = vmatprep.subr.bf16.mxu1 %v3922_v21  ;;  %v4654_v41 = vrot.slane %v4510_v54, %v393_v7 }
  0xf8   : > { %v1441_v35 = vmax.f32 %v837_v27, 0.0  ;;  %v1443_v40 = vmax.f32 %v910_v30, 0.0  ;;  %v1520_v45 = vpack.c.bf16 %v1440_v29, %v1424_v38  ;;  %v1522_v56 = vpack.c.bf16 %v1442_v60, %v1426_v15 }
  0xf9   : > { %v842_v42 = vpop.f32.mrf.mxu0  ;;  %v915_v8 = vpop.f32.mrf.mxu1  ;;  %v841_v3 = vadd.f32 %v840_v31, %v4521_v59  ;;  %v914_v9 = vadd.f32 %v913_v36, %v4531_v63  ;;  %v4659_v29 = vrot.slane %v4510_v54, %v389_v12  ;;  %v3937_v54 = vld [vmem:[%s5283_s3 + $0x140] sm:$0xff]  }
  0xfa   : > { %3635 = vmatpush3.bf16.msra.mxu0 %v3923_v28  ;;  %v1521_v43 = vpack.c.bf16 %v1441_v35, %v1425_v34  ;;  %3675 = vmatpush3.bf16.msra.mxu1 %v3924_v32  ;;  %v1523_v47 = vpack.c.bf16 %v1443_v40, %v1427_v39  ;;  %v843_v57 = vadd.f32 %v842_v42, %v4516_v58  ;;  %v3935_v32 = vld [vmem:[%s5283_s3 + $0x108] sm:$0xff]   ;;  %v3938_v40 = vld [vmem:[%s5283_s3 + $0x1c0] sm:$0xff]  }
  0xfb   : > { %v844_v46 = vpop.f32.mrf.mxu0  ;;  %3636 = vmatprep.subr.bf16.mxu0 %v3925_v33  ;;  %v917_v0 = vpop.f32.mrf.mxu1  ;;  %3676 = vmatprep.subr.bf16.mxu1 %v3926_v37  ;;  %v916_v4 = vadd.f32 %v915_v8, %v4526_v62  ;;  %v1456_v24 = vmax.f32 %v841_v3, 0.0  ;;  %v1458_v28 = vmax.f32 %v914_v9, 0.0  ;;  %v3936_v35 = vld [vmem:[%s5283_s3 + $0x188] sm:$0xff]  }
  0xfc   : > { %v845_v61 = vadd.f32 %v844_v46, %v4521_v59  ;;  %2631 = vmatprep.mubr.bf16.mxu0 %v1521_v43  ;;  %v918_v5 = vadd.f32 %v917_v0, %v4531_v63  ;;  %2696 = vmatprep.mubr.bf16.mxu1 %v1523_v47  ;;  %v3931_v59 = vld [vmem:[%s5283_s3 + $0x110] sm:$0xff]   ;;  %v1457_v18 = vmax.f32 %v843_v57, 0.0  ;;  %v3939_v47 = vld [vmem:[%s5283_s3 + $0x100] sm:$0xff]  }
  0xfd   : > { %v846_v6 = vpop.f32.mrf.mxu0  ;;  %2632 = vmatmul.mubr.bf16.gmra.mxu0 %v1520_v45  ;;  %v919_v11 = vpop.f32.mrf.mxu1  ;;  %2697 = vmatmul.mubr.bf16.gmra.mxu1 %v1522_v56  ;;  %v1459_v25 = vmax.f32 %v916_v4, 0.0  ;;  %v3940_v57 = vld [vmem:[%s5283_s3 + $0x180] sm:$0xff]  }
  0xfe   : > { %v847_v10 = vadd.f32 %v846_v6, %v4516_v58  ;;  %3637 = vmatpush3.bf16.msra.mxu0 %v3927_v44  ;;  %v1472_v13 = vmax.f32 %v845_v61, 0.0  ;;  %v920_v14 = vadd.f32 %v919_v11, %v4526_v62  ;;  %3677 = vmatpush3.bf16.msra.mxu1 %v3928_v48  ;;  %v3932_v58 = vld [vmem:[%s5283_s3 + $0x190] sm:$0xff]   ;;  %v1474_v20 = vmax.f32 %v918_v5, 0.0  ;;  %v3941_v61 = vld [vmem:[%s5283_s3 + $0x278] sm:$0xff]  }
  0xff   : > { %v956_v63 = vpop.f32.mrf.mxu0  ;;  %3638 = vmatprep.subr.bf16.mxu0 %v3929_v49  ;;  %v1029_v62 = vpop.f32.mrf.mxu1  ;;  %3678 = vmatprep.subr.bf16.mxu1 %v3930_v2  ;;  %v3942_v5 = vld [vmem:[%s5283_s3 + $0x2f8] sm:$0xff]  }
 0x100   : > { %v1473_v21 = vmax.f32 %v847_v10, 0.0  ;;  %v1475_v26 = vmax.f32 %v920_v14, 0.0  ;;  %v1536_v33 = vpack.c.bf16 %v1472_v13, %v1456_v24  ;;  %v1538_v36 = vpack.c.bf16 %v1474_v20, %v1458_v28  ;;  %v3944_v20 = vld [vmem:[%s5283_s3 + $0x2b8] sm:$0xff]  }
 0x101   : > { %v958_v27 = vpop.f32.mrf.mxu0  ;;  %v1031_v30 = vpop.f32.mrf.mxu1  ;;  %v957_v42 = vadd.f32 %v956_v63, %v4635_v16  ;;  %v1030_v44 = vadd.f32 %v1029_v62, %v4659_v29  ;;  %v3943_v63 = vld [vmem:[%s5283_s3 + $0x238] sm:$0xff]  }
 0x102   : > { %3639 = vmatpush3.bf16.msra.mxu0 %v3931_v59  ;;  %v1537_v31 = vpack.c.bf16 %v1473_v21, %v1457_v18  ;;  %3679 = vmatpush3.bf16.msra.mxu1 %v3932_v58  ;;  %v1539_v60 = vpack.c.bf16 %v1475_v26, %v1459_v25  ;;  %v959_v37 = vadd.f32 %v958_v27, %v4646_v22  ;;  %v3945_v21 = vld [vmem:[%s5283_s3 + $0x270] sm:$0xff]  }
 0x103   : > { %v960_v34 = vpop.f32.mrf.mxu0  ;;  %3640 = vmatprep.subr.bf16.mxu0 %v3933_v17  ;;  %v1033_v39 = vpop.f32.mrf.mxu1  ;;  %3680 = vmatprep.subr.bf16.mxu1 %v3934_v23  ;;  %v1032_v15 = vadd.f32 %v1031_v30, %v4654_v41  ;;  %v1364_v6 = vmax.f32 %v957_v42, 0.0  ;;  %v1366_v59 = vmax.f32 %v1030_v44, 0.0  ;;  %v3946_v26 = vld [vmem:[%s5283_s3 + $0x2f0] sm:$0xff]  }
 0x104   : > { %v961_v38 = vadd.f32 %v960_v34, %v4635_v16  ;;  %2639 = vmatprep.mubr.bf16.mxu0 %v1537_v31  ;;  %v1034_v8 = vadd.f32 %v1033_v39, %v4659_v29  ;;  %2704 = vmatprep.mubr.bf16.mxu1 %v1539_v60  ;;  %v1365_v0 = vmax.f32 %v959_v37, 0.0  ;;  %v3947_v60 = vld [vmem:[%s5283_s3 + $0x230] sm:$0xff]  }
 0x105   : > { %v962_v43 = vpop.f32.mrf.mxu0  ;;  %2640 = vmatmul.mubr.bf16.gmra.mxu0 %v1536_v33  ;;  %v1035_v46 = vpop.f32.mrf.mxu1  ;;  %2705 = vmatmul.mubr.bf16.gmra.mxu1 %v1538_v36  ;;  %v1367_v9 = vmax.f32 %v1032_v15, 0.0  ;;  %v3948_v37 = vld [vmem:[%s5283_s3 + $0x2b0] sm:$0xff]  }
 0x106   : > { %v963_v45 = vadd.f32 %v962_v43, %v4646_v22  ;;  %3641 = vmatpush3.bf16.msra.mxu0 %v3935_v32  ;;  %v1380_v48 = vmax.f32 %v961_v38, 0.0  ;;  %v1036_v49 = vadd.f32 %v1035_v46, %v4654_v41  ;;  %3681 = vmatpush3.bf16.msra.mxu1 %v3936_v35  ;;  %v1382_v2 = vmax.f32 %v1034_v8, 0.0  ;;  %v3949_v38 = vld [vmem:[%s5283_s3 + $0x268] sm:$0xff]  }
 0x107   : > { %v966_v56 = vpop.f32.mrf.mxu0  ;;  %3642 = vmatprep.subr.bf16.mxu0 %v3937_v54  ;;  %v1039_v4 = vpop.f32.mrf.mxu1  ;;  %3682 = vmatprep.subr.bf16.mxu1 %v3938_v40  ;;  %v3950_v8 = vld [vmem:[%s5283_s3 + $0x2e8] sm:$0xff]  }
 0x108   : > { %v1381_v3 = vmax.f32 %v963_v45, 0.0  ;;  %v1383_v10 = vmax.f32 %v1036_v49, 0.0  ;;  %v1492_v58 = vpack.c.bf16 %v1380_v48, %v1364_v6  ;;  %v1494_v62 = vpack.c.bf16 %v1382_v2, %v1366_v59  ;;  %v3952_v2 = vld [vmem:[%s5283_s3 + $0x2a8] sm:$0xff]  }
 0x109   : > { %v968_v11 = vpop.f32.mrf.mxu0  ;;  %v1041_v14 = vpop.f32.mrf.mxu1  ;;  %v967_v27 = vadd.f32 %v966_v56, %v4635_v16  ;;  %v1040_v32 = vadd.f32 %v1039_v4, %v4659_v29  ;;  %v3951_v56 = vld [vmem:[%s5283_s3 + $0x228] sm:$0xff]  }
 0x10a   : > { %v1493_v13 = vpack.c.bf16 %v1381_v3, %v1365_v0  ;;  %3643 = vmatpush3.bf16.msra.mxu0 %v3939_v47  ;;  %v1495_v17 = vpack.c.bf16 %v1383_v10, %v1367_v9  ;;  %3683 = vmatpush3.bf16.msra.mxu1 %v3940_v57  ;;  %v969_v23 = vadd.f32 %v968_v11, %v4646_v22  ;;  %v3953_v3 = vld [vmem:[%s5283_s3 + $0x260] sm:$0xff]  }
 0x10b   : > { %v970_v18 = vpop.f32.mrf.mxu0  ;;  %3708 = vmatprep.subr.bf16.mxu0 %v3941_v61  ;;  %v1043_v25 = vpop.f32.mrf.mxu1  ;;  %3748 = vmatprep.subr.bf16.mxu1 %v3942_v5  ;;  %v1042_v28 = vadd.f32 %v1041_v14, %v4654_v41  ;;  %v1396_v43 = vmax.f32 %v967_v27, 0.0  ;;  %v1398_v47 = vmax.f32 %v1040_v32, 0.0  ;;  %v3954_v10 = vld [vmem:[%s5283_s3 + $0x2e0] sm:$0xff]  }
 0x10c   : > { %v971_v24 = vadd.f32 %v970_v18, %v4635_v16  ;;  %2745 = vmatprep.mubr.bf16.mxu0 %v1493_v13  ;;  %v1044_v30 = vadd.f32 %v1043_v25, %v4659_v29  ;;  %2810 = vmatprep.mubr.bf16.mxu1 %v1495_v17  ;;  %v1397_v39 = vmax.f32 %v969_v23, 0.0  ;;  %v3955_v18 = vld [vmem:[%s5283_s3 + $0x220] sm:$0xff]  }
 0x10d   : > { %v972_v31 = vpop.f32.mrf.mxu0  ;;  %2746 = vmatmul.mubr.bf16.vlgmr.msra.gmra.mxu0 %v1492_v58  ;;  %v1045_v34 = vpop.f32.mrf.mxu1  ;;  %2811 = vmatmul.mubr.bf16.vlgmr.msra.gmra.mxu1 %v1494_v62  ;;  %v1399_v44 = vmax.f32 %v1042_v28, 0.0  ;;  %v3956_v23 = vld [vmem:[%s5283_s3 + $0x2a0] sm:$0xff]  }
 0x10e   : > { %v973_v33 = vadd.f32 %v972_v31, %v4646_v22  ;;  %3709 = vmatpush3.bf16.msra.mxu0 %v3943_v63  ;;  %v1412_v35 = vmax.f32 %v971_v24, 0.0  ;;  %v1046_v54 = vadd.f32 %v1045_v34, %v4654_v41  ;;  %3749 = vmatpush3.bf16.msra.mxu1 %v3944_v20  ;;  %v1414_v40 = vmax.f32 %v1044_v30, 0.0  ;;  %v3957_v24 = vld [vmem:[%s5283_s3 + $0x258] sm:$0xff]  }
 0x10f   : > { %v976_v36 = vpop.f32.mrf.mxu0  ;;  %3710 = vmatprep.subr.bf16.mxu0 %v3945_v21  ;;  %v1049_v15 = vpop.f32.mrf.mxu1  ;;  %3750 = vmatprep.subr.bf16.mxu1 %v3946_v26  ;;  %v3958_v30 = vld [vmem:[%s5283_s3 + $0x2d8] sm:$0xff]  }
 0x110   : > { %v1413_v42 = vmax.f32 %v973_v33, 0.0  ;;  %v1415_v45 = vmax.f32 %v1046_v54, 0.0  ;;  %v1508_v57 = vpack.c.bf16 %v1412_v35, %v1396_v43  ;;  %v1510_v4 = vpack.c.bf16 %v1414_v40, %v1398_v47  ;;  %v3960_v40 = vld [vmem:[%s5283_s3 + $0x298] sm:$0xff]  }
 0x111   : > { %v978_v46 = vpop.f32.mrf.mxu0  ;;  %v1051_v49 = vpop.f32.mrf.mxu1  ;;  %v977_v11 = vadd.f32 %v976_v36, %v4635_v16  ;;  %v1050_v63 = vadd.f32 %v1049_v15, %v4659_v29  ;;  %v3959_v36 = vld [vmem:[%s5283_s3 + $0x218] sm:$0xff]  }
 0x112   : > { %v1509_v48 = vpack.c.bf16 %v1413_v42, %v1397_v39  ;;  %3711 = vmatpush3.bf16.msra.mxu0 %v3947_v60  ;;  %v1511_v61 = vpack.c.bf16 %v1415_v45, %v1399_v44  ;;  %3751 = vmatpush3.bf16.msra.mxu1 %v3948_v37  ;;  %v979_v5 = vadd.f32 %v978_v46, %v4646_v22  ;;  %v3961_v42 = vld [vmem:[%s5283_s3 + $0x250] sm:$0xff]   ;;  %v4771_v45 = vld [vmem:[%s5282_s2 + $0x8] sm:$0xff] }
 0x113   : > { %v980_v0 = vpop.f32.mrf.mxu0  ;;  %3712 = vmatprep.subr.bf16.mxu0 %v3949_v38  ;;  %v1053_v9 = vpop.f32.mrf.mxu1  ;;  %3752 = vmatprep.subr.bf16.mxu1 %v3950_v8  ;;  %v1052_v59 = vadd.f32 %v1051_v49, %v4654_v41  ;;  %v1428_v31 = vmax.f32 %v977_v11, 0.0  ;;  %v1430_v60 = vmax.f32 %v1050_v63, 0.0  ;;  %v3962_v46 = vld [vmem:[%s5283_s3 + $0x2d0] sm:$0xff]   ;;  %v4799_v11 = vrot.slane %v4771_v45, %v369_v51 }
 0x114   : > { %v981_v6 = vadd.f32 %v980_v0, %v4635_v16  ;;  %2753 = vmatprep.mubr.bf16.mxu0 %v1509_v48  ;;  %v1054_v13 = vadd.f32 %v1053_v9, %v4659_v29  ;;  %2818 = vmatprep.mubr.bf16.mxu1 %v1511_v61  ;;  %v1429_v25 = vmax.f32 %v979_v5, 0.0  ;;  %v4812_v51 = vrot.slane %v4771_v45, %v373_v55  ;;  %v3969_v55 = vld [vmem:[%s5283_s3 + $0x240] sm:$0xff]  }
 0x115   : > { %v982_v14 = vpop.f32.mrf.mxu0  ;;  %2754 = vmatmul.mubr.bf16.gmra.mxu0 %v1508_v57  ;;  %v1055_v17 = vpop.f32.mrf.mxu1  ;;  %2819 = vmatmul.mubr.bf16.gmra.mxu1 %v1510_v4  ;;  %v1431_v32 = vmax.f32 %v1052_v59, 0.0  ;;  %v4788_v4 = vrot.slane %v4771_v45, %v365_v52  ;;  %v3966_v52 = vld [vmem:[%s5283_s3 + $0x2c8] sm:$0xff]  }
 0x116   : > { %v983_v58 = vadd.f32 %v982_v14, %v4646_v22  ;;  %3713 = vmatpush3.bf16.msra.mxu0 %v3951_v56  ;;  %v1444_v20 = vmax.f32 %v981_v6, 0.0  ;;  %v1056_v21 = vadd.f32 %v1055_v17, %v4654_v41  ;;  %3753 = vmatpush3.bf16.msra.mxu1 %v3952_v2  ;;  %v1446_v26 = vmax.f32 %v1054_v13, 0.0  ;;  %v3963_v2 = vld [vmem:[%s5283_s3 + $0x210] sm:$0xff]  }
 0x117   : > { %v986_v62 = vpop.f32.mrf.mxu0  ;;  %3714 = vmatprep.subr.bf16.mxu0 %v3953_v3  ;;  %v1059_v28 = vpop.f32.mrf.mxu1  ;;  %3754 = vmatprep.subr.bf16.mxu1 %v3954_v10 }
 0x118   : > { %v1445_v27 = vmax.f32 %v983_v58, 0.0  ;;  %v1447_v33 = vmax.f32 %v1056_v21, 0.0  ;;  %v1524_v37 = vpack.c.bf16 %v1444_v20, %v1428_v31  ;;  %v1526_v15 = vpack.c.bf16 %v1446_v26, %v1430_v60  ;;  %v3967_v21 = vld [vmem:[%s5283_s3 + $0x208] sm:$0xff]  }
 0x119   : > { %v988_v34 = vpop.f32.mrf.mxu0  ;;  %v1061_v54 = vpop.f32.mrf.mxu1  ;;  %v987_v47 = vadd.f32 %v986_v62, %v4635_v16  ;;  %v1060_v57 = vadd.f32 %v1059_v28, %v4659_v29  ;;  %v4807_v58 = vrot.slane %v4771_v45, %v377_v53  ;;  %v3968_v53 = vld [vmem:[%s5283_s3 + $0x288] sm:$0xff]  }
 0x11a   : > { %v1525_v35 = vpack.c.bf16 %v1445_v27, %v1429_v25  ;;  %3715 = vmatpush3.bf16.msra.mxu0 %v3955_v18  ;;  %v1527_v38 = vpack.c.bf16 %v1447_v33, %v1431_v32  ;;  %3755 = vmatpush3.bf16.msra.mxu1 %v3956_v23  ;;  %v989_v8 = vadd.f32 %v988_v34, %v4646_v22 }
 0x11b   : > { %v990_v39 = vpop.f32.mrf.mxu0  ;;  %3716 = vmatprep.subr.bf16.mxu0 %v3957_v24  ;;  %v1063_v44 = vpop.f32.mrf.mxu1  ;;  %3756 = vmatprep.subr.bf16.mxu1 %v3958_v30  ;;  %v1062_v48 = vadd.f32 %v1061_v54, %v4654_v41  ;;  %v1460_v59 = vmax.f32 %v987_v47, 0.0  ;;  %v1462_v17 = vmax.f32 %v1060_v57, 0.0  ;;  %v3970_v30 = vld [vmem:[%s5283_s3 + $0x2c0] sm:$0xff]  }
 0x11c   : > { %v991_v43 = vadd.f32 %v990_v39, %v4635_v16  ;;  %2761 = vmatprep.mubr.bf16.mxu0 %v1525_v35  ;;  %v1064_v49 = vadd.f32 %v1063_v44, %v4659_v29  ;;  %2826 = vmatprep.mubr.bf16.mxu1 %v1527_v38  ;;  %v3965_v29 = vld [vmem:[%s5283_s3 + $0x248] sm:$0xff]   ;;  %v1461_v6 = vmax.f32 %v989_v8, 0.0 }
 0x11d   : > { %v992_v56 = vpop.f32.mrf.mxu0  ;;  %2762 = vmatmul.mubr.bf16.gmra.mxu0 %v1524_v37  ;;  %v1065_v0 = vpop.f32.mrf.mxu1  ;;  %2827 = vmatmul.mubr.bf16.gmra.mxu1 %v1526_v15  ;;  %v1463_v13 = vmax.f32 %v1062_v48, 0.0 }
 0x11e   : > { %v993_v61 = vadd.f32 %v992_v56, %v4646_v22  ;;  %3717 = vmatpush3.bf16.msra.mxu0 %v3959_v36  ;;  %v1476_v3 = vmax.f32 %v991_v43, 0.0  ;;  %v1066_v16 = vadd.f32 %v1065_v0, %v4654_v41  ;;  %3757 = vmatpush3.bf16.msra.mxu1 %v3960_v40  ;;  %v3964_v22 = vld [vmem:[%s5283_s3 + $0x290] sm:$0xff]   ;;  %v1478_v9 = vmax.f32 %v1064_v49, 0.0  ;;  %v3971_v36 = vld [vmem:[%s5283_s3 + $0x200] sm:$0xff]  }
 0x11f   : > { %v1102_v5 = vpop.f32.mrf.mxu0  ;;  %3718 = vmatprep.subr.bf16.mxu0 %v3961_v42  ;;  %v1175_v41 = vpop.f32.mrf.mxu1  ;;  %3758 = vmatprep.subr.bf16.mxu1 %v3962_v46  ;;  %v3972_v40 = vld [vmem:[%s5283_s3 + $0x280] sm:$0xff]   ;;  %v3973_v42 = vld [vmem:[%s5283_s3 + $0x378] sm:$0xff]  }
 0x120   : > { %v1477_v10 = vmax.f32 %v993_v61, 0.0  ;;  %v1479_v14 = vmax.f32 %v1066_v16, 0.0  ;;  %v1540_v62 = vpack.c.bf16 %v1476_v3, %v1460_v59  ;;  %v1542_v25 = vpack.c.bf16 %v1478_v9, %v1462_v17  ;;  %v3974_v46 = vld [vmem:[%s5283_s3 + $0x3f8] sm:$0xff]  }
 0x121   : > { %v1104_v63 = vpop.f32.mrf.mxu0  ;;  %v1177_v20 = vpop.f32.mrf.mxu1  ;;  %v1103_v31 = vadd.f32 %v1102_v5, %v4788_v4  ;;  %v1176_v60 = vadd.f32 %v1175_v41, %v4812_v51 }
 0x122   : > { %v1541_v18 = vpack.c.bf16 %v1477_v10, %v1461_v6  ;;  %3719 = vmatpush3.bf16.msra.mxu0 %v3963_v2  ;;  %v1543_v23 = vpack.c.bf16 %v1479_v14, %v1463_v13  ;;  %3759 = vmatpush3.bf16.msra.mxu1 %v3964_v22  ;;  %v1105_v26 = vadd.f32 %v1104_v63, %v4799_v11  ;;  %v3975_v2 = vld [vmem:[%s5283_s3 + $0x338] sm:$0xff]  }
 0x123   : > { %v1106_v24 = vpop.f32.mrf.mxu0  ;;  %3720 = vmatprep.subr.bf16.mxu0 %v3965_v29  ;;  %v1179_v28 = vpop.f32.mrf.mxu1  ;;  %3760 = vmatprep.subr.bf16.mxu1 %v3966_v52  ;;  %v1178_v32 = vadd.f32 %v1177_v20, %v4807_v58  ;;  %v1368_v47 = vmax.f32 %v1103_v31, 0.0  ;;  %v1370_v57 = vmax.f32 %v1176_v60, 0.0  ;;  %v3976_v22 = vld [vmem:[%s5283_s3 + $0x3b8] sm:$0xff]   ;;  %v3977_v29 = vld [vmem:[%s5283_s3 + $0x370] sm:$0xff]  }
 0x124   : > { %v1107_v27 = vadd.f32 %v1106_v24, %v4788_v4  ;;  %2769 = vmatprep.mubr.bf16.mxu0 %v1541_v18  ;;  %v1180_v33 = vadd.f32 %v1179_v28, %v4812_v51  ;;  %2834 = vmatprep.mubr.bf16.mxu1 %v1543_v23  ;;  %v1369_v15 = vmax.f32 %v1105_v26, 0.0  ;;  %v3978_v52 = vld [vmem:[%s5283_s3 + $0x3f0] sm:$0xff]  }
 0x125   : > { %v1108_v34 = vpop.f32.mrf.mxu0  ;;  %2770 = vmatmul.mubr.bf16.gmra.mxu0 %v1540_v62  ;;  %v1181_v54 = vpop.f32.mrf.mxu1  ;;  %2835 = vmatmul.mubr.bf16.gmra.mxu1 %v1542_v25  ;;  %v1371_v48 = vmax.f32 %v1178_v32, 0.0 }
 0x126   : > { %v1109_v35 = vadd.f32 %v1108_v34, %v4799_v11  ;;  %3721 = vmatpush3.bf16.msra.mxu0 %v3967_v21  ;;  %v1384_v37 = vmax.f32 %v1107_v27, 0.0  ;;  %v1182_v38 = vadd.f32 %v1181_v54, %v4807_v58  ;;  %3761 = vmatpush3.bf16.msra.mxu1 %v3968_v53  ;;  %v1386_v8 = vmax.f32 %v1180_v33, 0.0  ;;  %v3979_v21 = vld [vmem:[%s5283_s3 + $0x330] sm:$0xff]  }
 0x127   : > { %v1112_v39 = vpop.f32.mrf.mxu0  ;;  %3722 = vmatprep.subr.bf16.mxu0 %v3969_v55  ;;  %v1185_v44 = vpop.f32.mrf.mxu1  ;;  %3762 = vmatprep.subr.bf16.mxu1 %v3970_v30  ;;  %v3980_v53 = vld [vmem:[%s5283_s3 + $0x3b0] sm:$0xff]   ;;  %v3981_v55 = vld [vmem:[%s5283_s3 + $0x368] sm:$0xff]  }
 0x128   : > { %v1385_v43 = vmax.f32 %v1109_v35, 0.0  ;;  %v1387_v49 = vmax.f32 %v1182_v38, 0.0  ;;  %v1496_v3 = vpack.c.bf16 %v1384_v37, %v1368_v47  ;;  %v1498_v6 = vpack.c.bf16 %v1386_v8, %v1370_v57  ;;  %v3982_v30 = vld [vmem:[%s5283_s3 + $0x3e8] sm:$0xff]  }
 0x129   : > { %v1114_v56 = vpop.f32.mrf.mxu0  ;;  %v1187_v0 = vpop.f32.mrf.mxu1  ;;  %v1113_v59 = vadd.f32 %v1112_v39, %v4788_v4  ;;  %v1186_v17 = vadd.f32 %v1185_v44, %v4812_v51 }
 0x12a   : > { %v1497_v61 = vpack.c.bf16 %v1385_v43, %v1369_v15  ;;  %3723 = vmatpush3.bf16.msra.mxu0 %v3971_v36  ;;  %v1499_v16 = vpack.c.bf16 %v1387_v49, %v1371_v48  ;;  %3763 = vmatpush3.bf16.msra.mxu1 %v3972_v40  ;;  %v1115_v9 = vadd.f32 %v1114_v56, %v4799_v11  ;;  %v3983_v36 = vld [vmem:[%s5283_s3 + $0x328] sm:$0xff]  }
 0x12b   : > { %v1116_v5 = vpop.f32.mrf.mxu0  ;;  %3788 = vmatprep.subr.bf16.mxu0 %v3973_v42  ;;  %v1189_v41 = vpop.f32.mrf.mxu1  ;;  %3828 = vmatprep.subr.bf16.mxu1 %v3974_v46  ;;  %v1188_v13 = vadd.f32 %v1187_v0, %v4807_v58  ;;  %v1400_v31 = vmax.f32 %v1113_v59, 0.0  ;;  %v1402_v60 = vmax.f32 %v1186_v17, 0.0  ;;  %v3984_v40 = vld [vmem:[%s5283_s3 + $0x3a8] sm:$0xff]   ;;  %v3985_v42 = vld [vmem:[%s5283_s3 + $0x360] sm:$0xff]  }
 0x12c   : > { %v1117_v10 = vadd.f32 %v1116_v5, %v4788_v4  ;;  %2875 = vmatprep.mubr.bf16.mxu0 %v1497_v61  ;;  %v1190_v14 = vadd.f32 %v1189_v41, %v4812_v51  ;;  %2940 = vmatprep.mubr.bf16.mxu1 %v1499_v16  ;;  %v1401_v25 = vmax.f32 %v1115_v9, 0.0  ;;  %v3986_v46 = vld [vmem:[%s5283_s3 + $0x3e0] sm:$0xff]  }
 0x12d   : > { %v1118_v63 = vpop.f32.mrf.mxu0  ;;  %2876 = vmatmul.mubr.bf16.vlgmr.msra.gmra.mxu0 %v1496_v3  ;;  %v1191_v20 = vpop.f32.mrf.mxu1  ;;  %2941 = vmatmul.mubr.bf16.vlgmr.msra.gmra.mxu1 %v1498_v6  ;;  %v1403_v32 = vmax.f32 %v1188_v13, 0.0 }
 0x12e   : > { %v1119_v18 = vadd.f32 %v1118_v63, %v4799_v11  ;;  %3789 = vmatpush3.bf16.msra.mxu0 %v3975_v2  ;;  %v1416_v62 = vmax.f32 %v1117_v10, 0.0  ;;  %v1192_v23 = vadd.f32 %v1191_v20, %v4807_v58  ;;  %3829 = vmatpush3.bf16.msra.mxu1 %v3976_v22  ;;  %v1418_v26 = vmax.f32 %v1190_v14, 0.0  ;;  %v3987_v2 = vld [vmem:[%s5283_s3 + $0x320] sm:$0xff]  }
 0x12f   : > { %v1122_v24 = vpop.f32.mrf.mxu0  ;;  %3790 = vmatprep.subr.bf16.mxu0 %v3977_v29  ;;  %v1195_v28 = vpop.f32.mrf.mxu1  ;;  %3830 = vmatprep.subr.bf16.mxu1 %v3978_v52  ;;  %v3988_v22 = vld [vmem:[%s5283_s3 + $0x3a0] sm:$0xff]   ;;  %v3989_v29 = vld [vmem:[%s5283_s3 + $0x358] sm:$0xff]  }
 0x130   : > { %v1417_v27 = vmax.f32 %v1119_v18, 0.0  ;;  %v1419_v33 = vmax.f32 %v1192_v23, 0.0  ;;  %v1512_v37 = vpack.c.bf16 %v1416_v62, %v1400_v31  ;;  %v1514_v15 = vpack.c.bf16 %v1418_v26, %v1402_v60  ;;  %v3990_v52 = vld [vmem:[%s5283_s3 + $0x3d8] sm:$0xff]  }
 0x131   : > { %v1124_v34 = vpop.f32.mrf.mxu0  ;;  %v1197_v54 = vpop.f32.mrf.mxu1  ;;  %v1123_v47 = vadd.f32 %v1122_v24, %v4788_v4  ;;  %v1196_v57 = vadd.f32 %v1195_v28, %v4812_v51 }
 0x132   : > { %v1513_v35 = vpack.c.bf16 %v1417_v27, %v1401_v25  ;;  %3791 = vmatpush3.bf16.msra.mxu0 %v3979_v21  ;;  %v1515_v38 = vpack.c.bf16 %v1419_v33, %v1403_v32  ;;  %3831 = vmatpush3.bf16.msra.mxu1 %v3980_v53  ;;  %v1125_v8 = vadd.f32 %v1124_v34, %v4799_v11  ;;  %v3991_v21 = vld [vmem:[%s5283_s3 + $0x318] sm:$0xff]  }
 0x133   : > { %v1126_v39 = vpop.f32.mrf.mxu0  ;;  %3792 = vmatprep.subr.bf16.mxu0 %v3981_v55  ;;  %v1199_v44 = vpop.f32.mrf.mxu1  ;;  %3832 = vmatprep.subr.bf16.mxu1 %v3982_v30  ;;  %v1198_v48 = vadd.f32 %v1197_v54, %v4807_v58  ;;  %v1432_v59 = vmax.f32 %v1123_v47, 0.0  ;;  %v1434_v17 = vmax.f32 %v1196_v57, 0.0  ;;  %v3992_v53 = vld [vmem:[%s5283_s3 + $0x398] sm:$0xff]   ;;  %v3993_v55 = vld [vmem:[%s5283_s3 + $0x350] sm:$0xff]  }
 0x134   : > { %v1127_v43 = vadd.f32 %v1126_v39, %v4788_v4  ;;  %2883 = vmatprep.mubr.bf16.mxu0 %v1513_v35  ;;  %v1200_v49 = vadd.f32 %v1199_v44, %v4812_v51  ;;  %2948 = vmatprep.mubr.bf16.mxu1 %v1515_v38  ;;  %v1433_v6 = vmax.f32 %v1125_v8, 0.0  ;;  %v3994_v30 = vld [vmem:[%s5283_s3 + $0x3d0] sm:$0xff]   ;;  %v4936_v38 = vrot.slane %v4771_v45, %v381_v19  ;;  %v3998_v19 = vld [vmem:[%s5283_s3 + $0x3c8] sm:$0xff]  }
 0x135   : > { %v1128_v56 = vpop.f32.mrf.mxu0  ;;  %2884 = vmatmul.mubr.bf16.gmra.mxu0 %v1512_v37  ;;  %v1201_v0 = vpop.f32.mrf.mxu1  ;;  %2949 = vmatmul.mubr.bf16.gmra.mxu1 %v1514_v15  ;;  %v1435_v13 = vmax.f32 %v1198_v48, 0.0  ;;  %v4947_v8 = vrot.slane %v4771_v45, %v385_v1  ;;  %v4955_v48 = vrot.slane %v4771_v45, %v393_v7  ;;  %v4960_v1 = vrot.slane %v4771_v45, %v389_v12  ;;  %v4000_v7 = vld [vmem:[%s5283_s3 + $0x388] sm:$0xff]  }
 0x136   : > { %v1129_v61 = vadd.f32 %v1128_v56, %v4799_v11  ;;  %3793 = vmatpush3.bf16.msra.mxu0 %v3983_v36  ;;  %v1448_v3 = vmax.f32 %v1127_v43, 0.0  ;;  %v1202_v16 = vadd.f32 %v1201_v0, %v4807_v58  ;;  %3833 = vmatpush3.bf16.msra.mxu1 %v3984_v40  ;;  %v1450_v9 = vmax.f32 %v1200_v49, 0.0  ;;  %v3995_v36 = vld [vmem:[%s5283_s3 + $0x310] sm:$0xff]  }
 0x137   : > { %v1132_v5 = vpop.f32.mrf.mxu0  ;;  %3794 = vmatprep.subr.bf16.mxu0 %v3985_v42  ;;  %v1205_v41 = vpop.f32.mrf.mxu1  ;;  %3834 = vmatprep.subr.bf16.mxu1 %v3986_v46 }
 0x138   : > { %v1449_v10 = vmax.f32 %v1129_v61, 0.0  ;;  %v1451_v14 = vmax.f32 %v1202_v16, 0.0  ;;  %v1528_v62 = vpack.c.bf16 %v1448_v3, %v1432_v59  ;;  %v1530_v25 = vpack.c.bf16 %v1450_v9, %v1434_v17  ;;  %v3999_v61 = vld [vmem:[%s5283_s3 + $0x308] sm:$0xff]  }
 0x139   : > { %v1134_v63 = vpop.f32.mrf.mxu0  ;;  %v1207_v20 = vpop.f32.mrf.mxu1  ;;  %v1133_v31 = vadd.f32 %v1132_v5, %v4788_v4  ;;  %v1206_v60 = vadd.f32 %v1205_v41, %v4812_v51 }
 0x13a   : > { %v1529_v18 = vpack.c.bf16 %v1449_v10, %v1433_v6  ;;  %3795 = vmatpush3.bf16.msra.mxu0 %v3987_v2  ;;  %v1531_v23 = vpack.c.bf16 %v1451_v14, %v1435_v13  ;;  %3835 = vmatpush3.bf16.msra.mxu1 %v3988_v22  ;;  %v1135_v26 = vadd.f32 %v1134_v63, %v4799_v11  ;;  %v4002_v22 = vld [vmem:[%s5283_s3 + $0x3c0] sm:$0xff]  }
 0x13b   : > { %v1136_v24 = vpop.f32.mrf.mxu0  ;;  %3796 = vmatprep.subr.bf16.mxu0 %v3989_v29  ;;  %v1209_v28 = vpop.f32.mrf.mxu1  ;;  %3836 = vmatprep.subr.bf16.mxu1 %v3990_v52  ;;  %v1208_v32 = vadd.f32 %v1207_v20, %v4807_v58  ;;  %v1464_v43 = vmax.f32 %v1133_v31, 0.0  ;;  %v1466_v49 = vmax.f32 %v1206_v60, 0.0  ;;  %v4003_v13 = vld [vmem:[%s5283_s3 + $0x300] sm:$0xff]  }
 0x13c   : > { %v1137_v27 = vadd.f32 %v1136_v24, %v4788_v4  ;;  %2891 = vmatprep.mubr.bf16.mxu0 %v1529_v18  ;;  %v1210_v33 = vadd.f32 %v1209_v28, %v4812_v51  ;;  %2956 = vmatprep.mubr.bf16.mxu1 %v1531_v23  ;;  %v3997_v51 = vld [vmem:[%s5283_s3 + $0x348] sm:$0xff]   ;;  %v1465_v40 = vmax.f32 %v1135_v26, 0.0  ;;  %v4004_v18 = vld [vmem:[%s5283_s3 + $0x380] sm:$0xff]  }
 0x13d   : > { %v1138_v34 = vpop.f32.mrf.mxu0  ;;  %2892 = vmatmul.mubr.bf16.gmra.mxu0 %v1528_v62  ;;  %v1211_v54 = vpop.f32.mrf.mxu1  ;;  %2957 = vmatmul.mubr.bf16.gmra.mxu1 %v1530_v25  ;;  %v1467_v44 = vmax.f32 %v1208_v32, 0.0 }
 0x13e   : > { %v1139_v35 = vadd.f32 %v1138_v34, %v4799_v11  ;;  %3797 = vmatpush3.bf16.msra.mxu0 %v3991_v21  ;;  %v1480_v37 = vmax.f32 %v1137_v27, 0.0  ;;  %v1212_v4 = vadd.f32 %v1211_v54, %v4807_v58  ;;  %3837 = vmatpush3.bf16.msra.mxu1 %v3992_v53  ;;  %v3996_v11 = vld [vmem:[%s5283_s3 + $0x390] sm:$0xff]   ;;  %v1482_v42 = vmax.f32 %v1210_v33, 0.0 }
 0x13f   : > { %v1248_v39 = vpop.f32.mrf.mxu0  ;;  %3798 = vmatprep.subr.bf16.mxu0 %v3993_v55  ;;  %v1321_v58 = vpop.f32.mrf.mxu1  ;;  %3838 = vmatprep.subr.bf16.mxu1 %v3994_v30 }
 0x140   : > { %v1481_v15 = vmax.f32 %v1139_v35, 0.0  ;;  %v1483_v46 = vmax.f32 %v1212_v4, 0.0  ;;  %v1544_v0 = vpack.c.bf16 %v1480_v37, %v1464_v43  ;;  %v1546_v12 = vpack.c.bf16 %v1482_v42, %v1466_v49 }
 0x141   : > { %v1250_v47 = vpop.f32.mrf.mxu0  ;;  %v1323_v57 = vpop.f32.mrf.mxu1  ;;  %v1249_v29 = vadd.f32 %v1248_v39, %v4936_v38  ;;  %v1322_v41 = vadd.f32 %v1321_v58, %v4960_v1 }
 0x142   : > { %v1545_v56 = vpack.c.bf16 %v1481_v15, %v1465_v40  ;;  %3799 = vmatpush3.bf16.msra.mxu0 %v3995_v36  ;;  %v1547_v2 = vpack.c.bf16 %v1483_v46, %v1467_v44  ;;  %3839 = vmatpush3.bf16.msra.mxu1 %v3996_v11  ;;  %v1251_v45 = vadd.f32 %v1250_v47, %v4947_v8 }
 0x143   : > { %v1252_v3 = vpop.f32.mrf.mxu0  ;;  %3800 = vmatprep.subr.bf16.mxu0 %v3997_v51  ;;  %v1325_v5 = vpop.f32.mrf.mxu1  ;;  %3840 = vmatprep.subr.bf16.mxu1 %v3998_v19  ;;  %v1324_v6 = vadd.f32 %v1323_v57, %v4955_v48  ;;  %v1372_v24 = vmax.f32 %v1249_v29, 0.0  ;;  %v1374_v26 = vmax.f32 %v1322_v41, 0.0 }
 0x144   : > { %v1253_v16 = vadd.f32 %v1252_v3, %v4936_v38  ;;  %2899 = vmatprep.mubr.bf16.mxu0 %v1545_v56  ;;  %v1326_v9 = vadd.f32 %v1325_v5, %v4960_v1  ;;  %2964 = vmatprep.mubr.bf16.mxu1 %v1547_v2  ;;  %v1373_v20 = vmax.f32 %v1251_v45, 0.0 }
 0x145   : > { %v1254_v10 = vpop.f32.mrf.mxu0  ;;  %2900 = vmatmul.mubr.bf16.gmra.mxu0 %v1544_v0  ;;  %v1327_v59 = vpop.f32.mrf.mxu1  ;;  %2965 = vmatmul.mubr.bf16.gmra.mxu1 %v1546_v12  ;;  %v1375_v53 = vmax.f32 %v1324_v6, 0.0 }
 0x146   : > { %v1255_v52 = vadd.f32 %v1254_v10, %v4947_v8  ;;  %3801 = vmatpush3.bf16.msra.mxu0 %v3999_v61  ;;  %v1388_v14 = vmax.f32 %v1253_v16, 0.0  ;;  %v1328_v63 = vadd.f32 %v1327_v59, %v4955_v48  ;;  %3841 = vmatpush3.bf16.msra.mxu1 %v4000_v7  ;;  %v1390_v21 = vmax.f32 %v1326_v9, 0.0 }
 0x147   : > { %v1258_v17 = vpop.f32.mrf.mxu0  ;;  %3802 = vmatprep.subr.bf16.mxu0 %v4001_v50  ;;  %v1331_v23 = vpop.f32.mrf.mxu1  ;;  %3842 = vmatprep.subr.bf16.mxu1 %v4002_v22 }
 0x148   : > { %v1389_v62 = vmax.f32 %v1255_v52, 0.0  ;;  %v1391_v55 = vmax.f32 %v1328_v63, 0.0  ;;  %v1500_v30 = vpack.c.bf16 %v1388_v14, %v1372_v24  ;;  %v1502_v33 = vpack.c.bf16 %v1390_v21, %v1374_v26 }
 0x149   : > { %v1260_v25 = vpop.f32.mrf.mxu0  ;;  %v1333_v28 = vpop.f32.mrf.mxu1  ;;  %v1259_v54 = vadd.f32 %v1258_v17, %v4936_v38  ;;  %v1332_v39 = vadd.f32 %v1331_v23, %v4960_v1 }
 0x14a   : > { %v1501_v27 = vpack.c.bf16 %v1389_v62, %v1373_v20  ;;  %3803 = vmatpush3.bf16.msra.mxu0 %v4003_v13  ;;  %v1503_v31 = vpack.c.bf16 %v1391_v55, %v1375_v53  ;;  %3843 = vmatpush3.bf16.msra.mxu1 %v4004_v18  ;;  %v1261_v34 = vadd.f32 %v1260_v25, %v4947_v8 }
 0x14b   : > { %v1262_v32 = vpop.f32.mrf.mxu0  ;;  %v1335_v35 = vpop.f32.mrf.mxu1  ;;  %v1334_v36 = vadd.f32 %v1333_v28, %v4955_v48  ;;  %v1404_v46 = vmax.f32 %v1259_v54, 0.0  ;;  %v1406_v57 = vmax.f32 %v1332_v39, 0.0 }
 0x14c   : > { %v1263_v60 = vadd.f32 %v1262_v32, %v4936_v38  ;;  %3005 = vmatprep.mubr.bf16.mxu0 %v1501_v27  ;;  %v1336_v37 = vadd.f32 %v1335_v35, %v4960_v1  ;;  %3070 = vmatprep.mubr.bf16.mxu1 %v1503_v31  ;;  %v1405_v58 = vmax.f32 %v1261_v34, 0.0 }
 0x14d   : > { %v1264_v4 = vpop.f32.mrf.mxu0  ;;  %3006 = vmatmul.mubr.bf16.vlgmr.msra.gmra.mxu0 %v1500_v30  ;;  %v1337_v51 = vpop.f32.mrf.mxu1  ;;  %3071 = vmatmul.mubr.bf16.vlgmr.msra.gmra.mxu1 %v1502_v33  ;;  %v1407_v47 = vmax.f32 %v1334_v36, 0.0 }
 0x14e   : > { %v1265_v11 = vadd.f32 %v1264_v4, %v4947_v8  ;;  %v1420_v40 = vmax.f32 %v1263_v60, 0.0  ;;  %v1338_v42 = vadd.f32 %v1337_v51, %v4955_v48  ;;  %v1422_v19 = vmax.f32 %v1336_v37, 0.0 }
 0x14f   : > { %v1268_v15 = vpop.f32.mrf.mxu0  ;;  %v1341_v44 = vpop.f32.mrf.mxu1 }
 0x150   : > { %v1421_v43 = vmax.f32 %v1265_v11, 0.0  ;;  %v1423_v49 = vmax.f32 %v1338_v42, 0.0  ;;  %v1516_v2 = vpack.c.bf16 %v1420_v40, %v1404_v46  ;;  %v1518_v50 = vpack.c.bf16 %v1422_v19, %v1406_v57 }
 0x151   : > { %v1270_v56 = vpop.f32.mrf.mxu0  ;;  %v1343_v0 = vpop.f32.mrf.mxu1  ;;  %v1269_v5 = vadd.f32 %v1268_v15, %v4936_v38  ;;  %v1342_v9 = vadd.f32 %v1341_v44, %v4960_v1 }
 0x152   : > { %v1517_v61 = vpack.c.bf16 %v1421_v43, %v1405_v58  ;;  %v1519_v3 = vpack.c.bf16 %v1423_v49, %v1407_v47  ;;  %v1271_v12 = vadd.f32 %v1270_v56, %v4947_v8  ;;  %v1344_v22 = vadd.f32 %v1343_v0, %v4955_v48 }
 0x153   : > { %v1272_v7 = vpop.f32.mrf.mxu0  ;;  %v1345_v16 = vpop.f32.mrf.mxu1  ;;  %v1436_v20 = vmax.f32 %v1269_v5, 0.0  ;;  %v1438_v24 = vmax.f32 %v1342_v9, 0.0 }
 0x154   : > { %v1273_v45 = vadd.f32 %v1272_v7, %v4936_v38  ;;  %3013 = vmatprep.mubr.bf16.mxu0 %v1517_v61  ;;  %v1346_v29 = vadd.f32 %v1345_v16, %v4960_v1  ;;  %3078 = vmatprep.mubr.bf16.mxu1 %v1519_v3  ;;  %v1437_v14 = vmax.f32 %v1271_v12, 0.0  ;;  %v1439_v21 = vmax.f32 %v1344_v22, 0.0 }
 0x155   : > { %v1274_v6 = vpop.f32.mrf.mxu0  ;;  %3014 = vmatmul.mubr.bf16.gmra.mxu0 %v1516_v2  ;;  %v1347_v41 = vpop.f32.mrf.mxu1  ;;  %3079 = vmatmul.mubr.bf16.gmra.mxu1 %v1518_v50 }
 0x156   : > { %v1275_v10 = vadd.f32 %v1274_v6, %v4947_v8  ;;  %v1452_v52 = vmax.f32 %v1273_v45, 0.0  ;;  %v1348_v59 = vadd.f32 %v1347_v41, %v4955_v48  ;;  %v1454_v63 = vmax.f32 %v1346_v29, 0.0 }
 0x157   : > { %v1278_v13 = vpop.f32.mrf.mxu0  ;;  %v1351_v18 = vpop.f32.mrf.mxu1 }
 0x158   : > { %v1453_v17 = vmax.f32 %v1275_v10, 0.0  ;;  %v1455_v62 = vmax.f32 %v1348_v59, 0.0  ;;  %v1532_v25 = vpack.c.bf16 %v1452_v52, %v1436_v20  ;;  %v1534_v28 = vpack.c.bf16 %v1454_v63, %v1438_v24 }
 0x159   : > { %v1280_v23 = vpop.f32.mrf.mxu0  ;;  %v1353_v55 = vpop.f32.mrf.mxu1  ;;  %v1279_v33 = vadd.f32 %v1278_v13, %v4936_v38  ;;  %v1352_v54 = vadd.f32 %v1351_v18, %v4960_v1 }
 0x15a   : > { %v1533_v53 = vpack.c.bf16 %v1453_v17, %v1437_v14  ;;  %v1535_v26 = vpack.c.bf16 %v1455_v62, %v1439_v21  ;;  %v1281_v30 = vadd.f32 %v1280_v23, %v4947_v8  ;;  %v1354_v34 = vadd.f32 %v1353_v55, %v4955_v48 }
 0x15b   : > { %v1282_v27 = vpop.f32.mrf.mxu0  ;;  %v1355_v32 = vpop.f32.mrf.mxu1  ;;  %v1470_v58 = vmax.f32 %v1352_v54, 0.0 }
 0x15c   : > { %v1283_v31 = vadd.f32 %v1282_v27, %v4936_v38  ;;  %3021 = vmatprep.mubr.bf16.mxu0 %v1533_v53  ;;  %v1356_v60 = vadd.f32 %v1355_v32, %v4960_v1  ;;  %3086 = vmatprep.mubr.bf16.mxu1 %v1535_v26  ;;  %v1469_v11 = vmax.f32 %v1281_v30, 0.0  ;;  %v1468_v38 = vmax.f32 %v1279_v33, 0.0 }
 0x15d   : > { %v1284_v35 = vpop.f32.mrf.mxu0  ;;  %3022 = vmatmul.mubr.bf16.gmra.mxu0 %v1532_v25  ;;  %v1357_v37 = vpop.f32.mrf.mxu1  ;;  %3087 = vmatmul.mubr.bf16.gmra.mxu1 %v1534_v28  ;;  %v1471_v42 = vmax.f32 %v1354_v34, 0.0 }
 0x15e   : > { %v1285_v36 = vadd.f32 %v1284_v35, %v4947_v8  ;;  %v1484_v4 = vmax.f32 %v1283_v31, 0.0  ;;  %v1358_v39 = vadd.f32 %v1357_v37, %v4955_v48  ;;  %v1486_v51 = vmax.f32 %v1356_v60, 0.0  ;;  %v3415_v48 = vld [vmem:[%s5284_s4] ss:$0 sm:$0xff] }
 0x160   : > { %v1485_v40 = vmax.f32 %v1285_v36, 0.0  ;;  %v1487_v15 = vmax.f32 %v1358_v39, 0.0  ;;  %v1548_v43 = vpack.c.bf16 %v1484_v4, %v1468_v38  ;;  %v1550_v46 = vpack.c.bf16 %v1486_v51, %v1470_v58 }
 0x162   : > { %v1549_v19 = vpack.c.bf16 %v1485_v40, %v1469_v11  ;;  %v1551_v44 = vpack.c.bf16 %v1487_v15, %v1471_v42 }
 0x164   : > { %3029 = vmatprep.mubr.bf16.mxu0 %v1549_v19  ;;  %3094 = vmatprep.mubr.bf16.mxu1 %v1551_v44 }
 0x165   : > { %3030 = vmatmul.mubr.bf16.gmra.mxu0 %v1548_v43  ;;  %3095 = vmatmul.mubr.bf16.gmra.mxu1 %v1550_v46 }
 0x1ad   : > { %v3564_v8 = vpop.f32.mrf.mxu0  ;;  %v3604_v1 = vpop.f32.mrf.mxu1 }
 0x1af   : > { %v3565_v47 = vpop.f32.mrf.mxu0  ;;  %v3605_v56 = vpop.f32.mrf.mxu1 }
 0x1b0   : > { %v3566_v49 = vadd.f32 %v3565_v47, %v3564_v8  ;;  %v3606_v57 = vadd.f32 %v3605_v56, %v3604_v1 }
 0x1b1   : > { %v3567_v61 = vpop.f32.mrf.mxu0  ;;  %v3607_v2 = vpop.f32.mrf.mxu1 }
 0x1b2   : > { %v2618_v0 = vadd.f32 %v3566_v49, %v3415_v48 }
 0x1b3   : > { %v3568_v3 = vpop.f32.mrf.mxu0  ;;  %v3608_v12 = vpop.f32.mrf.mxu1 }
 0x1b4   : > { %v5015_v7 = vadd.f32 %v3606_v57, %v2618_v0  ;;  %v3569_v50 = vadd.f32 %v3568_v3, %v3567_v61  ;;  %v3609_v45 = vadd.f32 %v3608_v12, %v3607_v2 }
 0x1b5   : > { %v3570_v16 = vpop.f32.mrf.mxu0  ;;  %v3610_v22 = vpop.f32.mrf.mxu1 }
 0x1b6   : > { %v2621_v5 = vadd.f32 %v3569_v50, %v3415_v48 }
 0x1b7   : > { %v3571_v29 = vpop.f32.mrf.mxu0  ;;  %v3611_v10 = vpop.f32.mrf.mxu1 }
 0x1b8   : > { %v5017_v6 = vadd.f32 %v3609_v45, %v2621_v5  ;;  %v3572_v9 = vadd.f32 %v3571_v29, %v3570_v16  ;;  %v3612_v41 = vadd.f32 %v3611_v10, %v3610_v22 }
 0x1b9   : > { %v3573_v52 = vpop.f32.mrf.mxu0  ;;  %v3613_v13 = vpop.f32.mrf.mxu1 }
 0x1ba   : > { %v2626_v59 = vadd.f32 %v3572_v9, %v3415_v48 }
 0x1bb   : > { %v3574_v14 = vpop.f32.mrf.mxu0  ;;  %v3614_v18 = vpop.f32.mrf.mxu1 }
 0x1bc   : > { %v5019_v63 = vadd.f32 %v3612_v41, %v2626_v59  ;;  %v3575_v17 = vadd.f32 %v3574_v14, %v3573_v52  ;;  %v3615_v20 = vadd.f32 %v3614_v18, %v3613_v13 }
 0x1bd   : > { %v3576_v21 = vpop.f32.mrf.mxu0  ;;  %v3616_v23 = vpop.f32.mrf.mxu1 }
 0x1be   : > { %v2629_v62 = vadd.f32 %v3575_v17, %v3415_v48 }
 0x1bf   : > { %v3577_v24 = vpop.f32.mrf.mxu0  ;;  %v3617_v25 = vpop.f32.mrf.mxu1 }
 0x1c0   : > { %v5021_v53 = vadd.f32 %v3615_v20, %v2629_v62  ;;  %v3578_v55 = vadd.f32 %v3577_v24, %v3576_v21  ;;  %v3618_v26 = vadd.f32 %v3617_v25, %v3616_v23 }
 0x1c1   : > { %v3579_v27 = vpop.f32.mrf.mxu0  ;;  %v3619_v30 = vpop.f32.mrf.mxu1 }
 0x1c2   : > { %v2634_v28 = vadd.f32 %v3578_v55, %v3415_v48 }
 0x1c3   : > { %v3580_v31 = vpop.f32.mrf.mxu0  ;;  %v3620_v34 = vpop.f32.mrf.mxu1 }
 0x1c4   : > { %v5023_v32 = vadd.f32 %v3618_v26, %v2634_v28  ;;  %v3581_v33 = vadd.f32 %v3580_v31, %v3579_v27  ;;  %v3621_v60 = vadd.f32 %v3620_v34, %v3619_v30 }
 0x1c5   : > { %v3582_v35 = vpop.f32.mrf.mxu0  ;;  %v3622_v36 = vpop.f32.mrf.mxu1 }
 0x1c6   : > { %v2637_v54 = vadd.f32 %v3581_v33, %v3415_v48 }
 0x1c7   : > { %v3583_v37 = vpop.f32.mrf.mxu0  ;;  %v3623_v11 = vpop.f32.mrf.mxu1 }
 0x1c8   : > { %v5025_v4 = vadd.f32 %v3621_v60, %v2637_v54  ;;  %v3584_v39 = vadd.f32 %v3583_v37, %v3582_v35  ;;  %v3624_v51 = vadd.f32 %v3623_v11, %v3622_v36 }
 0x1c9   : > { %v3585_v40 = vpop.f32.mrf.mxu0  ;;  %v3625_v42 = vpop.f32.mrf.mxu1 }
 0x1ca   : > { %v2642_v38 = vadd.f32 %v3584_v39, %v3415_v48 }
 0x1cb   : > { %v3586_v15 = vpop.f32.mrf.mxu0  ;;  %v3626_v43 = vpop.f32.mrf.mxu1 }
 0x1cc   : > { %v5027_v58 = vadd.f32 %v3624_v51, %v2642_v38  ;;  %v3587_v19 = vadd.f32 %v3586_v15, %v3585_v40  ;;  %v3627_v44 = vadd.f32 %v3626_v43, %v3625_v42 }
 0x1cd   : > { %v3644_v46 = vpop.f32.mrf.mxu0  ;;  %v3684_v1 = vpop.f32.mrf.mxu1 }
 0x1ce   : > { %5288 = vst [vmem:[#allocation2_spill] sm:$0xff] %v5027_v58  ;;  %v2645_v8 = vadd.f32 %v3587_v19, %v3415_v48 }
 0x1cf   : > { %v3645_v47 = vpop.f32.mrf.mxu0  ;;  %v3685_v56 = vpop.f32.mrf.mxu1 }
 0x1d0   : > { %v5029_v49 = vadd.f32 %v3627_v44, %v2645_v8  ;;  %v3646_v43 = vadd.f32 %v3645_v47, %v3644_v46 }
 0x1d1   : > { %v3647_v57 = vpop.f32.mrf.mxu0  ;;  %v5031_v61 = vpop.f32.mrf.mxu1 }
 0x1d2   : > { %5289 = vst [vmem:[#allocation3_spill] sm:$0xff] %v5029_v49  ;;  %v2748_v49 = vadd.f32 %v3646_v43, %v5015_v7 }
 0x1d3   : > { %v3648_v0 = vpop.f32.mrf.mxu0  ;;  %v5033_v2 = vpop.f32.mrf.mxu1 }
 0x1d4   : > { %v3689_v7 = vadd.f32 %v5033_v2, %v5031_v61 }
 0x1d5   : > { %v3650_v3 = vpop.f32.mrf.mxu0  ;;  %v5035_v50 = vpop.f32.mrf.mxu1 }
 0x1d7   : > { %v3651_v12 = vpop.f32.mrf.mxu0  ;;  %v5037_v45 = vpop.f32.mrf.mxu1 }
 0x1d8   : > { %v3652_v46 = vadd.f32 %v3651_v12, %v3650_v3 }
 0x1d9   : > { %v5039_v16 = vpop.f32.mrf.mxu0  ;;  %v5041_v48 = vpop.f32.mrf.mxu1 }
 0x1db   : > { %v3654_v5 = vpop.f32.mrf.mxu0  ;;  %v5043_v22 = vpop.f32.mrf.mxu1 }
 0x1dd   : > { %v5045_v29 = vpop.f32.mrf.mxu0  ;;  %v5047_v9 = vpop.f32.mrf.mxu1 }
 0x1df   : > { %v5049_v10 = vpop.f32.mrf.mxu0  ;;  %v5051_v41 = vpop.f32.mrf.mxu1 }
 0x1e1   : > { %v5053_v52 = vpop.f32.mrf.mxu0  ;;  %v5055_v59 = vpop.f32.mrf.mxu1 }
 0x1e3   : > { %v5057_v13 = vpop.f32.mrf.mxu0  ;;  %v5059_v14 = vpop.f32.mrf.mxu1 }
 0x1e5   : > { %v5061_v17 = vpop.f32.mrf.mxu0  ;;  %v5063_v18 = vpop.f32.mrf.mxu1 }
 0x1e6   : > { %5290 = vst [vmem:[#allocation4_spill] sm:$0xff] %v5063_v18 }
 0x1e7   : > { %v5065_v20 = vpop.f32.mrf.mxu0  ;;  %v5067_v21 = vpop.f32.mrf.mxu1 }
 0x1e8   : > { %5291 = vst [vmem:[#allocation5_spill] sm:$0xff] %v5067_v21  ;;  %v3649_v21 = vadd.f32 %v3648_v0, %v3647_v57 }
 0x1e9   : > { %v5069_v62 = vpop.f32.mrf.mxu0  ;;  %v5071_v23 = vpop.f32.mrf.mxu1 }
 0x1ea   : > { %5292 = vst [vmem:[#allocation6_spill] sm:$0xff] %v5069_v62  ;;  %5293 = vst [vmem:[#allocation7_spill] sm:$0xff] %v5071_v23  ;;  %v2751_v58 = vadd.f32 %v3649_v21, %v5017_v6  ;;  %v3692_v6 = vadd.f32 %v5037_v45, %v5035_v50  ;;  %v3695_v50 = vadd.f32 %v5043_v22, %v5041_v48 }
 0x1eb   : > { %v5073_v24 = vpop.f32.mrf.mxu0  ;;  %v5075_v55 = vpop.f32.mrf.mxu1 }
 0x1ec   : > { %5294 = vst [vmem:[#allocation8_spill] sm:$0xff] %v5073_v24  ;;  %5295 = vst [vmem:[#allocation9_spill] sm:$0xff] %v5075_v55  ;;  %v3686_v24 = vadd.f32 %v3685_v56, %v3684_v1  ;;  %v2756_v1 = vadd.f32 %v3652_v46, %v5019_v63  ;;  %v3655_v56 = vadd.f32 %v3654_v5, %v5039_v16 }
 0x1ed   : > { %v3724_v25 = vpop.f32.mrf.mxu0  ;;  %v3764_v26 = vpop.f32.mrf.mxu1  ;;  %v2816_v12 = vadd.f32 %v3689_v7, %v2751_v58  ;;  %v3658_v63 = vadd.f32 %v5049_v10, %v5045_v29 }
 0x1ef   : > { %v3725_v27 = vpop.f32.mrf.mxu0  ;;  %v3765_v28 = vpop.f32.mrf.mxu1 }
 0x1f1   : > { %v3727_v30 = vpop.f32.mrf.mxu0  ;;  %v3767_v31 = vpop.f32.mrf.mxu1 }
 0x1f3   : > { %v3728_v33 = vpop.f32.mrf.mxu0  ;;  %v3768_v34 = vpop.f32.mrf.mxu1 }
 0x1f4   : > { %v3729_v0 = vadd.f32 %v3728_v33, %v3727_v30  ;;  %v2821_v30 = vadd.f32 %v3692_v6, %v2756_v1  ;;  %v2759_v33 = vadd.f32 %v3655_v56, %v5021_v53  ;;  %v3769_v16 = vadd.f32 %v3768_v34, %v3767_v31 }
 0x1f5   : > { %v3730_v60 = vpop.f32.mrf.mxu0  ;;  %v5077_v35 = vpop.f32.mrf.mxu1  ;;  %v2764_v31 = vadd.f32 %v3658_v63, %v5023_v32  ;;  %v5303_v63 = vld [vmem:[#allocation6_spill] sm:$0xff] }
 0x1f6   : > { %v2824_v53 = vadd.f32 %v3695_v50, %v2759_v33  ;;  %v5302_v33 = vld [vmem:[#allocation2_spill] sm:$0xff] }
 0x1f7   : > { %v3731_v54 = vpop.f32.mrf.mxu0  ;;  %v5079_v36 = vpop.f32.mrf.mxu1 }
 0x1f8   : > { %v3732_v21 = vadd.f32 %v3731_v54, %v3730_v60  ;;  %v3772_v29 = vadd.f32 %v5079_v36, %v5077_v35 }
 0x1f9   : > { %v3733_v37 = vpop.f32.mrf.mxu0  ;;  %v5081_v39 = vpop.f32.mrf.mxu1 }
 0x1fa   : > { %v2886_v45 = vadd.f32 %v3732_v21, %v2821_v30 }
 0x1fb   : > { %v3734_v11 = vpop.f32.mrf.mxu0  ;;  %v5083_v51 = vpop.f32.mrf.mxu1 }
 0x1fd   : > { %v5085_v40 = vpop.f32.mrf.mxu0  ;;  %v5087_v38 = vpop.f32.mrf.mxu1 }
 0x1fe   : > { %5296 = vst [vmem:[#allocation10_spill] sm:$0xff] %v5087_v38 }
 0x1ff   : > { %v5089_v42 = vpop.f32.mrf.mxu0  ;;  %v5091_v15 = vpop.f32.mrf.mxu1 }
 0x200   : > { %5297 = vst [vmem:[#allocation11_spill] sm:$0xff] %v5091_v15  ;;  %v3726_v15 = vadd.f32 %v3725_v27, %v3724_v25 }
 0x201   : > { %v5093_v19 = vpop.f32.mrf.mxu0  ;;  %v5095_v44 = vpop.f32.mrf.mxu1 }
 0x202   : > { %5298 = vst [vmem:[#allocation12_spill] sm:$0xff] %v5095_v44  ;;  %v2813_v44 = vadd.f32 %v3686_v24, %v2748_v49  ;;  %v3766_v49 = vadd.f32 %v3765_v28, %v3764_v26  ;;  %v3735_v28 = vadd.f32 %v3734_v11, %v3733_v37  ;;  %v2951_v11 = vadd.f32 %v3772_v29, %v2886_v45  ;;  %v4023_v45 = vld [vmem:[%s4144_s18 + $0x10] sm:$0xff] }
 0x203   : > { %v5097_v8 = vpop.f32.mrf.mxu0  ;;  %v5099_v55 = vpop.f32.mrf.mxu1 }
 0x204   : > { %5299 = vst [vmem:[#allocation13_spill] sm:$0xff] %v5099_v55  ;;  %v2878_v57 = vadd.f32 %v3726_v15, %v2813_v44  ;;  %v2889_v1 = vadd.f32 %v3735_v28, %v2824_v53 }
 0x205   : > { %v5101_v23 = vpop.f32.mrf.mxu0  ;;  %v5104_v18 = vpop.f32.mrf.mxu1 }
 0x206   : > { %5300 = vst [vmem:[#allocation14_spill] sm:$0xff] %v5101_v23  ;;  %v2943_v27 = vadd.f32 %v3766_v49, %v2878_v57  ;;  %v3661_v57 = vadd.f32 %v5057_v13, %v5053_v52  ;;  %v3738_v52 = vadd.f32 %v5089_v42, %v5085_v40  ;;  %v4022_v42 = vld [vmem:[%s4144_s18 + $0x8] sm:$0xff] }
 0x207   : > { %v5106_v38 = vpop.f32.mrf.mxu0  ;;  %v5108_v62 = vpop.f32.mrf.mxu1 }
 0x209   : > { %v5110_v47 = vpop.f32.mrf.mxu0  ;;  %v5113_v55 = vpop.f32.mrf.mxu1 }
 0x20a   : > { %5301 = vst [vmem:[#allocation15_spill] sm:$0xff] %v5113_v55  ;;  %v2881_v55 = vadd.f32 %v3729_v0, %v2816_v12  ;;  %v4021_v0 = vld [vmem:[%s4144_s18] sm:$0xff]  ;;  %v3664_v12 = vadd.f32 %v5065_v20, %v5061_v17 }
 0x20b   : > { %v5115_v23 = vpop.f32.mrf.mxu0  ;;  %v5119_v43 = vpop.f32.mrf.mxu1 }
 0x20c   : > { %v2946_v54 = vadd.f32 %v3769_v16, %v2881_v55  ;;  %v3698_v55 = vadd.f32 %v5051_v41, %v5047_v9  ;;  %v3775_v9 = vadd.f32 %v5083_v51, %v5081_v39  ;;  %v5304_v16 = vld [vmem:[#allocation8_spill] sm:$0xff] }
 0x20d   : > { %v3804_v3 = vpop.f32.mrf.mxu0  ;;  %v3844_v24 = vpop.f32.mrf.mxu1 }
 0x20e   : > { %v2829_v49 = vadd.f32 %v3698_v55, %v2764_v31  ;;  %v5311_v55 = vld [vmem:[#allocation13_spill] sm:$0xff] }
 0x20f   : > { %v3805_v25 = vpop.f32.mrf.mxu0  ;;  %v3845_v2 = vpop.f32.mrf.mxu1 }
 0x210   : > { %v3806_v61 = vadd.f32 %v3805_v25, %v3804_v3  ;;  %v3846_v5 = vadd.f32 %v3845_v2, %v3844_v24  ;;  %v2767_v3 = vadd.f32 %v3661_v57, %v5025_v4  ;;  %v3701_v25 = vadd.f32 %v5059_v14, %v5055_v59  ;;  %v5305_v14 = vld [vmem:[#allocation10_spill] sm:$0xff] }
 0x211   : > { %v3807_v15 = vpop.f32.mrf.mxu0  ;;  %v3847_v26 = vpop.f32.mrf.mxu1  ;;  %v3741_v4 = vadd.f32 %v5097_v8, %v5093_v19  ;;  %v2894_v20 = vadd.f32 %v3738_v52, %v2829_v49 }
 0x212   : > { %v3008_v58 = vadd.f32 %v3806_v61, %v2943_v27  ;;  %v2954_v27 = vadd.f32 %v3775_v9, %v2889_v1  ;;  %v2832_v30 = vadd.f32 %v3701_v25, %v2767_v3  ;;  %v5313_v3 = vld [vmem:[#allocation7_spill] sm:$0xff] }
 0x213   : > { %v3808_v60 = vpop.f32.mrf.mxu0  ;;  %v3848_v7 = vpop.f32.mrf.mxu1 }
 0x214   : > { %v3073_v44 = vadd.f32 %v3846_v5, %v3008_v58  ;;  %v3809_v46 = vadd.f32 %v3808_v60, %v3807_v15  ;;  %v3849_v48 = vadd.f32 %v3848_v7, %v3847_v26  ;;  %v2772_v15 = vadd.f32 %v3664_v12, %v5302_v33  ;;  %v5306_v5 = vld [vmem:[#allocation11_spill] sm:$0xff]  ;;  %v5307_v60 = vld [vmem:[#allocation4_spill] sm:$0xff]  ;;  %v5309_v7 = vld [vmem:[#allocation14_spill] sm:$0xff] }
 0x215   : > { %v3810_v10 = vpop.f32.mrf.mxu0  ;;  %v3850_v22 = vpop.f32.mrf.mxu1  ;;  %v3667_v58 = vadd.f32 %v5304_v16, %v5303_v63  ;;  %v3778_v19 = vadd.f32 %v5306_v5, %v5305_v14  ;;  %v3744_v53 = vadd.f32 %v5106_v38, %v5309_v7  ;;  %v4024_v38 = vld [vmem:[%s4144_s18 + $0x18] sm:$0xff] }
 0x216   : > { %v3011_v34 = vadd.f32 %v3809_v46, %v2946_v54  ;;  %v5136_v37 = vadd.f32 %v4021_v0, %v3073_v44  ;;  %v5308_v54 = vld [vmem:[#allocation5_spill] sm:$0xff]  ;;  %v2897_v46 = vadd.f32 %v3741_v4, %v2832_v30  ;;  %v5310_v0 = vld [vmem:[#allocation12_spill] sm:$0xff]  ;;  %v3784_v4 = vadd.f32 %v5108_v62, %v5104_v18  ;;  %v5315_v18 = vld [vmem:[#allocation15_spill] sm:$0xff] }
 0x217   : > { %v3811_v56 = vpop.f32.mrf.mxu0  ;;  %v3851_v36 = vpop.f32.mrf.mxu1  ;;  %v3704_v44 = vadd.f32 %v5308_v54, %v5307_v60  ;;  %v2959_v29 = vadd.f32 %v3778_v19, %v2894_v20  ;;  %v5314_v12 = vld [vmem:[#allocation9_spill] sm:$0xff]  ;;  %v3787_v62 = vadd.f32 %v5119_v43, %v5315_v18 }
 0x218   : > { %v3076_v13 = vadd.f32 %v3849_v48, %v3011_v34  ;;  %v3812_v35 = vadd.f32 %v3811_v56, %v3810_v10  ;;  %v3113_v32 = vsel %vm763_vm0, %v5136_v37, 0.0  ;;  %v3852_v6 = vadd.f32 %v3851_v36, %v3850_v22  ;;  %v5312_v56 = vld [vmem:[#allocation3_spill] sm:$0xff] }
 0x219   : > { %v3813_v41 = vpop.f32.mrf.mxu0  ;;  %3114 = vadd.xlane.f32.xlu0 %v3113_v32  ;;  %v3853_v40 = vpop.f32.mrf.mxu1  ;;  %v2837_v22 = vadd.f32 %v3704_v44, %v2772_v15  ;;  %v2775_v52 = vadd.f32 %v3667_v58, %v5312_v56  ;;  %v3707_v9 = vadd.f32 %v5314_v12, %v5313_v3 }
 0x21a   : > { %v3016_v24 = vadd.f32 %v3812_v35, %v2951_v11  ;;  %v5150_v21 = vadd.f32 %v4022_v42, %v3076_v13  ;;  %v3781_v11 = vadd.f32 %v5311_v55, %v5310_v0 }
 0x21b   : > { %v3814_v17 = vpop.f32.mrf.mxu0  ;;  %v3854_v61 = vpop.f32.mrf.mxu1  ;;  %v2902_v49 = vadd.f32 %v3744_v53, %v2837_v22  ;;  %v2840_v20 = vadd.f32 %v3707_v9, %v2775_v52 }
 0x21c   : > { %v3081_v39 = vadd.f32 %v3852_v6, %v3016_v24  ;;  %v3815_v51 = vadd.f32 %v3814_v17, %v3813_v41  ;;  %v3116_v2 = vsel %vm763_vm0, %v5150_v21, 0.0  ;;  %v3855_v26 = vadd.f32 %v3854_v61, %v3853_v40 }
 0x21d   : > { %v3816_v59 = vpop.f32.mrf.mxu0  ;;  %3117 = vadd.xlane.f32.xlu0 %v3116_v2  ;;  %v3856_v50 = vpop.f32.mrf.mxu1  ;;  %v2962_v41 = vadd.f32 %v3781_v11, %v2897_v46  ;;  %v3747_v6 = vadd.f32 %v5115_v23, %v5110_v47  ;;  %v4025_v2 = vld [vmem:[%s4144_s18 + $0x20] sm:$0xff]  ;;  %v2967_v33 = vadd.f32 %v3784_v4, %v2902_v49 }
 0x21e   : > { %v3019_v8 = vadd.f32 %v3815_v51, %v2954_v27  ;;  %v5164_v28 = vadd.f32 %v4023_v45, %v3081_v39 }
 0x21f   : > { %v3817_v57 = vpop.f32.mrf.mxu0  ;;  %v3857_v34 = vpop.f32.mrf.mxu1  ;;  %v2905_v47 = vadd.f32 %v3747_v6, %v2840_v20 }
 0x220   : > { %v3084_v10 = vadd.f32 %v3855_v26, %v3019_v8  ;;  %v3818_v31 = vadd.f32 %v3817_v57, %v3816_v59  ;;  %v3119_v48 = vsel %vm763_vm0, %v5164_v28, 0.0  ;;  %v3858_v35 = vadd.f32 %v3857_v34, %v3856_v50  ;;  %v4026_v8 = vld [vmem:[%s4144_s18 + $0x28] sm:$0xff]  ;;  %v4027_v57 = vld [vmem:[%s4144_s18 + $0x30] sm:$0xff] }
 0x221   : > { %v3819_v1 = vpop.f32.mrf.mxu0  ;;  %3120 = vadd.xlane.f32.xlu1 %v3119_v48  ;;  %v3859_v36 = vpop.f32.mrf.mxu1  ;;  %v2970_v45 = vadd.f32 %v3787_v62, %v2905_v47 }
 0x222   : > { %v3024_v13 = vadd.f32 %v3818_v31, %v2959_v29  ;;  %v5176_v32 = vadd.f32 %v4024_v38, %v3084_v10  ;;  %v4028_v31 = vld [vmem:[%s4144_s18 + $0x38] sm:$0xff] }
 0x223   : > { %v3820_v24 = vpop.f32.mrf.mxu0  ;;  %v3860_v25 = vpop.f32.mrf.mxu1 }
 0x224   : > { %v3089_v40 = vadd.f32 %v3858_v35, %v3024_v13  ;;  %v3821_v42 = vadd.f32 %v3820_v24, %v3819_v1  ;;  %v3122_v27 = vsel %vm763_vm0, %v5176_v32, 0.0  ;;  %v3861_v51 = vadd.f32 %v3860_v25, %v3859_v36 }
 0x225   : > { %v3822_v17 = vpop.f32.mrf.mxu0  ;;  %3123 = vadd.xlane.f32.xlu1 %v3122_v27  ;;  %v3862_v61 = vpop.f32.mrf.mxu1 }
 0x226   : > { %v3027_v39 = vadd.f32 %v3821_v42, %v2962_v41  ;;  %v3107_v30 = vadd.f32 %v4025_v2, %v3089_v40 }
 0x227   : > { %v3823_v23 = vpop.f32.mrf.mxu0  ;;  %v3863_v16 = vpop.f32.mrf.mxu1 }
 0x228   : > { %v3092_v15 = vadd.f32 %v3861_v51, %v3027_v39  ;;  %v3824_v63 = vadd.f32 %v3823_v23, %v3822_v17  ;;  %v3125_v58 = vsel %vm763_vm0, %v3107_v30, 0.0  ;;  %v3864_v5 = vadd.f32 %v3863_v16, %v3862_v61 }
 0x229   : > { %v3825_v59 = vpop.f32.mrf.mxu0  ;;  %3126 = vadd.xlane.f32.xlu0 %v3125_v58  ;;  %v3865_v19 = vpop.f32.mrf.mxu1 }
 0x22a   : > { %v3032_v14 = vadd.f32 %v3824_v63, %v2967_v33  ;;  %v3108_v26 = vadd.f32 %v4026_v8, %v3092_v15 }
 0x22b   : > { %v3826_v50 = vpop.f32.mrf.mxu0  ;;  %v3866_v44 = vpop.f32.mrf.mxu1 }
 0x22c   : > { %v3097_v60 = vadd.f32 %v3864_v5, %v3032_v14  ;;  %v3827_v54 = vadd.f32 %v3826_v50, %v3825_v59  ;;  %v3128_v46 = vsel %vm763_vm0, %v3108_v26, 0.0  ;;  %v3867_v53 = vadd.f32 %v3866_v44, %v3865_v19 }
 0x22d   : > { %3129 = vadd.xlane.f32.xlu1 %v3128_v46 }
 0x22e   : > { %v3035_v7 = vadd.f32 %v3827_v54, %v2970_v45  ;;  %v3109_v29 = vadd.f32 %v4027_v57, %v3097_v60 }
 0x230   : > { %v3100_v10 = vadd.f32 %v3867_v53, %v3035_v7  ;;  %v3131_v43 = vsel %vm763_vm0, %v3109_v29, 0.0  ;;  %v3544_v7 = vld [vmem:[%s5285_s5] ss:$0 sm:$0xff] }
 0x231   : > { %3132 = vadd.xlane.f32.xlu0 %v3131_v43 }
 0x232   : > { %v3110_v34 = vadd.f32 %v4028_v31, %v3100_v10 }
 0x234   : > { %v3134_v48 = vsel %vm763_vm0, %v3110_v34, 0.0 }
 0x235   : > { %3135 = vadd.xlane.f32.xlu1 %v3134_v48 }
 0x2a2   : > { %v3115_v22 = vpop.xlane.xlu0 %3114 }
 0x2a3   : > { %v3138_v0 = vmul.f32 0.015625, %v3115_v22 }
 0x2a5   : > { %v5197_v55 = vsub.f32 %v5136_v37, %v3138_v0 }
 0x2a6   : > { %v3118_v11 = vpop.xlane.xlu0 %3117 }
 0x2a7   : > { %v3139_v1 = vmul.f32 0.015625, %v3118_v11  ;;  %v3154_v56 = vmul.f32 %v5197_v55, %v5197_v55 }
 0x2a9   : > { %v5202_v52 = vsub.f32 %v5150_v21, %v3139_v1  ;;  %v3162_v13 = vsel %vm763_vm0, %v3154_v56, 0.0 }
 0x2aa   : > { %v3121_v35 = vpop.xlane.xlu1 %3120  ;;  %3163 = vadd.xlane.f32.xlu0 %v3162_v13 }
 0x2ab   : > { %v3140_v36 = vmul.f32 0.015625, %v3121_v35  ;;  %v3155_v38 = vmul.f32 %v5202_v52, %v5202_v52 }
 0x2ad   : > { %v5208_v3 = vsub.f32 %v5164_v28, %v3140_v36  ;;  %v3165_v37 = vsel %vm763_vm0, %v3155_v38, 0.0 }
 0x2ae   : > { %v3124_v12 = vpop.xlane.xlu1 %3123  ;;  %3166 = vadd.xlane.f32.xlu1 %v3165_v37 }
 0x2af   : > { %v3141_v9 = vmul.f32 0.015625, %v3124_v12  ;;  %v3156_v21 = vmul.f32 %v5208_v3, %v5208_v3 }
 0x2b1   : > { %v5214_v41 = vsub.f32 %v5176_v32, %v3141_v9  ;;  %v3168_v49 = vsel %vm763_vm0, %v3156_v21, 0.0 }
 0x2b2   : > { %3169 = vadd.xlane.f32.xlu0 %v3168_v49  ;;  %v3127_v24 = vpop.xlane.xlu0 %3126 }
 0x2b3   : > { %v3142_v6 = vmul.f32 0.015625, %v3127_v24  ;;  %v3157_v28 = vmul.f32 %v5214_v41, %v5214_v41 }
 0x2b5   : > { %v5219_v40 = vsub.f32 %v3107_v30, %v3142_v6  ;;  %v3171_v42 = vsel %vm763_vm0, %v3157_v28, 0.0 }
 0x2b6   : > { %v3130_v25 = vpop.xlane.xlu1 %3129  ;;  %3172 = vadd.xlane.f32.xlu1 %v3171_v42 }
 0x2b7   : > { %v3143_v27 = vmul.f32 0.015625, %v3130_v25  ;;  %v3158_v4 = vmul.f32 %v5219_v40, %v5219_v40 }
 0x2b9   : > { %v5224_v32 = vsub.f32 %v3108_v26, %v3143_v27  ;;  %v3174_v17 = vsel %vm763_vm0, %v3158_v4, 0.0 }
 0x2ba   : > { %3175 = vadd.xlane.f32.xlu0 %v3174_v17  ;;  %v3133_v20 = vpop.xlane.xlu0 %3132 }
 0x2bb   : > { %v3144_v39 = vmul.f32 0.015625, %v3133_v20  ;;  %v3159_v51 = vmul.f32 %v5224_v32, %v5224_v32 }
 0x2bd   : > { %v5229_v61 = vsub.f32 %v3109_v29, %v3144_v39  ;;  %v3177_v2 = vsel %vm763_vm0, %v3159_v51, 0.0  ;;  %v3545_v29 = vld [vmem:[%s5286_s6] ss:$0 sm:$0xff] }
 0x2be   : > { %v3136_v30 = vpop.xlane.xlu1 %3135  ;;  %3178 = vadd.xlane.f32.xlu1 %v3177_v2 }
 0x2bf   : > { %v3145_v33 = vmul.f32 0.015625, %v3136_v30  ;;  %v3160_v23 = vmul.f32 %v5229_v61, %v5229_v61 }
 0x2c1   : > { %v5234_v47 = vsub.f32 %v3110_v34, %v3145_v33  ;;  %v3180_v15 = vsel %vm763_vm0, %v3160_v23, 0.0 }
 0x2c2   : > { %3181 = vadd.xlane.f32.xlu0 %v3180_v15 }
 0x2c3   : > { %v3161_v63 = vmul.f32 %v5234_v47, %v5234_v47 }
 0x2c5   : > { %v3183_v16 = vsel %vm763_vm0, %v3161_v63, 0.0 }
 0x2c6   : > { %3184 = vadd.xlane.f32.xlu1 %v3183_v16 }
 0x333   : > { %v3164_v58 = vpop.xlane.xlu0 %3163 }
 0x334   : > { %v3186_v59 = vmul.f32 0.015625, %v3164_v58 }
 0x336   : > { %v3194_v18 = vadd.f32 1e-05, %v3186_v59 }
 0x337   : > { %v3167_v62 = vpop.xlane.xlu1 %3166 }
 0x338   : > { %4005 = vrsqrt.f32 %v3194_v18  ;;  %v3187_v14 = vmul.f32 0.015625, %v3167_v62 }
 0x33a   : > { %v3195_v5 = vadd.f32 1e-05, %v3187_v14 }
 0x33b   : > { %v3170_v19 = vpop.xlane.xlu0 %3169 }
 0x33c   : > { %4007 = vrsqrt.f32 %v3195_v5  ;;  %v3188_v8 = vmul.f32 0.015625, %v3170_v19 }
 0x33e   : > { %v3196_v26 = vadd.f32 1e-05, %v3188_v8 }
 0x33f   : > { %v3173_v50 = vpop.xlane.xlu1 %3172 }
 0x340   : > { %4009 = vrsqrt.f32 %v3196_v26  ;;  %v3189_v45 = vmul.f32 0.015625, %v3173_v50 }
 0x342   : > { %v3197_v60 = vadd.f32 1e-05, %v3189_v45 }
 0x343   : > { %v3176_v54 = vpop.xlane.xlu0 %3175 }
 0x344   : > { %4011 = vrsqrt.f32 %v3197_v60  ;;  %v3190_v44 = vmul.f32 0.015625, %v3176_v54 }
 0x345   : > { %v4006_v46 = vpop.eup %4005 }
 0x346   : > { %v3210_v53 = vmul.f32 %v4006_v46, %v5197_v55  ;;  %v3198_v57 = vadd.f32 1e-05, %v3190_v44 }
 0x347   : > { %v3179_v10 = vpop.xlane.xlu1 %3178 }
 0x348   : > { %v3224_v43 = vmul.f32 %v3544_v7, %v3210_v53  ;;  %4013 = vrsqrt.f32 %v3198_v57  ;;  %v3191_v31 = vmul.f32 0.015625, %v3179_v10 }
 0x349   : > { %v4008_v34 = vpop.eup %4007 }
 0x34a   : > { %v3238_v48 = vadd.f32 %v3545_v29, %v3224_v43  ;;  %v3211_v22 = vmul.f32 %v4008_v34, %v5202_v52  ;;  %v3199_v0 = vadd.f32 1e-05, %v3191_v31 }
 0x34b   : > { %v3182_v55 = vpop.xlane.xlu0 %3181 }
 0x34c   : > { %3246 = vst.msk [vmem:[%s5252_s21] sm:$0xff] %vm763_vm0, %v3238_v48  ;;  %v3225_v11 = vmul.f32 %v3544_v7, %v3211_v22  ;;  %4015 = vrsqrt.f32 %v3199_v0  ;;  %v3192_v1 = vmul.f32 0.015625, %v3182_v55 }
 0x34d   : > { %v4010_v56 = vpop.eup %4009 }
 0x34e   : > { %v3239_v13 = vadd.f32 %v3545_v29, %v3225_v11  ;;  %v3212_v35 = vmul.f32 %v4010_v56, %v5208_v3  ;;  %v3200_v36 = vadd.f32 1e-05, %v3192_v1 }
 0x34f   : > { %v3185_v38 = vpop.xlane.xlu1 %3184 }
 0x350   : > { %3247 = vst.msk [vmem:[%s5252_s21 + $0x8] sm:$0xff] %vm763_vm0, %v3239_v13  ;;  %v3226_v37 = vmul.f32 %v3544_v7, %v3212_v35  ;;  %4017 = vrsqrt.f32 %v3200_v36  ;;  %v3193_v52 = vmul.f32 0.015625, %v3185_v38 }
 0x351   : > { %v4012_v12 = vpop.eup %4011 }
 0x352   : > { %v3240_v9 = vadd.f32 %v3545_v29, %v3226_v37  ;;  %v3213_v21 = vmul.f32 %v4012_v12, %v5214_v41  ;;  %v3201_v49 = vadd.f32 1e-05, %v3193_v52 }
 0x354   : > { %3248 = vst.msk [vmem:[%s5252_s21 + $0x10] sm:$0xff] %vm763_vm0, %v3240_v9  ;;  %v3227_v24 = vmul.f32 %v3544_v7, %v3213_v21  ;;  %4019 = vrsqrt.f32 %v3201_v49 }
 0x355   : > { %v4014_v3 = vpop.eup %4013 }
 0x356   : > { %v3241_v6 = vadd.f32 %v3545_v29, %v3227_v24  ;;  %v3214_v28 = vmul.f32 %v4014_v3, %v5219_v40 }
 0x358   : > { %3249 = vst.msk [vmem:[%s5252_s21 + $0x18] sm:$0xff] %vm763_vm0, %v3241_v6  ;;  %v3228_v42 = vmul.f32 %v3544_v7, %v3214_v28 }
 0x359   : > { %v4016_v25 = vpop.eup %4015 }
 0x35a   : > { %v3242_v27 = vadd.f32 %v3545_v29, %v3228_v42  ;;  %v3215_v4 = vmul.f32 %v4016_v25, %v5224_v32 }
 0x35c   : > { %3250 = vst.msk [vmem:[%s5252_s21 + $0x20] sm:$0xff] %vm763_vm0, %v3242_v27  ;;  %v3229_v41 = vmul.f32 %v3544_v7, %v3215_v4 }
 0x35d   : > { %v4018_v17 = vpop.eup %4017 }
 0x35e   : > { %v3243_v20 = vadd.f32 %v3545_v29, %v3229_v41  ;;  %v3216_v39 = vmul.f32 %v4018_v17, %v5229_v61 }
 0x360   : > { %3251 = vst.msk [vmem:[%s5252_s21 + $0x28] sm:$0xff] %vm763_vm0, %v3243_v20  ;;  %v3230_v51 = vmul.f32 %v3544_v7, %v3216_v39 }
 0x361   : > { %v4020_v40 = vpop.eup %4019 }
 0x362   : > { %v3244_v2 = vadd.f32 %v3545_v29, %v3230_v51  ;;  %v3217_v30 = vmul.f32 %v4020_v40, %v5234_v47 }
 0x364   : > { %3252 = vst.msk [vmem:[%s5252_s21 + $0x30] sm:$0xff] %vm763_vm0, %v3244_v2  ;;  %v3231_v33 = vmul.f32 %v3544_v7, %v3217_v30 }
 0x366   : > { %v3245_v23 = vadd.f32 %v3545_v29, %v3231_v33 }
 0x368   : > { %3253 = vst.msk [vmem:[%s5252_s21 + $0x38] sm:$0xff] %vm763_vm0, %v3245_v23 }
 0x369 PF: > { %s17_s24 = sadd.s32 1, %s4035_s24  }
 0x36a   : > { %p14_p4 = scmp.ge.s32.totalorder %s17_s24, 4  }
 0x36c   :  { %16 = sbr.rel (!%p14_p4) target bundleno = 1 (0x1), region = 78 }

// kernel: _lambda_.24
= control target key start
LH: loop header
LB: loop body
LE: loop exit
PB: predicated region body
PF: predicated region fallthrough
CT: control target
= control target key end

     0   :  { %s4206_s24 = smov 0   ;;  %s5484_s0 = inlined_call_operand.vmem [shape: f32[128,64], index: 0, kind: input, shape index: {}]   ;;  %s5485_s1 = inlined_call_operand.vmem [shape: bf16[64,2048], index: 1, kind: input, shape index: {}]   ;;  %s5486_s2 = inlined_call_operand.vmem [shape: f32[1,2048], index: 2, kind: input, shape index: {}]   ;;  %s5487_s3 = inlined_call_operand.vmem [shape: bf16[2048,64], index: 3, kind: input, shape index: {}]   ;;  %s5488_s4 = inlined_call_operand.vmem [shape: f32[1,64], index: 4, kind: input, shape index: {}]   ;;  %s5489_s5 = inlined_call_operand.vmem [shape: f32[1,64], index: 5, kind: input, shape index: {}]   ;;  %s5490_s6 = inlined_call_operand.vmem [shape: f32[1,64], index: 6, kind: input, shape index: {}]   ;;  %s5491_s7 = inlined_call_operand.vmem [shape: f32[128,4], index: 7, kind: output, shape index: {}]  }
   0x1 LB: > { %s3438_s25 = sadd.s32 4294967295, %s4163_s24   ;;  %p3442_p0 = scmp.ge.s32.totalorder %s4163_s24, 1  ;;  %s4163_s24 = sphi %s4206_s24, %s17_s24  }
   0x2   : > { %p238_p1 = scmp.lt.s32.totalorder %s4163_s24, 3 }
   0x4   : > { %p239_p2 = pnand %p3442_p0, %p238_p1 }
   0x6   : > { %242 = sbr.rel (%p239_p2) target bundleno = 1049 (0x419), region = 48 }
   0xb   : > { %v343_v0 = vld [vmem:[%s5485_s1 + $0x180] sm:$0xff]  ;;  %v344_v2 = vld [vmem:[%s5485_s1 + $0x188] sm:$0xff]  ;;  %s3443_s9 = sshll.u32 %s3438_s25, 3  ;;  %v4165_v8 = vmov 0   ;;  %v345_v31 = vld [vmem:[%s5485_s1 + $0x190] sm:$0xff]  ;;  %vm763_vm0 = vcmask 523264  }
   0xc   : > { %v351_v1 = vld [vmem:[%s5485_s1 + $0x1c0] sm:$0xff]  ;;  %v352_v4 = vld [vmem:[%s5485_s1 + $0x1c8] sm:$0xff]  ;;  %808 = vmatprep.mubr.bf16.mxu0 %v4165_v8  ;;  %881 = vmatprep.mubr.bf16.mxu1 %v4165_v8  ;;  %p271_p3 = scmp.lt.s32.totalorder %s3443_s9, 15  ;;  %v353_v32 = vld [vmem:[%s5485_s1 + $0x1d0] sm:$0xff]  ;;  %vm3246_vm1 = vcmask 130048   ;;  %vm3271_vm2 = vcmask 261248  }
   0xd   : > { %v3496_v3 = vcombine.high %v343_v0, %v351_v1  ;;  %v3495_v5 = vcombine.low %v343_v0, %v351_v1  ;;  %v327_v6 = vld [vmem:[%s5485_s1 + $0x100] sm:$0xff]  ;;  %v3498_v9 = vcombine.high %v344_v2, %v352_v4  ;;  %v3497_v10 = vcombine.low %v344_v2, %v352_v4  ;;  %v328_v12 = vld [vmem:[%s5485_s1 + $0x108] sm:$0xff]  ;;  %v346_v33 = vld [vmem:[%s5485_s1 + $0x198] sm:$0xff] }
   0xe   : > { %v335_v7 = vld [vmem:[%s5485_s1 + $0x140] sm:$0xff]  ;;  %v336_v13 = vld [vmem:[%s5485_s1 + $0x148] sm:$0xff]  ;;  %s5521_s9 = smov (!%p271_p3, %s3443_s9), 15  ;;  %v354_v34 = vld [vmem:[%s5485_s1 + $0x1d8] sm:$0xff]  ;;  %v3500_v39 = vcombine.high %v345_v31, %v353_v32  ;;  %v3499_v44 = vcombine.low %v345_v31, %v353_v32  ;;  %vm3296_vm3 = vcmask 392448   ;;  %vm3321_vm4 = vcmask 523648  }
   0xf   : > { %v3480_v11 = vcombine.high %v327_v6, %v335_v7  ;;  %v311_v14 = vld [vmem:[%s5485_s1 + $0x80] sm:$0xff]  ;;  %784 = vmatprep.subr.bf16.mxu0 %v3496_v3  ;;  %v3482_v15 = vcombine.high %v328_v12, %v336_v13  ;;  %v312_v17 = vld [vmem:[%s5485_s1 + $0x88] sm:$0xff]  ;;  %857 = vmatprep.subr.bf16.mxu1 %v3498_v9  ;;  %v3479_v19 = vcombine.low %v327_v6, %v335_v7  ;;  %s3444_s11 = sshll.u32 %s5521_s9, 3  ;;  %v329_v42 = vld [vmem:[%s5485_s1 + $0x110] sm:$0xff]  ;;  %vm3346_vm5 = vcmask 7168  }
  0x10   : > { %v319_v16 = vld [vmem:[%s5485_s1 + $0xc0] sm:$0xff]  ;;  %v320_v18 = vld [vmem:[%s5485_s1 + $0xc8] sm:$0xff]  ;;  %785 = vmatpush1.bf16.msra.mxu0 %v3495_v5  ;;  %858 = vmatpush1.bf16.msra.mxu1 %v3497_v10  ;;  %v3481_v20 = vcombine.low %v328_v12, %v336_v13  ;;  %s4272_s18 = scalar_lea.vmem %s5484_s0, %s3444_s11  ;;  %v3502_v40 = vcombine.high %v346_v33, %v354_v34  ;;  %v337_v43 = vld [vmem:[%s5485_s1 + $0x150] sm:$0xff]  ;;  %v3501_v47 = vcombine.low %v346_v33, %v354_v34  ;;  %vm3355_vm6 = vcmask 15360   ;;  %s5440_s21 = scalar_lea.vmem %s5491_s7, %s3444_s11 }
  0x11   : > { %786 = vmatprep.subr.bf16.mxu0 %v3480_v11  ;;  %v3464_v21 = vcombine.high %v311_v14, %v319_v16  ;;  %859 = vmatprep.subr.bf16.mxu1 %v3482_v15  ;;  %v3466_v22 = vcombine.high %v312_v17, %v320_v18  ;;  %v295_v23 = vld [vmem:[%s5485_s1] sm:$0xff]  ;;  %v296_v25 = vld [vmem:[%s5485_s1 + $0x8] sm:$0xff]  ;;  %v3463_v27 = vcombine.low %v311_v14, %v319_v16  ;;  %v330_v45 = vld [vmem:[%s5485_s1 + $0x118] sm:$0xff]  ;;  %vm3364_vm7 = vcmask 23552  }
  0x12   : > { %v303_v24 = vld [vmem:[%s5485_s1 + $0x40] sm:$0xff]  ;;  %v304_v26 = vld [vmem:[%s5485_s1 + $0x48] sm:$0xff]  ;;  %v3465_v28 = vcombine.low %v312_v17, %v320_v18  ;;  %v338_v46 = vld [vmem:[%s5485_s1 + $0x158] sm:$0xff]  ;;  %v3484_v48 = vcombine.high %v329_v42, %v337_v43  ;;  %v3483_v56 = vcombine.low %v329_v42, %v337_v43  ;;  %vm3373_vm8 = vcmask 31744  }
  0x13   : > { %v3448_v29 = vcombine.high %v295_v23, %v303_v24  ;;  %v3450_v30 = vcombine.high %v296_v25, %v304_v26  ;;  %v3447_v35 = vcombine.low %v295_v23, %v303_v24  ;;  %v283_v36 = vld [vmem:[%s4272_s18] sm:$0xff]  ;;  %v284_v37 = vld [vmem:[%s4272_s18 + $0x8] sm:$0xff]  ;;  %v3449_v38 = vcombine.low %v296_v25, %v304_v26  ;;  %v313_v49 = vld [vmem:[%s5485_s1 + $0x90] sm:$0xff] }
  0x14   : > { %787 = vmatpush1.bf16.msra.mxu0 %v3479_v19  ;;  %860 = vmatpush1.bf16.msra.mxu1 %v3481_v20  ;;  %v4288_v41 = vpack.c.bf16 %v284_v37, %v283_v36  ;;  %v321_v50 = vld [vmem:[%s5485_s1 + $0xd0] sm:$0xff]  ;;  %v3486_v51 = vcombine.high %v330_v45, %v338_v46  ;;  %v314_v52 = vld [vmem:[%s5485_s1 + $0x98] sm:$0xff]  ;;  %v3485_v57 = vcombine.low %v330_v45, %v338_v46  ;;  %v347_v2 = vld [vmem:[%s5485_s1 + $0x1a0] sm:$0xff] }
  0x15   : > { %788 = vmatprep.subr.bf16.mxu0 %v3464_v21  ;;  %861 = vmatprep.subr.bf16.mxu1 %v3466_v22  ;;  %v322_v53 = vld [vmem:[%s5485_s1 + $0xd8] sm:$0xff]  ;;  %v285_v54 = vld [vmem:[%s4272_s18 + $0x10] sm:$0xff]  ;;  %v3468_v58 = vcombine.high %v313_v49, %v321_v50  ;;  %v3467_v1 = vcombine.low %v313_v49, %v321_v50  ;;  %v287_v3 = vld [vmem:[%s4272_s18 + $0x20] sm:$0xff] }
  0x16   : > { %v286_v55 = vld [vmem:[%s4272_s18 + $0x18] sm:$0xff]  ;;  %v3470_v59 = vcombine.high %v314_v52, %v322_v53  ;;  %v297_v61 = vld [vmem:[%s5485_s1 + $0x10] sm:$0xff]  ;;  %v288_v4 = vld [vmem:[%s4272_s18 + $0x28] sm:$0xff]  ;;  %v3469_v5 = vcombine.low %v314_v52, %v322_v53 }
  0x17   : > { %v4322_v60 = vpack.c.bf16 %v286_v55, %v285_v54  ;;  %v305_v62 = vld [vmem:[%s5485_s1 + $0x50] sm:$0xff]  ;;  %v298_v63 = vld [vmem:[%s5485_s1 + $0x18] sm:$0xff]  ;;  %v355_v7 = vld [vmem:[%s5485_s1 + $0x1e0] sm:$0xff]  ;;  %v4356_v15 = vpack.c.bf16 %v288_v4, %v287_v3 }
  0x18   : > { %789 = vmatpush1.bf16.msra.mxu0 %v3463_v27  ;;  %862 = vmatpush1.bf16.msra.mxu1 %v3465_v28  ;;  %v306_v0 = vld [vmem:[%s5485_s1 + $0x58] sm:$0xff]  ;;  %v3452_v6 = vcombine.high %v297_v61, %v305_v62  ;;  %v348_v10 = vld [vmem:[%s5485_s1 + $0x1a8] sm:$0xff]  ;;  %v3451_v12 = vcombine.low %v297_v61, %v305_v62  ;;  %v3504_v14 = vcombine.high %v347_v2, %v355_v7  ;;  %v289_v17 = vld [vmem:[%s4272_s18 + $0x30] sm:$0xff] }
  0x19   : > { %790 = vmatprep.subr.bf16.mxu0 %v3448_v29  ;;  %863 = vmatprep.subr.bf16.mxu1 %v3450_v30  ;;  %v3454_v9 = vcombine.high %v298_v63, %v306_v0  ;;  %v356_v11 = vld [vmem:[%s5485_s1 + $0x1e8] sm:$0xff]  ;;  %v3453_v13 = vcombine.low %v298_v63, %v306_v0  ;;  %v290_v18 = vld [vmem:[%s4272_s18 + $0x38] sm:$0xff]  ;;  %v331_v20 = vld [vmem:[%s5485_s1 + $0x120] sm:$0xff]  ;;  %v3503_v24 = vcombine.low %v347_v2, %v355_v7 }
  0x1a   : > { %v3506_v16 = vcombine.high %v348_v10, %v356_v11  ;;  %v4366_v19 = vpack.c.bf16 %v290_v18, %v289_v17  ;;  %v339_v21 = vld [vmem:[%s5485_s1 + $0x160] sm:$0xff]  ;;  %v332_v22 = vld [vmem:[%s5485_s1 + $0x128] sm:$0xff]  ;;  %v3505_v27 = vcombine.low %v348_v10, %v356_v11  ;;  %v349_v42 = vld [vmem:[%s5485_s1 + $0x1b0] sm:$0xff] }
  0x1b   : > { %v340_v23 = vld [vmem:[%s5485_s1 + $0x168] sm:$0xff]  ;;  %v315_v25 = vld [vmem:[%s5485_s1 + $0xa0] sm:$0xff]  ;;  %v3488_v30 = vcombine.high %v331_v20, %v339_v21  ;;  %v3487_v32 = vcombine.low %v331_v20, %v339_v21  ;;  %v357_v43 = vld [vmem:[%s5485_s1 + $0x1f0] sm:$0xff] }
  0x1c   : > { %791 = vmatpush1.bf16.msra.mxu0 %v3447_v35  ;;  %864 = vmatpush1.bf16.msra.mxu1 %v3449_v38  ;;  %v323_v26 = vld [vmem:[%s5485_s1 + $0xe0] sm:$0xff]  ;;  %v316_v28 = vld [vmem:[%s5485_s1 + $0xa8] sm:$0xff]  ;;  %v3490_v31 = vcombine.high %v332_v22, %v340_v23  ;;  %v3489_v33 = vcombine.low %v332_v22, %v340_v23  ;;  %v350_v46 = vld [vmem:[%s5485_s1 + $0x1b8] sm:$0xff] }
  0x1d   : > { %930 = vmatprep.subr.bf16.mxu0 %v3500_v39  ;;  %1003 = vmatprep.subr.bf16.mxu1 %v3502_v40  ;;  %v324_v29 = vld [vmem:[%s5485_s1 + $0xe8] sm:$0xff]  ;;  %v3472_v34 = vcombine.high %v315_v25, %v323_v26  ;;  %v299_v35 = vld [vmem:[%s5485_s1 + $0x20] sm:$0xff]  ;;  %v3471_v40 = vcombine.low %v315_v25, %v323_v26  ;;  %v333_v53 = vld [vmem:[%s5485_s1 + $0x130] sm:$0xff] }
  0x1e   : > { %v307_v36 = vld [vmem:[%s5485_s1 + $0x60] sm:$0xff]  ;;  %v3474_v37 = vcombine.high %v316_v28, %v324_v29  ;;  %v300_v38 = vld [vmem:[%s5485_s1 + $0x28] sm:$0xff]  ;;  %v341_v54 = vld [vmem:[%s5485_s1 + $0x170] sm:$0xff] }
  0x1f   : > { %3511 = vmatmul.mubr.msk.bf16.vlgmr.msra.gmra.mxu0 %vm763_vm0, %v4288_v41  ;;  %3515 = vmatmul.mubr.msk.bf16.vlgmr.msra.gmra.mxu1 %vm763_vm0, %v4288_v41  ;;  %v308_v39 = vld [vmem:[%s5485_s1 + $0x68] sm:$0xff]  ;;  %v3456_v45 = vcombine.high %v299_v35, %v307_v36  ;;  %v3455_v49 = vcombine.low %v299_v35, %v307_v36  ;;  %v334_v55 = vld [vmem:[%s5485_s1 + $0x138] sm:$0xff]  ;;  %v3492_v62 = vcombine.high %v333_v53, %v341_v54  ;;  %v4009_v23 = vld [vmem:[%s5487_s3 + $0x70] sm:$0xff]  }
  0x20   : > { %931 = vmatpush1.bf16.msra.mxu0 %v3499_v44  ;;  %1004 = vmatpush1.bf16.msra.mxu1 %v3501_v47  ;;  %v3473_v44 = vcombine.low %v316_v28, %v324_v29  ;;  %v358_v47 = vld [vmem:[%s5485_s1 + $0x1f8] sm:$0xff]  ;;  %v3457_v50 = vcombine.low %v300_v38, %v308_v39  ;;  %v3491_v2 = vcombine.low %v333_v53, %v341_v54  ;;  %v4011_v25 = vld [vmem:[%s5487_s3 + $0x30] sm:$0xff]   ;;  %v4015_v28 = vld [vmem:[%s5487_s3 + $0x28] sm:$0xff]  }
  0x21   : > { %818 = vmatprep.mubr.bf16.mxu0 %v4165_v8  ;;  %891 = vmatprep.mubr.bf16.mxu1 %v4165_v8  ;;  %v3510_v52 = vcombine.high %v350_v46, %v358_v47  ;;  %v3509_v61 = vcombine.low %v350_v46, %v358_v47  ;;  %v318_v0 = vld [vmem:[%s5485_s1 + $0xb8] sm:$0xff]  ;;  %v4012_v26 = vld [vmem:[%s5487_s3 + $0xb0] sm:$0xff]   ;;  %v4016_v29 = vld [vmem:[%s5487_s3 + $0xa8] sm:$0xff]  }
  0x22   : > { %932 = vmatprep.subr.bf16.mxu0 %v3484_v48  ;;  %1005 = vmatprep.subr.bf16.mxu1 %v3486_v51  ;;  %v3458_v48 = vcombine.high %v300_v38, %v308_v39  ;;  %v3508_v51 = vcombine.high %v349_v42, %v357_v43  ;;  %v310_v10 = vld [vmem:[%s5485_s1 + $0x78] sm:$0xff]  ;;  %v4026_v38 = vld [vmem:[%s5487_s3 + $0xd0] sm:$0xff]   ;;  %v4035_v46 = vld [vmem:[%s5487_s3] sm:$0xff]  }
  0x23   : > { %v4005_v17 = vld [vmem:[%s5487_s3 + $0x78] sm:$0xff]   ;;  %v4027_v39 = vld [vmem:[%s5487_s3 + $0x10] sm:$0xff]   ;;  %v4036_v47 = vld [vmem:[%s5487_s3 + $0x80] sm:$0xff]  }
  0x24   : > { %933 = vmatpush1.bf16.msra.mxu0 %v3483_v56  ;;  %1006 = vmatpush1.bf16.msra.mxu1 %v3485_v57  ;;  %v342_v56 = vld [vmem:[%s5485_s1 + $0x178] sm:$0xff]  ;;  %v3507_v57 = vcombine.low %v349_v42, %v357_v43  ;;  %v4029_v42 = vld [vmem:[%s5487_s3 + $0x48] sm:$0xff]   ;;  %v4638_v54 = vld [vmem:[%s5486_s2] sm:$0xff] }
  0x25   : > { %934 = vmatprep.subr.bf16.mxu0 %v3468_v58  ;;  %1007 = vmatprep.subr.bf16.mxu1 %v3470_v59  ;;  %v317_v58 = vld [vmem:[%s5485_s1 + $0xb0] sm:$0xff]  ;;  %v3494_v63 = vcombine.high %v334_v55, %v342_v56  ;;  %v3493_v3 = vcombine.low %v334_v55, %v342_v56  ;;  %v4006_v18 = vld [vmem:[%s5487_s3 + $0xf8] sm:$0xff]   ;;  %v4032_v43 = vld [vmem:[%s5487_s3 + $0x88] sm:$0xff]  }
  0x26   : > { %v325_v59 = vld [vmem:[%s5485_s1 + $0xf0] sm:$0xff]  ;;  %v4007_v21 = vld [vmem:[%s5487_s3 + $0x38] sm:$0xff]  }
  0x27   : > { %3512 = vmatmul.mubr.msk.bf16.gmra.mxu0 %vm763_vm0, %v4322_v60  ;;  %3516 = vmatmul.mubr.msk.bf16.gmra.mxu1 %vm763_vm0, %v4322_v60  ;;  %v3476_v4 = vcombine.high %v317_v58, %v325_v59  ;;  %v3475_v11 = vcombine.low %v317_v58, %v325_v59  ;;  %v4008_v22 = vld [vmem:[%s5487_s3 + $0xb8] sm:$0xff]  }
  0x28   : > { %828 = vmatprep.mubr.bf16.mxu0 %v4165_v8  ;;  %901 = vmatprep.mubr.bf16.mxu1 %v4165_v8  ;;  %v4023_v35 = vld [vmem:[%s5487_s3 + $0x18] sm:$0xff]  }
  0x29   : > { %935 = vmatpush1.bf16.msra.mxu0 %v3467_v1  ;;  %1008 = vmatpush1.bf16.msra.mxu1 %v3469_v5  ;;  %v326_v1 = vld [vmem:[%s5485_s1 + $0xf8] sm:$0xff]  ;;  %v301_v5 = vld [vmem:[%s5485_s1 + $0x30] sm:$0xff] }
  0x2a   : > { %936 = vmatprep.subr.bf16.mxu0 %v3452_v6  ;;  %1009 = vmatprep.subr.bf16.mxu1 %v3454_v9  ;;  %v309_v6 = vld [vmem:[%s5485_s1 + $0x70] sm:$0xff]  ;;  %v3478_v7 = vcombine.high %v318_v0, %v326_v1  ;;  %v302_v9 = vld [vmem:[%s5485_s1 + $0x38] sm:$0xff] }
  0x2b   : > { %v3461_v20 = vcombine.low %v302_v9, %v310_v10  ;;  %v4024_v36 = vld [vmem:[%s5487_s3 + $0x98] sm:$0xff]  }
  0x2d   : > { %937 = vmatpush1.bf16.msra.mxu0 %v3451_v12  ;;  %1010 = vmatpush1.bf16.msra.mxu1 %v3453_v13  ;;  %v3477_v12 = vcombine.low %v318_v0, %v326_v1  ;;  %v3460_v13 = vcombine.high %v301_v5, %v309_v6 }
  0x2e   : > { %1076 = vmatprep.subr.bf16.mxu0 %v3504_v14  ;;  %1149 = vmatprep.subr.bf16.mxu1 %v3506_v16  ;;  %v3462_v14 = vcombine.high %v302_v9, %v310_v10  ;;  %v3459_v16 = vcombine.low %v301_v5, %v309_v6 }
  0x2f   : > { %3513 = vmatmul.mubr.msk.bf16.gmra.mxu0 %vm763_vm0, %v4356_v15  ;;  %3517 = vmatmul.mubr.msk.bf16.gmra.mxu1 %vm763_vm0, %v4356_v15 }
  0x30   : > { %838 = vmatprep.mubr.bf16.mxu0 %v4165_v8  ;;  %911 = vmatprep.mubr.bf16.mxu1 %v4165_v8 }
  0x37   : > { %3514 = vmatmul.mubr.msk.bf16.gmra.mxu0 %vm763_vm0, %v4366_v19  ;;  %3518 = vmatmul.mubr.msk.bf16.gmra.mxu1 %vm763_vm0, %v4366_v19 }
  0x38   : > { %954 = vmatprep.mubr.bf16.mxu0 %v4165_v8  ;;  %1027 = vmatprep.mubr.bf16.mxu1 %v4165_v8 }
  0x3f   : > { %3519 = vmatmul.mubr.msk.bf16.vlgmr.msra.gmra.mxu0 %vm763_vm0, %v4288_v41  ;;  %3523 = vmatmul.mubr.msk.bf16.vlgmr.msra.gmra.mxu1 %vm763_vm0, %v4288_v41 }
  0x40   : > { %1077 = vmatpush1.bf16.msra.mxu0 %v3503_v24  ;;  %1150 = vmatpush1.bf16.msra.mxu1 %v3505_v27  ;;  %v4010_v24 = vld [vmem:[%s5487_s3 + $0xf0] sm:$0xff]   ;;  %v4013_v27 = vld [vmem:[%s5487_s3 + $0x68] sm:$0xff]  }
  0x41   : > { %964 = vmatprep.mubr.bf16.mxu0 %v4165_v8  ;;  %1037 = vmatprep.mubr.bf16.mxu1 %v4165_v8 }
  0x42   : > { %1078 = vmatprep.subr.bf16.mxu0 %v3488_v30  ;;  %1151 = vmatprep.subr.bf16.mxu1 %v3490_v31  ;;  %v4017_v30 = vld [vmem:[%s5487_s3 + $0x60] sm:$0xff]  }
  0x43   : > { %v4018_v31 = vld [vmem:[%s5487_s3 + $0xe0] sm:$0xff]  }
  0x44   : > { %1079 = vmatpush1.bf16.msra.mxu0 %v3487_v32  ;;  %1152 = vmatpush1.bf16.msra.mxu1 %v3489_v33  ;;  %v4019_v32 = vld [vmem:[%s5487_s3 + $0x20] sm:$0xff]  }
  0x45   : > { %1080 = vmatprep.subr.bf16.mxu0 %v3472_v34  ;;  %1153 = vmatprep.subr.bf16.mxu1 %v3474_v37  ;;  %v4020_v33 = vld [vmem:[%s5487_s3 + $0xa0] sm:$0xff]   ;;  %v4021_v34 = vld [vmem:[%s5487_s3 + $0x58] sm:$0xff]   ;;  %v4025_v37 = vld [vmem:[%s5487_s3 + $0x50] sm:$0xff]  }
  0x47   : > { %3520 = vmatmul.mubr.msk.bf16.gmra.mxu0 %vm763_vm0, %v4322_v60  ;;  %3524 = vmatmul.mubr.msk.bf16.gmra.mxu1 %vm763_vm0, %v4322_v60 }
  0x48   : > { %974 = vmatprep.mubr.bf16.mxu0 %v4165_v8  ;;  %1047 = vmatprep.mubr.bf16.mxu1 %v4165_v8 }
  0x49   : > { %1081 = vmatpush1.bf16.msra.mxu0 %v3471_v40  ;;  %1154 = vmatpush1.bf16.msra.mxu1 %v3473_v44  ;;  %v4028_v40 = vld [vmem:[%s5487_s3 + $0x90] sm:$0xff]   ;;  %v4033_v44 = vld [vmem:[%s5487_s3 + $0x40] sm:$0xff]  }
  0x4a   : > { %1082 = vmatprep.subr.bf16.mxu0 %v3456_v45  ;;  %1155 = vmatprep.subr.bf16.mxu1 %v3458_v48  ;;  %v4034_v45 = vld [vmem:[%s5487_s3 + $0xc0] sm:$0xff]   ;;  %v4037_v48 = vld [vmem:[%s5487_s3 + $0x178] sm:$0xff]  }
  0x4d   : > { %1083 = vmatpush1.bf16.msra.mxu0 %v3455_v49  ;;  %1156 = vmatpush1.bf16.msra.mxu1 %v3457_v50  ;;  %v363_v49 = vlaneseq }
  0x4e   : > { %1222 = vmatprep.subr.bf16.mxu0 %v3508_v51  ;;  %1295 = vmatprep.subr.bf16.mxu1 %v3510_v52 }
  0x4f   : > { %3521 = vmatmul.mubr.msk.bf16.gmra.mxu0 %vm763_vm0, %v4356_v15  ;;  %3525 = vmatmul.mubr.msk.bf16.gmra.mxu1 %vm763_vm0, %v4356_v15  ;;  %v4630_v50 = vshrl.u32 %v363_v49, 7 }
  0x50   : > { %984 = vmatprep.mubr.bf16.mxu0 %v4165_v8  ;;  %1057 = vmatprep.mubr.bf16.mxu1 %v4165_v8 }
  0x51   : > { %v369_v51 = vsub.s32 1, %v4630_v50  ;;  %v365_v52 = vsub.s32 0, %v4630_v50  ;;  %v377_v53 = vsub.s32 3, %v4630_v50  ;;  %v373_v55 = vsub.s32 2, %v4630_v50 }
  0x53   : > { %v4644_v58 = vrot.slane %v4638_v54, %v369_v51  ;;  %v4649_v59 = vrot.slane %v4638_v54, %v365_v52 }
  0x57   : > { %3522 = vmatmul.mubr.msk.bf16.gmra.mxu0 %vm763_vm0, %v4366_v19  ;;  %3526 = vmatmul.mubr.msk.bf16.gmra.mxu1 %vm763_vm0, %v4366_v19 }
  0x58   : > { %1100 = vmatprep.mubr.bf16.mxu0 %v4165_v8  ;;  %1173 = vmatprep.mubr.bf16.mxu1 %v4165_v8 }
  0x5f   : > { %3527 = vmatmul.mubr.msk.bf16.vlgmr.msra.gmra.mxu0 %vm763_vm0, %v4288_v41  ;;  %3531 = vmatmul.mubr.msk.bf16.vlgmr.msra.gmra.mxu1 %vm763_vm0, %v4288_v41 }
  0x60   : > { %1223 = vmatpush1.bf16.msra.mxu0 %v3507_v57  ;;  %1296 = vmatpush1.bf16.msra.mxu1 %v3509_v61 }
  0x61   : > { %1110 = vmatprep.mubr.bf16.mxu0 %v4165_v8  ;;  %1183 = vmatprep.mubr.bf16.mxu1 %v4165_v8 }
  0x62   : > { %1224 = vmatprep.subr.bf16.mxu0 %v3492_v62  ;;  %1297 = vmatprep.subr.bf16.mxu1 %v3494_v63  ;;  %v4654_v62 = vrot.slane %v4638_v54, %v377_v53  ;;  %v4659_v63 = vrot.slane %v4638_v54, %v373_v55 }
  0x64   : > { %1225 = vmatpush1.bf16.msra.mxu0 %v3491_v2  ;;  %1298 = vmatpush1.bf16.msra.mxu1 %v3493_v3 }
  0x65   : > { %1226 = vmatprep.subr.bf16.mxu0 %v3476_v4  ;;  %1299 = vmatprep.subr.bf16.mxu1 %v3478_v7 }
  0x67   : > { %3528 = vmatmul.mubr.msk.bf16.gmra.mxu0 %vm763_vm0, %v4322_v60  ;;  %3532 = vmatmul.mubr.msk.bf16.gmra.mxu1 %vm763_vm0, %v4322_v60 }
  0x68   : > { %1120 = vmatprep.mubr.bf16.mxu0 %v4165_v8  ;;  %1193 = vmatprep.mubr.bf16.mxu1 %v4165_v8 }
  0x69   : > { %1227 = vmatpush1.bf16.msra.mxu0 %v3475_v11  ;;  %1300 = vmatpush1.bf16.msra.mxu1 %v3477_v12 }
  0x6a   : > { %1228 = vmatprep.subr.bf16.mxu0 %v3460_v13  ;;  %1301 = vmatprep.subr.bf16.mxu1 %v3462_v14 }
  0x6d   : > { %1229 = vmatpush1.bf16.msra.mxu0 %v3459_v16  ;;  %1302 = vmatpush1.bf16.msra.mxu1 %v3461_v20 }
  0x6e   : > { %3676 = vmatprep.subr.bf16.mxu0 %v4005_v17  ;;  %3716 = vmatprep.subr.bf16.mxu1 %v4006_v18 }
  0x6f   : > { %3529 = vmatmul.mubr.msk.bf16.gmra.mxu0 %vm763_vm0, %v4356_v15  ;;  %3533 = vmatmul.mubr.msk.bf16.gmra.mxu1 %vm763_vm0, %v4356_v15 }
  0x70   : > { %1130 = vmatprep.mubr.bf16.mxu0 %v4165_v8  ;;  %1203 = vmatprep.mubr.bf16.mxu1 %v4165_v8 }
  0x77   : > { %3530 = vmatmul.mubr.msk.bf16.gmra.mxu0 %vm763_vm0, %v4366_v19  ;;  %3534 = vmatmul.mubr.msk.bf16.gmra.mxu1 %vm763_vm0, %v4366_v19 }
  0x78   : > { %1246 = vmatprep.mubr.bf16.mxu0 %v4165_v8  ;;  %1319 = vmatprep.mubr.bf16.mxu1 %v4165_v8 }
  0x7f   : > { %3535 = vmatmul.mubr.msk.bf16.vlgmr.msra.gmra.mxu0 %vm763_vm0, %v4288_v41  ;;  %3539 = vmatmul.mubr.msk.bf16.vlgmr.msra.gmra.mxu1 %vm763_vm0, %v4288_v41  ;;  %v4014_v41 = vld [vmem:[%s5487_s3 + $0xe8] sm:$0xff]  }
  0x80   : > { %1256 = vmatprep.mubr.bf16.mxu0 %v4165_v8  ;;  %1329 = vmatprep.mubr.bf16.mxu1 %v4165_v8 }
  0x81   : > { %3677 = vmatpush3.bf16.msra.mxu0 %v4007_v21  ;;  %3717 = vmatpush3.bf16.msra.mxu1 %v4008_v22 }
  0x82   : > { %3678 = vmatprep.subr.bf16.mxu0 %v4009_v23  ;;  %3718 = vmatprep.subr.bf16.mxu1 %v4010_v24 }
  0x85   : > { %3679 = vmatpush3.bf16.msra.mxu0 %v4011_v25  ;;  %3719 = vmatpush3.bf16.msra.mxu1 %v4012_v26 }
  0x86   : > { %3680 = vmatprep.subr.bf16.mxu0 %v4013_v27  ;;  %3720 = vmatprep.subr.bf16.mxu1 %v4014_v41 }
  0x87   : > { %3536 = vmatmul.mubr.msk.bf16.gmra.mxu0 %vm763_vm0, %v4322_v60  ;;  %3540 = vmatmul.mubr.msk.bf16.gmra.mxu1 %vm763_vm0, %v4322_v60  ;;  %v4022_v60 = vld [vmem:[%s5487_s3 + $0xd8] sm:$0xff]  }
  0x88   : > { %1266 = vmatprep.mubr.bf16.mxu0 %v4165_v8  ;;  %1339 = vmatprep.mubr.bf16.mxu1 %v4165_v8 }
  0x89   : > { %3681 = vmatpush3.bf16.msra.mxu0 %v4015_v28  ;;  %3721 = vmatpush3.bf16.msra.mxu1 %v4016_v29  ;;  %v4039_v28 = vld [vmem:[%s5487_s3 + $0x138] sm:$0xff]  }
  0x8a   : > { %3682 = vmatprep.subr.bf16.mxu0 %v4017_v30  ;;  %3722 = vmatprep.subr.bf16.mxu1 %v4018_v31 }
  0x8d   : > { %3683 = vmatpush3.bf16.msra.mxu0 %v4019_v32  ;;  %3723 = vmatpush3.bf16.msra.mxu1 %v4020_v33  ;;  %v4040_v32 = vld [vmem:[%s5487_s3 + $0x1b8] sm:$0xff]   ;;  %v4041_v33 = vld [vmem:[%s5487_s3 + $0x170] sm:$0xff]  }
  0x8e   : > { %3684 = vmatprep.subr.bf16.mxu0 %v4021_v34  ;;  %3724 = vmatprep.subr.bf16.mxu1 %v4022_v60 }
  0x8f   : > { %3537 = vmatmul.mubr.msk.bf16.gmra.mxu0 %vm763_vm0, %v4356_v15  ;;  %3541 = vmatmul.mubr.msk.bf16.gmra.mxu1 %vm763_vm0, %v4356_v15  ;;  %v4030_v15 = vld [vmem:[%s5487_s3 + $0xc8] sm:$0xff]  }
  0x90   : > { %1276 = vmatprep.mubr.bf16.mxu0 %v4165_v8  ;;  %1349 = vmatprep.mubr.bf16.mxu1 %v4165_v8  ;;  %v4031_v8 = vld [vmem:[%s5487_s3 + $0x8] sm:$0xff]  }
  0x91   : > { %3685 = vmatpush3.bf16.msra.mxu0 %v4023_v35  ;;  %3725 = vmatpush3.bf16.msra.mxu1 %v4024_v36 }
  0x92   : > { %3686 = vmatprep.subr.bf16.mxu0 %v4025_v37  ;;  %3726 = vmatprep.subr.bf16.mxu1 %v4026_v38  ;;  %v4042_v37 = vld [vmem:[%s5487_s3 + $0x1f0] sm:$0xff]  }
  0x95   : > { %3687 = vmatpush3.bf16.msra.mxu0 %v4027_v39  ;;  %3727 = vmatpush3.bf16.msra.mxu1 %v4028_v40 }
  0x96   : > { %3688 = vmatprep.subr.bf16.mxu0 %v4029_v42  ;;  %3728 = vmatprep.subr.bf16.mxu1 %v4030_v15 }
  0x97   : > { %3538 = vmatmul.mubr.msk.bf16.gmra.mxu0 %vm763_vm0, %v4366_v19  ;;  %3542 = vmatmul.mubr.msk.bf16.gmra.mxu1 %vm763_vm0, %v4366_v19  ;;  %v4038_v19 = vld [vmem:[%s5487_s3 + $0x1f8] sm:$0xff]  }
  0x99   : > { %3689 = vmatpush3.bf16.msra.mxu0 %v4031_v8  ;;  %3729 = vmatpush3.bf16.msra.mxu1 %v4032_v43 }
  0x9a   : > { %3690 = vmatprep.subr.bf16.mxu0 %v4033_v44  ;;  %3730 = vmatprep.subr.bf16.mxu1 %v4034_v45  ;;  %v4043_v44 = vld [vmem:[%s5487_s3 + $0x130] sm:$0xff]  }
  0x9d   : > { %3691 = vmatpush3.bf16.msra.mxu0 %v4035_v46  ;;  %3731 = vmatpush3.bf16.msra.mxu1 %v4036_v47 }
  0x9e   : > { %3756 = vmatprep.subr.bf16.mxu0 %v4037_v48  ;;  %3796 = vmatprep.subr.bf16.mxu1 %v4038_v19  ;;  %v4044_v48 = vld [vmem:[%s5487_s3 + $0x1b0] sm:$0xff]   ;;  %v4045_v19 = vld [vmem:[%s5487_s3 + $0x168] sm:$0xff]  }
  0xdf   : > { %v810_v56 = vpop.f32.mrf.mxu0  ;;  %v883_v57 = vpop.f32.mrf.mxu1 }
  0xe0   : > { %v811_v5 = vadd.f32 %v810_v56, %v4649_v59  ;;  %v884_v10 = vadd.f32 %v883_v57, %v4659_v63 }
  0xe1   : > { %v812_v61 = vpop.f32.mrf.mxu0  ;;  %v885_v0 = vpop.f32.mrf.mxu1 }
  0xe2   : > { %v813_v2 = vadd.f32 %v812_v61, %v4644_v58  ;;  %v886_v6 = vadd.f32 %v885_v0, %v4654_v62  ;;  %v1360_v22 = vmax.f32 %v811_v5, 0.0  ;;  %v1362_v26 = vmax.f32 %v884_v10, 0.0  ;;  %v4046_v0 = vld [vmem:[%s5487_s3 + $0x1e8] sm:$0xff]  }
  0xe3   : > { %v814_v1 = vpop.f32.mrf.mxu0  ;;  %v887_v4 = vpop.f32.mrf.mxu1 }
  0xe4   : > { %v815_v3 = vadd.f32 %v814_v1, %v4649_v59  ;;  %v888_v7 = vadd.f32 %v887_v4, %v4659_v63  ;;  %v1361_v17 = vmax.f32 %v813_v2, 0.0  ;;  %v1363_v23 = vmax.f32 %v886_v6, 0.0 }
  0xe5   : > { %v816_v9 = vpop.f32.mrf.mxu0  ;;  %v889_v12 = vpop.f32.mrf.mxu1 }
  0xe6   : > { %v817_v11 = vadd.f32 %v816_v9, %v4644_v58  ;;  %v1376_v13 = vmax.f32 %v815_v3, 0.0  ;;  %v890_v14 = vadd.f32 %v889_v12, %v4654_v62  ;;  %v1378_v18 = vmax.f32 %v888_v7, 0.0  ;;  %v4047_v9 = vld [vmem:[%s5487_s3 + $0x128] sm:$0xff]  }
  0xe7   : > { %v820_v16 = vpop.f32.mrf.mxu0  ;;  %v893_v21 = vpop.f32.mrf.mxu1 }
  0xe8   : > { %v1377_v20 = vmax.f32 %v817_v11, 0.0  ;;  %v1379_v24 = vmax.f32 %v890_v14, 0.0  ;;  %v1488_v29 = vpack.c.bf16 %v1376_v13, %v1360_v22  ;;  %v1490_v34 = vpack.c.bf16 %v1378_v18, %v1362_v26  ;;  %v4048_v13 = vld [vmem:[%s5487_s3 + $0x1a8] sm:$0xff]   ;;  %v4049_v14 = vld [vmem:[%s5487_s3 + $0x160] sm:$0xff]  }
  0xe9   : > { %v822_v25 = vpop.f32.mrf.mxu0  ;;  %v895_v27 = vpop.f32.mrf.mxu1  ;;  %v821_v38 = vadd.f32 %v820_v16, %v4649_v59  ;;  %v894_v15 = vadd.f32 %v893_v21, %v4659_v63  ;;  %v4050_v21 = vld [vmem:[%s5487_s3 + $0x1e0] sm:$0xff]  }
  0xea   : > { %v1489_v41 = vpack.c.bf16 %v1377_v20, %v1361_v17  ;;  %v1491_v31 = vpack.c.bf16 %v1379_v24, %v1363_v23  ;;  %v823_v60 = vadd.f32 %v822_v25, %v4644_v58  ;;  %v896_v39 = vadd.f32 %v895_v27, %v4654_v62 }
  0xeb   : > { %v824_v30 = vpop.f32.mrf.mxu0  ;;  %v897_v36 = vpop.f32.mrf.mxu1  ;;  %v1392_v1 = vmax.f32 %v821_v38, 0.0  ;;  %v1394_v5 = vmax.f32 %v894_v15, 0.0 }
  0xec   : > { %v825_v35 = vadd.f32 %v824_v30, %v4649_v59  ;;  %2615 = vmatprep.mubr.bf16.mxu0 %v1489_v41  ;;  %v898_v40 = vadd.f32 %v897_v36, %v4659_v63  ;;  %2680 = vmatprep.mubr.bf16.mxu1 %v1491_v31  ;;  %v1393_v49 = vmax.f32 %v823_v60, 0.0  ;;  %v1395_v2 = vmax.f32 %v896_v39, 0.0 }
  0xed   : > { %v826_v42 = vpop.f32.mrf.mxu0  ;;  %2616 = vmatmul.mubr.bf16.vlgmr.msra.gmra.mxu0 %v1488_v29  ;;  %v899_v43 = vpop.f32.mrf.mxu1  ;;  %2681 = vmatmul.mubr.bf16.vlgmr.msra.gmra.mxu1 %v1490_v34 }
  0xee   : > { %v827_v8 = vadd.f32 %v826_v42, %v4644_v58  ;;  %3757 = vmatpush3.bf16.msra.mxu0 %v4039_v28  ;;  %v1408_v45 = vmax.f32 %v825_v35, 0.0  ;;  %v900_v46 = vadd.f32 %v899_v43, %v4654_v62  ;;  %3797 = vmatpush3.bf16.msra.mxu1 %v4040_v32  ;;  %v1410_v56 = vmax.f32 %v898_v40, 0.0  ;;  %v4051_v28 = vld [vmem:[%s5487_s3 + $0x120] sm:$0xff]  }
  0xef   : > { %v830_v47 = vpop.f32.mrf.mxu0  ;;  %3758 = vmatprep.subr.bf16.mxu0 %v4041_v33  ;;  %v903_v61 = vpop.f32.mrf.mxu1  ;;  %3798 = vmatprep.subr.bf16.mxu1 %v4042_v37  ;;  %v4052_v32 = vld [vmem:[%s5487_s3 + $0x1a0] sm:$0xff]   ;;  %v4053_v33 = vld [vmem:[%s5487_s3 + $0x158] sm:$0xff]  }
  0xf0   : > { %v1409_v57 = vmax.f32 %v827_v8, 0.0  ;;  %v1411_v3 = vmax.f32 %v900_v46, 0.0  ;;  %v1504_v10 = vpack.c.bf16 %v1408_v45, %v1392_v1  ;;  %v1506_v16 = vpack.c.bf16 %v1410_v56, %v1394_v5  ;;  %v4054_v37 = vld [vmem:[%s5487_s3 + $0x1d8] sm:$0xff]  }
  0xf1   : > { %v832_v4 = vpop.f32.mrf.mxu0  ;;  %v905_v6 = vpop.f32.mrf.mxu1  ;;  %v831_v22 = vadd.f32 %v830_v47, %v4649_v59  ;;  %v904_v26 = vadd.f32 %v903_v61, %v4659_v63  ;;  %v385_v1 = vsub.s32 5, %v4630_v50 }
  0xf2   : > { %3759 = vmatpush3.bf16.msra.mxu0 %v4043_v44  ;;  %v1505_v7 = vpack.c.bf16 %v1409_v57, %v1393_v49  ;;  %3799 = vmatpush3.bf16.msra.mxu1 %v4044_v48  ;;  %v1507_v12 = vpack.c.bf16 %v1411_v3, %v1395_v2  ;;  %v833_v17 = vadd.f32 %v832_v4, %v4644_v58  ;;  %v4055_v44 = vld [vmem:[%s5487_s3 + $0x118] sm:$0xff]   ;;  %v4057_v49 = vld [vmem:[%s5487_s3 + $0x150] sm:$0xff]  }
  0xf3   : > { %v834_v11 = vpop.f32.mrf.mxu0  ;;  %3760 = vmatprep.subr.bf16.mxu0 %v4045_v19  ;;  %v907_v20 = vpop.f32.mrf.mxu1  ;;  %3800 = vmatprep.subr.bf16.mxu1 %v4046_v0  ;;  %v906_v23 = vadd.f32 %v905_v6, %v4654_v62  ;;  %v1424_v38 = vmax.f32 %v831_v22, 0.0  ;;  %v1426_v15 = vmax.f32 %v904_v26, 0.0  ;;  %v4056_v48 = vld [vmem:[%s5487_s3 + $0x198] sm:$0xff]   ;;  %v381_v19 = vsub.s32 4, %v4630_v50  ;;  %v4058_v2 = vld [vmem:[%s5487_s3 + $0x1d0] sm:$0xff]  }
  0xf4   : > { %v835_v18 = vadd.f32 %v834_v11, %v4649_v59  ;;  %2623 = vmatprep.mubr.bf16.mxu0 %v1505_v7  ;;  %v908_v24 = vadd.f32 %v907_v20, %v4659_v63  ;;  %2688 = vmatprep.mubr.bf16.mxu1 %v1507_v12  ;;  %v1425_v34 = vmax.f32 %v833_v17, 0.0  ;;  %v393_v7 = vsub.s32 7, %v4630_v50  ;;  %v4061_v17 = vld [vmem:[%s5487_s3 + $0x148] sm:$0xff]  }
  0xf5   : > { %v836_v25 = vpop.f32.mrf.mxu0  ;;  %2624 = vmatmul.mubr.bf16.gmra.mxu0 %v1504_v10  ;;  %v909_v41 = vpop.f32.mrf.mxu1  ;;  %2689 = vmatmul.mubr.bf16.gmra.mxu1 %v1506_v16  ;;  %v1427_v39 = vmax.f32 %v906_v23, 0.0  ;;  %v389_v12 = vsub.s32 6, %v4630_v50  ;;  %v4763_v16 = vrot.slane %v4638_v54, %v381_v19  ;;  %v4774_v22 = vrot.slane %v4638_v54, %v385_v1  ;;  %v4062_v23 = vld [vmem:[%s5487_s3 + $0x1c8] sm:$0xff]   ;;  %v4129_v50 = vld [vmem:[%s5487_s3 + $0x340] sm:$0xff]  }
  0xf6   : > { %v837_v27 = vadd.f32 %v836_v25, %v4644_v58  ;;  %3761 = vmatpush3.bf16.msra.mxu0 %v4047_v9  ;;  %v1440_v29 = vmax.f32 %v835_v18, 0.0  ;;  %v910_v30 = vadd.f32 %v909_v41, %v4654_v62  ;;  %3801 = vmatpush3.bf16.msra.mxu1 %v4048_v13  ;;  %v1442_v60 = vmax.f32 %v908_v24, 0.0 }
  0xf7   : > { %v840_v31 = vpop.f32.mrf.mxu0  ;;  %3762 = vmatprep.subr.bf16.mxu0 %v4049_v14  ;;  %v913_v36 = vpop.f32.mrf.mxu1  ;;  %3802 = vmatprep.subr.bf16.mxu1 %v4050_v21  ;;  %v4782_v41 = vrot.slane %v4638_v54, %v393_v7 }
  0xf8   : > { %v1441_v35 = vmax.f32 %v837_v27, 0.0  ;;  %v1443_v40 = vmax.f32 %v910_v30, 0.0  ;;  %v1520_v45 = vpack.c.bf16 %v1440_v29, %v1424_v38  ;;  %v1522_v56 = vpack.c.bf16 %v1442_v60, %v1426_v15 }
  0xf9   : > { %v842_v42 = vpop.f32.mrf.mxu0  ;;  %v915_v8 = vpop.f32.mrf.mxu1  ;;  %v841_v3 = vadd.f32 %v840_v31, %v4649_v59  ;;  %v914_v9 = vadd.f32 %v913_v36, %v4659_v63  ;;  %v4787_v29 = vrot.slane %v4638_v54, %v389_v12  ;;  %v4065_v54 = vld [vmem:[%s5487_s3 + $0x140] sm:$0xff]  }
  0xfa   : > { %3763 = vmatpush3.bf16.msra.mxu0 %v4051_v28  ;;  %v1521_v43 = vpack.c.bf16 %v1441_v35, %v1425_v34  ;;  %3803 = vmatpush3.bf16.msra.mxu1 %v4052_v32  ;;  %v1523_v47 = vpack.c.bf16 %v1443_v40, %v1427_v39  ;;  %v843_v57 = vadd.f32 %v842_v42, %v4644_v58  ;;  %v4063_v32 = vld [vmem:[%s5487_s3 + $0x108] sm:$0xff]   ;;  %v4066_v40 = vld [vmem:[%s5487_s3 + $0x1c0] sm:$0xff]  }
  0xfb   : > { %v844_v46 = vpop.f32.mrf.mxu0  ;;  %3764 = vmatprep.subr.bf16.mxu0 %v4053_v33  ;;  %v917_v0 = vpop.f32.mrf.mxu1  ;;  %3804 = vmatprep.subr.bf16.mxu1 %v4054_v37  ;;  %v916_v4 = vadd.f32 %v915_v8, %v4654_v62  ;;  %v1456_v24 = vmax.f32 %v841_v3, 0.0  ;;  %v1458_v28 = vmax.f32 %v914_v9, 0.0  ;;  %v4064_v35 = vld [vmem:[%s5487_s3 + $0x188] sm:$0xff]  }
  0xfc   : > { %v845_v61 = vadd.f32 %v844_v46, %v4649_v59  ;;  %2631 = vmatprep.mubr.bf16.mxu0 %v1521_v43  ;;  %v918_v5 = vadd.f32 %v917_v0, %v4659_v63  ;;  %2696 = vmatprep.mubr.bf16.mxu1 %v1523_v47  ;;  %v4059_v59 = vld [vmem:[%s5487_s3 + $0x110] sm:$0xff]   ;;  %v1457_v18 = vmax.f32 %v843_v57, 0.0  ;;  %v4067_v47 = vld [vmem:[%s5487_s3 + $0x100] sm:$0xff]  }
  0xfd   : > { %v846_v6 = vpop.f32.mrf.mxu0  ;;  %2632 = vmatmul.mubr.bf16.gmra.mxu0 %v1520_v45  ;;  %v919_v11 = vpop.f32.mrf.mxu1  ;;  %2697 = vmatmul.mubr.bf16.gmra.mxu1 %v1522_v56  ;;  %v1459_v25 = vmax.f32 %v916_v4, 0.0  ;;  %v4068_v57 = vld [vmem:[%s5487_s3 + $0x180] sm:$0xff]  }
  0xfe   : > { %v847_v10 = vadd.f32 %v846_v6, %v4644_v58  ;;  %3765 = vmatpush3.bf16.msra.mxu0 %v4055_v44  ;;  %v1472_v13 = vmax.f32 %v845_v61, 0.0  ;;  %v920_v14 = vadd.f32 %v919_v11, %v4654_v62  ;;  %3805 = vmatpush3.bf16.msra.mxu1 %v4056_v48  ;;  %v4060_v58 = vld [vmem:[%s5487_s3 + $0x190] sm:$0xff]   ;;  %v1474_v20 = vmax.f32 %v918_v5, 0.0  ;;  %v4069_v61 = vld [vmem:[%s5487_s3 + $0x278] sm:$0xff]  }
  0xff   : > { %v956_v63 = vpop.f32.mrf.mxu0  ;;  %3766 = vmatprep.subr.bf16.mxu0 %v4057_v49  ;;  %v1029_v62 = vpop.f32.mrf.mxu1  ;;  %3806 = vmatprep.subr.bf16.mxu1 %v4058_v2  ;;  %v4070_v5 = vld [vmem:[%s5487_s3 + $0x2f8] sm:$0xff]  }
 0x100   : > { %v1473_v21 = vmax.f32 %v847_v10, 0.0  ;;  %v1475_v26 = vmax.f32 %v920_v14, 0.0  ;;  %v1536_v33 = vpack.c.bf16 %v1472_v13, %v1456_v24  ;;  %v1538_v36 = vpack.c.bf16 %v1474_v20, %v1458_v28  ;;  %v4072_v20 = vld [vmem:[%s5487_s3 + $0x2b8] sm:$0xff]  }
 0x101   : > { %v958_v27 = vpop.f32.mrf.mxu0  ;;  %v1031_v30 = vpop.f32.mrf.mxu1  ;;  %v957_v42 = vadd.f32 %v956_v63, %v4763_v16  ;;  %v1030_v44 = vadd.f32 %v1029_v62, %v4787_v29  ;;  %v4071_v63 = vld [vmem:[%s5487_s3 + $0x238] sm:$0xff]  }
 0x102   : > { %3767 = vmatpush3.bf16.msra.mxu0 %v4059_v59  ;;  %v1537_v31 = vpack.c.bf16 %v1473_v21, %v1457_v18  ;;  %3807 = vmatpush3.bf16.msra.mxu1 %v4060_v58  ;;  %v1539_v60 = vpack.c.bf16 %v1475_v26, %v1459_v25  ;;  %v959_v37 = vadd.f32 %v958_v27, %v4774_v22  ;;  %v4073_v21 = vld [vmem:[%s5487_s3 + $0x270] sm:$0xff]  }
 0x103   : > { %v960_v34 = vpop.f32.mrf.mxu0  ;;  %3768 = vmatprep.subr.bf16.mxu0 %v4061_v17  ;;  %v1033_v39 = vpop.f32.mrf.mxu1  ;;  %3808 = vmatprep.subr.bf16.mxu1 %v4062_v23  ;;  %v1032_v15 = vadd.f32 %v1031_v30, %v4782_v41  ;;  %v1364_v6 = vmax.f32 %v957_v42, 0.0  ;;  %v1366_v59 = vmax.f32 %v1030_v44, 0.0  ;;  %v4074_v26 = vld [vmem:[%s5487_s3 + $0x2f0] sm:$0xff]  }
 0x104   : > { %v961_v38 = vadd.f32 %v960_v34, %v4763_v16  ;;  %2639 = vmatprep.mubr.bf16.mxu0 %v1537_v31  ;;  %v1034_v8 = vadd.f32 %v1033_v39, %v4787_v29  ;;  %2704 = vmatprep.mubr.bf16.mxu1 %v1539_v60  ;;  %v1365_v0 = vmax.f32 %v959_v37, 0.0  ;;  %v4075_v60 = vld [vmem:[%s5487_s3 + $0x230] sm:$0xff]  }
 0x105   : > { %v962_v43 = vpop.f32.mrf.mxu0  ;;  %2640 = vmatmul.mubr.bf16.gmra.mxu0 %v1536_v33  ;;  %v1035_v46 = vpop.f32.mrf.mxu1  ;;  %2705 = vmatmul.mubr.bf16.gmra.mxu1 %v1538_v36  ;;  %v1367_v9 = vmax.f32 %v1032_v15, 0.0  ;;  %v4076_v37 = vld [vmem:[%s5487_s3 + $0x2b0] sm:$0xff]  }
 0x106   : > { %v963_v45 = vadd.f32 %v962_v43, %v4774_v22  ;;  %3769 = vmatpush3.bf16.msra.mxu0 %v4063_v32  ;;  %v1380_v48 = vmax.f32 %v961_v38, 0.0  ;;  %v1036_v49 = vadd.f32 %v1035_v46, %v4782_v41  ;;  %3809 = vmatpush3.bf16.msra.mxu1 %v4064_v35  ;;  %v1382_v2 = vmax.f32 %v1034_v8, 0.0  ;;  %v4077_v38 = vld [vmem:[%s5487_s3 + $0x268] sm:$0xff]  }
 0x107   : > { %v966_v56 = vpop.f32.mrf.mxu0  ;;  %3770 = vmatprep.subr.bf16.mxu0 %v4065_v54  ;;  %v1039_v4 = vpop.f32.mrf.mxu1  ;;  %3810 = vmatprep.subr.bf16.mxu1 %v4066_v40  ;;  %v4078_v8 = vld [vmem:[%s5487_s3 + $0x2e8] sm:$0xff]  }
 0x108   : > { %v1381_v3 = vmax.f32 %v963_v45, 0.0  ;;  %v1383_v10 = vmax.f32 %v1036_v49, 0.0  ;;  %v1492_v58 = vpack.c.bf16 %v1380_v48, %v1364_v6  ;;  %v1494_v62 = vpack.c.bf16 %v1382_v2, %v1366_v59  ;;  %v4080_v2 = vld [vmem:[%s5487_s3 + $0x2a8] sm:$0xff]  }
 0x109   : > { %v968_v11 = vpop.f32.mrf.mxu0  ;;  %v1041_v14 = vpop.f32.mrf.mxu1  ;;  %v967_v27 = vadd.f32 %v966_v56, %v4763_v16  ;;  %v1040_v32 = vadd.f32 %v1039_v4, %v4787_v29  ;;  %v4079_v56 = vld [vmem:[%s5487_s3 + $0x228] sm:$0xff]  }
 0x10a   : > { %v1493_v13 = vpack.c.bf16 %v1381_v3, %v1365_v0  ;;  %3771 = vmatpush3.bf16.msra.mxu0 %v4067_v47  ;;  %v1495_v17 = vpack.c.bf16 %v1383_v10, %v1367_v9  ;;  %3811 = vmatpush3.bf16.msra.mxu1 %v4068_v57  ;;  %v969_v23 = vadd.f32 %v968_v11, %v4774_v22  ;;  %v4081_v3 = vld [vmem:[%s5487_s3 + $0x260] sm:$0xff]  }
 0x10b   : > { %v970_v18 = vpop.f32.mrf.mxu0  ;;  %3836 = vmatprep.subr.bf16.mxu0 %v4069_v61  ;;  %v1043_v25 = vpop.f32.mrf.mxu1  ;;  %3876 = vmatprep.subr.bf16.mxu1 %v4070_v5  ;;  %v1042_v28 = vadd.f32 %v1041_v14, %v4782_v41  ;;  %v1396_v43 = vmax.f32 %v967_v27, 0.0  ;;  %v1398_v47 = vmax.f32 %v1040_v32, 0.0  ;;  %v4082_v10 = vld [vmem:[%s5487_s3 + $0x2e0] sm:$0xff]  }
 0x10c   : > { %v971_v24 = vadd.f32 %v970_v18, %v4763_v16  ;;  %2745 = vmatprep.mubr.bf16.mxu0 %v1493_v13  ;;  %v1044_v30 = vadd.f32 %v1043_v25, %v4787_v29  ;;  %2810 = vmatprep.mubr.bf16.mxu1 %v1495_v17  ;;  %v1397_v39 = vmax.f32 %v969_v23, 0.0  ;;  %v4083_v18 = vld [vmem:[%s5487_s3 + $0x220] sm:$0xff]  }
 0x10d   : > { %v972_v31 = vpop.f32.mrf.mxu0  ;;  %2746 = vmatmul.mubr.bf16.vlgmr.msra.gmra.mxu0 %v1492_v58  ;;  %v1045_v34 = vpop.f32.mrf.mxu1  ;;  %2811 = vmatmul.mubr.bf16.vlgmr.msra.gmra.mxu1 %v1494_v62  ;;  %v1399_v44 = vmax.f32 %v1042_v28, 0.0  ;;  %v4084_v23 = vld [vmem:[%s5487_s3 + $0x2a0] sm:$0xff]  }
 0x10e   : > { %v973_v33 = vadd.f32 %v972_v31, %v4774_v22  ;;  %3837 = vmatpush3.bf16.msra.mxu0 %v4071_v63  ;;  %v1412_v35 = vmax.f32 %v971_v24, 0.0  ;;  %v1046_v54 = vadd.f32 %v1045_v34, %v4782_v41  ;;  %3877 = vmatpush3.bf16.msra.mxu1 %v4072_v20  ;;  %v1414_v40 = vmax.f32 %v1044_v30, 0.0  ;;  %v4085_v24 = vld [vmem:[%s5487_s3 + $0x258] sm:$0xff]  }
 0x10f   : > { %v976_v36 = vpop.f32.mrf.mxu0  ;;  %3838 = vmatprep.subr.bf16.mxu0 %v4073_v21  ;;  %v1049_v15 = vpop.f32.mrf.mxu1  ;;  %3878 = vmatprep.subr.bf16.mxu1 %v4074_v26  ;;  %v4086_v30 = vld [vmem:[%s5487_s3 + $0x2d8] sm:$0xff]  }
 0x110   : > { %v1413_v42 = vmax.f32 %v973_v33, 0.0  ;;  %v1415_v45 = vmax.f32 %v1046_v54, 0.0  ;;  %v1508_v57 = vpack.c.bf16 %v1412_v35, %v1396_v43  ;;  %v1510_v4 = vpack.c.bf16 %v1414_v40, %v1398_v47  ;;  %v4088_v40 = vld [vmem:[%s5487_s3 + $0x298] sm:$0xff]  }
 0x111   : > { %v978_v46 = vpop.f32.mrf.mxu0  ;;  %v1051_v49 = vpop.f32.mrf.mxu1  ;;  %v977_v11 = vadd.f32 %v976_v36, %v4763_v16  ;;  %v1050_v63 = vadd.f32 %v1049_v15, %v4787_v29  ;;  %v4087_v36 = vld [vmem:[%s5487_s3 + $0x218] sm:$0xff]  }
 0x112   : > { %v1509_v48 = vpack.c.bf16 %v1413_v42, %v1397_v39  ;;  %3839 = vmatpush3.bf16.msra.mxu0 %v4075_v60  ;;  %v1511_v61 = vpack.c.bf16 %v1415_v45, %v1399_v44  ;;  %3879 = vmatpush3.bf16.msra.mxu1 %v4076_v37  ;;  %v979_v5 = vadd.f32 %v978_v46, %v4774_v22  ;;  %v4089_v42 = vld [vmem:[%s5487_s3 + $0x250] sm:$0xff]   ;;  %v4899_v45 = vld [vmem:[%s5486_s2 + $0x8] sm:$0xff] }
 0x113   : > { %v980_v0 = vpop.f32.mrf.mxu0  ;;  %3840 = vmatprep.subr.bf16.mxu0 %v4077_v38  ;;  %v1053_v9 = vpop.f32.mrf.mxu1  ;;  %3880 = vmatprep.subr.bf16.mxu1 %v4078_v8  ;;  %v1052_v59 = vadd.f32 %v1051_v49, %v4782_v41  ;;  %v1428_v31 = vmax.f32 %v977_v11, 0.0  ;;  %v1430_v60 = vmax.f32 %v1050_v63, 0.0  ;;  %v4090_v46 = vld [vmem:[%s5487_s3 + $0x2d0] sm:$0xff]   ;;  %v4927_v11 = vrot.slane %v4899_v45, %v369_v51 }
 0x114   : > { %v981_v6 = vadd.f32 %v980_v0, %v4763_v16  ;;  %2753 = vmatprep.mubr.bf16.mxu0 %v1509_v48  ;;  %v1054_v13 = vadd.f32 %v1053_v9, %v4787_v29  ;;  %2818 = vmatprep.mubr.bf16.mxu1 %v1511_v61  ;;  %v1429_v25 = vmax.f32 %v979_v5, 0.0  ;;  %v4940_v51 = vrot.slane %v4899_v45, %v373_v55  ;;  %v4097_v55 = vld [vmem:[%s5487_s3 + $0x240] sm:$0xff]  }
 0x115   : > { %v982_v14 = vpop.f32.mrf.mxu0  ;;  %2754 = vmatmul.mubr.bf16.gmra.mxu0 %v1508_v57  ;;  %v1055_v17 = vpop.f32.mrf.mxu1  ;;  %2819 = vmatmul.mubr.bf16.gmra.mxu1 %v1510_v4  ;;  %v1431_v32 = vmax.f32 %v1052_v59, 0.0  ;;  %v4916_v4 = vrot.slane %v4899_v45, %v365_v52  ;;  %v4094_v52 = vld [vmem:[%s5487_s3 + $0x2c8] sm:$0xff]  }
 0x116   : > { %v983_v58 = vadd.f32 %v982_v14, %v4774_v22  ;;  %3841 = vmatpush3.bf16.msra.mxu0 %v4079_v56  ;;  %v1444_v20 = vmax.f32 %v981_v6, 0.0  ;;  %v1056_v21 = vadd.f32 %v1055_v17, %v4782_v41  ;;  %3881 = vmatpush3.bf16.msra.mxu1 %v4080_v2  ;;  %v1446_v26 = vmax.f32 %v1054_v13, 0.0  ;;  %v4091_v2 = vld [vmem:[%s5487_s3 + $0x210] sm:$0xff]  }
 0x117   : > { %v986_v62 = vpop.f32.mrf.mxu0  ;;  %3842 = vmatprep.subr.bf16.mxu0 %v4081_v3  ;;  %v1059_v28 = vpop.f32.mrf.mxu1  ;;  %3882 = vmatprep.subr.bf16.mxu1 %v4082_v10 }
 0x118   : > { %v1445_v27 = vmax.f32 %v983_v58, 0.0  ;;  %v1447_v33 = vmax.f32 %v1056_v21, 0.0  ;;  %v1524_v37 = vpack.c.bf16 %v1444_v20, %v1428_v31  ;;  %v1526_v15 = vpack.c.bf16 %v1446_v26, %v1430_v60  ;;  %v4095_v21 = vld [vmem:[%s5487_s3 + $0x208] sm:$0xff]  }
 0x119   : > { %v988_v34 = vpop.f32.mrf.mxu0  ;;  %v1061_v54 = vpop.f32.mrf.mxu1  ;;  %v987_v47 = vadd.f32 %v986_v62, %v4763_v16  ;;  %v1060_v57 = vadd.f32 %v1059_v28, %v4787_v29  ;;  %v4935_v58 = vrot.slane %v4899_v45, %v377_v53  ;;  %v4096_v53 = vld [vmem:[%s5487_s3 + $0x288] sm:$0xff]  }
 0x11a   : > { %v1525_v35 = vpack.c.bf16 %v1445_v27, %v1429_v25  ;;  %3843 = vmatpush3.bf16.msra.mxu0 %v4083_v18  ;;  %v1527_v38 = vpack.c.bf16 %v1447_v33, %v1431_v32  ;;  %3883 = vmatpush3.bf16.msra.mxu1 %v4084_v23  ;;  %v989_v8 = vadd.f32 %v988_v34, %v4774_v22 }
 0x11b   : > { %v990_v39 = vpop.f32.mrf.mxu0  ;;  %3844 = vmatprep.subr.bf16.mxu0 %v4085_v24  ;;  %v1063_v44 = vpop.f32.mrf.mxu1  ;;  %3884 = vmatprep.subr.bf16.mxu1 %v4086_v30  ;;  %v1062_v48 = vadd.f32 %v1061_v54, %v4782_v41  ;;  %v1460_v59 = vmax.f32 %v987_v47, 0.0  ;;  %v1462_v17 = vmax.f32 %v1060_v57, 0.0  ;;  %v4098_v30 = vld [vmem:[%s5487_s3 + $0x2c0] sm:$0xff]  }
 0x11c   : > { %v991_v43 = vadd.f32 %v990_v39, %v4763_v16  ;;  %2761 = vmatprep.mubr.bf16.mxu0 %v1525_v35  ;;  %v1064_v49 = vadd.f32 %v1063_v44, %v4787_v29  ;;  %2826 = vmatprep.mubr.bf16.mxu1 %v1527_v38  ;;  %v4093_v29 = vld [vmem:[%s5487_s3 + $0x248] sm:$0xff]   ;;  %v1461_v6 = vmax.f32 %v989_v8, 0.0 }
 0x11d   : > { %v992_v56 = vpop.f32.mrf.mxu0  ;;  %2762 = vmatmul.mubr.bf16.gmra.mxu0 %v1524_v37  ;;  %v1065_v0 = vpop.f32.mrf.mxu1  ;;  %2827 = vmatmul.mubr.bf16.gmra.mxu1 %v1526_v15  ;;  %v1463_v13 = vmax.f32 %v1062_v48, 0.0 }
 0x11e   : > { %v993_v61 = vadd.f32 %v992_v56, %v4774_v22  ;;  %3845 = vmatpush3.bf16.msra.mxu0 %v4087_v36  ;;  %v1476_v3 = vmax.f32 %v991_v43, 0.0  ;;  %v1066_v16 = vadd.f32 %v1065_v0, %v4782_v41  ;;  %3885 = vmatpush3.bf16.msra.mxu1 %v4088_v40  ;;  %v4092_v22 = vld [vmem:[%s5487_s3 + $0x290] sm:$0xff]   ;;  %v1478_v9 = vmax.f32 %v1064_v49, 0.0  ;;  %v4099_v36 = vld [vmem:[%s5487_s3 + $0x200] sm:$0xff]  }
 0x11f   : > { %v1102_v5 = vpop.f32.mrf.mxu0  ;;  %3846 = vmatprep.subr.bf16.mxu0 %v4089_v42  ;;  %v1175_v41 = vpop.f32.mrf.mxu1  ;;  %3886 = vmatprep.subr.bf16.mxu1 %v4090_v46  ;;  %v4100_v40 = vld [vmem:[%s5487_s3 + $0x280] sm:$0xff]   ;;  %v4101_v42 = vld [vmem:[%s5487_s3 + $0x378] sm:$0xff]  }
 0x120   : > { %v1477_v10 = vmax.f32 %v993_v61, 0.0  ;;  %v1479_v14 = vmax.f32 %v1066_v16, 0.0  ;;  %v1540_v62 = vpack.c.bf16 %v1476_v3, %v1460_v59  ;;  %v1542_v25 = vpack.c.bf16 %v1478_v9, %v1462_v17  ;;  %v4102_v46 = vld [vmem:[%s5487_s3 + $0x3f8] sm:$0xff]  }
 0x121   : > { %v1104_v63 = vpop.f32.mrf.mxu0  ;;  %v1177_v20 = vpop.f32.mrf.mxu1  ;;  %v1103_v31 = vadd.f32 %v1102_v5, %v4916_v4  ;;  %v1176_v60 = vadd.f32 %v1175_v41, %v4940_v51 }
 0x122   : > { %v1541_v18 = vpack.c.bf16 %v1477_v10, %v1461_v6  ;;  %3847 = vmatpush3.bf16.msra.mxu0 %v4091_v2  ;;  %v1543_v23 = vpack.c.bf16 %v1479_v14, %v1463_v13  ;;  %3887 = vmatpush3.bf16.msra.mxu1 %v4092_v22  ;;  %v1105_v26 = vadd.f32 %v1104_v63, %v4927_v11  ;;  %v4103_v2 = vld [vmem:[%s5487_s3 + $0x338] sm:$0xff]  }
 0x123   : > { %v1106_v24 = vpop.f32.mrf.mxu0  ;;  %3848 = vmatprep.subr.bf16.mxu0 %v4093_v29  ;;  %v1179_v28 = vpop.f32.mrf.mxu1  ;;  %3888 = vmatprep.subr.bf16.mxu1 %v4094_v52  ;;  %v1178_v32 = vadd.f32 %v1177_v20, %v4935_v58  ;;  %v1368_v47 = vmax.f32 %v1103_v31, 0.0  ;;  %v1370_v57 = vmax.f32 %v1176_v60, 0.0  ;;  %v4104_v22 = vld [vmem:[%s5487_s3 + $0x3b8] sm:$0xff]   ;;  %v4105_v29 = vld [vmem:[%s5487_s3 + $0x370] sm:$0xff]  }
 0x124   : > { %v1107_v27 = vadd.f32 %v1106_v24, %v4916_v4  ;;  %2769 = vmatprep.mubr.bf16.mxu0 %v1541_v18  ;;  %v1180_v33 = vadd.f32 %v1179_v28, %v4940_v51  ;;  %2834 = vmatprep.mubr.bf16.mxu1 %v1543_v23  ;;  %v1369_v15 = vmax.f32 %v1105_v26, 0.0  ;;  %v4106_v52 = vld [vmem:[%s5487_s3 + $0x3f0] sm:$0xff]  }
 0x125   : > { %v1108_v34 = vpop.f32.mrf.mxu0  ;;  %2770 = vmatmul.mubr.bf16.gmra.mxu0 %v1540_v62  ;;  %v1181_v54 = vpop.f32.mrf.mxu1  ;;  %2835 = vmatmul.mubr.bf16.gmra.mxu1 %v1542_v25  ;;  %v1371_v48 = vmax.f32 %v1178_v32, 0.0 }
 0x126   : > { %v1109_v35 = vadd.f32 %v1108_v34, %v4927_v11  ;;  %3849 = vmatpush3.bf16.msra.mxu0 %v4095_v21  ;;  %v1384_v37 = vmax.f32 %v1107_v27, 0.0  ;;  %v1182_v38 = vadd.f32 %v1181_v54, %v4935_v58  ;;  %3889 = vmatpush3.bf16.msra.mxu1 %v4096_v53  ;;  %v1386_v8 = vmax.f32 %v1180_v33, 0.0  ;;  %v4107_v21 = vld [vmem:[%s5487_s3 + $0x330] sm:$0xff]  }
 0x127   : > { %v1112_v39 = vpop.f32.mrf.mxu0  ;;  %3850 = vmatprep.subr.bf16.mxu0 %v4097_v55  ;;  %v1185_v44 = vpop.f32.mrf.mxu1  ;;  %3890 = vmatprep.subr.bf16.mxu1 %v4098_v30  ;;  %v4108_v53 = vld [vmem:[%s5487_s3 + $0x3b0] sm:$0xff]   ;;  %v4109_v55 = vld [vmem:[%s5487_s3 + $0x368] sm:$0xff]  }
 0x128   : > { %v1385_v43 = vmax.f32 %v1109_v35, 0.0  ;;  %v1387_v49 = vmax.f32 %v1182_v38, 0.0  ;;  %v1496_v3 = vpack.c.bf16 %v1384_v37, %v1368_v47  ;;  %v1498_v6 = vpack.c.bf16 %v1386_v8, %v1370_v57  ;;  %v4110_v30 = vld [vmem:[%s5487_s3 + $0x3e8] sm:$0xff]  }
 0x129   : > { %v1114_v56 = vpop.f32.mrf.mxu0  ;;  %v1187_v0 = vpop.f32.mrf.mxu1  ;;  %v1113_v59 = vadd.f32 %v1112_v39, %v4916_v4  ;;  %v1186_v17 = vadd.f32 %v1185_v44, %v4940_v51 }
 0x12a   : > { %v1497_v61 = vpack.c.bf16 %v1385_v43, %v1369_v15  ;;  %3851 = vmatpush3.bf16.msra.mxu0 %v4099_v36  ;;  %v1499_v16 = vpack.c.bf16 %v1387_v49, %v1371_v48  ;;  %3891 = vmatpush3.bf16.msra.mxu1 %v4100_v40  ;;  %v1115_v9 = vadd.f32 %v1114_v56, %v4927_v11  ;;  %v4111_v36 = vld [vmem:[%s5487_s3 + $0x328] sm:$0xff]  }
 0x12b   : > { %v1116_v5 = vpop.f32.mrf.mxu0  ;;  %3916 = vmatprep.subr.bf16.mxu0 %v4101_v42  ;;  %v1189_v41 = vpop.f32.mrf.mxu1  ;;  %3956 = vmatprep.subr.bf16.mxu1 %v4102_v46  ;;  %v1188_v13 = vadd.f32 %v1187_v0, %v4935_v58  ;;  %v1400_v31 = vmax.f32 %v1113_v59, 0.0  ;;  %v1402_v60 = vmax.f32 %v1186_v17, 0.0  ;;  %v4112_v40 = vld [vmem:[%s5487_s3 + $0x3a8] sm:$0xff]   ;;  %v4113_v42 = vld [vmem:[%s5487_s3 + $0x360] sm:$0xff]  }
 0x12c   : > { %v1117_v10 = vadd.f32 %v1116_v5, %v4916_v4  ;;  %2875 = vmatprep.mubr.bf16.mxu0 %v1497_v61  ;;  %v1190_v14 = vadd.f32 %v1189_v41, %v4940_v51  ;;  %2940 = vmatprep.mubr.bf16.mxu1 %v1499_v16  ;;  %v1401_v25 = vmax.f32 %v1115_v9, 0.0  ;;  %v4114_v46 = vld [vmem:[%s5487_s3 + $0x3e0] sm:$0xff]  }
 0x12d   : > { %v1118_v63 = vpop.f32.mrf.mxu0  ;;  %2876 = vmatmul.mubr.bf16.vlgmr.msra.gmra.mxu0 %v1496_v3  ;;  %v1191_v20 = vpop.f32.mrf.mxu1  ;;  %2941 = vmatmul.mubr.bf16.vlgmr.msra.gmra.mxu1 %v1498_v6  ;;  %v1403_v32 = vmax.f32 %v1188_v13, 0.0 }
 0x12e   : > { %v1119_v18 = vadd.f32 %v1118_v63, %v4927_v11  ;;  %3917 = vmatpush3.bf16.msra.mxu0 %v4103_v2  ;;  %v1416_v62 = vmax.f32 %v1117_v10, 0.0  ;;  %v1192_v23 = vadd.f32 %v1191_v20, %v4935_v58  ;;  %3957 = vmatpush3.bf16.msra.mxu1 %v4104_v22  ;;  %v1418_v26 = vmax.f32 %v1190_v14, 0.0  ;;  %v4115_v2 = vld [vmem:[%s5487_s3 + $0x320] sm:$0xff]  }
 0x12f   : > { %v1122_v24 = vpop.f32.mrf.mxu0  ;;  %3918 = vmatprep.subr.bf16.mxu0 %v4105_v29  ;;  %v1195_v28 = vpop.f32.mrf.mxu1  ;;  %3958 = vmatprep.subr.bf16.mxu1 %v4106_v52  ;;  %v4116_v22 = vld [vmem:[%s5487_s3 + $0x3a0] sm:$0xff]   ;;  %v4117_v29 = vld [vmem:[%s5487_s3 + $0x358] sm:$0xff]  }
 0x130   : > { %v1417_v27 = vmax.f32 %v1119_v18, 0.0  ;;  %v1419_v33 = vmax.f32 %v1192_v23, 0.0  ;;  %v1512_v37 = vpack.c.bf16 %v1416_v62, %v1400_v31  ;;  %v1514_v15 = vpack.c.bf16 %v1418_v26, %v1402_v60  ;;  %v4118_v52 = vld [vmem:[%s5487_s3 + $0x3d8] sm:$0xff]  }
 0x131   : > { %v1124_v34 = vpop.f32.mrf.mxu0  ;;  %v1197_v54 = vpop.f32.mrf.mxu1  ;;  %v1123_v47 = vadd.f32 %v1122_v24, %v4916_v4  ;;  %v1196_v57 = vadd.f32 %v1195_v28, %v4940_v51 }
 0x132   : > { %v1513_v35 = vpack.c.bf16 %v1417_v27, %v1401_v25  ;;  %3919 = vmatpush3.bf16.msra.mxu0 %v4107_v21  ;;  %v1515_v38 = vpack.c.bf16 %v1419_v33, %v1403_v32  ;;  %3959 = vmatpush3.bf16.msra.mxu1 %v4108_v53  ;;  %v1125_v8 = vadd.f32 %v1124_v34, %v4927_v11  ;;  %v4119_v21 = vld [vmem:[%s5487_s3 + $0x318] sm:$0xff]  }
 0x133   : > { %v1126_v39 = vpop.f32.mrf.mxu0  ;;  %3920 = vmatprep.subr.bf16.mxu0 %v4109_v55  ;;  %v1199_v44 = vpop.f32.mrf.mxu1  ;;  %3960 = vmatprep.subr.bf16.mxu1 %v4110_v30  ;;  %v1198_v48 = vadd.f32 %v1197_v54, %v4935_v58  ;;  %v1432_v59 = vmax.f32 %v1123_v47, 0.0  ;;  %v1434_v17 = vmax.f32 %v1196_v57, 0.0  ;;  %v4120_v53 = vld [vmem:[%s5487_s3 + $0x398] sm:$0xff]   ;;  %v4121_v55 = vld [vmem:[%s5487_s3 + $0x350] sm:$0xff]  }
 0x134   : > { %v1127_v43 = vadd.f32 %v1126_v39, %v4916_v4  ;;  %2883 = vmatprep.mubr.bf16.mxu0 %v1513_v35  ;;  %v1200_v49 = vadd.f32 %v1199_v44, %v4940_v51  ;;  %2948 = vmatprep.mubr.bf16.mxu1 %v1515_v38  ;;  %v1433_v6 = vmax.f32 %v1125_v8, 0.0  ;;  %v4122_v30 = vld [vmem:[%s5487_s3 + $0x3d0] sm:$0xff]   ;;  %v5064_v38 = vrot.slane %v4899_v45, %v381_v19  ;;  %v4126_v19 = vld [vmem:[%s5487_s3 + $0x3c8] sm:$0xff]  }
 0x135   : > { %v1128_v56 = vpop.f32.mrf.mxu0  ;;  %2884 = vmatmul.mubr.bf16.gmra.mxu0 %v1512_v37  ;;  %v1201_v0 = vpop.f32.mrf.mxu1  ;;  %2949 = vmatmul.mubr.bf16.gmra.mxu1 %v1514_v15  ;;  %v1435_v13 = vmax.f32 %v1198_v48, 0.0  ;;  %v5075_v8 = vrot.slane %v4899_v45, %v385_v1  ;;  %v5083_v48 = vrot.slane %v4899_v45, %v393_v7  ;;  %v5088_v1 = vrot.slane %v4899_v45, %v389_v12  ;;  %v4128_v7 = vld [vmem:[%s5487_s3 + $0x388] sm:$0xff]  }
 0x136   : > { %v1129_v61 = vadd.f32 %v1128_v56, %v4927_v11  ;;  %3921 = vmatpush3.bf16.msra.mxu0 %v4111_v36  ;;  %v1448_v3 = vmax.f32 %v1127_v43, 0.0  ;;  %v1202_v16 = vadd.f32 %v1201_v0, %v4935_v58  ;;  %3961 = vmatpush3.bf16.msra.mxu1 %v4112_v40  ;;  %v1450_v9 = vmax.f32 %v1200_v49, 0.0  ;;  %v4123_v36 = vld [vmem:[%s5487_s3 + $0x310] sm:$0xff]  }
 0x137   : > { %v1132_v5 = vpop.f32.mrf.mxu0  ;;  %3922 = vmatprep.subr.bf16.mxu0 %v4113_v42  ;;  %v1205_v41 = vpop.f32.mrf.mxu1  ;;  %3962 = vmatprep.subr.bf16.mxu1 %v4114_v46 }
 0x138   : > { %v1449_v10 = vmax.f32 %v1129_v61, 0.0  ;;  %v1451_v14 = vmax.f32 %v1202_v16, 0.0  ;;  %v1528_v62 = vpack.c.bf16 %v1448_v3, %v1432_v59  ;;  %v1530_v25 = vpack.c.bf16 %v1450_v9, %v1434_v17  ;;  %v4127_v61 = vld [vmem:[%s5487_s3 + $0x308] sm:$0xff]  }
 0x139   : > { %v1134_v63 = vpop.f32.mrf.mxu0  ;;  %v1207_v20 = vpop.f32.mrf.mxu1  ;;  %v1133_v31 = vadd.f32 %v1132_v5, %v4916_v4  ;;  %v1206_v60 = vadd.f32 %v1205_v41, %v4940_v51 }
 0x13a   : > { %v1529_v18 = vpack.c.bf16 %v1449_v10, %v1433_v6  ;;  %3923 = vmatpush3.bf16.msra.mxu0 %v4115_v2  ;;  %v1531_v23 = vpack.c.bf16 %v1451_v14, %v1435_v13  ;;  %3963 = vmatpush3.bf16.msra.mxu1 %v4116_v22  ;;  %v1135_v26 = vadd.f32 %v1134_v63, %v4927_v11  ;;  %v4130_v22 = vld [vmem:[%s5487_s3 + $0x3c0] sm:$0xff]  }
 0x13b   : > { %v1136_v24 = vpop.f32.mrf.mxu0  ;;  %3924 = vmatprep.subr.bf16.mxu0 %v4117_v29  ;;  %v1209_v28 = vpop.f32.mrf.mxu1  ;;  %3964 = vmatprep.subr.bf16.mxu1 %v4118_v52  ;;  %v1208_v32 = vadd.f32 %v1207_v20, %v4935_v58  ;;  %v1464_v43 = vmax.f32 %v1133_v31, 0.0  ;;  %v1466_v49 = vmax.f32 %v1206_v60, 0.0  ;;  %v4131_v13 = vld [vmem:[%s5487_s3 + $0x300] sm:$0xff]  }
 0x13c   : > { %v1137_v27 = vadd.f32 %v1136_v24, %v4916_v4  ;;  %2891 = vmatprep.mubr.bf16.mxu0 %v1529_v18  ;;  %v1210_v33 = vadd.f32 %v1209_v28, %v4940_v51  ;;  %2956 = vmatprep.mubr.bf16.mxu1 %v1531_v23  ;;  %v4125_v51 = vld [vmem:[%s5487_s3 + $0x348] sm:$0xff]   ;;  %v1465_v40 = vmax.f32 %v1135_v26, 0.0  ;;  %v4132_v18 = vld [vmem:[%s5487_s3 + $0x380] sm:$0xff]  }
 0x13d   : > { %v1138_v34 = vpop.f32.mrf.mxu0  ;;  %2892 = vmatmul.mubr.bf16.gmra.mxu0 %v1528_v62  ;;  %v1211_v54 = vpop.f32.mrf.mxu1  ;;  %2957 = vmatmul.mubr.bf16.gmra.mxu1 %v1530_v25  ;;  %v1467_v44 = vmax.f32 %v1208_v32, 0.0 }
 0x13e   : > { %v1139_v35 = vadd.f32 %v1138_v34, %v4927_v11  ;;  %3925 = vmatpush3.bf16.msra.mxu0 %v4119_v21  ;;  %v1480_v37 = vmax.f32 %v1137_v27, 0.0  ;;  %v1212_v4 = vadd.f32 %v1211_v54, %v4935_v58  ;;  %3965 = vmatpush3.bf16.msra.mxu1 %v4120_v53  ;;  %v4124_v11 = vld [vmem:[%s5487_s3 + $0x390] sm:$0xff]   ;;  %v1482_v42 = vmax.f32 %v1210_v33, 0.0 }
 0x13f   : > { %v1248_v39 = vpop.f32.mrf.mxu0  ;;  %3926 = vmatprep.subr.bf16.mxu0 %v4121_v55  ;;  %v1321_v58 = vpop.f32.mrf.mxu1  ;;  %3966 = vmatprep.subr.bf16.mxu1 %v4122_v30 }
 0x140   : > { %v1481_v15 = vmax.f32 %v1139_v35, 0.0  ;;  %v1483_v46 = vmax.f32 %v1212_v4, 0.0  ;;  %v1544_v0 = vpack.c.bf16 %v1480_v37, %v1464_v43  ;;  %v1546_v12 = vpack.c.bf16 %v1482_v42, %v1466_v49 }
 0x141   : > { %v1250_v47 = vpop.f32.mrf.mxu0  ;;  %v1323_v57 = vpop.f32.mrf.mxu1  ;;  %v1249_v29 = vadd.f32 %v1248_v39, %v5064_v38  ;;  %v1322_v41 = vadd.f32 %v1321_v58, %v5088_v1 }
 0x142   : > { %v1545_v56 = vpack.c.bf16 %v1481_v15, %v1465_v40  ;;  %3927 = vmatpush3.bf16.msra.mxu0 %v4123_v36  ;;  %v1547_v2 = vpack.c.bf16 %v1483_v46, %v1467_v44  ;;  %3967 = vmatpush3.bf16.msra.mxu1 %v4124_v11  ;;  %v1251_v45 = vadd.f32 %v1250_v47, %v5075_v8 }
 0x143   : > { %v1252_v3 = vpop.f32.mrf.mxu0  ;;  %3928 = vmatprep.subr.bf16.mxu0 %v4125_v51  ;;  %v1325_v5 = vpop.f32.mrf.mxu1  ;;  %3968 = vmatprep.subr.bf16.mxu1 %v4126_v19  ;;  %v1324_v6 = vadd.f32 %v1323_v57, %v5083_v48  ;;  %v1372_v24 = vmax.f32 %v1249_v29, 0.0  ;;  %v1374_v27 = vmax.f32 %v1322_v41, 0.0 }
 0x144   : > { %v1253_v16 = vadd.f32 %v1252_v3, %v5064_v38  ;;  %2899 = vmatprep.mubr.bf16.mxu0 %v1545_v56  ;;  %v1326_v9 = vadd.f32 %v1325_v5, %v5088_v1  ;;  %2964 = vmatprep.mubr.bf16.mxu1 %v1547_v2  ;;  %v1373_v20 = vmax.f32 %v1251_v45, 0.0 }
 0x145   : > { %v1254_v10 = vpop.f32.mrf.mxu0  ;;  %2900 = vmatmul.mubr.bf16.gmra.mxu0 %v1544_v0  ;;  %v1327_v59 = vpop.f32.mrf.mxu1  ;;  %2965 = vmatmul.mubr.bf16.gmra.mxu1 %v1546_v12  ;;  %v1375_v53 = vmax.f32 %v1324_v6, 0.0 }
 0x146   : > { %v1255_v52 = vadd.f32 %v1254_v10, %v5075_v8  ;;  %3929 = vmatpush3.bf16.msra.mxu0 %v4127_v61  ;;  %v1388_v14 = vmax.f32 %v1253_v16, 0.0  ;;  %v1328_v63 = vadd.f32 %v1327_v59, %v5083_v48  ;;  %3969 = vmatpush3.bf16.msra.mxu1 %v4128_v7  ;;  %v1390_v21 = vmax.f32 %v1326_v9, 0.0 }
 0x147   : > { %v1258_v17 = vpop.f32.mrf.mxu0  ;;  %3930 = vmatprep.subr.bf16.mxu0 %v4129_v50  ;;  %v1331_v23 = vpop.f32.mrf.mxu1  ;;  %3970 = vmatprep.subr.bf16.mxu1 %v4130_v22 }
 0x148   : > { %v1389_v62 = vmax.f32 %v1255_v52, 0.0  ;;  %v1391_v55 = vmax.f32 %v1328_v63, 0.0  ;;  %v1259_v25 = vadd.f32 %v1258_v17, %v5064_v38  ;;  %v1332_v30 = vadd.f32 %v1331_v23, %v5088_v1 }
 0x149   : > { %v1260_v26 = vpop.f32.mrf.mxu0  ;;  %v1333_v32 = vpop.f32.mrf.mxu1  ;;  %v1500_v33 = vpack.c.bf16 %v1388_v14, %v1372_v24  ;;  %v1502_v54 = vpack.c.bf16 %v1390_v21, %v1374_v27 }
 0x14a   : > { %v1501_v28 = vpack.c.bf16 %v1389_v62, %v1373_v20  ;;  %v1261_v31 = vadd.f32 %v1260_v26, %v5075_v8  ;;  %3931 = vmatpush3.bf16.msra.mxu0 %v4131_v13  ;;  %v1503_v34 = vpack.c.bf16 %v1391_v55, %v1375_v53  ;;  %v1334_v60 = vadd.f32 %v1333_v32, %v5083_v48 }
 0x14b   : > { %3971 = vmatpush3.bf16.msra.mxu1 %v4132_v18  ;;  %v1262_v35 = vpop.f32.mrf.mxu0  ;;  %v1335_v37 = vpop.f32.mrf.mxu1  ;;  %v1404_v4 = vmax.f32 %v1259_v25, 0.0  ;;  %v1406_v51 = vmax.f32 %v1332_v30, 0.0 }
 0x14c   : > { %v1263_v36 = vadd.f32 %v1262_v35, %v5064_v38  ;;  %3005 = vmatprep.mubr.bf16.mxu0 %v1501_v28  ;;  %v1336_v39 = vadd.f32 %v1335_v37, %v5088_v1  ;;  %3070 = vmatprep.mubr.bf16.mxu1 %v1503_v34  ;;  %v1405_v40 = vmax.f32 %v1261_v31, 0.0  ;;  %v1407_v19 = vmax.f32 %v1334_v60, 0.0 }
 0x14d   : > { %v1264_v11 = vpop.f32.mrf.mxu0  ;;  %3006 = vmatmul.mubr.bf16.vlgmr.msra.gmra.mxu0 %v1500_v33  ;;  %v1337_v58 = vpop.f32.mrf.mxu1 }
 0x14e   : > { %v1420_v42 = vmax.f32 %v1263_v36, 0.0  ;;  %v1265_v15 = vadd.f32 %v1264_v11, %v5075_v8  ;;  %3071 = vmatmul.mubr.bf16.vlgmr.msra.gmra.mxu1 %v1502_v54  ;;  %v1422_v43 = vmax.f32 %v1336_v39, 0.0  ;;  %v1338_v44 = vadd.f32 %v1337_v58, %v5083_v48 }
 0x14f   : > { %v1268_v46 = vpop.f32.mrf.mxu0  ;;  %v1341_v49 = vpop.f32.mrf.mxu1 }
 0x150   : > { %v1421_v47 = vmax.f32 %v1265_v15, 0.0  ;;  %v1516_v56 = vpack.c.bf16 %v1420_v42, %v1404_v4  ;;  %v1423_v57 = vmax.f32 %v1338_v44, 0.0  ;;  %v1269_v61 = vadd.f32 %v1268_v46, %v5064_v38 }
 0x151   : > { %v1270_v0 = vpop.f32.mrf.mxu0  ;;  %v1518_v2 = vpack.c.bf16 %v1422_v43, %v1406_v51  ;;  %v1342_v50 = vadd.f32 %v1341_v49, %v5088_v1  ;;  %v1343_v12 = vpop.f32.mrf.mxu1 }
 0x152   : > { %v1517_v3 = vpack.c.bf16 %v1421_v47, %v1405_v40  ;;  %v1271_v7 = vadd.f32 %v1270_v0, %v5075_v8  ;;  %v1519_v45 = vpack.c.bf16 %v1423_v57, %v1407_v19  ;;  %v1344_v5 = vadd.f32 %v1343_v12, %v5083_v48 }
 0x153   : > { %v1272_v16 = vpop.f32.mrf.mxu0  ;;  %v1345_v29 = vpop.f32.mrf.mxu1  ;;  %v1436_v6 = vmax.f32 %v1269_v61, 0.0  ;;  %v1438_v52 = vmax.f32 %v1342_v50, 0.0 }
 0x154   : > { %v1273_v22 = vadd.f32 %v1272_v16, %v5064_v38  ;;  %3013 = vmatprep.mubr.bf16.mxu0 %v1517_v3  ;;  %3078 = vmatprep.mubr.bf16.mxu1 %v1519_v45  ;;  %v1346_v10 = vadd.f32 %v1345_v29, %v5088_v1  ;;  %v1437_v41 = vmax.f32 %v1271_v7, 0.0  ;;  %v1439_v63 = vmax.f32 %v1344_v5, 0.0 }
 0x155   : > { %v1274_v9 = vpop.f32.mrf.mxu0  ;;  %3014 = vmatmul.mubr.bf16.gmra.mxu0 %v1516_v56  ;;  %v1347_v14 = vpop.f32.mrf.mxu1 }
 0x156   : > { %v1452_v59 = vmax.f32 %v1273_v22, 0.0  ;;  %v1275_v13 = vadd.f32 %v1274_v9, %v5075_v8  ;;  %3079 = vmatmul.mubr.bf16.gmra.mxu1 %v1518_v2  ;;  %v1454_v17 = vmax.f32 %v1346_v10, 0.0  ;;  %v1348_v20 = vadd.f32 %v1347_v14, %v5083_v48 }
 0x157   : > { %v1278_v18 = vpop.f32.mrf.mxu0  ;;  %v1351_v62 = vpop.f32.mrf.mxu1 }
 0x158   : > { %v1453_v21 = vmax.f32 %v1275_v13, 0.0  ;;  %v1532_v23 = vpack.c.bf16 %v1452_v59, %v1436_v6  ;;  %v1279_v24 = vadd.f32 %v1278_v18, %v5064_v38  ;;  %v1455_v53 = vmax.f32 %v1348_v20, 0.0 }
 0x159   : > { %v1280_v55 = vpop.f32.mrf.mxu0  ;;  %v1534_v26 = vpack.c.bf16 %v1454_v17, %v1438_v52  ;;  %v1352_v28 = vadd.f32 %v1351_v62, %v5088_v1  ;;  %v1353_v30 = vpop.f32.mrf.mxu1 }
 0x15a   : > { %v1533_v25 = vpack.c.bf16 %v1453_v21, %v1437_v41  ;;  %v1281_v27 = vadd.f32 %v1280_v55, %v5075_v8  ;;  %v1535_v31 = vpack.c.bf16 %v1455_v53, %v1439_v63  ;;  %v1354_v33 = vadd.f32 %v1353_v30, %v5083_v48 }
 0x15b   : > { %v1282_v32 = vpop.f32.mrf.mxu0  ;;  %v1355_v60 = vpop.f32.mrf.mxu1  ;;  %v1468_v35 = vmax.f32 %v1279_v24, 0.0  ;;  %v1470_v4 = vmax.f32 %v1352_v28, 0.0 }
 0x15c   : > { %v1283_v34 = vadd.f32 %v1282_v32, %v5064_v38  ;;  %3021 = vmatprep.mubr.bf16.mxu0 %v1533_v25  ;;  %v1356_v36 = vadd.f32 %v1355_v60, %v5088_v1  ;;  %3086 = vmatprep.mubr.bf16.mxu1 %v1535_v31  ;;  %v1469_v37 = vmax.f32 %v1281_v27, 0.0  ;;  %v1471_v40 = vmax.f32 %v1354_v33, 0.0 }
 0x15d   : > { %v1284_v54 = vpop.f32.mrf.mxu0  ;;  %3022 = vmatmul.mubr.bf16.gmra.mxu0 %v1532_v23  ;;  %v1357_v51 = vpop.f32.mrf.mxu1 }
 0x15e   : > { %v1484_v39 = vmax.f32 %v1283_v34, 0.0  ;;  %v1285_v11 = vadd.f32 %v1284_v54, %v5075_v8  ;;  %3087 = vmatmul.mubr.bf16.gmra.mxu1 %v1534_v26  ;;  %v1486_v42 = vmax.f32 %v1356_v36, 0.0  ;;  %v1358_v15 = vadd.f32 %v1357_v51, %v5083_v48  ;;  %v3543_v8 = vld [vmem:[%s5488_s4] ss:$0 sm:$0xff] }
 0x160   : > { %v1485_v38 = vmax.f32 %v1285_v11, 0.0  ;;  %v1548_v58 = vpack.c.bf16 %v1484_v39, %v1468_v35  ;;  %v1487_v19 = vmax.f32 %v1358_v15, 0.0  ;;  %v1550_v44 = vpack.c.bf16 %v1486_v42, %v1470_v4 }
 0x162   : > { %v1549_v43 = vpack.c.bf16 %v1485_v38, %v1469_v37  ;;  %v1551_v46 = vpack.c.bf16 %v1487_v19, %v1471_v40 }
 0x164   : > { %3029 = vmatprep.mubr.bf16.mxu0 %v1549_v43  ;;  %3094 = vmatprep.mubr.bf16.mxu1 %v1551_v46 }
 0x165   : > { %3030 = vmatmul.mubr.bf16.gmra.mxu0 %v1548_v58 }
 0x166   : > { %3095 = vmatmul.mubr.bf16.gmra.mxu1 %v1550_v44 }
 0x1ad   : > { %v3692_v1 = vpop.f32.mrf.mxu0  ;;  %v3732_v47 = vpop.f32.mrf.mxu1 }
 0x1af   : > { %v3693_v49 = vpop.f32.mrf.mxu0  ;;  %v3733_v57 = vpop.f32.mrf.mxu1 }
 0x1b0   : > { %v3694_v56 = vadd.f32 %v3693_v49, %v3692_v1  ;;  %v3734_v48 = vadd.f32 %v3733_v57, %v3732_v47 }
 0x1b1   : > { %v3695_v61 = vpop.f32.mrf.mxu0  ;;  %v3735_v2 = vpop.f32.mrf.mxu1 }
 0x1b2   : > { %v2618_v0 = vadd.f32 %v3694_v56, %v3543_v8 }
 0x1b3   : > { %v3696_v3 = vpop.f32.mrf.mxu0  ;;  %v3736_v12 = vpop.f32.mrf.mxu1 }
 0x1b4   : > { %v5143_v7 = vadd.f32 %v3734_v48, %v2618_v0  ;;  %v3697_v50 = vadd.f32 %v3696_v3, %v3695_v61  ;;  %v3737_v45 = vadd.f32 %v3736_v12, %v3735_v2 }
 0x1b5   : > { %v3698_v16 = vpop.f32.mrf.mxu0  ;;  %v3738_v22 = vpop.f32.mrf.mxu1 }
 0x1b6   : > { %v2621_v5 = vadd.f32 %v3697_v50, %v3543_v8 }
 0x1b7   : > { %v3699_v29 = vpop.f32.mrf.mxu0  ;;  %v3739_v10 = vpop.f32.mrf.mxu1 }
 0x1b8   : > { %v5145_v6 = vadd.f32 %v3737_v45, %v2621_v5  ;;  %v3700_v9 = vadd.f32 %v3699_v29, %v3698_v16  ;;  %v3740_v41 = vadd.f32 %v3739_v10, %v3738_v22 }
 0x1b9   : > { %v3701_v52 = vpop.f32.mrf.mxu0  ;;  %v3741_v13 = vpop.f32.mrf.mxu1 }
 0x1ba   : > { %v2626_v59 = vadd.f32 %v3700_v9, %v3543_v8 }
 0x1bb   : > { %v3702_v14 = vpop.f32.mrf.mxu0  ;;  %v3742_v18 = vpop.f32.mrf.mxu1 }
 0x1bc   : > { %v5147_v63 = vadd.f32 %v3740_v41, %v2626_v59  ;;  %v3703_v17 = vadd.f32 %v3702_v14, %v3701_v52  ;;  %v3743_v20 = vadd.f32 %v3742_v18, %v3741_v13 }
 0x1bd   : > { %v3704_v21 = vpop.f32.mrf.mxu0  ;;  %v3744_v23 = vpop.f32.mrf.mxu1 }
 0x1be   : > { %v2629_v62 = vadd.f32 %v3703_v17, %v3543_v8 }
 0x1bf   : > { %v3705_v24 = vpop.f32.mrf.mxu0  ;;  %v3745_v25 = vpop.f32.mrf.mxu1 }
 0x1c0   : > { %v5149_v53 = vadd.f32 %v3743_v20, %v2629_v62  ;;  %v3706_v55 = vadd.f32 %v3705_v24, %v3704_v21  ;;  %v3746_v26 = vadd.f32 %v3745_v25, %v3744_v23 }
 0x1c1   : > { %v3707_v27 = vpop.f32.mrf.mxu0  ;;  %v3747_v30 = vpop.f32.mrf.mxu1 }
 0x1c2   : > { %v2634_v28 = vadd.f32 %v3706_v55, %v3543_v8 }
 0x1c3   : > { %v3708_v31 = vpop.f32.mrf.mxu0  ;;  %v3748_v34 = vpop.f32.mrf.mxu1 }
 0x1c4   : > { %v5151_v32 = vadd.f32 %v3746_v26, %v2634_v28  ;;  %v3709_v33 = vadd.f32 %v3708_v31, %v3707_v27  ;;  %v3749_v60 = vadd.f32 %v3748_v34, %v3747_v30 }
 0x1c5   : > { %v3710_v35 = vpop.f32.mrf.mxu0  ;;  %v3750_v36 = vpop.f32.mrf.mxu1 }
 0x1c6   : > { %v2637_v54 = vadd.f32 %v3709_v33, %v3543_v8 }
 0x1c7   : > { %v3711_v37 = vpop.f32.mrf.mxu0  ;;  %v3751_v11 = vpop.f32.mrf.mxu1 }
 0x1c8   : > { %v5153_v4 = vadd.f32 %v3749_v60, %v2637_v54  ;;  %v3712_v39 = vadd.f32 %v3711_v37, %v3710_v35  ;;  %v3752_v51 = vadd.f32 %v3751_v11, %v3750_v36 }
 0x1c9   : > { %v3713_v40 = vpop.f32.mrf.mxu0  ;;  %v3753_v15 = vpop.f32.mrf.mxu1 }
 0x1ca   : > { %v2642_v42 = vadd.f32 %v3712_v39, %v3543_v8 }
 0x1cb   : > { %v3714_v38 = vpop.f32.mrf.mxu0  ;;  %v3754_v43 = vpop.f32.mrf.mxu1 }
 0x1cc   : > { %v5155_v58 = vadd.f32 %v3752_v51, %v2642_v42  ;;  %v3715_v19 = vadd.f32 %v3714_v38, %v3713_v40  ;;  %v3755_v44 = vadd.f32 %v3754_v43, %v3753_v15 }
 0x1cd   : > { %v3772_v46 = vpop.f32.mrf.mxu0  ;;  %v3812_v47 = vpop.f32.mrf.mxu1 }
 0x1ce   : > { %5492 = vst [vmem:[#allocation2_spill] sm:$0xff] %v5155_v58  ;;  %v2645_v1 = vadd.f32 %v3715_v19, %v3543_v8 }
 0x1cf   : > { %v3773_v49 = vpop.f32.mrf.mxu0  ;;  %v3813_v57 = vpop.f32.mrf.mxu1 }
 0x1d0   : > { %v5157_v56 = vadd.f32 %v3755_v44, %v2645_v1  ;;  %v3774_v43 = vadd.f32 %v3773_v49, %v3772_v46 }
 0x1d1   : > { %v3775_v48 = vpop.f32.mrf.mxu0  ;;  %v5159_v61 = vpop.f32.mrf.mxu1 }
 0x1d2   : > { %5493 = vst [vmem:[#allocation3_spill] sm:$0xff] %v5157_v56  ;;  %v2748_v56 = vadd.f32 %v3774_v43, %v5143_v7 }
 0x1d3   : > { %v3776_v0 = vpop.f32.mrf.mxu0  ;;  %v5161_v2 = vpop.f32.mrf.mxu1 }
 0x1d4   : > { %v3817_v7 = vadd.f32 %v5161_v2, %v5159_v61 }
 0x1d5   : > { %v3778_v3 = vpop.f32.mrf.mxu0  ;;  %v5163_v50 = vpop.f32.mrf.mxu1 }
 0x1d7   : > { %v3779_v12 = vpop.f32.mrf.mxu0  ;;  %v5165_v45 = vpop.f32.mrf.mxu1 }
 0x1d8   : > { %v3780_v46 = vadd.f32 %v3779_v12, %v3778_v3 }
 0x1d9   : > { %v5167_v16 = vpop.f32.mrf.mxu0  ;;  %v5169_v8 = vpop.f32.mrf.mxu1 }
 0x1db   : > { %v3782_v5 = vpop.f32.mrf.mxu0  ;;  %v5171_v22 = vpop.f32.mrf.mxu1 }
 0x1dd   : > { %v5173_v29 = vpop.f32.mrf.mxu0  ;;  %v5175_v9 = vpop.f32.mrf.mxu1 }
 0x1df   : > { %v5177_v10 = vpop.f32.mrf.mxu0  ;;  %v5179_v41 = vpop.f32.mrf.mxu1 }
 0x1e1   : > { %v5181_v52 = vpop.f32.mrf.mxu0  ;;  %v5183_v59 = vpop.f32.mrf.mxu1 }
 0x1e3   : > { %v5185_v13 = vpop.f32.mrf.mxu0  ;;  %v5187_v14 = vpop.f32.mrf.mxu1 }
 0x1e5   : > { %v5189_v17 = vpop.f32.mrf.mxu0  ;;  %v5191_v18 = vpop.f32.mrf.mxu1 }
 0x1e6   : > { %5494 = vst [vmem:[#allocation4_spill] sm:$0xff] %v5191_v18 }
 0x1e7   : > { %v5193_v20 = vpop.f32.mrf.mxu0  ;;  %v5195_v21 = vpop.f32.mrf.mxu1 }
 0x1e8   : > { %5495 = vst [vmem:[#allocation5_spill] sm:$0xff] %v5195_v21  ;;  %v3777_v21 = vadd.f32 %v3776_v0, %v3775_v48 }
 0x1e9   : > { %v5197_v62 = vpop.f32.mrf.mxu0  ;;  %v5199_v23 = vpop.f32.mrf.mxu1 }
 0x1ea   : > { %5496 = vst [vmem:[#allocation6_spill] sm:$0xff] %v5197_v62  ;;  %5497 = vst [vmem:[#allocation7_spill] sm:$0xff] %v5199_v23  ;;  %v2751_v58 = vadd.f32 %v3777_v21, %v5145_v6  ;;  %v3820_v6 = vadd.f32 %v5165_v45, %v5163_v50  ;;  %v3823_v50 = vadd.f32 %v5171_v22, %v5169_v8 }
 0x1eb   : > { %v5201_v24 = vpop.f32.mrf.mxu0  ;;  %v5203_v55 = vpop.f32.mrf.mxu1 }
 0x1ec   : > { %5498 = vst [vmem:[#allocation8_spill] sm:$0xff] %v5201_v24  ;;  %5499 = vst [vmem:[#allocation9_spill] sm:$0xff] %v5203_v55  ;;  %v3814_v24 = vadd.f32 %v3813_v57, %v3812_v47  ;;  %v2756_v47 = vadd.f32 %v3780_v46, %v5147_v63  ;;  %v3783_v57 = vadd.f32 %v3782_v5, %v5167_v16 }
 0x1ed   : > { %v3852_v25 = vpop.f32.mrf.mxu0  ;;  %v3892_v26 = vpop.f32.mrf.mxu1  ;;  %v2816_v12 = vadd.f32 %v3817_v7, %v2751_v58  ;;  %v3786_v63 = vadd.f32 %v5177_v10, %v5173_v29 }
 0x1ef   : > { %v3853_v27 = vpop.f32.mrf.mxu0  ;;  %v3893_v28 = vpop.f32.mrf.mxu1 }
 0x1f1   : > { %v3855_v30 = vpop.f32.mrf.mxu0  ;;  %v3895_v31 = vpop.f32.mrf.mxu1 }
 0x1f3   : > { %v3856_v33 = vpop.f32.mrf.mxu0  ;;  %v3896_v34 = vpop.f32.mrf.mxu1 }
 0x1f4   : > { %v3857_v0 = vadd.f32 %v3856_v33, %v3855_v30  ;;  %v2821_v30 = vadd.f32 %v3820_v6, %v2756_v47  ;;  %v2759_v33 = vadd.f32 %v3783_v57, %v5149_v53  ;;  %v3897_v16 = vadd.f32 %v3896_v34, %v3895_v31 }
 0x1f5   : > { %v3858_v60 = vpop.f32.mrf.mxu0  ;;  %v5205_v35 = vpop.f32.mrf.mxu1  ;;  %v2764_v31 = vadd.f32 %v3786_v63, %v5151_v32  ;;  %v5507_v63 = vld [vmem:[#allocation6_spill] sm:$0xff] }
 0x1f6   : > { %v2824_v53 = vadd.f32 %v3823_v50, %v2759_v33  ;;  %v5506_v33 = vld [vmem:[#allocation2_spill] sm:$0xff] }
 0x1f7   : > { %v3859_v54 = vpop.f32.mrf.mxu0  ;;  %v5207_v36 = vpop.f32.mrf.mxu1 }
 0x1f8   : > { %v3860_v21 = vadd.f32 %v3859_v54, %v3858_v60  ;;  %v3900_v29 = vadd.f32 %v5207_v36, %v5205_v35 }
 0x1f9   : > { %v3861_v37 = vpop.f32.mrf.mxu0  ;;  %v5209_v39 = vpop.f32.mrf.mxu1 }
 0x1fa   : > { %v2886_v45 = vadd.f32 %v3860_v21, %v2821_v30 }
 0x1fb   : > { %v3862_v11 = vpop.f32.mrf.mxu0  ;;  %v5211_v51 = vpop.f32.mrf.mxu1 }
 0x1fd   : > { %v5213_v40 = vpop.f32.mrf.mxu0  ;;  %v5215_v42 = vpop.f32.mrf.mxu1 }
 0x1fe   : > { %5500 = vst [vmem:[#allocation10_spill] sm:$0xff] %v5215_v42 }
 0x1ff   : > { %v5217_v15 = vpop.f32.mrf.mxu0  ;;  %v5219_v38 = vpop.f32.mrf.mxu1 }
 0x200   : > { %5501 = vst [vmem:[#allocation11_spill] sm:$0xff] %v5219_v38  ;;  %v3854_v38 = vadd.f32 %v3853_v27, %v3852_v25 }
 0x201   : > { %v5221_v19 = vpop.f32.mrf.mxu0  ;;  %v5223_v44 = vpop.f32.mrf.mxu1 }
 0x202   : > { %5502 = vst [vmem:[#allocation12_spill] sm:$0xff] %v5223_v44  ;;  %v2813_v44 = vadd.f32 %v3814_v24, %v2748_v56  ;;  %v3894_v56 = vadd.f32 %v3893_v28, %v3892_v26  ;;  %v3863_v28 = vadd.f32 %v3862_v11, %v3861_v37  ;;  %v2951_v11 = vadd.f32 %v3900_v29, %v2886_v45  ;;  %v4151_v45 = vld [vmem:[%s4272_s18 + $0x10] sm:$0xff] }
 0x203   : > { %v5225_v1 = vpop.f32.mrf.mxu0  ;;  %v5227_v55 = vpop.f32.mrf.mxu1 }
 0x204   : > { %5503 = vst [vmem:[#allocation13_spill] sm:$0xff] %v5227_v55  ;;  %v2878_v48 = vadd.f32 %v3854_v38, %v2813_v44  ;;  %v2889_v47 = vadd.f32 %v3863_v28, %v2824_v53 }
 0x205   : > { %v5229_v23 = vpop.f32.mrf.mxu0  ;;  %v5232_v18 = vpop.f32.mrf.mxu1 }
 0x206   : > { %5504 = vst [vmem:[#allocation14_spill] sm:$0xff] %v5229_v23  ;;  %v2943_v27 = vadd.f32 %v3894_v56, %v2878_v48  ;;  %v3789_v48 = vadd.f32 %v5185_v13, %v5181_v52  ;;  %v3866_v52 = vadd.f32 %v5217_v15, %v5213_v40  ;;  %v4150_v15 = vld [vmem:[%s4272_s18 + $0x8] sm:$0xff] }
 0x207   : > { %v5234_v42 = vpop.f32.mrf.mxu0  ;;  %v5236_v62 = vpop.f32.mrf.mxu1 }
 0x209   : > { %v5238_v49 = vpop.f32.mrf.mxu0  ;;  %v5241_v55 = vpop.f32.mrf.mxu1 }
 0x20a   : > { %5505 = vst [vmem:[#allocation15_spill] sm:$0xff] %v5241_v55  ;;  %v2881_v55 = vadd.f32 %v3857_v0, %v2816_v12  ;;  %v4149_v0 = vld [vmem:[%s4272_s18] sm:$0xff]  ;;  %v3792_v12 = vadd.f32 %v5193_v20, %v5189_v17 }
 0x20b   : > { %v5243_v23 = vpop.f32.mrf.mxu0  ;;  %v5247_v43 = vpop.f32.mrf.mxu1 }
 0x20c   : > { %v2946_v54 = vadd.f32 %v3897_v16, %v2881_v55  ;;  %v3826_v55 = vadd.f32 %v5179_v41, %v5175_v9  ;;  %v3903_v9 = vadd.f32 %v5211_v51, %v5209_v39  ;;  %v5508_v16 = vld [vmem:[#allocation8_spill] sm:$0xff] }
 0x20d   : > { %v3932_v3 = vpop.f32.mrf.mxu0 }
 0x20e   : > { %v3972_v24 = vpop.f32.mrf.mxu1 }
 0x20f   : > { %v3933_v25 = vpop.f32.mrf.mxu0 }
 0x210   : > { %v3934_v61 = vadd.f32 %v3933_v25, %v3932_v3  ;;  %v3973_v2 = vpop.f32.mrf.mxu1  ;;  %v2767_v3 = vadd.f32 %v3789_v48, %v5153_v4  ;;  %v3829_v25 = vadd.f32 %v5187_v14, %v5183_v59  ;;  %v3869_v4 = vadd.f32 %v5225_v1, %v5221_v19  ;;  %v5509_v14 = vld [vmem:[#allocation10_spill] sm:$0xff] }
 0x211   : > { %v3935_v38 = vpop.f32.mrf.mxu0  ;;  %v3974_v5 = vadd.f32 %v3973_v2, %v3972_v24  ;;  %v2829_v24 = vadd.f32 %v3826_v55, %v2764_v31  ;;  %v5515_v55 = vld [vmem:[#allocation13_spill] sm:$0xff] }
 0x212   : > { %v3008_v58 = vadd.f32 %v3934_v61, %v2943_v27  ;;  %v3975_v26 = vpop.f32.mrf.mxu1  ;;  %v2954_v27 = vadd.f32 %v3903_v9, %v2889_v47  ;;  %v2832_v30 = vadd.f32 %v3829_v25, %v2767_v3  ;;  %v5517_v3 = vld [vmem:[#allocation7_spill] sm:$0xff] }
 0x213   : > { %v3936_v60 = vpop.f32.mrf.mxu0  ;;  %v2894_v20 = vadd.f32 %v3866_v52, %v2829_v24  ;;  %v5516_v52 = vld [vmem:[#allocation3_spill] sm:$0xff] }
 0x214   : > { %v3073_v44 = vadd.f32 %v3974_v5, %v3008_v58  ;;  %v3937_v46 = vadd.f32 %v3936_v60, %v3935_v38  ;;  %v3976_v7 = vpop.f32.mrf.mxu1  ;;  %v2772_v38 = vadd.f32 %v3792_v12, %v5506_v33  ;;  %v3795_v58 = vadd.f32 %v5508_v16, %v5507_v63  ;;  %v5510_v5 = vld [vmem:[#allocation11_spill] sm:$0xff]  ;;  %v5511_v60 = vld [vmem:[#allocation4_spill] sm:$0xff]  ;;  %v5518_v12 = vld [vmem:[#allocation9_spill] sm:$0xff] }
 0x215   : > { %v3938_v10 = vpop.f32.mrf.mxu0  ;;  %v3977_v8 = vadd.f32 %v3976_v7, %v3975_v26  ;;  %v3906_v19 = vadd.f32 %v5510_v5, %v5509_v14  ;;  %v5513_v7 = vld [vmem:[#allocation14_spill] sm:$0xff]  ;;  %v3835_v9 = vadd.f32 %v5518_v12, %v5517_v3 }
 0x216   : > { %v3011_v34 = vadd.f32 %v3937_v46, %v2946_v54  ;;  %v3978_v22 = vpop.f32.mrf.mxu1  ;;  %v5264_v37 = vadd.f32 %v4149_v0, %v3073_v44  ;;  %v5512_v54 = vld [vmem:[#allocation5_spill] sm:$0xff]  ;;  %v2897_v46 = vadd.f32 %v3869_v4, %v2832_v30  ;;  %v3872_v53 = vadd.f32 %v5234_v42, %v5513_v7  ;;  %v5514_v0 = vld [vmem:[#allocation12_spill] sm:$0xff] }
 0x217   : > { %v3939_v57 = vpop.f32.mrf.mxu0  ;;  %v3832_v44 = vadd.f32 %v5512_v54, %v5511_v60  ;;  %v2959_v29 = vadd.f32 %v3906_v19, %v2894_v20  ;;  %v4152_v42 = vld [vmem:[%s4272_s18 + $0x18] sm:$0xff]  ;;  %v3912_v4 = vadd.f32 %v5236_v62, %v5232_v18  ;;  %v5519_v18 = vld [vmem:[#allocation15_spill] sm:$0xff] }
 0x218   : > { %v3076_v13 = vadd.f32 %v3977_v8, %v3011_v34  ;;  %v3940_v35 = vadd.f32 %v3939_v57, %v3938_v10  ;;  %v3979_v36 = vpop.f32.mrf.mxu1  ;;  %v3113_v32 = vsel %vm763_vm0, %v5264_v37, 0.0  ;;  %v3915_v62 = vadd.f32 %v5247_v43, %v5519_v18 }
 0x219   : > { %v3980_v41 = vadd.f32 %v3979_v36, %v3978_v22  ;;  %v3941_v56 = vpop.f32.mrf.mxu0  ;;  %3114 = vadd.xlane.f32.xlu0 %v3113_v32  ;;  %v2837_v22 = vadd.f32 %v3832_v44, %v2772_v38 }
 0x21a   : > { %v3016_v6 = vadd.f32 %v3940_v35, %v2951_v11  ;;  %v3981_v40 = vpop.f32.mrf.mxu1  ;;  %v5278_v21 = vadd.f32 %v4150_v15, %v3076_v13  ;;  %v3909_v11 = vadd.f32 %v5515_v55, %v5514_v0  ;;  %v2775_v13 = vadd.f32 %v3795_v58, %v5516_v52 }
 0x21b   : > { %v3942_v17 = vpop.f32.mrf.mxu0 }
 0x21c   : > { %v3081_v39 = vadd.f32 %v3980_v41, %v3016_v6  ;;  %v3943_v51 = vadd.f32 %v3942_v17, %v3941_v56  ;;  %v3982_v61 = vpop.f32.mrf.mxu1  ;;  %v3116_v2 = vsel %vm763_vm0, %v5278_v21, 0.0  ;;  %v2962_v41 = vadd.f32 %v3909_v11, %v2897_v46 }
 0x21d   : > { %v3944_v59 = vpop.f32.mrf.mxu0  ;;  %3117 = vadd.xlane.f32.xlu0 %v3116_v2  ;;  %v3983_v26 = vadd.f32 %v3982_v61, %v3981_v40  ;;  %v2902_v56 = vadd.f32 %v3872_v53, %v2837_v22  ;;  %v3875_v6 = vadd.f32 %v5243_v23, %v5238_v49  ;;  %v4153_v2 = vld [vmem:[%s4272_s18 + $0x20] sm:$0xff] }
 0x21e   : > { %v3019_v1 = vadd.f32 %v3943_v51, %v2954_v27  ;;  %v3984_v50 = vpop.f32.mrf.mxu1  ;;  %v5292_v28 = vadd.f32 %v4151_v45, %v3081_v39  ;;  %v2840_v39 = vadd.f32 %v3835_v9, %v2775_v13 }
 0x21f   : > { %v3945_v48 = vpop.f32.mrf.mxu0  ;;  %v2967_v33 = vadd.f32 %v3912_v4, %v2902_v56 }
 0x220   : > { %v3084_v10 = vadd.f32 %v3983_v26, %v3019_v1  ;;  %v3946_v31 = vadd.f32 %v3945_v48, %v3944_v59  ;;  %v3985_v34 = vpop.f32.mrf.mxu1  ;;  %v3119_v8 = vsel %vm763_vm0, %v5292_v28, 0.0  ;;  %v2905_v49 = vadd.f32 %v3875_v6, %v2840_v39  ;;  %v4154_v1 = vld [vmem:[%s4272_s18 + $0x28] sm:$0xff]  ;;  %v4155_v48 = vld [vmem:[%s4272_s18 + $0x30] sm:$0xff] }
 0x221   : > { %v3947_v47 = vpop.f32.mrf.mxu0  ;;  %v3986_v57 = vadd.f32 %v3985_v34, %v3984_v50  ;;  %3120 = vadd.xlane.f32.xlu1 %v3119_v8 }
 0x222   : > { %v3024_v35 = vadd.f32 %v3946_v31, %v2959_v29  ;;  %v3987_v36 = vpop.f32.mrf.mxu1  ;;  %v5304_v32 = vadd.f32 %v4152_v42, %v3084_v10  ;;  %v2970_v45 = vadd.f32 %v3915_v62, %v2905_v49  ;;  %v4156_v31 = vld [vmem:[%s4272_s18 + $0x38] sm:$0xff] }
 0x223   : > { %v3948_v24 = vpop.f32.mrf.mxu0 }
 0x224   : > { %v3089_v40 = vadd.f32 %v3986_v57, %v3024_v35  ;;  %v3949_v15 = vadd.f32 %v3948_v24, %v3947_v47  ;;  %v3988_v25 = vpop.f32.mrf.mxu1  ;;  %v3122_v27 = vsel %vm763_vm0, %v5304_v32, 0.0 }
 0x225   : > { %v3950_v17 = vpop.f32.mrf.mxu0  ;;  %v3989_v20 = vadd.f32 %v3988_v25, %v3987_v36  ;;  %3123 = vadd.xlane.f32.xlu1 %v3122_v27 }
 0x226   : > { %v3027_v51 = vadd.f32 %v3949_v15, %v2962_v41  ;;  %v3990_v61 = vpop.f32.mrf.mxu1  ;;  %v3107_v30 = vadd.f32 %v4153_v2, %v3089_v40 }
 0x227   : > { %v3951_v23 = vpop.f32.mrf.mxu0 }
 0x228   : > { %v3092_v38 = vadd.f32 %v3989_v20, %v3027_v51  ;;  %v3952_v63 = vadd.f32 %v3951_v23, %v3950_v17  ;;  %v3991_v16 = vpop.f32.mrf.mxu1  ;;  %v3125_v58 = vsel %vm763_vm0, %v3107_v30, 0.0 }
 0x229   : > { %v3953_v59 = vpop.f32.mrf.mxu0  ;;  %v3992_v14 = vadd.f32 %v3991_v16, %v3990_v61  ;;  %3126 = vadd.xlane.f32.xlu0 %v3125_v58 }
 0x22a   : > { %v3032_v5 = vadd.f32 %v3952_v63, %v2967_v33  ;;  %v3993_v19 = vpop.f32.mrf.mxu1  ;;  %v3108_v26 = vadd.f32 %v4154_v1, %v3092_v38 }
 0x22b   : > { %v3954_v50 = vpop.f32.mrf.mxu0 }
 0x22c   : > { %v3097_v60 = vadd.f32 %v3992_v14, %v3032_v5  ;;  %v3955_v54 = vadd.f32 %v3954_v50, %v3953_v59  ;;  %v3994_v44 = vpop.f32.mrf.mxu1  ;;  %v3128_v46 = vsel %vm763_vm0, %v3108_v26, 0.0 }
 0x22d   : > { %v3995_v7 = vadd.f32 %v3994_v44, %v3993_v19  ;;  %3129 = vadd.xlane.f32.xlu1 %v3128_v46  ;;  %v5371_v46 = vld [vmem:[%s5489_s5] ss:$0 sm:$0xff] }
 0x22e   : > { %v3035_v53 = vadd.f32 %v3955_v54, %v2970_v45  ;;  %v3109_v29 = vadd.f32 %v4155_v48, %v3097_v60 }
 0x230   : > { %v3100_v10 = vadd.f32 %v3995_v7, %v3035_v53  ;;  %v3131_v43 = vsel %vm763_vm0, %v3109_v29, 0.0  ;;  %v5377_v53 = vld [vmem:[%s5490_s6] ss:$0 sm:$0xff] }
 0x231   : > { %3132 = vadd.xlane.f32.xlu0 %v3131_v43 }
 0x232   : > { %v3110_v34 = vadd.f32 %v4156_v31, %v3100_v10 }
 0x234   : > { %v3134_v8 = vsel %vm763_vm0, %v3110_v34, 0.0 }
 0x235   : > { %3135 = vadd.xlane.f32.xlu1 %v3134_v8 }
 0x2a2   : > { %v3115_v22 = vpop.xlane.xlu0 %3114 }
 0x2a3   : > { %v3138_v0 = vmul.f32 0.015625, %v3115_v22 }
 0x2a5   : > { %v5325_v55 = vsub.f32 %v5264_v37, %v3138_v0 }
 0x2a6   : > { %v3118_v11 = vpop.xlane.xlu0 %3117 }
 0x2a7   : > { %v3139_v47 = vmul.f32 0.015625, %v3118_v11  ;;  %v3154_v57 = vmul.f32 %v5325_v55, %v5325_v55 }
 0x2a9   : > { %v5330_v52 = vsub.f32 %v5278_v21, %v3139_v47  ;;  %v3162_v13 = vsel %vm763_vm0, %v3154_v57, 0.0 }
 0x2aa   : > { %v3121_v35 = vpop.xlane.xlu1 %3120  ;;  %3163 = vadd.xlane.f32.xlu0 %v3162_v13 }
 0x2ab   : > { %v3140_v36 = vmul.f32 0.015625, %v3121_v35  ;;  %v3155_v42 = vmul.f32 %v5330_v52, %v5330_v52 }
 0x2ad   : > { %v5336_v3 = vsub.f32 %v5292_v28, %v3140_v36  ;;  %v3165_v37 = vsel %vm763_vm0, %v3155_v42, 0.0 }
 0x2ae   : > { %v3124_v12 = vpop.xlane.xlu1 %3123  ;;  %3166 = vadd.xlane.f32.xlu1 %v3165_v37 }
 0x2af   : > { %v3141_v9 = vmul.f32 0.015625, %v3124_v12  ;;  %v3156_v21 = vmul.f32 %v5336_v3, %v5336_v3 }
 0x2b1   : > { %v5342_v41 = vsub.f32 %v5304_v32, %v3141_v9  ;;  %v3168_v56 = vsel %vm763_vm0, %v3156_v21, 0.0 }
 0x2b2   : > { %3169 = vadd.xlane.f32.xlu0 %v3168_v56  ;;  %v3127_v24 = vpop.xlane.xlu0 %3126 }
 0x2b3   : > { %v3142_v6 = vmul.f32 0.015625, %v3127_v24  ;;  %v3157_v28 = vmul.f32 %v5342_v41, %v5342_v41 }
 0x2b5   : > { %v5347_v40 = vsub.f32 %v3107_v30, %v3142_v6  ;;  %v3171_v15 = vsel %vm763_vm0, %v3157_v28, 0.0 }
 0x2b6   : > { %v3130_v25 = vpop.xlane.xlu1 %3129  ;;  %3172 = vadd.xlane.f32.xlu1 %v3171_v15 }
 0x2b7   : > { %v3143_v27 = vmul.f32 0.015625, %v3130_v25  ;;  %v3158_v4 = vmul.f32 %v5347_v40, %v5347_v40 }
 0x2b9   : > { %v5352_v32 = vsub.f32 %v3108_v26, %v3143_v27  ;;  %v3174_v17 = vsel %vm763_vm0, %v3158_v4, 0.0 }
 0x2ba   : > { %3175 = vadd.xlane.f32.xlu0 %v3174_v17  ;;  %v3133_v20 = vpop.xlane.xlu0 %3132 }
 0x2bb   : > { %v3144_v39 = vmul.f32 0.015625, %v3133_v20  ;;  %v3159_v51 = vmul.f32 %v5352_v32, %v5352_v32 }
 0x2bd   : > { %v5357_v61 = vsub.f32 %v3109_v29, %v3144_v39  ;;  %v3177_v2 = vsel %vm763_vm0, %v3159_v51, 0.0 }
 0x2be   : > { %v3136_v30 = vpop.xlane.xlu1 %3135  ;;  %3178 = vadd.xlane.f32.xlu1 %v3177_v2 }
 0x2bf   : > { %v3145_v33 = vmul.f32 0.015625, %v3136_v30  ;;  %v3160_v23 = vmul.f32 %v5357_v61, %v5357_v61 }
 0x2c1   : > { %v5362_v49 = vsub.f32 %v3110_v34, %v3145_v33  ;;  %v3180_v38 = vsel %vm763_vm0, %v3160_v23, 0.0 }
 0x2c2   : > { %3181 = vadd.xlane.f32.xlu0 %v3180_v38 }
 0x2c3   : > { %v3161_v63 = vmul.f32 %v5362_v49, %v5362_v49 }
 0x2c5   : > { %v3183_v16 = vsel %vm763_vm0, %v3161_v63, 0.0 }
 0x2c6   : > { %3184 = vadd.xlane.f32.xlu1 %v3183_v16 }
 0x333   : > { %v3164_v58 = vpop.xlane.xlu0 %3163 }
 0x334   : > { %v3186_v59 = vmul.f32 0.015625, %v3164_v58 }
 0x336   : > { %v3194_v14 = vadd.f32 1e-05, %v3186_v59 }
 0x337   : > { %v3167_v18 = vpop.xlane.xlu1 %3166 }
 0x338   : > { %4133 = vrsqrt.f32 %v3194_v14  ;;  %v3187_v62 = vmul.f32 0.015625, %v3167_v18 }
 0x33a   : > { %v3195_v5 = vadd.f32 1e-05, %v3187_v62 }
 0x33b   : > { %v3170_v19 = vpop.xlane.xlu0 %3169 }
 0x33c   : > { %4135 = vrsqrt.f32 %v3195_v5  ;;  %v3188_v1 = vmul.f32 0.015625, %v3170_v19 }
 0x33e   : > { %v3196_v26 = vadd.f32 1e-05, %v3188_v1 }
 0x33f   : > { %v3173_v50 = vpop.xlane.xlu1 %3172 }
 0x340   : > { %4137 = vrsqrt.f32 %v3196_v26  ;;  %v3189_v45 = vmul.f32 0.015625, %v3173_v50 }
 0x342   : > { %v3197_v60 = vadd.f32 1e-05, %v3189_v45 }
 0x343   : > { %v3176_v44 = vpop.xlane.xlu0 %3175 }
 0x344   : > { %4139 = vrsqrt.f32 %v3197_v60  ;;  %v3190_v48 = vmul.f32 0.015625, %v3176_v44 }
 0x345   : > { %v4134_v54 = vpop.eup %4133 }
 0x346   : > { %v3210_v7 = vmul.f32 %v4134_v54, %v5325_v55  ;;  %v3198_v22 = vadd.f32 1e-05, %v3190_v48 }
 0x347   : > { %v3179_v29 = vpop.xlane.xlu1 %3178 }
 0x348   : > { %v3224_v10 = vmul.f32 %v5371_v46, %v3210_v7  ;;  %v3191_v8 = vmul.f32 0.015625, %v3179_v29  ;;  %4141 = vrsqrt.f32 %v3198_v22 }
 0x349   : > { %v4136_v43 = vpop.eup %4135 }
 0x34a   : > { %v3238_v31 = vadd.f32 %v5377_v53, %v3224_v10  ;;  %v3211_v34 = vmul.f32 %v4136_v43, %v5330_v52  ;;  %v3199_v57 = vadd.f32 1e-05, %v3191_v8 }
 0x34b   : > { %v3182_v42 = vpop.xlane.xlu0 %3181 }
 0x34c   : > { %v3247_v0 = vsel %vm3246_vm1, %v3238_v31, -inf  ;;  %v3225_v55 = vmul.f32 %v5371_v46, %v3211_v34  ;;  %v3272_v35 = vsel %vm3271_vm2, %v3238_v31, -inf  ;;  %4143 = vrsqrt.f32 %v3199_v57 }
 0x34d   : > { %v4138_v11 = vpop.eup %4137  ;;  %3248 = vmax.xlane.f32.xlu0 %v3247_v0  ;;  %v3297_v12 = vsel %vm3296_vm3, %v3238_v31, -inf  ;;  %v3192_v56 = vmul.f32 0.015625, %v3182_v42  ;;  %v3322_v6 = vsel %vm3321_vm4, %v3238_v31, -inf }
 0x34e   : > { %v3239_v47 = vadd.f32 %v5377_v53, %v3225_v55  ;;  %v3212_v36 = vmul.f32 %v4138_v11, %v5336_v3 }
 0x34f   : > { %v3185_v24 = vpop.xlane.xlu1 %3184  ;;  %v3200_v27 = vadd.f32 1e-05, %v3192_v56 }
 0x350   : > { %v3250_v13 = vsel %vm3246_vm1, %v3239_v47, -inf  ;;  %v3275_v37 = vsel %vm3271_vm2, %v3239_v47, -inf  ;;  %v3226_v9 = vmul.f32 %v5371_v46, %v3212_v36  ;;  %v3300_v3 = vsel %vm3296_vm3, %v3239_v47, -inf }
 0x351   : > { %v4140_v52 = vpop.eup %4139  ;;  %3251 = vmax.xlane.f32.xlu1 %v3250_v13  ;;  %3273 = vmax.xlane.f32.xlu0 %v3272_v35  ;;  %v3193_v25 = vmul.f32 0.015625, %v3185_v24  ;;  %v3325_v4 = vsel %vm3321_vm4, %v3239_v47, -inf  ;;  %4145 = vrsqrt.f32 %v3200_v27 }
 0x352   : > { %v3213_v21 = vmul.f32 %v4140_v52, %v5342_v41  ;;  %v3240_v28 = vadd.f32 %v5377_v53, %v3226_v9 }
 0x353   : > { %v3201_v39 = vadd.f32 1e-05, %v3193_v25 }
 0x354   : > { %v3227_v15 = vmul.f32 %v5371_v46, %v3213_v21  ;;  %v3253_v41 = vsel %vm3246_vm1, %v3240_v28, -inf  ;;  %v3278_v30 = vsel %vm3271_vm2, %v3240_v28, -inf  ;;  %v3303_v38 = vsel %vm3296_vm3, %v3240_v28, -inf }
 0x355   : > { %3276 = vmax.xlane.f32.xlu1 %v3275_v37  ;;  %3298 = vmax.xlane.f32.xlu0 %v3297_v12  ;;  %v4142_v20 = vpop.eup %4141  ;;  %4147 = vrsqrt.f32 %v3201_v39  ;;  %v3328_v59 = vsel %vm3321_vm4, %v3240_v28, -inf }
 0x356   : > { %v3241_v17 = vadd.f32 %v5377_v53, %v3227_v15  ;;  %v3214_v33 = vmul.f32 %v4142_v20, %v5347_v40 }
 0x358   : > { %v3256_v2 = vsel %vm3246_vm1, %v3241_v17, -inf  ;;  %v3281_v23 = vsel %vm3271_vm2, %v3241_v17, -inf  ;;  %v3228_v63 = vmul.f32 %v5371_v46, %v3214_v33  ;;  %v3306_v58 = vsel %vm3296_vm3, %v3241_v17, -inf }
 0x359   : > { %3301 = vmax.xlane.f32.xlu1 %v3300_v3  ;;  %3323 = vmax.xlane.f32.xlu0 %v3322_v6  ;;  %v4144_v51 = vpop.eup %4143  ;;  %v3331_v18 = vsel %vm3321_vm4, %v3241_v17, -inf }
 0x35a   : > { %v3215_v16 = vmul.f32 %v4144_v51, %v5352_v32  ;;  %v3242_v14 = vadd.f32 %v5377_v53, %v3228_v63 }
 0x35c   : > { %v3229_v40 = vmul.f32 %v5371_v46, %v3215_v16  ;;  %v3259_v62 = vsel %vm3246_vm1, %v3242_v14, -inf  ;;  %v3284_v26 = vsel %vm3271_vm2, %v3242_v14, -inf  ;;  %v3309_v60 = vsel %vm3296_vm3, %v3242_v14, -inf }
 0x35d   : > { %3326 = vmax.xlane.f32.xlu1 %v3325_v4  ;;  %3254 = vmax.xlane.f32.xlu0 %v3253_v41  ;;  %v3334_v48 = vsel %vm3321_vm4, %v3242_v14, -inf }
 0x35e   : > { %v3243_v5 = vadd.f32 %v5377_v53, %v3229_v40  ;;  %v4146_v19 = vpop.eup %4145 }
 0x35f   : > { %v3216_v50 = vmul.f32 %v4146_v19, %v5357_v61 }
 0x360   : > { %v3262_v1 = vsel %vm3246_vm1, %v3243_v5, -inf  ;;  %v3287_v45 = vsel %vm3271_vm2, %v3243_v5, -inf  ;;  %v3312_v7 = vsel %vm3296_vm3, %v3243_v5, -inf  ;;  %v3337_v10 = vsel %vm3321_vm4, %v3243_v5, -inf }
 0x361   : > { %3257 = vmax.xlane.f32.xlu1 %v3256_v2  ;;  %3279 = vmax.xlane.f32.xlu0 %v3278_v30  ;;  %v3230_v54 = vmul.f32 %v5371_v46, %v3216_v50 }
 0x362   : > { %v4148_v32 = vpop.eup %4147 }
 0x363   : > { %v3217_v44 = vmul.f32 %v4148_v32, %v5362_v49  ;;  %v3244_v29 = vadd.f32 %v5377_v53, %v3230_v54 }
 0x365   : > { %3282 = vmax.xlane.f32.xlu1 %v3281_v23  ;;  %3304 = vmax.xlane.f32.xlu0 %v3303_v38  ;;  %v3231_v61 = vmul.f32 %v5371_v46, %v3217_v44  ;;  %v3265_v43 = vsel %vm3246_vm1, %v3244_v29, -inf  ;;  %v3290_v34 = vsel %vm3271_vm2, %v3244_v29, -inf  ;;  %v3315_v46 = vsel %vm3296_vm3, %v3244_v29, -inf }
 0x366   : > { %v3340_v0 = vsel %vm3321_vm4, %v3244_v29, -inf }
 0x367   : > { %v3245_v31 = vadd.f32 %v5377_v53, %v3231_v61 }
 0x369   : > { %3307 = vmax.xlane.f32.xlu1 %v3306_v58  ;;  %3329 = vmax.xlane.f32.xlu0 %v3328_v59  ;;  %v3268_v49 = vsel %vm3246_vm1, %v3245_v31, -inf  ;;  %v3293_v8 = vsel %vm3271_vm2, %v3245_v31, -inf  ;;  %v3318_v22 = vsel %vm3296_vm3, %v3245_v31, -inf  ;;  %v3343_v53 = vsel %vm3321_vm4, %v3245_v31, -inf }
 0x36d   : > { %3332 = vmax.xlane.f32.xlu1 %v3331_v18  ;;  %3260 = vmax.xlane.f32.xlu0 %v3259_v62 }
 0x371   : > { %3263 = vmax.xlane.f32.xlu1 %v3262_v1  ;;  %3285 = vmax.xlane.f32.xlu0 %v3284_v26 }
 0x375   : > { %3288 = vmax.xlane.f32.xlu1 %v3287_v45  ;;  %3310 = vmax.xlane.f32.xlu0 %v3309_v60 }
 0x379   : > { %3313 = vmax.xlane.f32.xlu1 %v3312_v7  ;;  %3335 = vmax.xlane.f32.xlu0 %v3334_v48 }
 0x37d   : > { %3338 = vmax.xlane.f32.xlu1 %v3337_v10  ;;  %3266 = vmax.xlane.f32.xlu0 %v3265_v43 }
 0x381   : > { %3269 = vmax.xlane.f32.xlu1 %v3268_v49  ;;  %3291 = vmax.xlane.f32.xlu0 %v3290_v34 }
 0x385   : > { %3294 = vmax.xlane.f32.xlu1 %v3293_v8  ;;  %3316 = vmax.xlane.f32.xlu0 %v3315_v46 }
 0x389   : > { %3319 = vmax.xlane.f32.xlu1 %v3318_v22  ;;  %3341 = vmax.xlane.f32.xlu0 %v3340_v0 }
 0x38d   : > { %3344 = vmax.xlane.f32.xlu1 %v3343_v53 }
 0x3d6   : > { %v3249_v55 = vpop.xlane.xlu0 %3248 }
 0x3da   : > { %v3252_v11 = vpop.xlane.xlu1 %3251  ;;  %v3274_v47 = vpop.xlane.xlu0 %3273 }
 0x3db   : > { %v3347_v35 = vsel %vm3346_vm5, %v3249_v55, %v3274_v47 }
 0x3de   : > { %v3277_v57 = vpop.xlane.xlu1 %3276  ;;  %v3299_v13 = vpop.xlane.xlu0 %3298 }
 0x3df   : > { %v3356_v36 = vsel %vm3355_vm6, %v3347_v35, %v3299_v13  ;;  %v3348_v12 = vsel %vm3346_vm5, %v3252_v11, %v3277_v57 }
 0x3e2   : > { %v3302_v52 = vpop.xlane.xlu1 %3301  ;;  %v3324_v42 = vpop.xlane.xlu0 %3323 }
 0x3e3   : > { %v3365_v37 = vsel %vm3364_vm7, %v3356_v36, %v3324_v42  ;;  %v3357_v9 = vsel %vm3355_vm6, %v3348_v12, %v3302_v52 }
 0x3e4   : > { %3374 = vst.msk [vmem:[%s5440_s21] sm:$0xff] %vm3373_vm8, %v3365_v37 }
 0x3e6   : > { %v3327_v21 = vpop.xlane.xlu1 %3326  ;;  %v3255_v56 = vpop.xlane.xlu0 %3254 }
 0x3e7   : > { %v3366_v24 = vsel %vm3364_vm7, %v3357_v9, %v3327_v21 }
 0x3e8   : > { %3375 = vst.msk [vmem:[%s5440_s21 + $0x8] sm:$0xff] %vm3373_vm8, %v3366_v24 }
 0x3ea   : > { %v3258_v3 = vpop.xlane.xlu1 %3257  ;;  %v3280_v6 = vpop.xlane.xlu0 %3279 }
 0x3eb   : > { %v3349_v25 = vsel %vm3346_vm5, %v3255_v56, %v3280_v6 }
 0x3ee   : > { %v3283_v28 = vpop.xlane.xlu1 %3282  ;;  %v3305_v15 = vpop.xlane.xlu0 %3304 }
 0x3ef   : > { %v3358_v27 = vsel %vm3355_vm6, %v3349_v25, %v3305_v15  ;;  %v3350_v20 = vsel %vm3346_vm5, %v3258_v3, %v3283_v28 }
 0x3f2   : > { %v3308_v4 = vpop.xlane.xlu1 %3307  ;;  %v3330_v41 = vpop.xlane.xlu0 %3329 }
 0x3f3   : > { %v3367_v17 = vsel %vm3364_vm7, %v3358_v27, %v3330_v41  ;;  %v3359_v39 = vsel %vm3355_vm6, %v3350_v20, %v3308_v4 }
 0x3f4   : > { %3376 = vst.msk [vmem:[%s5440_s21 + $0x10] sm:$0xff] %vm3373_vm8, %v3367_v17 }
 0x3f6   : > { %v3333_v51 = vpop.xlane.xlu1 %3332  ;;  %v3261_v2 = vpop.xlane.xlu0 %3260 }
 0x3f7   : > { %v3368_v30 = vsel %vm3364_vm7, %v3359_v39, %v3333_v51 }
 0x3f8   : > { %3377 = vst.msk [vmem:[%s5440_s21 + $0x18] sm:$0xff] %vm3373_vm8, %v3368_v30 }
 0x3fa   : > { %v3264_v33 = vpop.xlane.xlu1 %3263  ;;  %v3286_v23 = vpop.xlane.xlu0 %3285 }
 0x3fb   : > { %v3351_v16 = vsel %vm3346_vm5, %v3261_v2, %v3286_v23 }
 0x3fe   : > { %v3289_v38 = vpop.xlane.xlu1 %3288  ;;  %v3311_v63 = vpop.xlane.xlu0 %3310 }
 0x3ff   : > { %v3360_v58 = vsel %vm3355_vm6, %v3351_v16, %v3311_v63  ;;  %v3352_v18 = vsel %vm3346_vm5, %v3264_v33, %v3289_v38 }
 0x402   : > { %v3314_v59 = vpop.xlane.xlu1 %3313  ;;  %v3336_v14 = vpop.xlane.xlu0 %3335 }
 0x403   : > { %v3369_v40 = vsel %vm3364_vm7, %v3360_v58, %v3336_v14  ;;  %v3361_v62 = vsel %vm3355_vm6, %v3352_v18, %v3314_v59 }
 0x404   : > { %3378 = vst.msk [vmem:[%s5440_s21 + $0x20] sm:$0xff] %vm3373_vm8, %v3369_v40 }
 0x406   : > { %v3339_v5 = vpop.xlane.xlu1 %3338  ;;  %v3267_v19 = vpop.xlane.xlu0 %3266 }
 0x407   : > { %v3370_v32 = vsel %vm3364_vm7, %v3361_v62, %v3339_v5 }
 0x408   : > { %3379 = vst.msk [vmem:[%s5440_s21 + $0x28] sm:$0xff] %vm3373_vm8, %v3370_v32 }
 0x40a   : > { %v3270_v1 = vpop.xlane.xlu1 %3269  ;;  %v3292_v26 = vpop.xlane.xlu0 %3291 }
 0x40b   : > { %v3353_v60 = vsel %vm3346_vm5, %v3267_v19, %v3292_v26 }
 0x40e   : > { %v3295_v50 = vpop.xlane.xlu1 %3294  ;;  %v3317_v45 = vpop.xlane.xlu0 %3316 }
 0x40f   : > { %v3362_v54 = vsel %vm3355_vm6, %v3353_v60, %v3317_v45  ;;  %v3354_v29 = vsel %vm3346_vm5, %v3270_v1, %v3295_v50 }
 0x412   : > { %v3320_v44 = vpop.xlane.xlu1 %3319  ;;  %v3342_v7 = vpop.xlane.xlu0 %3341 }
 0x413   : > { %v3371_v48 = vsel %vm3364_vm7, %v3362_v54, %v3342_v7  ;;  %v3363_v61 = vsel %vm3355_vm6, %v3354_v29, %v3320_v44 }
 0x414   : > { %3380 = vst.msk [vmem:[%s5440_s21 + $0x30] sm:$0xff] %vm3373_vm8, %v3371_v48 }
 0x416   : > { %v3345_v10 = vpop.xlane.xlu1 %3344 }
 0x417   : > { %v3372_v43 = vsel %vm3364_vm7, %v3363_v61, %v3345_v10 }
 0x418   : > { %3381 = vst.msk [vmem:[%s5440_s21 + $0x38] sm:$0xff] %vm3373_vm8, %v3372_v43 }
 0x419 PF: > { %s17_s24 = sadd.s32 1, %s4163_s24  }
 0x41a   : > { %p14_p4 = scmp.ge.s32.totalorder %s17_s24, 4  }
 0x41c   :  { %16 = sbr.rel (!%p14_p4) target bundleno = 1 (0x1), region = 78 }

// kernel: _lambda_.13
= control target key start
LH: loop header
LB: loop body
LE: loop exit
PB: predicated region body
PF: predicated region fallthrough
CT: control target
= control target key end

     0   :  { %s8165_s17 = smov 0   ;;  %s9521_s0 = inlined_call_operand.vmem [shape: f32[2,64,64], index: 0, kind: input, shape index: {}]   ;;  %s9522_s1 = inlined_call_operand.vmem [shape: bf16[8,64,8], index: 1, kind: input, shape index: {}]   ;;  %s9523_s2 = inlined_call_operand.vmem [shape: bf16[8,64,8], index: 2, kind: input, shape index: {}]   ;;  %s9524_s3 = inlined_call_operand.vmem [shape: bf16[8,64,8], index: 3, kind: input, shape index: {}]   ;;  %s9525_s4 = inlined_call_operand.vmem [shape: f32[8,1,8], index: 4, kind: input, shape index: {}]   ;;  %s9526_s5 = inlined_call_operand.vmem [shape: f32[8,1,8], index: 5, kind: input, shape index: {}]   ;;  %s9527_s6 = inlined_call_operand.vmem [shape: f32[8,1,8], index: 6, kind: input, shape index: {}]   ;;  %s9528_s7 = inlined_call_operand.vmem [shape: bf16[8,8,64], index: 7, kind: input, shape index: {}]   ;;  %s9529_s8 = inlined_call_operand.vmem [shape: f32[1,64], index: 8, kind: input, shape index: {}]   ;;  %s9530_s9 = inlined_call_operand.vmem [shape: f32[1,64], index: 9, kind: input, shape index: {}]   ;;  %s9531_s10 = inlined_call_operand.vmem [shape: f32[1,64], index: 10, kind: input, shape index: {}]   ;;  %s9532_s11 = inlined_call_operand.vmem [shape: f32[2,64,64], index: 11, kind: output, shape index: {}]  }
   0x1 LB: > { %s6069_s18 = sadd.s32 4294967295, %s8103_s17   ;;  %p6073_p0 = scmp.ge.s32.totalorder %s8103_s17, 1  ;;  %s8103_s17 = sphi %s8165_s17, %s21_s17  }
   0x2   : > { %p337_p1 = scmp.lt.s32.totalorder %s8103_s17, 3 }
   0x4   : > { %p338_p2 = pnand %p6073_p0, %p337_p1 }
   0x5   : > { %p377_p3 = scmp.lt.s32.totalorder (!%p338_p2), %s6069_s18, 1 }
   0x6   : > { %341 = sbr.rel (%p338_p2) target bundleno = 6851 (0x1ac3), region = 64 }
   0xb   : > { %v7721_v0 = vld [vmem:[%s9523_s2 + $0x18] sm:$0xff]   ;;  %v7722_v1 = vld [vmem:[%s9523_s2 + $0x10] sm:$0xff]   ;;  %s9534_s18 = smov (!%p377_p3, %s6069_s18), 1  ;;  %v7723_v2 = vld [vmem:[%s9523_s2 + $0x8] sm:$0xff]   ;;  %vm439_vm0 = vcmask 523264   ;;  %vm733_vm1 = vcmask 64512  }
   0xc   : > { %6969 = vmatprep.subr.bf16.mxu1 %v7721_v0  ;;  %s6591_s25 = sshll.u32 %s9534_s18, 6  ;;  %v7725_v3 = vld [vmem:[%s9522_s1 + $0x18] sm:$0xff]   ;;  %v7726_v4 = vld [vmem:[%s9522_s1 + $0x10] sm:$0xff]   ;;  %v7724_v8 = vld [vmem:[%s9523_s2] sm:$0xff]   ;;  %vm1607_vm2 = vcmask 1043456  }
   0xd   : > { %6970 = vmatpush3.bf16.msra.mxu1 %v7721_v0  ;;  %s8193_s30 = scalar_lea.vmem %s9521_s0, %s6591_s25  ;;  %6953 = vmatprep.subr.bf16.mxu0 %v7725_v3  ;;  %v7727_v11 = vld [vmem:[%s9522_s1 + $0x8] sm:$0xff]   ;;  %v7728_v14 = vld [vmem:[%s9522_s1] sm:$0xff]   ;;  %v7729_v20 = vld [vmem:[%s9524_s3 + $0x18] sm:$0xff]   ;;  %s9493_s12 = scalar_lea.vmem %s9532_s11, %s6591_s25 }
   0xe   : > { %6971 = vmatprep.subr.bf16.mxu1 %v7722_v1  ;;  %v388_v5 = vld [vmem:[%s8193_s30] sm:$0xff]  ;;  %v389_v6 = vld [vmem:[%s8193_s30 + $0x8] sm:$0xff]  ;;  %6954 = vmatpush3.bf16.msra.mxu0 %v7725_v3  ;;  %v390_v9 = vld [vmem:[%s8193_s30 + $0x10] sm:$0xff] }
   0xf   : > { %v8200_v7 = vpack.c.bf16 %v389_v6, %v388_v5  ;;  %6955 = vmatprep.subr.bf16.mxu0 %v7726_v4  ;;  %v391_v10 = vld [vmem:[%s8193_s30 + $0x18] sm:$0xff]  ;;  %v392_v12 = vld [vmem:[%s8193_s30 + $0x20] sm:$0xff]  ;;  %v393_v13 = vld [vmem:[%s8193_s30 + $0x28] sm:$0xff] }
  0x10   : > { %v8219_v15 = vpack.c.bf16 %v391_v10, %v390_v9  ;;  %v8221_v16 = vpack.c.bf16 %v393_v13, %v392_v12  ;;  %v394_v17 = vld [vmem:[%s8193_s30 + $0x30] sm:$0xff]  ;;  %v395_v18 = vld [vmem:[%s8193_s30 + $0x38] sm:$0xff]  ;;  %v7731_v22 = vld [vmem:[%s9524_s3 + $0x8] sm:$0xff]  }
  0x11   : > { %6972 = vmatpush3.bf16.msra.mxu1 %v7722_v1  ;;  %6977 = vmatprep.mubr.msk.bf16.mxu1 %vm439_vm0, %v8200_v7  ;;  %v8229_v19 = vpack.c.bf16 %v395_v18, %v394_v17  ;;  %v7730_v21 = vld [vmem:[%s9524_s3 + $0x10] sm:$0xff]   ;;  %v7732_v23 = vld [vmem:[%s9524_s3] sm:$0xff]   ;;  %v7733_v6 = vld [vmem:[%s9523_s2 + $0x38] sm:$0xff]  }
  0x12   : > { %6973 = vmatprep.subr.bf16.mxu1 %v7723_v2  ;;  %6961 = vmatprep.mubr.msk.bf16.mxu0 %vm439_vm0, %v8200_v7  ;;  %v6078_v29 = vld [vmem:[%s9525_s4] ss:$0 sm:$0xff]  ;;  %v7735_v9 = vld [vmem:[%s9523_s2 + $0x28] sm:$0xff]  }
  0x13   : > { %6956 = vmatpush3.bf16.msra.mxu0 %v7726_v4  ;;  %v6087_v37 = vld [vmem:[%s9526_s5] ss:$0 sm:$0xff] }
  0x14   : > { %6957 = vmatprep.subr.bf16.mxu0 %v7727_v11  ;;  %v6096_v17 = vld [vmem:[%s9527_s6] ss:$0 sm:$0xff] }
  0x15   : > { %6974 = vmatpush3.bf16.msra.mxu1 %v7723_v2 }
  0x16   : > { %6975 = vmatprep.subr.bf16.mxu1 %v7724_v8 }
  0x17   : > { %6958 = vmatpush3.bf16.msra.mxu0 %v7727_v11  ;;  %v7736_v11 = vld [vmem:[%s9523_s2 + $0x20] sm:$0xff]  }
  0x18   : > { %6959 = vmatprep.subr.bf16.mxu0 %v7728_v14 }
  0x19   : > { %6976 = vmatpush3.bf16.msra.mxu1 %v7724_v8  ;;  %v7734_v8 = vld [vmem:[%s9523_s2 + $0x30] sm:$0xff]  }
  0x1b   : > { %6960 = vmatpush3.bf16.msra.mxu0 %v7728_v14 }
  0x1c   : > { %6978 = vmatmul.mubr.msk.bf16.vlgmr.msra.gmra.mxu1 %vm439_vm0, %v8219_v15  ;;  %6985 = vmatprep.subr.bf16.mxu0 %v7729_v20 }
  0x1d   : > { %6981 = vmatprep.mubr.msk.bf16.mxu1 %vm439_vm0, %v8221_v16 }
  0x1e   : > { %6962 = vmatmul.mubr.msk.bf16.vlgmr.msra.gmra.mxu0 %vm439_vm0, %v8219_v15 }
  0x1f   : > { %6965 = vmatprep.mubr.msk.bf16.mxu0 %vm439_vm0, %v8221_v16  ;;  %6986 = vmatpush3.bf16.msra.mxu0 %v7729_v20 }
  0x20   : > { %6987 = vmatprep.subr.bf16.mxu0 %v7730_v21 }
  0x23   : > { %6988 = vmatpush3.bf16.msra.mxu0 %v7730_v21 }
  0x24   : > { %6982 = vmatmul.mubr.msk.bf16.gmra.mxu1 %vm439_vm0, %v8229_v19  ;;  %6989 = vmatprep.subr.bf16.mxu0 %v7731_v22 }
  0x26   : > { %6966 = vmatmul.mubr.msk.bf16.gmra.mxu0 %vm439_vm0, %v8229_v19 }
  0x27   : > { %6993 = vmatprep.mubr.msk.bf16.mxu0 %vm439_vm0, %v8200_v7  ;;  %6990 = vmatpush3.bf16.msra.mxu0 %v7731_v22 }
  0x28   : > { %6991 = vmatprep.subr.bf16.mxu0 %v7732_v23 }
  0x2b   : > { %6992 = vmatpush3.bf16.msra.mxu0 %v7732_v23 }
  0x2e   : > { %6994 = vmatmul.mubr.msk.bf16.vlgmr.msra.gmra.mxu0 %vm439_vm0, %v8219_v15 }
  0x2f   : > { %6997 = vmatprep.mubr.msk.bf16.mxu0 %vm439_vm0, %v8221_v16 }
  0x36   : > { %6998 = vmatmul.mubr.msk.bf16.gmra.mxu0 %vm439_vm0, %v8229_v19 }
  0xdc   : > { %v6979_v24 = vpop.f32.mrf.mxu1 }
  0xdd   : > { %v599_v49 = vadd.f32 %v6979_v24, %v6087_v37 }
  0xde   : > { %v590_v25 = vpop.f32.mrf.mxu1  ;;  %v6963_v27 = vpop.f32.mrf.mxu0 }
  0xdf   : > { %v591_v54 = vadd.f32 %v6087_v37, %v590_v25  ;;  %v495_v63 = vadd.f32 %v6963_v27, %v6078_v29 }
  0xe0   : > { %v6980_v26 = vpop.f32.mrf.mxu1  ;;  %v486_v30 = vpop.f32.mrf.mxu0 }
  0xe1   : > { %v487_v33 = vadd.f32 %v6078_v29, %v486_v30  ;;  %v602_v48 = vadd.f32 %v6980_v26, %v6087_v37 }
  0xe2   : > { %v593_v28 = vpop.f32.mrf.mxu1  ;;  %v6964_v32 = vpop.f32.mrf.mxu0 }
  0xe3   : > { %v730_v50 = vpack.c.bf16 %v602_v48, %v599_v49  ;;  %v594_v53 = vadd.f32 %v6087_v37, %v593_v28  ;;  %v498_v0 = vadd.f32 %v6964_v32, %v6078_v29 }
  0xe4   : > { %v6983_v31 = vpop.f32.mrf.mxu1  ;;  %v489_v35 = vpop.f32.mrf.mxu0 }
  0xe5   : > { %v490_v36 = vadd.f32 %v6078_v29, %v489_v35  ;;  %v615_v39 = vadd.f32 %v6983_v31, %v6087_v37  ;;  %v729_v56 = vpack.c.bf16 %v594_v53, %v591_v54  ;;  %v750_v57 = vsel %vm733_vm1, %v730_v50, 0 }
  0xe6   : > { %v606_v34 = vpop.f32.mrf.mxu1  ;;  %v6967_v52 = vpop.f32.mrf.mxu0  ;;  %v726_v2 = vpack.c.bf16 %v498_v0, %v495_v63 }
  0xe7   : > { %v725_v41 = vpack.c.bf16 %v490_v36, %v487_v33  ;;  %v607_v43 = vadd.f32 %v6087_v37, %v606_v34  ;;  %v747_v60 = vsel %vm733_vm1, %v729_v56, 0  ;;  %v511_v3 = vadd.f32 %v6967_v52, %v6078_v29 }
  0xe8   : > { %v6984_v38 = vpop.f32.mrf.mxu1  ;;  %v502_v55 = vpop.f32.mrf.mxu0 }
  0xe9   : > { %v618_v40 = vadd.f32 %v6984_v38, %v6087_v37  ;;  %7009 = vmatprep.mubr.msk.bf16.mxu1 %vm733_vm1, %v725_v41  ;;  %v503_v61 = vadd.f32 %v6078_v29, %v502_v55 }
  0xea   : > { %v609_v42 = vpop.f32.mrf.mxu1  ;;  %v6968_v58 = vpop.f32.mrf.mxu0 }
  0xeb   : > { %v732_v44 = vpack.c.bf16 %v618_v40, %v615_v39  ;;  %v610_v45 = vadd.f32 %v6087_v37, %v609_v42  ;;  %v514_v4 = vadd.f32 %v6968_v58, %v6078_v29 }
  0xec   : > { %v505_v59 = vpop.f32.mrf.mxu0 }
  0xed   : > { %v731_v46 = vpack.c.bf16 %v610_v45, %v607_v43  ;;  %7673 = vmatprep.subr.msk.bf16.mxu1 %vm733_vm1, %v732_v44  ;;  %v756_v47 = vsel %vm733_vm1, %v732_v44, 0  ;;  %v506_v62 = vadd.f32 %v6078_v29, %v505_v59  ;;  %v728_v5 = vpack.c.bf16 %v514_v4, %v511_v3 }
  0xee   : > { %7002 = vmatpush3.bf16.xpose.msra.mxu1 %v756_v47  ;;  %v6995_v10 = vpop.f32.mrf.mxu0 }
  0xef   : > { %7674 = vmatprep.subr.msk.bf16.mxu1 %vm733_vm1, %v731_v46  ;;  %v753_v51 = vsel %vm733_vm1, %v731_v46, 0  ;;  %v727_v1 = vpack.c.bf16 %v506_v62, %v503_v61  ;;  %v703_v26 = vadd.f32 %v6995_v10, %v6096_v17 }
  0xf0   : > { %v694_v12 = vpop.f32.mrf.mxu0 }
  0xf1   : > { %v695_v31 = vadd.f32 %v6096_v17, %v694_v12 }
  0xf2   : > { %v6996_v13 = vpop.f32.mrf.mxu0 }
  0xf3   : > { %v706_v27 = vadd.f32 %v6996_v13, %v6096_v17 }
  0xf4   : > { %v697_v14 = vpop.f32.mrf.mxu0 }
  0xf5   : > { %v900_v32 = vpack.c.bf16 %v706_v27, %v703_v26  ;;  %v698_v33 = vadd.f32 %v6096_v17, %v697_v14 }
  0xf6   : > { %7004 = vmatpush3.bf16.xpose.msra.mxu1 %v753_v51  ;;  %v6999_v18 = vpop.f32.mrf.mxu0  ;;  %v8326_v51 = vld [vmem:[%s9522_s1 + $0x38] sm:$0xff]  }
  0xf7   : > { %7675 = vmatprep.subr.msk.bf16.mxu1 %vm733_vm1, %v730_v50  ;;  %v719_v21 = vadd.f32 %v6999_v18, %v6096_v17  ;;  %v899_v34 = vpack.c.bf16 %v698_v33, %v695_v31 }
  0xf8   : > { %v710_v20 = vpop.f32.mrf.mxu0 }
  0xf9   : > { %v711_v23 = vadd.f32 %v6096_v17, %v710_v20 }
  0xfa   : > { %v7000_v22 = vpop.f32.mrf.mxu0 }
  0xfb   : > { %v722_v24 = vadd.f32 %v7000_v22, %v6096_v17 }
  0xfc   : > { %v713_v25 = vpop.f32.mrf.mxu0 }
  0xfd   : > { %v902_v28 = vpack.c.bf16 %v722_v24, %v719_v21  ;;  %v714_v29 = vadd.f32 %v6096_v17, %v713_v25 }
  0xfe   : > { %7006 = vmatpush3.bf16.xpose.msra.mxu1 %v750_v57 }
  0xff   : > { %7676 = vmatprep.subr.msk.bf16.mxu1 %vm733_vm1, %v729_v56  ;;  %v901_v30 = vpack.c.bf16 %v714_v29, %v711_v23  ;;  %7017 = vmatprep.subr.bf16.mxu0 %v902_v28  ;;  %v6140_v56 = vld [vmem:[%s9526_s5 + $0x1] ss:$0 sm:$0xff] }
 0x100   : > { %7018 = vmatpush3.bf16.msra.mxu0 %v902_v28 }
 0x101   : > { %7019 = vmatprep.subr.bf16.mxu0 %v901_v30 }
 0x104   : > { %7020 = vmatpush3.bf16.msra.mxu0 %v901_v30 }
 0x105   : > { %7021 = vmatprep.subr.bf16.mxu0 %v900_v32 }
 0x106   : > { %7008 = vmatpush3.bf16.xpose.msra.mxu1 %v747_v60 }
 0x107   : > { %7049 = vmatprep.subr.bf16.mxu1 %v7733_v6 }
 0x108   : > { %7022 = vmatpush3.bf16.msra.mxu0 %v900_v32 }
 0x109   : > { %7023 = vmatprep.subr.bf16.mxu0 %v899_v34 }
 0x10c   : > { %7024 = vmatpush3.bf16.msra.mxu0 %v899_v34 }
 0x10d   : > { %7010 = vmatmul.mubr.msk.bf16.vlgmr.msra.gmra.mxu1 %vm733_vm1, %v726_v2  ;;  %7033 = vmatprep.subr.bf16.mxu0 %v8326_v51 }
 0x10e   : > { %7013 = vmatprep.mubr.msk.bf16.mxu1 %vm733_vm1, %v727_v1  ;;  %7050 = vmatpush3.bf16.msra.mxu1 %v7733_v6 }
 0x10f   : > { %7051 = vmatprep.subr.bf16.mxu1 %v7734_v8 }
 0x112   : > { %7052 = vmatpush3.bf16.msra.mxu1 %v7734_v8 }
 0x113   : > { %7053 = vmatprep.subr.bf16.mxu1 %v7735_v9 }
 0x115   : > { %7014 = vmatmul.mubr.msk.bf16.gmra.mxu1 %vm733_vm1, %v728_v5 }
 0x116   : > { %7057 = vmatprep.mubr.msk.bf16.mxu1 %vm439_vm0, %v8200_v7  ;;  %7054 = vmatpush3.bf16.msra.mxu1 %v7735_v9 }
 0x117   : > { %7055 = vmatprep.subr.bf16.mxu1 %v7736_v11 }
 0x11a   : > { %7056 = vmatpush3.bf16.msra.mxu1 %v7736_v11 }
 0x11d   : > { %7058 = vmatmul.mubr.msk.bf16.vlgmr.msra.gmra.mxu1 %vm439_vm0, %v8219_v15 }
 0x11e   : > { %7061 = vmatprep.mubr.msk.bf16.mxu1 %vm439_vm0, %v8221_v16 }
 0x125   : > { %7062 = vmatmul.mubr.msk.bf16.gmra.mxu1 %vm439_vm0, %v8229_v19 }
 0x1cd   : > { %v8300_v35 = vpop.f32.mrf.mxu1 }
 0x1ce   : > { %v829_v36 = vsel %vm439_vm0, %v8300_v35, -inf }
 0x1cf   : > { %830 = vmax.xlane.f32.xlu1 %v829_v36  ;;  %v792_v37 = vpop.f32.mrf.mxu1 }
 0x1d0   : > { %v823_v38 = vsel %vm439_vm0, %v792_v37, -inf }
 0x1d1   : > { %824 = vmax.xlane.f32.xlu0 %v823_v38  ;;  %v7012_v39 = vpop.f32.mrf.mxu1 }
 0x1d2   : > { %v832_v40 = vsel %vm439_vm0, %v7012_v39, -inf }
 0x1d3   : > { %833 = vmax.xlane.f32.xlu1 %v832_v40  ;;  %v795_v41 = vpop.f32.mrf.mxu1 }
 0x1d4   : > { %v826_v42 = vsel %vm439_vm0, %v795_v41, -inf }
 0x1d5   : > { %827 = vmax.xlane.f32.xlu0 %v826_v42  ;;  %v8307_v43 = vpop.f32.mrf.mxu1 }
 0x1d6   : > { %v841_v48 = vsel %vm439_vm0, %v8307_v43, -inf }
 0x1d7   : > { %v8309_v44 = vpop.f32.mrf.mxu1 }
 0x1d8   : > { %v835_v45 = vsel %vm439_vm0, %v8309_v44, -inf }
 0x1d9   : > { %836 = vmax.xlane.f32.xlu0 %v835_v45  ;;  %v8313_v46 = vpop.f32.mrf.mxu1 }
 0x1da   : > { %v844_v50 = vsel %vm439_vm0, %v8313_v46, -inf }
 0x1db   : > { %v8315_v47 = vpop.f32.mrf.mxu1 }
 0x1dc   : > { %v838_v49 = vsel %vm439_vm0, %v8315_v47, -inf }
 0x1dd   : > { %842 = vmax.xlane.f32.xlu0 %v841_v48  ;;  %839 = vmax.xlane.f32.xlu1 %v838_v49  ;;  %v7059_v52 = vpop.f32.mrf.mxu1  ;;  %v7739_v48 = vld [vmem:[%s9522_s1 + $0x28] sm:$0xff]  }
 0x1de   : > { %v1191_v4 = vadd.f32 %v7059_v52, %v6140_v56 }
 0x1df   : > { %v1182_v53 = vpop.f32.mrf.mxu1 }
 0x1e0   : > { %v1183_v9 = vadd.f32 %v6140_v56, %v1182_v53  ;;  %v7740_v53 = vld [vmem:[%s9522_s1 + $0x20] sm:$0xff]  }
 0x1e1   : > { %845 = vmax.xlane.f32.xlu1 %v844_v50  ;;  %v7060_v54 = vpop.f32.mrf.mxu1 }
 0x1e2   : > { %v1194_v5 = vadd.f32 %v7060_v54, %v6140_v56 }
 0x1e3   : > { %v1185_v55 = vpop.f32.mrf.mxu1 }
 0x1e4   : > { %v1324_v6 = vpack.c.bf16 %v1194_v5, %v1191_v4  ;;  %v1186_v10 = vadd.f32 %v6140_v56, %v1185_v55 }
 0x1e5   : > { %v7063_v57 = vpop.f32.mrf.mxu1 }
 0x1e6   : > { %v1207_v59 = vadd.f32 %v7063_v57, %v6140_v56  ;;  %v1323_v11 = vpack.c.bf16 %v1186_v10, %v1183_v9  ;;  %v1343_v12 = vsel %vm733_vm1, %v1324_v6, 0  ;;  %v7742_v57 = vld [vmem:[%s9524_s3 + $0x30] sm:$0xff]  }
 0x1e7   : > { %v1198_v58 = vpop.f32.mrf.mxu1 }
 0x1e8   : > { %v1199_v61 = vadd.f32 %v6140_v56, %v1198_v58  ;;  %v1340_v17 = vsel %vm733_vm1, %v1323_v11, 0  ;;  %v7743_v58 = vld [vmem:[%s9524_s3 + $0x28] sm:$0xff]  }
 0x1e9   : > { %v7064_v60 = vpop.f32.mrf.mxu1 }
 0x1ea   : > { %v1210_v62 = vadd.f32 %v7064_v60, %v6140_v56 }
 0x1eb   : > { %v1201_v63 = vpop.f32.mrf.mxu1 }
 0x1ec   : > { %v1326_v0 = vpack.c.bf16 %v1210_v62, %v1207_v59  ;;  %v1202_v1 = vadd.f32 %v6140_v56, %v1201_v63  ;;  %v7741_v56 = vld [vmem:[%s9524_s3 + $0x38] sm:$0xff]   ;;  %v7744_v59 = vld [vmem:[%s9524_s3 + $0x20] sm:$0xff]  }
 0x1ee   : > { %7677 = vmatprep.subr.msk.bf16.mxu1 %vm733_vm1, %v1326_v0  ;;  %v1349_v2 = vsel %vm733_vm1, %v1326_v0, 0  ;;  %v1325_v3 = vpack.c.bf16 %v1202_v1, %v1199_v61 }
 0x1ef   : > { %7082 = vmatpush3.bf16.xpose.msra.mxu1 %v1349_v2 }
 0x1f0   : > { %7678 = vmatprep.subr.msk.bf16.mxu1 %vm733_vm1, %v1325_v3  ;;  %v1346_v8 = vsel %vm733_vm1, %v1325_v3, 0 }
 0x1f7   : > { %7084 = vmatpush3.bf16.xpose.msra.mxu1 %v1346_v8  ;;  %v6122_v8 = vld [vmem:[%s9525_s4 + $0x1] ss:$0 sm:$0xff] }
 0x1f8   : > { %7679 = vmatprep.subr.msk.bf16.mxu1 %vm733_vm1, %v1324_v6 }
 0x1ff   : > { %7086 = vmatpush3.bf16.xpose.msra.mxu1 %v1343_v12 }
 0x200   : > { %7680 = vmatprep.subr.msk.bf16.mxu1 %vm733_vm1, %v1323_v11 }
 0x207   : > { %7088 = vmatpush3.bf16.xpose.msra.mxu1 %v1340_v17 }
 0x258   : > { %v831_v13 = vpop.xlane.xlu1 %830 }
 0x259   : > { %v849_v20 = vsub.f32 %v8300_v35, %v831_v13 }
 0x25a   : > { %v825_v14 = vpop.xlane.xlu0 %824 }
 0x25b   : > { %v847_v18 = vsub.f32 %v792_v37, %v825_v14  ;;  %v859_v27 = vmul.f32 1.442695, %v849_v20 }
 0x25c   : > { %v834_v21 = vpop.xlane.xlu1 %833 }
 0x25d   : > { %v855_v22 = vmul.f32 1.442695, %v847_v18  ;;  %v850_v23 = vsub.f32 %v7012_v39, %v834_v21 }
 0x25e   : > { %v828_v24 = vpop.xlane.xlu0 %827 }
 0x25f   : > { %v861_v25 = vmul.f32 1.442695, %v850_v23  ;;  %v848_v26 = vsub.f32 %v795_v41, %v828_v24  ;;  %7817 = vpow2.f32 %v855_v22 }
 0x261   : > { %v857_v28 = vmul.f32 1.442695, %v848_v26  ;;  %7819 = vpow2.f32 %v861_v25 }
 0x262   : > { %v837_v29 = vpop.xlane.xlu0 %836 }
 0x263   : > { %7821 = vpow2.f32 %v857_v28  ;;  %v851_v30 = vsub.f32 %v8309_v44, %v837_v29 }
 0x264   : > { %7823 = vpow2.f32 %v859_v27 }
 0x265   : > { %v863_v33 = vmul.f32 1.442695, %v851_v30 }
 0x266   : > { %v843_v31 = vpop.xlane.xlu0 %842  ;;  %v840_v32 = vpop.xlane.xlu1 %839 }
 0x267   : > { %v853_v34 = vsub.f32 %v8307_v43, %v843_v31  ;;  %v852_v35 = vsub.f32 %v8315_v47, %v840_v32  ;;  %7825 = vpow2.f32 %v863_v33  ;;  %v6158_v33 = vld [vmem:[%s9527_s6 + $0x1] ss:$0 sm:$0xff] }
 0x269   : > { %v865_v36 = vmul.f32 1.442695, %v852_v35  ;;  %v867_v37 = vmul.f32 1.442695, %v853_v34 }
 0x26a   : > { %v846_v38 = vpop.xlane.xlu1 %845 }
 0x26b   : > { %v854_v39 = vsub.f32 %v8313_v46, %v846_v38  ;;  %7827 = vpow2.f32 %v865_v36  ;;  %v7738_v46 = vld [vmem:[%s9522_s1 + $0x30] sm:$0xff]  }
 0x26c   : > { %v8345_v41 = vpop.eup %7817  ;;  %7829 = vpow2.f32 %v867_v37 }
 0x26d   : > { %v869_v40 = vmul.f32 1.442695, %v854_v39 }
 0x26e   : > { %v8347_v42 = vpop.eup %7819 }
 0x26f   : > { %7831 = vpow2.f32 %v869_v40 }
 0x270   : > { %v8349_v44 = vpop.eup %7821 }
 0x271   : > { %v8351_v45 = vpop.eup %7823  ;;  %v895_v43 = vpack.c.bf16 %v8349_v44, %v8345_v41 }
 0x272   : > { %v896_v47 = vpack.c.bf16 %v8347_v42, %v8351_v45 }
 0x273   : > { %7025 = vmatprep.mubr.msk.bf16.mxu0 %vm439_vm0, %v895_v43 }
 0x274   : > { %7026 = vmatmul.mubr.msk.bf16.vlgmr.msra.gmra.mxu0 %vm439_vm0, %v896_v47  ;;  %v8366_v49 = vpop.eup %7825 }
 0x275   : > { %7034 = vmatpush3.bf16.msra.mxu0 %v8326_v51 }
 0x276   : > { %7035 = vmatprep.subr.bf16.mxu0 %v7738_v46 }
 0x278   : > { %v8368_v50 = vpop.eup %7827 }
 0x279   : > { %7036 = vmatpush3.bf16.msra.mxu0 %v7738_v46  ;;  %v897_v52 = vpack.c.bf16 %v8368_v50, %v8366_v49  ;;  %v8375_v54 = vpop.eup %7829 }
 0x27a   : > { %7037 = vmatprep.subr.bf16.mxu0 %v7739_v48 }
 0x27b   : > { %7029 = vmatprep.mubr.msk.bf16.mxu0 %vm439_vm0, %v897_v52 }
 0x27c   : > { %v8377_v51 = vpop.eup %7831 }
 0x27d   : > { %v898_v55 = vpack.c.bf16 %v8377_v51, %v8375_v54  ;;  %7038 = vmatpush3.bf16.msra.mxu0 %v7739_v48 }
 0x27e   : > { %7039 = vmatprep.subr.bf16.mxu0 %v7740_v53 }
 0x27f   : > { %7030 = vmatmul.mubr.msk.bf16.gmra.mxu0 %vm439_vm0, %v898_v55 }
 0x280   : > { %7041 = vmatprep.mubr.msk.bf16.mxu0 %vm439_vm0, %v8200_v7 }
 0x281   : > { %7040 = vmatpush3.bf16.msra.mxu0 %v7740_v53 }
 0x282   : > { %7065 = vmatprep.subr.bf16.mxu0 %v7741_v56 }
 0x287   : > { %7042 = vmatmul.mubr.msk.bf16.vlgmr.msra.gmra.mxu0 %vm439_vm0, %v8219_v15 }
 0x288   : > { %7045 = vmatprep.mubr.msk.bf16.mxu0 %vm439_vm0, %v8221_v16  ;;  %7066 = vmatpush3.bf16.msra.mxu0 %v7741_v56 }
 0x289   : > { %7067 = vmatprep.subr.bf16.mxu0 %v7742_v57 }
 0x28c   : > { %7068 = vmatpush3.bf16.msra.mxu0 %v7742_v57 }
 0x28d   : > { %7069 = vmatprep.subr.bf16.mxu0 %v7743_v58 }
 0x28f   : > { %7046 = vmatmul.mubr.msk.bf16.gmra.mxu0 %vm439_vm0, %v8229_v19 }
 0x290   : > { %7073 = vmatprep.mubr.msk.bf16.mxu0 %vm439_vm0, %v8200_v7  ;;  %7070 = vmatpush3.bf16.msra.mxu0 %v7743_v58 }
 0x291   : > { %7071 = vmatprep.subr.bf16.mxu0 %v7744_v59 }
 0x294   : > { %7072 = vmatpush3.bf16.msra.mxu0 %v7744_v59 }
 0x297   : > { %7074 = vmatmul.mubr.msk.bf16.vlgmr.msra.gmra.mxu0 %vm439_vm0, %v8219_v15 }
 0x298   : > { %7077 = vmatprep.mubr.msk.bf16.mxu0 %vm439_vm0, %v8221_v16 }
 0x29f   : > { %7078 = vmatmul.mubr.msk.bf16.gmra.mxu0 %vm439_vm0, %v8229_v19 }
 0x334   : > { %v8411_v60 = vpop.f32.mrf.mxu0 }
 0x336   : > { %v8413_v61 = vpop.f32.mrf.mxu0 }
 0x338   : > { %v8415_v62 = vpop.f32.mrf.mxu0 }
 0x33a   : > { %v8417_v63 = vpop.f32.mrf.mxu0 }
 0x33f   : > { %v8419_v0 = vpop.f32.mrf.mxu0 }
 0x341   : > { %v8421_v1 = vpop.f32.mrf.mxu0 }
 0x343   : > { %v8423_v2 = vpop.f32.mrf.mxu0 }
 0x345   : > { %v8425_v3 = vpop.f32.mrf.mxu0 }
 0x347   : > { %v7043_v4 = vpop.f32.mrf.mxu0 }
 0x348   : > { %v1085_v13 = vadd.f32 %v7043_v4, %v6122_v8 }
 0x349   : > { %v1076_v5 = vpop.f32.mrf.mxu0 }
 0x34a   : > { %v1077_v11 = vadd.f32 %v6122_v8, %v1076_v5 }
 0x34b   : > { %v7044_v6 = vpop.f32.mrf.mxu0 }
 0x34c   : > { %v1088_v9 = vadd.f32 %v7044_v6, %v6122_v8 }
 0x34d   : > { %v1079_v10 = vpop.f32.mrf.mxu0 }
 0x34e   : > { %v1080_v12 = vadd.f32 %v6122_v8, %v1079_v10  ;;  %v1320_v18 = vpack.c.bf16 %v1088_v9, %v1085_v13 }
 0x34f   : > { %v7047_v14 = vpop.f32.mrf.mxu0 }
 0x350   : > { %v1319_v17 = vpack.c.bf16 %v1080_v12, %v1077_v11  ;;  %v1101_v26 = vadd.f32 %v7047_v14, %v6122_v8 }
 0x351   : > { %v1092_v20 = vpop.f32.mrf.mxu0 }
 0x352   : > { %7089 = vmatprep.mubr.msk.bf16.mxu1 %vm733_vm1, %v1319_v17  ;;  %v1093_v24 = vadd.f32 %v6122_v8, %v1092_v20 }
 0x353   : > { %v7048_v21 = vpop.f32.mrf.mxu0  ;;  %7090 = vmatmul.mubr.msk.bf16.vlgmr.msra.gmra.mxu1 %vm733_vm1, %v1320_v18 }
 0x354   : > { %v1104_v22 = vadd.f32 %v7048_v21, %v6122_v8  ;;  %v871_v21 = vsel %vm439_vm0, %v8345_v41, 0.0  ;;  %v889_v41 = vsel %vm439_vm0, %v8375_v54, 0.0 }
 0x355   : > { %v1095_v23 = vpop.f32.mrf.mxu0 }
 0x356   : > { %v1096_v25 = vadd.f32 %v6122_v8, %v1095_v23  ;;  %v1322_v28 = vpack.c.bf16 %v1104_v22, %v1101_v26  ;;  %v877_v23 = vsel %vm439_vm0, %v8351_v45, 0.0  ;;  %v880_v26 = vsel %vm439_vm0, %v8347_v42, 0.0  ;;  %v1000_v45 = vld [vmem:[%s9528_s7] sm:$0xf] }
 0x357   : > { %v7075_v29 = vpop.f32.mrf.mxu0  ;;  %7682 = vmatprep.subr.msk.bf16.mxu1 %vm1607_vm2, %v1000_v45  ;;  %v1689_v42 = vsel %vm1607_vm2, %v1000_v45, 0 }
 0x358   : > { %v1321_v27 = vpack.c.bf16 %v1096_v25, %v1093_v24  ;;  %v1297_v43 = vadd.f32 %v7075_v29, %v6158_v33  ;;  %v874_v24 = vsel %vm439_vm0, %v8349_v44, 0.0  ;;  %v883_v25 = vsel %vm439_vm0, %v8366_v49, 0.0  ;;  %7124 = vmatpush3.bf16.msra.mxu1 %v1689_v42 }
 0x359   : > { %v1288_v30 = vpop.f32.mrf.mxu0  ;;  %v892_v44 = vsel %vm439_vm0, %v8377_v51, 0.0 }
 0x35a   : > { %7093 = vmatprep.mubr.msk.bf16.mxu1 %vm733_vm1, %v1321_v27  ;;  %v1289_v53 = vadd.f32 %v6158_v33, %v1288_v30  ;;  %v886_v27 = vsel %vm439_vm0, %v8368_v50, 0.0 }
 0x35b   : > { %7094 = vmatmul.mubr.msk.bf16.gmra.mxu1 %vm733_vm1, %v1322_v28  ;;  %v7076_v31 = vpop.f32.mrf.mxu0 }
 0x35c   : > { %v1300_v47 = vadd.f32 %v7076_v31, %v6158_v33 }
 0x35d   : > { %v1291_v32 = vpop.f32.mrf.mxu0 }
 0x35e   : > { %v1493_v55 = vpack.c.bf16 %v1300_v47, %v1297_v43  ;;  %v1292_v56 = vadd.f32 %v6158_v33, %v1291_v32 }
 0x35f   : > { %v7079_v34 = vpop.f32.mrf.mxu0 }
 0x360   : > { %v1313_v36 = vadd.f32 %v7079_v34, %v6158_v33  ;;  %v1492_v57 = vpack.c.bf16 %v1292_v56, %v1289_v53 }
 0x361   : > { %v1304_v35 = vpop.f32.mrf.mxu0 }
 0x362   : > { %v1305_v38 = vadd.f32 %v6158_v33, %v1304_v35 }
 0x363   : > { %v7080_v37 = vpop.f32.mrf.mxu0 }
 0x364   : > { %v1316_v39 = vadd.f32 %v7080_v37, %v6158_v33 }
 0x365   : > { %v1307_v40 = vpop.f32.mrf.mxu0 }
 0x366   : > { %v1495_v46 = vpack.c.bf16 %v1316_v39, %v1313_v36  ;;  %v1308_v48 = vadd.f32 %v6158_v33, %v1307_v40 }
 0x368   : > { %v1494_v52 = vpack.c.bf16 %v1308_v48, %v1305_v38  ;;  %7097 = vmatprep.subr.bf16.mxu0 %v1495_v46 }
 0x369   : > { %7098 = vmatpush3.bf16.msra.mxu0 %v1495_v46 }
 0x36a   : > { %7099 = vmatprep.subr.bf16.mxu0 %v1494_v52 }
 0x36d   : > { %7100 = vmatpush3.bf16.msra.mxu0 %v1494_v52 }
 0x36e   : > { %7101 = vmatprep.subr.bf16.mxu0 %v1493_v55 }
 0x371   : > { %7102 = vmatpush3.bf16.msra.mxu0 %v1493_v55 }
 0x372   : > { %7103 = vmatprep.subr.bf16.mxu0 %v1492_v57 }
 0x375   : > { %7104 = vmatpush3.bf16.msra.mxu0 %v1492_v57 }
 0x413   : > { %v7091_v58 = vpop.f32.mrf.mxu1 }
 0x414   : > { %v1422_v8 = vsel %vm439_vm0, %v7091_v58, -inf }
 0x415   : > { %v1385_v59 = vpop.f32.mrf.mxu1 }
 0x416   : > { %v1416_v4 = vsel %vm439_vm0, %v1385_v59, -inf }
 0x417   : > { %1417 = vmax.xlane.f32.xlu0 %v1416_v4  ;;  %v7092_v5 = vpop.f32.mrf.mxu1 }
 0x418   : > { %v1425_v12 = vsel %vm439_vm0, %v7092_v5, -inf }
 0x419   : > { %v1388_v6 = vpop.f32.mrf.mxu1 }
 0x41a   : > { %v1419_v9 = vsel %vm439_vm0, %v1388_v6, -inf }
 0x41b   : > { %1423 = vmax.xlane.f32.xlu0 %v1422_v8  ;;  %1420 = vmax.xlane.f32.xlu1 %v1419_v9  ;;  %v7095_v10 = vpop.f32.mrf.mxu1 }
 0x41c   : > { %v1434_v18 = vsel %vm439_vm0, %v7095_v10, -inf }
 0x41d   : > { %v1401_v11 = vpop.f32.mrf.mxu1 }
 0x41e   : > { %v1428_v13 = vsel %vm439_vm0, %v1401_v11, -inf }
 0x41f   : > { %1426 = vmax.xlane.f32.xlu1 %v1425_v12  ;;  %1429 = vmax.xlane.f32.xlu0 %v1428_v13  ;;  %v7096_v14 = vpop.f32.mrf.mxu1 }
 0x420   : > { %v1437_v22 = vsel %vm439_vm0, %v7096_v14, -inf }
 0x421   : > { %v1404_v17 = vpop.f32.mrf.mxu1 }
 0x422   : > { %v1431_v20 = vsel %vm439_vm0, %v1404_v17, -inf }
 0x423   : > { %1435 = vmax.xlane.f32.xlu0 %v1434_v18  ;;  %1432 = vmax.xlane.f32.xlu1 %v1431_v20 }
 0x427   : > { %872 = vadd.xlane.f32.xlu0 %v871_v21  ;;  %1438 = vmax.xlane.f32.xlu1 %v1437_v22 }
 0x42b   : > { %878 = vadd.xlane.f32.xlu0 %v877_v23  ;;  %875 = vadd.xlane.f32.xlu1 %v874_v24  ;;  %v7745_v24 = vld [vmem:[%s9523_s2 + $0x58] sm:$0xff]  }
 0x42c   : > { %7149 = vmatprep.subr.bf16.mxu1 %v7745_v24 }
 0x42f   : > { %884 = vadd.xlane.f32.xlu0 %v883_v25  ;;  %881 = vadd.xlane.f32.xlu1 %v880_v26 }
 0x433   : > { %890 = vadd.xlane.f32.xlu0 %v889_v41  ;;  %887 = vadd.xlane.f32.xlu1 %v886_v27 }
 0x437   : > { %893 = vadd.xlane.f32.xlu1 %v892_v44 }
 0x4a0   : > { %v1418_v49 = vpop.xlane.xlu0 %1417 }
 0x4a1   : > { %v1440_v54 = vsub.f32 %v1385_v59, %v1418_v49 }
 0x4a3   : > { %v1448_v28 = vmul.f32 1.442695, %v1440_v54 }
 0x4a4   : > { %v1424_v50 = vpop.xlane.xlu0 %1423  ;;  %v1421_v29 = vpop.xlane.xlu1 %1420 }
 0x4a5   : > { %7833 = vpow2.f32 %v1448_v28  ;;  %v1442_v30 = vsub.f32 %v7091_v58, %v1424_v50  ;;  %v1441_v31 = vsub.f32 %v1388_v6, %v1421_v29 }
 0x4a7   : > { %v1452_v51 = vmul.f32 1.442695, %v1442_v30  ;;  %v1450_v32 = vmul.f32 1.442695, %v1441_v31 }
 0x4a8   : > { %v1427_v33 = vpop.xlane.xlu1 %1426  ;;  %v1430_v34 = vpop.xlane.xlu0 %1429 }
 0x4a9   : > { %7835 = vpow2.f32 %v1452_v51  ;;  %v1443_v35 = vsub.f32 %v7092_v5, %v1427_v33  ;;  %v1444_v36 = vsub.f32 %v1401_v11, %v1430_v34 }
 0x4aa   : > { %7837 = vpow2.f32 %v1450_v32 }
 0x4ab   : > { %v1454_v37 = vmul.f32 1.442695, %v1443_v35  ;;  %v1456_v38 = vmul.f32 1.442695, %v1444_v36  ;;  %v7746_v36 = vld [vmem:[%s9523_s2 + $0x50] sm:$0xff]  }
 0x4ac   : > { %v1436_v39 = vpop.xlane.xlu0 %1435  ;;  %v1433_v40 = vpop.xlane.xlu1 %1432 }
 0x4ad   : > { %7839 = vpow2.f32 %v1454_v37  ;;  %v1446_v43 = vsub.f32 %v7095_v10, %v1436_v39  ;;  %v1445_v47 = vsub.f32 %v1404_v17, %v1433_v40 }
 0x4ae   : > { %7841 = vpow2.f32 %v1456_v38 }
 0x4af   : > { %v1460_v46 = vmul.f32 1.442695, %v1446_v43  ;;  %v1458_v48 = vmul.f32 1.442695, %v1445_v47  ;;  %v6175_v47 = vld [vmem:[%s9528_s7 + $0x4] sm:$0xf] }
 0x4b0   : > { %v873_v52 = vpop.xlane.xlu0 %872  ;;  %v1439_v53 = vpop.xlane.xlu1 %1438  ;;  %7681 = vmatprep.subr.msk.bf16.mxu0 %vm1607_vm2, %v6175_v47 }
 0x4b1   : > { %7843 = vpow2.f32 %v1460_v46  ;;  %v1447_v55 = vsub.f32 %v7096_v14, %v1439_v53 }
 0x4b2   : > { %v7834_v56 = vpop.eup %7833  ;;  %7845 = vpow2.f32 %v1458_v48 }
 0x4b3   : > { %v1462_v57 = vmul.f32 1.442695, %v1447_v55  ;;  %v1464_v58 = vsel %vm439_vm0, %v7834_v56, 0.0  ;;  %7847 = vrcp.f32 %v873_v52 }
 0x4b4   : > { %1465 = vadd.xlane.f32.xlu0 %v1464_v58  ;;  %v879_v59 = vpop.xlane.xlu0 %878  ;;  %v876_v4 = vpop.xlane.xlu1 %875 }
 0x4b5   : > { %7849 = vpow2.f32 %v1462_v57 }
 0x4b6   : > { %v7836_v5 = vpop.eup %7835  ;;  %7851 = vrcp.f32 %v876_v4 }
 0x4b7   : > { %v7838_v6 = vpop.eup %7837  ;;  %v1470_v8 = vsel %vm439_vm0, %v7836_v5, 0.0  ;;  %7853 = vrcp.f32 %v879_v59 }
 0x4b8   : > { %1471 = vadd.xlane.f32.xlu0 %v1470_v8  ;;  %v885_v9 = vpop.xlane.xlu0 %884  ;;  %v882_v10 = vpop.xlane.xlu1 %881  ;;  %v1467_v11 = vsel %vm439_vm0, %v7838_v6, 0.0  ;;  %v1488_v12 = vpack.c.bf16 %v7838_v6, %v7834_v56 }
 0x4b9   : > { %1468 = vadd.xlane.f32.xlu1 %v1467_v11  ;;  %7855 = vrcp.f32 %v882_v10 }
 0x4ba   : > { %v7840_v13 = vpop.eup %7839  ;;  %7105 = vmatprep.mubr.msk.bf16.mxu0 %vm439_vm0, %v1488_v12  ;;  %7857 = vrcp.f32 %v885_v9 }
 0x4bb   : > { %v7842_v14 = vpop.eup %7841  ;;  %v1489_v17 = vpack.c.bf16 %v7840_v13, %v7836_v5  ;;  %v1473_v18 = vsel %vm439_vm0, %v7840_v13, 0.0 }
 0x4bc   : > { %v1476_v20 = vsel %vm439_vm0, %v7842_v14, 0.0  ;;  %v891_v21 = vpop.xlane.xlu0 %890  ;;  %v888_v22 = vpop.xlane.xlu1 %887 }
 0x4bd   : > { %1477 = vadd.xlane.f32.xlu0 %v1476_v20  ;;  %1474 = vadd.xlane.f32.xlu1 %v1473_v18  ;;  %7859 = vrcp.f32 %v888_v22 }
 0x4be   : > { %v7844_v23 = vpop.eup %7843  ;;  %7106 = vmatmul.mubr.msk.bf16.vlgmr.msra.gmra.mxu0 %vm439_vm0, %v1489_v17  ;;  %7861 = vrcp.f32 %v891_v21 }
 0x4bf   : > { %v7846_v25 = vpop.eup %7845  ;;  %v1482_v26 = vsel %vm439_vm0, %v7844_v23, 0.0 }
 0x4c0   : > { %v1479_v41 = vsel %vm439_vm0, %v7846_v25, 0.0  ;;  %v894_v27 = vpop.xlane.xlu1 %893  ;;  %v1490_v44 = vpack.c.bf16 %v7846_v25, %v7842_v14  ;;  %v7848_v45 = vpop.eup %7847 }
 0x4c1   : > { %1483 = vadd.xlane.f32.xlu0 %v1482_v26  ;;  %1480 = vadd.xlane.f32.xlu1 %v1479_v41  ;;  %7863 = vrcp.f32 %v894_v27  ;;  %v988_v29 = vmul.f32 %v7848_v45, %v8413_v61 }
 0x4c2   : > { %v7850_v42 = vpop.eup %7849  ;;  %7109 = vmatprep.mubr.msk.bf16.mxu0 %vm439_vm0, %v1490_v44 }
 0x4c3   : > { %v1485_v49 = vsel %vm439_vm0, %v7850_v42, 0.0  ;;  %v1491_v54 = vpack.c.bf16 %v7850_v42, %v7844_v23  ;;  %v7852_v28 = vpop.eup %7851  ;;  %v7750_v23 = vld [vmem:[%s9522_s1 + $0x50] sm:$0xff]   ;;  %v7751_v42 = vld [vmem:[%s9522_s1 + $0x48] sm:$0xff]  }
 0x4c4   : > { %v7854_v50 = vpop.eup %7853  ;;  %v989_v30 = vmul.f32 %v7852_v28, %v8417_v63 }
 0x4c5   : > { %1486 = vadd.xlane.f32.xlu1 %v1485_v49  ;;  %v990_v32 = vmul.f32 %v7854_v50, %v8411_v60 }
 0x4c6   : > { %7110 = vmatmul.mubr.msk.bf16.gmra.mxu0 %vm439_vm0, %v1491_v54  ;;  %v7856_v31 = vpop.eup %7855  ;;  %v996_v51 = vpack.c.bf16 %v989_v30, %v988_v29 }
 0x4c7   : > { %v991_v33 = vmul.f32 %v7856_v31, %v8415_v62  ;;  %v7858_v34 = vpop.eup %7857  ;;  %v7747_v62 = vld [vmem:[%s9523_s2 + $0x48] sm:$0xff]  }
 0x4c8   : > { %7125 = vmatprep.mubr.msk.bf16.mxu1 %vm733_vm1, %v996_v51  ;;  %v992_v63 = vmul.f32 %v7858_v34, %v8421_v1  ;;  %v1609_v1 = vsel %vm1607_vm2, %v6175_v47, 0 }
 0x4c9   : > { %v997_v35 = vpack.c.bf16 %v991_v33, %v990_v32  ;;  %7114 = vmatpush3.bf16.msra.mxu0 %v1609_v1  ;;  %v7752_v32 = vld [vmem:[%s9522_s1 + $0x40] sm:$0xff]  }
 0x4ca   : > { %v7860_v37 = vpop.eup %7859 }
 0x4cb   : > { %v7862_v61 = vpop.eup %7861  ;;  %7126 = vmatmul.mubr.msk.bf16.vlgmr.msra.gmra.mxu1 %vm733_vm1, %v997_v35  ;;  %v993_v38 = vmul.f32 %v7860_v37, %v8425_v3 }
 0x4cc   : > { %7150 = vmatpush3.bf16.msra.mxu1 %v7745_v24  ;;  %v994_v40 = vmul.f32 %v7862_v61, %v8419_v0  ;;  %v7748_v0 = vld [vmem:[%s9523_s2 + $0x40] sm:$0xff]  }
 0x4cd   : > { %v998_v39 = vpack.c.bf16 %v993_v38, %v992_v63  ;;  %7151 = vmatprep.subr.bf16.mxu1 %v7746_v36 }
 0x4ce   : > { %v7864_v60 = vpop.eup %7863 }
 0x4cf   : > { %v995_v43 = vmul.f32 %v7864_v60, %v8423_v2  ;;  %7129 = vmatprep.mubr.msk.bf16.mxu1 %vm733_vm1, %v998_v39  ;;  %v7749_v2 = vld [vmem:[%s9522_s1 + $0x58] sm:$0xff]   ;;  %v6211_v39 = vld [vmem:[%s9526_s5 + $0x2] ss:$0 sm:$0xff] }
 0x4d0   : > { %7152 = vmatpush3.bf16.msra.mxu1 %v7746_v36  ;;  %7133 = vmatprep.subr.bf16.mxu0 %v7749_v2 }
 0x4d1   : > { %v999_v3 = vpack.c.bf16 %v995_v43, %v994_v40  ;;  %7153 = vmatprep.subr.bf16.mxu1 %v7747_v62 }
 0x4d3   : > { %7130 = vmatmul.mubr.msk.bf16.gmra.mxu1 %vm733_vm1, %v999_v3 }
 0x4d4   : > { %7154 = vmatpush3.bf16.msra.mxu1 %v7747_v62  ;;  %7157 = vmatprep.mubr.msk.bf16.mxu1 %vm439_vm0, %v8200_v7 }
 0x4d5   : > { %7155 = vmatprep.subr.bf16.mxu1 %v7748_v0 }
 0x4d8   : > { %7156 = vmatpush3.bf16.msra.mxu1 %v7748_v0 }
 0x4db   : > { %7158 = vmatmul.mubr.msk.bf16.vlgmr.msra.gmra.mxu1 %vm439_vm0, %v8219_v15 }
 0x4dc   : > { %7161 = vmatprep.mubr.msk.bf16.mxu1 %vm439_vm0, %v8221_v16 }
 0x4e3   : > { %7162 = vmatmul.mubr.msk.bf16.gmra.mxu1 %vm439_vm0, %v8229_v19 }
 0x53d   : > { %v1466_v48 = vpop.xlane.xlu0 %1465 }
 0x53e   : > { %7865 = vrcp.f32 %v1466_v48 }
 0x541   : > { %v1472_v53 = vpop.xlane.xlu0 %1471 }
 0x542   : > { %v1469_v46 = vpop.xlane.xlu1 %1468 }
 0x546   : > { %v1475_v52 = vpop.xlane.xlu1 %1474  ;;  %v1478_v56 = vpop.xlane.xlu0 %1477 }
 0x547   : > { %7867 = vrcp.f32 %v1475_v52 }
 0x548   : > { %7869 = vrcp.f32 %v1469_v46 }
 0x549   : > { %7871 = vrcp.f32 %v1472_v53 }
 0x54a   : > { %v1481_v55 = vpop.xlane.xlu1 %1480  ;;  %7873 = vrcp.f32 %v1478_v56  ;;  %v1484_v58 = vpop.xlane.xlu0 %1483 }
 0x54b   : > { %v7866_v5 = vpop.eup %7865 }
 0x54e   : > { %v1487_v57 = vpop.xlane.xlu1 %1486 }
 0x54f   : > { %7875 = vrcp.f32 %v1487_v57 }
 0x550   : > { %7877 = vrcp.f32 %v1481_v55 }
 0x551   : > { %7879 = vrcp.f32 %v1484_v58 }
 0x554   : > { %v7868_v8 = vpop.eup %7867 }
 0x555   : > { %v7870_v9 = vpop.eup %7869 }
 0x556   : > { %v7872_v12 = vpop.eup %7871 }
 0x557   : > { %v7874_v24 = vpop.eup %7873 }
 0x55c   : > { %v7876_v26 = vpop.eup %7875 }
 0x55d   : > { %v7878_v41 = vpop.eup %7877 }
 0x55e   : > { %v7880_v49 = vpop.eup %7879 }
 0x57e   : > { %v7107_v59 = vpop.f32.mrf.mxu0 }
 0x57f   : > { %v1583_v17 = vmul.f32 %v7872_v12, %v7107_v59 }
 0x580   : > { %v1542_v4 = vpop.f32.mrf.mxu0 }
 0x581   : > { %v1581_v13 = vmul.f32 %v7866_v5, %v1542_v4 }
 0x582   : > { %v7108_v6 = vpop.f32.mrf.mxu0 }
 0x583   : > { %v1584_v10 = vmul.f32 %v7868_v8, %v7108_v6  ;;  %v7753_v8 = vld [vmem:[%s9524_s3 + $0x58] sm:$0xff]  }
 0x584   : > { %v1545_v11 = vpop.f32.mrf.mxu0 }
 0x585   : > { %v1582_v14 = vmul.f32 %v7870_v9, %v1545_v11  ;;  %v1590_v21 = vpack.c.bf16 %v1584_v10, %v1583_v17  ;;  %v7754_v9 = vld [vmem:[%s9524_s3 + $0x50] sm:$0xff]   ;;  %v7755_v10 = vld [vmem:[%s9524_s3 + $0x48] sm:$0xff]   ;;  %v7756_v11 = vld [vmem:[%s9524_s3 + $0x40] sm:$0xff]  }
 0x586   : > { %v7111_v18 = vpop.f32.mrf.mxu0 }
 0x587   : > { %v1589_v20 = vpack.c.bf16 %v1582_v14, %v1581_v13  ;;  %v1587_v50 = vmul.f32 %v7880_v49, %v7111_v18 }
 0x588   : > { %v1558_v22 = vpop.f32.mrf.mxu0 }
 0x589   : > { %7115 = vmatprep.mubr.msk.bf16.mxu0 %vm733_vm1, %v1589_v20  ;;  %v1585_v54 = vmul.f32 %v7874_v24, %v1558_v22 }
 0x58a   : > { %v7112_v25 = vpop.f32.mrf.mxu0  ;;  %7116 = vmatmul.mubr.msk.bf16.vlgmr.msra.gmra.mxu0 %vm733_vm1, %v1590_v21 }
 0x58b   : > { %7134 = vmatpush3.bf16.msra.mxu0 %v7749_v2  ;;  %v1588_v27 = vmul.f32 %v7876_v26, %v7112_v25  ;;  %v8523_v45 = vpop.f32.mrf.mxu1  ;;  %v6193_v26 = vld [vmem:[%s9525_s4 + $0x2] ss:$0 sm:$0xff] }
 0x58c   : > { %v1561_v44 = vpop.f32.mrf.mxu0  ;;  %7135 = vmatprep.subr.bf16.mxu0 %v7750_v23 }
 0x58d   : > { %v1586_v28 = vmul.f32 %v7878_v41, %v1561_v44  ;;  %v8528_v29 = vpop.f32.mrf.mxu1  ;;  %v1592_v31 = vpack.c.bf16 %v1588_v27, %v1587_v50 }
 0x58f   : > { %v1591_v30 = vpack.c.bf16 %v1586_v28, %v1585_v54  ;;  %7136 = vmatpush3.bf16.msra.mxu0 %v7750_v23  ;;  %v8530_v51 = vpop.f32.mrf.mxu1 }
 0x590   : > { %7137 = vmatprep.subr.bf16.mxu0 %v7751_v42 }
 0x591   : > { %7119 = vmatprep.mubr.msk.bf16.mxu0 %vm733_vm1, %v1591_v30  ;;  %v8537_v33 = vpop.f32.mrf.mxu1 }
 0x592   : > { %7120 = vmatmul.mubr.msk.bf16.gmra.mxu0 %vm733_vm1, %v1592_v31 }
 0x593   : > { %7138 = vmatpush3.bf16.msra.mxu0 %v7751_v42  ;;  %7141 = vmatprep.mubr.msk.bf16.mxu0 %vm439_vm0, %v8200_v7  ;;  %v8541_v34 = vpop.f32.mrf.mxu1 }
 0x594   : > { %7139 = vmatprep.subr.bf16.mxu0 %v7752_v32 }
 0x595   : > { %v8543_v35 = vpop.f32.mrf.mxu1 }
 0x597   : > { %7140 = vmatpush3.bf16.msra.mxu0 %v7752_v32  ;;  %v8545_v36 = vpop.f32.mrf.mxu1 }
 0x598   : > { %7165 = vmatprep.subr.bf16.mxu0 %v7753_v8 }
 0x599   : > { %v8547_v37 = vpop.f32.mrf.mxu1 }
 0x59a   : > { %7142 = vmatmul.mubr.msk.bf16.vlgmr.msra.gmra.mxu0 %vm439_vm0, %v8219_v15 }
 0x59b   : > { %7145 = vmatprep.mubr.msk.bf16.mxu0 %vm439_vm0, %v8221_v16  ;;  %v7159_v61 = vpop.f32.mrf.mxu1  ;;  %7166 = vmatpush3.bf16.msra.mxu0 %v7753_v8 }
 0x59c   : > { %v1946_v53 = vadd.f32 %v7159_v61, %v6211_v39  ;;  %7167 = vmatprep.subr.bf16.mxu0 %v7754_v9 }
 0x59d   : > { %v1937_v63 = vpop.f32.mrf.mxu1 }
 0x59e   : > { %v1938_v58 = vadd.f32 %v6211_v39, %v1937_v63 }
 0x59f   : > { %v7160_v38 = vpop.f32.mrf.mxu1  ;;  %7168 = vmatpush3.bf16.msra.mxu0 %v7754_v9 }
 0x5a0   : > { %v1949_v55 = vadd.f32 %v7160_v38, %v6211_v39  ;;  %7169 = vmatprep.subr.bf16.mxu0 %v7755_v10 }
 0x5a1   : > { %v1940_v60 = vpop.f32.mrf.mxu1 }
 0x5a2   : > { %7146 = vmatmul.mubr.msk.bf16.gmra.mxu0 %vm439_vm0, %v8229_v19  ;;  %v2079_v56 = vpack.c.bf16 %v1949_v55, %v1946_v53  ;;  %v1941_v59 = vadd.f32 %v6211_v39, %v1940_v60 }
 0x5a3   : > { %7173 = vmatprep.mubr.msk.bf16.mxu0 %vm439_vm0, %v8200_v7  ;;  %v7163_v62 = vpop.f32.mrf.mxu1  ;;  %7170 = vmatpush3.bf16.msra.mxu0 %v7755_v10 }
 0x5a4   : > { %v1962_v43 = vadd.f32 %v7163_v62, %v6211_v39  ;;  %v2078_v4 = vpack.c.bf16 %v1941_v59, %v1938_v58  ;;  %v2098_v5 = vsel %vm733_vm1, %v2079_v56, 0  ;;  %7171 = vmatprep.subr.bf16.mxu0 %v7756_v11 }
 0x5a5   : > { %v1953_v40 = vpop.f32.mrf.mxu1 }
 0x5a6   : > { %v1954_v1 = vadd.f32 %v6211_v39, %v1953_v40  ;;  %v2095_v6 = vsel %vm733_vm1, %v2078_v4, 0 }
 0x5a7   : > { %v7164_v47 = vpop.f32.mrf.mxu1  ;;  %7172 = vmatpush3.bf16.msra.mxu0 %v7756_v11 }
 0x5a8   : > { %v1965_v3 = vadd.f32 %v7164_v47, %v6211_v39 }
 0x5a9   : > { %v1956_v0 = vpop.f32.mrf.mxu1 }
 0x5aa   : > { %v2081_v2 = vpack.c.bf16 %v1965_v3, %v1962_v43  ;;  %v1957_v46 = vadd.f32 %v6211_v39, %v1956_v0  ;;  %7174 = vmatmul.mubr.msk.bf16.vlgmr.msra.gmra.mxu0 %vm439_vm0, %v8219_v15  ;;  %v6229_v3 = vld [vmem:[%s9527_s6 + $0x2] ss:$0 sm:$0xff] }
 0x5ab   : > { %7177 = vmatprep.mubr.msk.bf16.mxu0 %vm439_vm0, %v8221_v16 }
 0x5ac   : > { %7683 = vmatprep.subr.msk.bf16.mxu1 %vm733_vm1, %v2081_v2  ;;  %v2104_v48 = vsel %vm733_vm1, %v2081_v2, 0  ;;  %v2080_v52 = vpack.c.bf16 %v1957_v46, %v1954_v1 }
 0x5ad   : > { %7182 = vmatpush3.bf16.xpose.msra.mxu1 %v2104_v48 }
 0x5ae   : > { %7684 = vmatprep.subr.msk.bf16.mxu1 %vm733_vm1, %v2080_v52  ;;  %v2101_v57 = vsel %vm733_vm1, %v2080_v52, 0 }
 0x5b2   : > { %7178 = vmatmul.mubr.msk.bf16.gmra.mxu0 %vm439_vm0, %v8229_v19 }
 0x5b5   : > { %7184 = vmatpush3.bf16.xpose.msra.mxu1 %v2101_v57 }
 0x5b6   : > { %7685 = vmatprep.subr.msk.bf16.mxu1 %vm733_vm1, %v2079_v56 }
 0x5bd   : > { %7186 = vmatpush3.bf16.xpose.msra.mxu1 %v2098_v5 }
 0x5be   : > { %7686 = vmatprep.subr.msk.bf16.mxu1 %vm733_vm1, %v2078_v4 }
 0x5c5   : > { %7188 = vmatpush3.bf16.xpose.msra.mxu1 %v2095_v6 }
 0x64a   : > { %v8586_v12 = vpop.f32.mrf.mxu0 }
 0x64c   : > { %v8588_v13 = vpop.f32.mrf.mxu0 }
 0x64e   : > { %v8590_v14 = vpop.f32.mrf.mxu0 }
 0x650   : > { %v8592_v17 = vpop.f32.mrf.mxu0 }
 0x652   : > { %v8594_v18 = vpop.f32.mrf.mxu0 }
 0x654   : > { %v8596_v20 = vpop.f32.mrf.mxu0 }
 0x656   : > { %v8598_v21 = vpop.f32.mrf.mxu0 }
 0x658   : > { %v8600_v22 = vpop.f32.mrf.mxu0 }
 0x65a   : > { %v7143_v23 = vpop.f32.mrf.mxu0 }
 0x65b   : > { %v1840_v49 = vadd.f32 %v7143_v23, %v6193_v26 }
 0x65c   : > { %v1831_v24 = vpop.f32.mrf.mxu0 }
 0x65d   : > { %v1832_v44 = vadd.f32 %v6193_v26, %v1831_v24 }
 0x65e   : > { %v7144_v25 = vpop.f32.mrf.mxu0 }
 0x65f   : > { %v1843_v41 = vadd.f32 %v7144_v25, %v6193_v26 }
 0x660   : > { %v1834_v27 = vpop.f32.mrf.mxu0 }
 0x661   : > { %v1835_v42 = vadd.f32 %v6193_v26, %v1834_v27  ;;  %v2075_v50 = vpack.c.bf16 %v1843_v41, %v1840_v49 }
 0x662   : > { %v7147_v54 = vpop.f32.mrf.mxu0 }
 0x663   : > { %v2074_v28 = vpack.c.bf16 %v1835_v42, %v1832_v44  ;;  %v1856_v60 = vadd.f32 %v7147_v54, %v6193_v26 }
 0x664   : > { %v1847_v30 = vpop.f32.mrf.mxu0 }
 0x665   : > { %7189 = vmatprep.mubr.msk.bf16.mxu1 %vm733_vm1, %v2074_v28  ;;  %v1848_v63 = vadd.f32 %v6193_v26, %v1847_v30 }
 0x666   : > { %v7148_v31 = vpop.f32.mrf.mxu0  ;;  %7190 = vmatmul.mubr.msk.bf16.vlgmr.msra.gmra.mxu1 %vm733_vm1, %v2075_v50 }
 0x667   : > { %v1859_v32 = vadd.f32 %v7148_v31, %v6193_v26 }
 0x668   : > { %v1850_v61 = vpop.f32.mrf.mxu0 }
 0x669   : > { %v1851_v38 = vadd.f32 %v6193_v26, %v1850_v61  ;;  %v2077_v62 = vpack.c.bf16 %v1859_v32, %v1856_v60 }
 0x66a   : > { %v7175_v40 = vpop.f32.mrf.mxu0 }
 0x66b   : > { %v2076_v39 = vpack.c.bf16 %v1851_v38, %v1848_v63  ;;  %v2052_v56 = vadd.f32 %v7175_v40, %v6229_v3 }
 0x66c   : > { %v2043_v43 = vpop.f32.mrf.mxu0 }
 0x66d   : > { %7193 = vmatprep.mubr.msk.bf16.mxu1 %vm733_vm1, %v2076_v39  ;;  %v2044_v5 = vadd.f32 %v6229_v3, %v2043_v43 }
 0x66e   : > { %7194 = vmatmul.mubr.msk.bf16.gmra.mxu1 %vm733_vm1, %v2077_v62  ;;  %v7176_v47 = vpop.f32.mrf.mxu0 }
 0x66f   : > { %7231 = vmatprep.mubr.msk.bf16.mxu1 %vm439_vm0, %v8200_v7  ;;  %v2055_v57 = vadd.f32 %v7176_v47, %v6229_v3 }
 0x670   : > { %v2046_v1 = vpop.f32.mrf.mxu0 }
 0x671   : > { %v2248_v6 = vpack.c.bf16 %v2055_v57, %v2052_v56  ;;  %v2047_v8 = vadd.f32 %v6229_v3, %v2046_v1 }
 0x672   : > { %v7179_v0 = vpop.f32.mrf.mxu0 }
 0x673   : > { %v2068_v46 = vadd.f32 %v7179_v0, %v6229_v3  ;;  %v2247_v9 = vpack.c.bf16 %v2047_v8, %v2044_v5 }
 0x674   : > { %v2059_v2 = vpop.f32.mrf.mxu0 }
 0x675   : > { %v2060_v52 = vadd.f32 %v6229_v3, %v2059_v2 }
 0x676   : > { %v7180_v48 = vpop.f32.mrf.mxu0 }
 0x677   : > { %v2071_v53 = vadd.f32 %v7180_v48, %v6229_v3 }
 0x678   : > { %v2062_v55 = vpop.f32.mrf.mxu0 }
 0x679   : > { %v2250_v58 = vpack.c.bf16 %v2071_v53, %v2068_v46  ;;  %v2063_v59 = vadd.f32 %v6229_v3, %v2062_v55 }
 0x67b   : > { %v2249_v4 = vpack.c.bf16 %v2063_v59, %v2060_v52  ;;  %7197 = vmatprep.subr.bf16.mxu0 %v2250_v58 }
 0x67c   : > { %7198 = vmatpush3.bf16.msra.mxu0 %v2250_v58 }
 0x67d   : > { %7199 = vmatprep.subr.bf16.mxu0 %v2249_v4 }
 0x680   : > { %7200 = vmatpush3.bf16.msra.mxu0 %v2249_v4 }
 0x681   : > { %7201 = vmatprep.subr.bf16.mxu0 %v2248_v6 }
 0x684   : > { %7202 = vmatpush3.bf16.msra.mxu0 %v2248_v6 }
 0x685   : > { %7203 = vmatprep.subr.bf16.mxu0 %v2247_v9 }
 0x688   : > { %7204 = vmatpush3.bf16.msra.mxu0 %v2247_v9 }
 0x726   : > { %v7191_v10 = vpop.f32.mrf.mxu1 }
 0x727   : > { %v2177_v26 = vsel %vm439_vm0, %v7191_v10, -inf }
 0x728   : > { %v2140_v11 = vpop.f32.mrf.mxu1 }
 0x729   : > { %v2171_v23 = vsel %vm439_vm0, %v2140_v11, -inf }
 0x72a   : > { %2172 = vmax.xlane.f32.xlu0 %v2171_v23  ;;  %v7192_v24 = vpop.f32.mrf.mxu1 }
 0x72b   : > { %v2180_v42 = vsel %vm439_vm0, %v7192_v24, -inf }
 0x72c   : > { %v2143_v25 = vpop.f32.mrf.mxu1 }
 0x72d   : > { %v2174_v41 = vsel %vm439_vm0, %v2143_v25, -inf }
 0x72e   : > { %2178 = vmax.xlane.f32.xlu0 %v2177_v26  ;;  %2175 = vmax.xlane.f32.xlu1 %v2174_v41  ;;  %v7195_v27 = vpop.f32.mrf.mxu1 }
 0x72f   : > { %v2189_v50 = vsel %vm439_vm0, %v7195_v27, -inf }
 0x730   : > { %v2156_v44 = vpop.f32.mrf.mxu1 }
 0x731   : > { %v2183_v49 = vsel %vm439_vm0, %v2156_v44, -inf }
 0x732   : > { %2181 = vmax.xlane.f32.xlu1 %v2180_v42  ;;  %2184 = vmax.xlane.f32.xlu0 %v2183_v49  ;;  %v7196_v54 = vpop.f32.mrf.mxu1 }
 0x733   : > { %v2192_v31 = vsel %vm439_vm0, %v7196_v54, -inf }
 0x734   : > { %v2159_v28 = vpop.f32.mrf.mxu1 }
 0x735   : > { %v2186_v30 = vsel %vm439_vm0, %v2159_v28, -inf }
 0x736   : > { %2190 = vmax.xlane.f32.xlu0 %v2189_v50  ;;  %2187 = vmax.xlane.f32.xlu1 %v2186_v30 }
 0x73a   : > { %2193 = vmax.xlane.f32.xlu1 %v2192_v31 }
 0x7b3   : > { %v2173_v32 = vpop.xlane.xlu0 %2172 }
 0x7b4   : > { %v2195_v61 = vsub.f32 %v2140_v11, %v2173_v32  ;;  %v6246_v32 = vld [vmem:[%s9528_s7 + $0x8] sm:$0xf] }
 0x7b5   : > { %7687 = vmatprep.subr.msk.bf16.mxu0 %vm1607_vm2, %v6246_v32 }
 0x7b6   : > { %v2203_v63 = vmul.f32 1.442695, %v2195_v61  ;;  %v2363_v61 = vsel %vm1607_vm2, %v6246_v32, 0 }
 0x7b7   : > { %v2179_v38 = vpop.xlane.xlu0 %2178  ;;  %v2176_v60 = vpop.xlane.xlu1 %2175 }
 0x7b8   : > { %7881 = vpow2.f32 %v2203_v63  ;;  %v2197_v39 = vsub.f32 %v7191_v10, %v2179_v38  ;;  %v2196_v62 = vsub.f32 %v2143_v25, %v2176_v60  ;;  %v7757_v63 = vld [vmem:[%s9523_s2 + $0x78] sm:$0xff]   ;;  %v7762_v60 = vld [vmem:[%s9522_s1 + $0x70] sm:$0xff]  }
 0x7b9   : > { %v7761_v38 = vld [vmem:[%s9522_s1 + $0x78] sm:$0xff]  }
 0x7ba   : > { %v2207_v40 = vmul.f32 1.442695, %v2197_v39  ;;  %v2205_v43 = vmul.f32 1.442695, %v2196_v62  ;;  %7223 = vmatprep.subr.bf16.mxu1 %v7761_v38  ;;  %v7763_v39 = vld [vmem:[%s9522_s1 + $0x68] sm:$0xff]   ;;  %v7764_v62 = vld [vmem:[%s9522_s1 + $0x60] sm:$0xff]  }
 0x7bb   : > { %v2182_v47 = vpop.xlane.xlu1 %2181  ;;  %v2185_v1 = vpop.xlane.xlu0 %2184  ;;  %7224 = vmatpush3.bf16.msra.mxu1 %v7761_v38  ;;  %v8686_v38 = vld [vmem:[%s9525_s4 + $0x3] ss:$0 sm:$0xff] }
 0x7bc   : > { %7883 = vpow2.f32 %v2207_v40  ;;  %v2198_v3 = vsub.f32 %v7192_v24, %v2182_v47  ;;  %v2199_v0 = vsub.f32 %v2156_v44, %v2185_v1  ;;  %7225 = vmatprep.subr.bf16.mxu1 %v7762_v60 }
 0x7bd   : > { %7885 = vpow2.f32 %v2205_v43 }
 0x7be   : > { %v2209_v2 = vmul.f32 1.442695, %v2198_v3  ;;  %v2211_v46 = vmul.f32 1.442695, %v2199_v0 }
 0x7bf   : > { %v2191_v48 = vpop.xlane.xlu0 %2190  ;;  %v2188_v52 = vpop.xlane.xlu1 %2187  ;;  %7226 = vmatpush3.bf16.msra.mxu1 %v7762_v60 }
 0x7c0   : > { %7887 = vpow2.f32 %v2209_v2  ;;  %v2201_v53 = vsub.f32 %v7195_v27, %v2191_v48  ;;  %v2200_v55 = vsub.f32 %v2159_v28, %v2188_v52  ;;  %7227 = vmatprep.subr.bf16.mxu1 %v7763_v39 }
 0x7c1   : > { %7889 = vpow2.f32 %v2211_v46 }
 0x7c2   : > { %v2215_v56 = vmul.f32 1.442695, %v2201_v53  ;;  %v2213_v57 = vmul.f32 1.442695, %v2200_v55 }
 0x7c3   : > { %v2194_v58 = vpop.xlane.xlu1 %2193  ;;  %7228 = vmatpush3.bf16.msra.mxu1 %v7763_v39 }
 0x7c4   : > { %7891 = vpow2.f32 %v2215_v56  ;;  %v2202_v59 = vsub.f32 %v7196_v54, %v2194_v58  ;;  %7229 = vmatprep.subr.bf16.mxu1 %v7764_v62 }
 0x7c5   : > { %v7882_v4 = vpop.eup %7881  ;;  %7893 = vpow2.f32 %v2213_v57 }
 0x7c6   : > { %v2217_v5 = vmul.f32 1.442695, %v2202_v59  ;;  %v2219_v6 = vsel %vm439_vm0, %v7882_v4, 0.0 }
 0x7c7   : > { %2220 = vadd.xlane.f32.xlu0 %v2219_v6  ;;  %7230 = vmatpush3.bf16.msra.mxu1 %v7764_v62 }
 0x7c8   : > { %7895 = vpow2.f32 %v2217_v5 }
 0x7c9   : > { %v7884_v8 = vpop.eup %7883 }
 0x7ca   : > { %v7886_v9 = vpop.eup %7885  ;;  %v2225_v10 = vsel %vm439_vm0, %v7884_v8, 0.0  ;;  %7232 = vmatmul.mubr.msk.bf16.vlgmr.msra.gmra.mxu1 %vm439_vm0, %v8219_v15 }
 0x7cb   : > { %2226 = vadd.xlane.f32.xlu0 %v2225_v10  ;;  %v2222_v11 = vsel %vm439_vm0, %v7886_v9, 0.0  ;;  %v2243_v23 = vpack.c.bf16 %v7886_v9, %v7882_v4  ;;  %7235 = vmatprep.mubr.msk.bf16.mxu1 %vm439_vm0, %v8221_v16 }
 0x7cc   : > { %2223 = vadd.xlane.f32.xlu1 %v2222_v11 }
 0x7cd   : > { %v7888_v24 = vpop.eup %7887  ;;  %7205 = vmatprep.mubr.msk.bf16.mxu0 %vm439_vm0, %v2243_v23 }
 0x7ce   : > { %v7890_v25 = vpop.eup %7889  ;;  %v2244_v26 = vpack.c.bf16 %v7888_v24, %v7884_v8  ;;  %v2228_v41 = vsel %vm439_vm0, %v7888_v24, 0.0  ;;  %v7758_v24 = vld [vmem:[%s9523_s2 + $0x70] sm:$0xff]  }
 0x7cf   : > { %v2231_v27 = vsel %vm439_vm0, %v7890_v25, 0.0 }
 0x7d0   : > { %2232 = vadd.xlane.f32.xlu0 %v2231_v27  ;;  %2229 = vadd.xlane.f32.xlu1 %v2228_v41 }
 0x7d1   : > { %v7892_v44 = vpop.eup %7891  ;;  %7206 = vmatmul.mubr.msk.bf16.vlgmr.msra.gmra.mxu0 %vm439_vm0, %v2244_v26 }
 0x7d2   : > { %v7894_v42 = vpop.eup %7893  ;;  %v2237_v49 = vsel %vm439_vm0, %v7892_v44, 0.0  ;;  %7214 = vmatpush3.bf16.msra.mxu0 %v2363_v61  ;;  %7236 = vmatmul.mubr.msk.bf16.gmra.mxu1 %vm439_vm0, %v8229_v19  ;;  %v7760_v61 = vld [vmem:[%s9523_s2 + $0x60] sm:$0xff]  }
 0x7d3   : > { %v2234_v54 = vsel %vm439_vm0, %v7894_v42, 0.0  ;;  %v2245_v28 = vpack.c.bf16 %v7894_v42, %v7890_v25  ;;  %7239 = vmatprep.subr.bf16.mxu0 %v7757_v63  ;;  %7263 = vmatprep.mubr.msk.bf16.mxu1 %vm439_vm0, %v8200_v7 }
 0x7d4   : > { %2238 = vadd.xlane.f32.xlu0 %v2237_v49  ;;  %2235 = vadd.xlane.f32.xlu1 %v2234_v54  ;;  %v7759_v49 = vld [vmem:[%s9523_s2 + $0x68] sm:$0xff]  }
 0x7d5   : > { %v7896_v50 = vpop.eup %7895  ;;  %7209 = vmatprep.mubr.msk.bf16.mxu0 %vm439_vm0, %v2245_v28 }
 0x7d6   : > { %v2240_v30 = vsel %vm439_vm0, %v7896_v50, 0.0  ;;  %v2246_v31 = vpack.c.bf16 %v7896_v50, %v7892_v44 }
 0x7d8   : > { %2241 = vadd.xlane.f32.xlu1 %v2240_v30 }
 0x7d9   : > { %7210 = vmatmul.mubr.msk.bf16.gmra.mxu0 %vm439_vm0, %v2246_v31 }
 0x850   : > { %v2221_v43 = vpop.xlane.xlu0 %2220 }
 0x851   : > { %7897 = vrcp.f32 %v2221_v43 }
 0x854   : > { %v2227_v1 = vpop.xlane.xlu0 %2226 }
 0x855   : > { %v2224_v40 = vpop.xlane.xlu1 %2223 }
 0x859   : > { %v2230_v47 = vpop.xlane.xlu1 %2229  ;;  %v2233_v0 = vpop.xlane.xlu0 %2232 }
 0x85a   : > { %7899 = vrcp.f32 %v2230_v47 }
 0x85b   : > { %7901 = vrcp.f32 %v2224_v40 }
 0x85c   : > { %7903 = vrcp.f32 %v2227_v1 }
 0x85d   : > { %v2236_v3 = vpop.xlane.xlu1 %2235  ;;  %7905 = vrcp.f32 %v2233_v0  ;;  %v2239_v46 = vpop.xlane.xlu0 %2238 }
 0x85e   : > { %v7898_v53 = vpop.eup %7897 }
 0x861   : > { %v2242_v2 = vpop.xlane.xlu1 %2241 }
 0x862   : > { %7907 = vrcp.f32 %v2242_v2  ;;  %v7765_v2 = vld [vmem:[%s9524_s3 + $0x78] sm:$0xff]  }
 0x863   : > { %7909 = vrcp.f32 %v2236_v3  ;;  %7255 = vmatprep.subr.bf16.mxu1 %v7765_v2 }
 0x864   : > { %7911 = vrcp.f32 %v2239_v46  ;;  %v7766_v46 = vld [vmem:[%s9524_s3 + $0x70] sm:$0xff]   ;;  %7256 = vmatpush3.bf16.msra.mxu1 %v7765_v2 }
 0x865   : > { %7257 = vmatprep.subr.bf16.mxu1 %v7766_v46 }
 0x867   : > { %v7900_v56 = vpop.eup %7899 }
 0x868   : > { %v7902_v57 = vpop.eup %7901  ;;  %7258 = vmatpush3.bf16.msra.mxu1 %v7766_v46 }
 0x869   : > { %v7904_v4 = vpop.eup %7903 }
 0x86a   : > { %v7906_v25 = vpop.eup %7905 }
 0x86f   : > { %v7908_v41 = vpop.eup %7907 }
 0x870   : > { %v7910_v27 = vpop.eup %7909 }
 0x871   : > { %v7912_v54 = vpop.eup %7911 }
 0x891   : > { %v7207_v48 = vpop.f32.mrf.mxu0 }
 0x892   : > { %v2338_v8 = vmul.f32 %v7904_v4, %v7207_v48  ;;  %v7767_v48 = vld [vmem:[%s9524_s3 + $0x68] sm:$0xff]  }
 0x893   : > { %v2297_v52 = vpop.f32.mrf.mxu0  ;;  %7259 = vmatprep.subr.bf16.mxu1 %v7767_v48 }
 0x894   : > { %v2336_v5 = vmul.f32 %v7898_v53, %v2297_v52  ;;  %v7768_v52 = vld [vmem:[%s9524_s3 + $0x60] sm:$0xff]   ;;  %7260 = vmatpush3.bf16.msra.mxu1 %v7767_v48  ;;  %v1734_v53 = vadd.f32 %v8523_v45, %v8586_v12  ;;  %v1750_v45 = vadd.f32 %v8541_v34, %v8594_v18 }
 0x895   : > { %v7208_v55 = vpop.f32.mrf.mxu0  ;;  %7261 = vmatprep.subr.bf16.mxu1 %v7768_v52 }
 0x896   : > { %v2339_v58 = vmul.f32 %v7900_v56, %v7208_v55  ;;  %v1726_v56 = vadd.f32 %v8528_v29, %v8588_v13  ;;  %v1742_v29 = vadd.f32 %v8543_v35, %v8596_v20  ;;  %v6278_v35 = vld [vmem:[%s9526_s5 + $0x3] ss:$0 sm:$0xff] }
 0x897   : > { %v2300_v59 = vpop.f32.mrf.mxu0 }
 0x898   : > { %v2337_v6 = vmul.f32 %v7902_v57, %v2300_v59  ;;  %v2345_v11 = vpack.c.bf16 %v2339_v58, %v2338_v8  ;;  %7262 = vmatpush3.bf16.msra.mxu1 %v7768_v52  ;;  %v1737_v59 = vadd.f32 %v8530_v51, %v8590_v14  ;;  %v1753_v51 = vadd.f32 %v8545_v36, %v8598_v21 }
 0x899   : > { %v7211_v9 = vpop.f32.mrf.mxu0 }
 0x89a   : > { %v2344_v10 = vpack.c.bf16 %v2337_v6, %v2336_v5  ;;  %v2342_v30 = vmul.f32 %v7912_v54, %v7211_v9 }
 0x89b   : > { %v2313_v23 = vpop.f32.mrf.mxu0  ;;  %7264 = vmatmul.mubr.msk.bf16.vlgmr.msra.gmra.mxu1 %vm439_vm0, %v8219_v15 }
 0x89c   : > { %7215 = vmatprep.mubr.msk.bf16.mxu0 %vm733_vm1, %v2344_v10  ;;  %v2340_v28 = vmul.f32 %v7906_v25, %v2313_v23  ;;  %7267 = vmatprep.mubr.msk.bf16.mxu1 %vm439_vm0, %v8221_v16 }
 0x89d   : > { %v7212_v26 = vpop.f32.mrf.mxu0  ;;  %7216 = vmatmul.mubr.msk.bf16.vlgmr.msra.gmra.mxu0 %vm733_vm1, %v2345_v11 }
 0x89e   : > { %7240 = vmatpush3.bf16.msra.mxu0 %v7757_v63  ;;  %v2343_v44 = vmul.f32 %v7908_v41, %v7212_v26  ;;  %v7233_v63 = vpop.f32.mrf.mxu1 }
 0x89f   : > { %v2316_v42 = vpop.f32.mrf.mxu0  ;;  %7241 = vmatprep.subr.bf16.mxu0 %v7758_v24  ;;  %v8689_v60 = vadd.f32 %v7233_v63, %v8686_v38 }
 0x8a0   : > { %v2341_v50 = vmul.f32 %v7910_v27, %v2316_v42  ;;  %v2347_v32 = vpack.c.bf16 %v2343_v44, %v2342_v30  ;;  %v2513_v39 = vpop.f32.mrf.mxu1 }
 0x8a1   : > { %v2514_v40 = vadd.f32 %v8686_v38, %v2513_v39 }
 0x8a2   : > { %v2346_v31 = vpack.c.bf16 %v2341_v50, %v2340_v28  ;;  %7242 = vmatpush3.bf16.msra.mxu0 %v7758_v24  ;;  %v7234_v62 = vpop.f32.mrf.mxu1 }
 0x8a3   : > { %7243 = vmatprep.subr.bf16.mxu0 %v7759_v49  ;;  %v8693_v43 = vadd.f32 %v7234_v62, %v8686_v38  ;;  %7268 = vmatmul.mubr.msk.bf16.gmra.mxu1 %vm439_vm0, %v8229_v19 }
 0x8a4   : > { %7219 = vmatprep.mubr.msk.bf16.mxu0 %vm733_vm1, %v2346_v31  ;;  %v2516_v47 = vpop.f32.mrf.mxu1 }
 0x8a5   : > { %7220 = vmatmul.mubr.msk.bf16.gmra.mxu0 %vm733_vm1, %v2347_v32  ;;  %v2757_v1 = vpack.c.bf16 %v8693_v43, %v8689_v60  ;;  %v2517_v3 = vadd.f32 %v8686_v38, %v2516_v47  ;;  %v6296_v60 = vld [vmem:[%s9527_s6 + $0x3] ss:$0 sm:$0xff] }
 0x8a6   : > { %7244 = vmatpush3.bf16.msra.mxu0 %v7759_v49  ;;  %7247 = vmatprep.mubr.msk.bf16.mxu0 %vm439_vm0, %v8200_v7 }
 0x8a7   : > { %7245 = vmatprep.subr.bf16.mxu0 %v7760_v61  ;;  %v2756_v0 = vpack.c.bf16 %v2517_v3, %v2514_v40 }
 0x8aa   : > { %7246 = vmatpush3.bf16.msra.mxu0 %v7760_v61  ;;  %v7237_v61 = vpop.f32.mrf.mxu1 }
 0x8ac   : > { %v2529_v62 = vpop.f32.mrf.mxu1 }
 0x8ad   : > { %7248 = vmatmul.mubr.msk.bf16.vlgmr.msra.gmra.mxu0 %vm439_vm0, %v8219_v15  ;;  %v2530_v46 = vadd.f32 %v8686_v38, %v2529_v62 }
 0x8ae   : > { %7251 = vmatprep.mubr.msk.bf16.mxu0 %vm439_vm0, %v8221_v16  ;;  %v7238_v3 = vpop.f32.mrf.mxu1 }
 0x8b5   : > { %7252 = vmatmul.mubr.msk.bf16.gmra.mxu0 %vm439_vm0, %v8229_v19 }
 0x8b6   : > { %7279 = vmatprep.mubr.msk.bf16.mxu0 %vm733_vm1, %v2756_v0  ;;  %v2532_v0 = vpop.f32.mrf.mxu1 }
 0x8b7   : > { %v2533_v48 = vadd.f32 %v8686_v38, %v2532_v0 }
 0x8b9   : > { %v2758_v52 = vpack.c.bf16 %v2533_v48, %v2530_v46 }
 0x95d   : > { %v7217_v55 = vpop.f32.mrf.mxu0 }
 0x95e   : > { %v8721_v57 = vadd.f32 %v7217_v55, %v1734_v53  ;;  %v2538_v53 = vadd.f32 %v7237_v61, %v8686_v38  ;;  %v2541_v55 = vadd.f32 %v7238_v3, %v8686_v38 }
 0x95f   : > { %v2399_v58 = vpop.f32.mrf.mxu0 }
 0x960   : > { %v8725_v4 = vadd.f32 %v2399_v58, %v1726_v56  ;;  %v2759_v56 = vpack.c.bf16 %v2541_v55, %v2538_v53  ;;  %v7265_v58 = vpop.f32.mrf.mxu1 }
 0x961   : > { %v7218_v5 = vpop.f32.mrf.mxu0 }
 0x962   : > { %v8727_v6 = vadd.f32 %v7218_v5, %v1737_v59  ;;  %v2725_v59 = vpop.f32.mrf.mxu1 }
 0x963   : > { %v8729_v8 = vpop.f32.mrf.mxu0 }
 0x964   : > { %v7266_v5 = vpop.f32.mrf.mxu1 }
 0x965   : > { %v7221_v12 = vpop.f32.mrf.mxu0 }
 0x966   : > { %v8735_v13 = vadd.f32 %v7221_v12, %v1750_v45  ;;  %v2728_v45 = vpop.f32.mrf.mxu1 }
 0x967   : > { %v2415_v9 = vpop.f32.mrf.mxu0 }
 0x968   : > { %v8739_v14 = vadd.f32 %v2415_v9, %v1742_v29  ;;  %v7269_v43 = vpop.f32.mrf.mxu1 }
 0x969   : > { %v7222_v10 = vpop.f32.mrf.mxu0  ;;  %v2750_v12 = vadd.f32 %v7269_v43, %v6296_v60 }
 0x96a   : > { %v8741_v11 = vadd.f32 %v7222_v10, %v1753_v51  ;;  %v2734_v10 = vadd.f32 %v7265_v58, %v6296_v60 }
 0x96b   : > { %v8743_v23 = vpop.f32.mrf.mxu0 }
 0x96d   : > { %v7249_v24 = vpop.f32.mrf.mxu0 }
 0x96e   : > { %v2628_v30 = vadd.f32 %v7249_v24, %v6278_v35  ;;  %v2737_v24 = vadd.f32 %v7266_v5, %v6296_v60 }
 0x96f   : > { %v2619_v25 = vpop.f32.mrf.mxu0 }
 0x970   : > { %v2620_v39 = vadd.f32 %v6278_v35, %v2619_v25 }
 0x971   : > { %v7250_v34 = vpop.f32.mrf.mxu0 }
 0x972   : > { %v2631_v50 = vadd.f32 %v7250_v34, %v6278_v35 }
 0x973   : > { %v2622_v18 = vpop.f32.mrf.mxu0 }
 0x974   : > { %v2761_v31 = vpack.c.bf16 %v2631_v50, %v2628_v30  ;;  %v2623_v63 = vadd.f32 %v6278_v35, %v2622_v18 }
 0x975   : > { %v7253_v26 = vpop.f32.mrf.mxu0 }
 0x976   : > { %v2644_v27 = vadd.f32 %v7253_v26, %v6278_v35  ;;  %v2760_v40 = vpack.c.bf16 %v2623_v63, %v2620_v39  ;;  %v2780_v47 = vsel %vm733_vm1, %v2761_v31, 0  ;;  %v2726_v26 = vadd.f32 %v6296_v60, %v2725_v59 }
 0x977   : > { %v2635_v41 = vpop.f32.mrf.mxu0 }
 0x978   : > { %v2636_v44 = vadd.f32 %v6278_v35, %v2635_v41  ;;  %v2777_v2 = vsel %vm733_vm1, %v2760_v40, 0  ;;  %v2930_v41 = vpack.c.bf16 %v2737_v24, %v2734_v10 }
 0x979   : > { %v7254_v20 = vpop.f32.mrf.mxu0 }
 0x97a   : > { %v2647_v36 = vadd.f32 %v7254_v20, %v6278_v35 }
 0x97b   : > { %v2638_v21 = vpop.f32.mrf.mxu0 }
 0x97c   : > { %v2763_v42 = vpack.c.bf16 %v2647_v36, %v2644_v27  ;;  %v2639_v49 = vadd.f32 %v6278_v35, %v2638_v21  ;;  %v2729_v35 = vadd.f32 %v6296_v60, %v2728_v45 }
 0x97e   : > { %v2762_v54 = vpack.c.bf16 %v2639_v49, %v2636_v44  ;;  %7688 = vmatprep.subr.msk.bf16.mxu0 %vm733_vm1, %v2763_v42  ;;  %v2786_v28 = vsel %vm733_vm1, %v2763_v42, 0  ;;  %v2929_v20 = vpack.c.bf16 %v2729_v35, %v2726_v26 }
 0x97f   : > { %7272 = vmatpush3.bf16.xpose.msra.mxu0 %v2786_v28 }
 0x980   : > { %7689 = vmatprep.subr.msk.bf16.mxu0 %vm733_vm1, %v2762_v54  ;;  %v2783_v32 = vsel %vm733_vm1, %v2762_v54, 0 }
 0x987   : > { %7274 = vmatpush3.bf16.xpose.msra.mxu0 %v2783_v32 }
 0x988   : > { %7690 = vmatprep.subr.msk.bf16.mxu0 %vm733_vm1, %v2761_v31 }
 0x98f   : > { %7276 = vmatpush3.bf16.xpose.msra.mxu0 %v2780_v47 }
 0x990   : > { %7691 = vmatprep.subr.msk.bf16.mxu0 %vm733_vm1, %v2760_v40 }
 0x997   : > { %7278 = vmatpush3.bf16.xpose.msra.mxu0 %v2777_v2 }
 0x99e   : > { %7280 = vmatmul.mubr.msk.bf16.vlgmr.msra.gmra.mxu0 %vm733_vm1, %v2757_v1  ;;  %v2741_v1 = vpop.f32.mrf.mxu1 }
 0x99f   : > { %7283 = vmatprep.mubr.msk.bf16.mxu0 %vm733_vm1, %v2758_v52  ;;  %v2742_v9 = vadd.f32 %v6296_v60, %v2741_v1 }
 0x9a0   : > { %v7270_v29 = vpop.f32.mrf.mxu1 }
 0x9a1   : > { %v2753_v38 = vadd.f32 %v7270_v29, %v6296_v60 }
 0x9a2   : > { %v2744_v51 = vpop.f32.mrf.mxu1 }
 0x9a3   : > { %v2932_v25 = vpack.c.bf16 %v2753_v38, %v2750_v12  ;;  %v2745_v34 = vadd.f32 %v6296_v60, %v2744_v51 }
 0x9a5   : > { %v2931_v18 = vpack.c.bf16 %v2745_v34, %v2742_v9  ;;  %7287 = vmatprep.subr.bf16.mxu1 %v2932_v25 }
 0x9a6   : > { %7284 = vmatmul.mubr.msk.bf16.gmra.mxu0 %vm733_vm1, %v2759_v56  ;;  %7288 = vmatpush3.bf16.msra.mxu1 %v2932_v25 }
 0x9a7   : > { %7321 = vmatprep.mubr.msk.bf16.mxu0 %vm439_vm0, %v8200_v7  ;;  %7289 = vmatprep.subr.bf16.mxu1 %v2931_v18 }
 0x9aa   : > { %7290 = vmatpush3.bf16.msra.mxu1 %v2931_v18 }
 0x9ab   : > { %7291 = vmatprep.subr.bf16.mxu1 %v2930_v41 }
 0x9ae   : > { %7292 = vmatpush3.bf16.msra.mxu1 %v2930_v41 }
 0x9af   : > { %7293 = vmatprep.subr.bf16.mxu1 %v2929_v20 }
 0x9b2   : > { %7294 = vmatpush3.bf16.msra.mxu1 %v2929_v20 }
 0xa5e   : > { %v7281_v27 = vpop.f32.mrf.mxu0 }
 0xa5f   : > { %v2859_v49 = vsel %vm439_vm0, %v7281_v27, -inf }
 0xa60   : > { %v2822_v36 = vpop.f32.mrf.mxu0 }
 0xa61   : > { %v2853_v21 = vsel %vm439_vm0, %v2822_v36, -inf }
 0xa62   : > { %2854 = vmax.xlane.f32.xlu0 %v2853_v21  ;;  %v7282_v44 = vpop.f32.mrf.mxu0 }
 0xa63   : > { %v2862_v30 = vsel %vm439_vm0, %v7282_v44, -inf }
 0xa64   : > { %v2825_v42 = vpop.f32.mrf.mxu0 }
 0xa65   : > { %v2856_v54 = vsel %vm439_vm0, %v2825_v42, -inf }
 0xa66   : > { %2860 = vmax.xlane.f32.xlu0 %v2859_v49  ;;  %2857 = vmax.xlane.f32.xlu1 %v2856_v54  ;;  %v7285_v28 = vpop.f32.mrf.mxu0 }
 0xa67   : > { %v2871_v63 = vsel %vm439_vm0, %v7285_v28, -inf }
 0xa68   : > { %v2838_v50 = vpop.f32.mrf.mxu0 }
 0xa69   : > { %v2865_v31 = vsel %vm439_vm0, %v2838_v50, -inf }
 0xa6a   : > { %2863 = vmax.xlane.f32.xlu1 %v2862_v30  ;;  %2866 = vmax.xlane.f32.xlu0 %v2865_v31  ;;  %v7286_v32 = vpop.f32.mrf.mxu0 }
 0xa6b   : > { %v2874_v62 = vsel %vm439_vm0, %v7286_v32, -inf }
 0xa6c   : > { %v2841_v61 = vpop.f32.mrf.mxu0 }
 0xa6d   : > { %v2868_v39 = vsel %vm439_vm0, %v2841_v61, -inf }
 0xa6e   : > { %2872 = vmax.xlane.f32.xlu0 %v2871_v63  ;;  %2869 = vmax.xlane.f32.xlu1 %v2868_v39  ;;  %v7769_v39 = vld [vmem:[%s9523_s2 + $0x98] sm:$0xff]  }
 0xa72   : > { %2875 = vmax.xlane.f32.xlu1 %v2874_v62  ;;  %v7773_v62 = vld [vmem:[%s9522_s1 + $0x98] sm:$0xff]  }
 0xa73   : > { %7313 = vmatprep.subr.bf16.mxu0 %v7773_v62 }
 0xa74   : > { %7314 = vmatpush3.bf16.msra.mxu0 %v7773_v62 }
 0xaeb   : > { %v2855_v40 = vpop.xlane.xlu0 %2854 }
 0xaec   : > { %v2877_v47 = vsub.f32 %v2822_v36, %v2855_v40  ;;  %v7774_v40 = vld [vmem:[%s9522_s1 + $0x90] sm:$0xff]  }
 0xaed   : > { %7315 = vmatprep.subr.bf16.mxu0 %v7774_v40 }
 0xaee   : > { %v2885_v3 = vmul.f32 1.442695, %v2877_v47  ;;  %v7775_v47 = vld [vmem:[%s9522_s1 + $0x88] sm:$0xff]   ;;  %7316 = vmatpush3.bf16.msra.mxu0 %v7774_v40 }
 0xaef   : > { %v2861_v0 = vpop.xlane.xlu0 %2860  ;;  %v2858_v2 = vpop.xlane.xlu1 %2857  ;;  %7317 = vmatprep.subr.bf16.mxu0 %v7775_v47 }
 0xaf0   : > { %7913 = vpow2.f32 %v2885_v3  ;;  %v2879_v46 = vsub.f32 %v7281_v27, %v2861_v0  ;;  %v2878_v48 = vsub.f32 %v2825_v42, %v2858_v2  ;;  %v7776_v3 = vld [vmem:[%s9522_s1 + $0x80] sm:$0xff]  }
 0xaf2   : > { %v2889_v52 = vmul.f32 1.442695, %v2879_v46  ;;  %v2887_v53 = vmul.f32 1.442695, %v2878_v48  ;;  %7318 = vmatpush3.bf16.msra.mxu0 %v7775_v47 }
 0xaf3   : > { %v2864_v55 = vpop.xlane.xlu1 %2863  ;;  %v2867_v56 = vpop.xlane.xlu0 %2866  ;;  %7319 = vmatprep.subr.bf16.mxu0 %v7776_v3 }
 0xaf4   : > { %7915 = vpow2.f32 %v2889_v52  ;;  %v2880_v58 = vsub.f32 %v7282_v44, %v2864_v55  ;;  %v2881_v59 = vsub.f32 %v2838_v50, %v2867_v56 }
 0xaf5   : > { %7917 = vpow2.f32 %v2887_v53 }
 0xaf6   : > { %v2891_v5 = vmul.f32 1.442695, %v2880_v58  ;;  %v2893_v45 = vmul.f32 1.442695, %v2881_v59  ;;  %7320 = vmatpush3.bf16.msra.mxu0 %v7776_v3 }
 0xaf7   : > { %v2873_v60 = vpop.xlane.xlu0 %2872  ;;  %v2870_v43 = vpop.xlane.xlu1 %2869 }
 0xaf8   : > { %7919 = vpow2.f32 %v2891_v5  ;;  %v2883_v1 = vsub.f32 %v7285_v28, %v2873_v60  ;;  %v2882_v12 = vsub.f32 %v2841_v61, %v2870_v43  ;;  %v6313_v61 = vld [vmem:[%s9528_s7 + $0xc] sm:$0xf] }
 0xaf9   : > { %7921 = vpow2.f32 %v2893_v45  ;;  %7692 = vmatprep.subr.msk.bf16.mxu1 %vm1607_vm2, %v6313_v61  ;;  %v3045_v63 = vsel %vm1607_vm2, %v6313_v61, 0  ;;  %7322 = vmatmul.mubr.msk.bf16.vlgmr.msra.gmra.mxu0 %vm439_vm0, %v8219_v15 }
 0xafa   : > { %v2897_v29 = vmul.f32 1.442695, %v2883_v1  ;;  %v2895_v9 = vmul.f32 1.442695, %v2882_v12  ;;  %7325 = vmatprep.mubr.msk.bf16.mxu0 %vm439_vm0, %v8221_v16 }
 0xafb   : > { %v2876_v38 = vpop.xlane.xlu1 %2875 }
 0xafc   : > { %7923 = vpow2.f32 %v2897_v29  ;;  %v2884_v51 = vsub.f32 %v7286_v32, %v2876_v38 }
 0xafd   : > { %v7914_v10 = vpop.eup %7913  ;;  %7925 = vpow2.f32 %v2895_v9 }
 0xafe   : > { %v2899_v24 = vmul.f32 1.442695, %v2884_v51  ;;  %v2901_v25 = vsel %vm439_vm0, %v7914_v10, 0.0 }
 0xaff   : > { %2902 = vadd.xlane.f32.xlu0 %v2901_v25 }
 0xb00   : > { %7927 = vpow2.f32 %v2899_v24 }
 0xb01   : > { %v7916_v34 = vpop.eup %7915  ;;  %7326 = vmatmul.mubr.msk.bf16.gmra.mxu0 %vm439_vm0, %v8229_v19 }
 0xb02   : > { %v7918_v18 = vpop.eup %7917  ;;  %v2907_v26 = vsel %vm439_vm0, %v7916_v34, 0.0  ;;  %7353 = vmatprep.mubr.msk.bf16.mxu0 %vm439_vm0, %v8200_v7 }
 0xb03   : > { %2908 = vadd.xlane.f32.xlu0 %v2907_v26  ;;  %v2904_v41 = vsel %vm439_vm0, %v7918_v18, 0.0  ;;  %v2925_v35 = vpack.c.bf16 %v7918_v18, %v7914_v10  ;;  %v7770_v18 = vld [vmem:[%s9523_s2 + $0x90] sm:$0xff]  }
 0xb04   : > { %2905 = vadd.xlane.f32.xlu1 %v2904_v41 }
 0xb05   : > { %v7920_v20 = vpop.eup %7919  ;;  %7295 = vmatprep.mubr.msk.bf16.mxu1 %vm439_vm0, %v2925_v35 }
 0xb06   : > { %v7922_v27 = vpop.eup %7921  ;;  %v2926_v36 = vpack.c.bf16 %v7920_v20, %v7916_v34  ;;  %v2910_v21 = vsel %vm439_vm0, %v7920_v20, 0.0 }
 0xb07   : > { %v2913_v44 = vsel %vm439_vm0, %v7922_v27, 0.0 }
 0xb08   : > { %2914 = vadd.xlane.f32.xlu0 %v2913_v44  ;;  %2911 = vadd.xlane.f32.xlu1 %v2910_v21  ;;  %v7771_v21 = vld [vmem:[%s9523_s2 + $0x88] sm:$0xff]  }
 0xb09   : > { %v7924_v42 = vpop.eup %7923  ;;  %7296 = vmatmul.mubr.msk.bf16.vlgmr.msra.gmra.mxu1 %vm439_vm0, %v2926_v36 }
 0xb0a   : > { %v7926_v49 = vpop.eup %7925  ;;  %v2919_v54 = vsel %vm439_vm0, %v7924_v42, 0.0  ;;  %7304 = vmatpush3.bf16.msra.mxu1 %v3045_v63 }
 0xb0b   : > { %v2916_v28 = vsel %vm439_vm0, %v7926_v49, 0.0  ;;  %v2927_v50 = vpack.c.bf16 %v7926_v49, %v7922_v27  ;;  %7329 = vmatprep.subr.bf16.mxu1 %v7769_v39 }
 0xb0c   : > { %2920 = vadd.xlane.f32.xlu0 %v2919_v54  ;;  %2917 = vadd.xlane.f32.xlu1 %v2916_v28 }
 0xb0d   : > { %v7928_v30 = vpop.eup %7927  ;;  %7299 = vmatprep.mubr.msk.bf16.mxu1 %vm439_vm0, %v2927_v50 }
 0xb0e   : > { %v2922_v31 = vsel %vm439_vm0, %v7928_v30, 0.0  ;;  %v2928_v32 = vpack.c.bf16 %v7928_v30, %v7924_v42  ;;  %v7772_v30 = vld [vmem:[%s9523_s2 + $0x80] sm:$0xff]  }
 0xb10   : > { %2923 = vadd.xlane.f32.xlu1 %v2922_v31 }
 0xb11   : > { %7300 = vmatmul.mubr.msk.bf16.gmra.mxu1 %vm439_vm0, %v2928_v32  ;;  %v8843_v32 = vld [vmem:[%s9525_s4 + $0x4] ss:$0 sm:$0xff] }
 0xb88   : > { %v2903_v2 = vpop.xlane.xlu0 %2902 }
 0xb89   : > { %7929 = vrcp.f32 %v2903_v2 }
 0xb8c   : > { %v2909_v48 = vpop.xlane.xlu0 %2908 }
 0xb8d   : > { %v2906_v0 = vpop.xlane.xlu1 %2905 }
 0xb91   : > { %v2912_v46 = vpop.xlane.xlu1 %2911  ;;  %v2915_v53 = vpop.xlane.xlu0 %2914 }
 0xb92   : > { %7931 = vrcp.f32 %v2912_v46  ;;  %v7777_v46 = vld [vmem:[%s9524_s3 + $0x98] sm:$0xff]  }
 0xb93   : > { %7933 = vrcp.f32 %v2906_v0  ;;  %7345 = vmatprep.subr.bf16.mxu0 %v7777_v46 }
 0xb94   : > { %7935 = vrcp.f32 %v2909_v48  ;;  %v7778_v48 = vld [vmem:[%s9524_s3 + $0x90] sm:$0xff]   ;;  %7346 = vmatpush3.bf16.msra.mxu0 %v7777_v46 }
 0xb95   : > { %v2918_v52 = vpop.xlane.xlu1 %2917  ;;  %7937 = vrcp.f32 %v2915_v53  ;;  %v2921_v56 = vpop.xlane.xlu0 %2920  ;;  %7347 = vmatprep.subr.bf16.mxu0 %v7778_v48  ;;  %v7780_v53 = vld [vmem:[%s9524_s3 + $0x80] sm:$0xff]  }
 0xb96   : > { %v7930_v5 = vpop.eup %7929 }
 0xb98   : > { %7348 = vmatpush3.bf16.msra.mxu0 %v7778_v48 }
 0xb99   : > { %v2924_v55 = vpop.xlane.xlu1 %2923 }
 0xb9a   : > { %7939 = vrcp.f32 %v2924_v55 }
 0xb9b   : > { %7941 = vrcp.f32 %v2918_v52  ;;  %v7779_v52 = vld [vmem:[%s9524_s3 + $0x88] sm:$0xff]  }
 0xb9c   : > { %7943 = vrcp.f32 %v2921_v56  ;;  %7349 = vmatprep.subr.bf16.mxu0 %v7779_v52 }
 0xb9d   : > { %7350 = vmatpush3.bf16.msra.mxu0 %v7779_v52 }
 0xb9e   : > { %7351 = vmatprep.subr.bf16.mxu0 %v7780_v53 }
 0xb9f   : > { %v7932_v60 = vpop.eup %7931 }
 0xba0   : > { %v7934_v43 = vpop.eup %7933 }
 0xba1   : > { %v7936_v29 = vpop.eup %7935  ;;  %7352 = vmatpush3.bf16.msra.mxu0 %v7780_v53 }
 0xba2   : > { %v7938_v26 = vpop.eup %7937 }
 0xba4   : > { %7354 = vmatmul.mubr.msk.bf16.vlgmr.msra.gmra.mxu0 %vm439_vm0, %v8219_v15 }
 0xba5   : > { %7357 = vmatprep.mubr.msk.bf16.mxu0 %vm439_vm0, %v8221_v16 }
 0xba7   : > { %v7940_v35 = vpop.eup %7939 }
 0xba8   : > { %v7942_v20 = vpop.eup %7941 }
 0xba9   : > { %v7944_v44 = vpop.eup %7943 }
 0xbac   : > { %7358 = vmatmul.mubr.msk.bf16.gmra.mxu0 %vm439_vm0, %v8229_v19 }
 0xbb9   : > { %v7323_v31 = vpop.f32.mrf.mxu0 }
 0xbba   : > { %v8846_v61 = vadd.f32 %v7323_v31, %v8843_v32 }
 0xbbb   : > { %v3195_v63 = vpop.f32.mrf.mxu0 }
 0xbbc   : > { %v3196_v62 = vadd.f32 %v8843_v32, %v3195_v63 }
 0xbc9   : > { %v7297_v58 = vpop.f32.mrf.mxu1 }
 0xbca   : > { %v3020_v51 = vmul.f32 %v7936_v29, %v7297_v58 }
 0xbcb   : > { %v2979_v59 = vpop.f32.mrf.mxu1 }
 0xbcc   : > { %v3018_v9 = vmul.f32 %v7930_v5, %v2979_v59 }
 0xbcd   : > { %v7298_v45 = vpop.f32.mrf.mxu1 }
 0xbce   : > { %v3021_v1 = vmul.f32 %v7932_v60, %v7298_v45 }
 0xbcf   : > { %v2982_v12 = vpop.f32.mrf.mxu1 }
 0xbd0   : > { %v3019_v38 = vmul.f32 %v7934_v43, %v2982_v12  ;;  %v3027_v25 = vpack.c.bf16 %v3021_v1, %v3020_v51 }
 0xbd1   : > { %v7301_v10 = vpop.f32.mrf.mxu1 }
 0xbd2   : > { %v3026_v24 = vpack.c.bf16 %v3019_v38, %v3018_v9  ;;  %v3024_v54 = vmul.f32 %v7944_v44, %v7301_v10 }
 0xbd3   : > { %v2995_v34 = vpop.f32.mrf.mxu1 }
 0xbd4   : > { %7305 = vmatprep.mubr.msk.bf16.mxu1 %vm733_vm1, %v3026_v24  ;;  %v3022_v42 = vmul.f32 %v7938_v26, %v2995_v34 }
 0xbd5   : > { %v7302_v41 = vpop.f32.mrf.mxu1  ;;  %7306 = vmatmul.mubr.msk.bf16.vlgmr.msra.gmra.mxu1 %vm733_vm1, %v3027_v25 }
 0xbd6   : > { %7330 = vmatpush3.bf16.msra.mxu1 %v7769_v39  ;;  %v3025_v27 = vmul.f32 %v7940_v35, %v7302_v41  ;;  %v7324_v39 = vpop.f32.mrf.mxu0 }
 0xbd7   : > { %v2998_v36 = vpop.f32.mrf.mxu1  ;;  %7331 = vmatprep.subr.bf16.mxu1 %v7770_v18  ;;  %v8850_v40 = vadd.f32 %v7324_v39, %v8843_v32 }
 0xbd8   : > { %v3023_v49 = vmul.f32 %v7942_v20, %v2998_v36  ;;  %v3029_v50 = vpack.c.bf16 %v3025_v27, %v3024_v54  ;;  %v3198_v47 = vpop.f32.mrf.mxu0 }
 0xbd9   : > { %v3439_v3 = vpack.c.bf16 %v8850_v40, %v8846_v61  ;;  %v3199_v0 = vadd.f32 %v8843_v32, %v3198_v47  ;;  %v6363_v61 = vld [vmem:[%s9527_s6 + $0x4] ss:$0 sm:$0xff] }
 0xbda   : > { %v3028_v28 = vpack.c.bf16 %v3023_v49, %v3022_v42  ;;  %7332 = vmatpush3.bf16.msra.mxu1 %v7770_v18  ;;  %v7327_v49 = vpop.f32.mrf.mxu0 }
 0xbdb   : > { %7333 = vmatprep.subr.bf16.mxu1 %v7771_v21  ;;  %v3438_v2 = vpack.c.bf16 %v3199_v0, %v3196_v62  ;;  %v3220_v46 = vadd.f32 %v7327_v49, %v8843_v32 }
 0xbdc   : > { %7309 = vmatprep.mubr.msk.bf16.mxu1 %vm733_vm1, %v3028_v28 }
 0xbdd   : > { %7310 = vmatmul.mubr.msk.bf16.gmra.mxu1 %vm733_vm1, %v3029_v50  ;;  %v3211_v50 = vpop.f32.mrf.mxu0 }
 0xbde   : > { %7334 = vmatpush3.bf16.msra.mxu1 %v7771_v21  ;;  %7337 = vmatprep.mubr.msk.bf16.mxu1 %vm439_vm0, %v8200_v7  ;;  %v3212_v47 = vadd.f32 %v8843_v32, %v3211_v50 }
 0xbdf   : > { %7335 = vmatprep.subr.bf16.mxu1 %v7772_v30  ;;  %v7328_v63 = vpop.f32.mrf.mxu0 }
 0xbe0   : > { %v3223_v48 = vadd.f32 %v7328_v63, %v8843_v32 }
 0xbe1   : > { %v3214_v39 = vpop.f32.mrf.mxu0 }
 0xbe2   : > { %7336 = vmatpush3.bf16.msra.mxu1 %v7772_v30  ;;  %v3215_v0 = vadd.f32 %v8843_v32, %v3214_v39  ;;  %v3441_v52 = vpack.c.bf16 %v3223_v48, %v3220_v46 }
 0xbe5   : > { %7338 = vmatmul.mubr.msk.bf16.vlgmr.msra.gmra.mxu1 %vm439_vm0, %v8219_v15 }
 0xbe6   : > { %7341 = vmatprep.mubr.msk.bf16.mxu1 %vm439_vm0, %v8221_v16 }
 0xbed   : > { %7342 = vmatmul.mubr.msk.bf16.gmra.mxu1 %vm439_vm0, %v8229_v19 }
 0xbee   : > { %7369 = vmatprep.mubr.msk.bf16.mxu1 %vm733_vm1, %v3438_v2  ;;  %v3440_v2 = vpack.c.bf16 %v3215_v0, %v3212_v47 }
 0xc64   : > { %v7355_v53 = vpop.f32.mrf.mxu0 }
 0xc95   : > { %v7307_v55 = vpop.f32.mrf.mxu1 }
 0xc96   : > { %v8875_v56 = vadd.f32 %v7307_v55, %v8721_v57  ;;  %v3407_v55 = vpop.f32.mrf.mxu0 }
 0xc97   : > { %v3081_v58 = vpop.f32.mrf.mxu1 }
 0xc98   : > { %v8878_v59 = vadd.f32 %v3081_v58, %v8725_v4  ;;  %v7356_v58 = vpop.f32.mrf.mxu0 }
 0xc99   : > { %v7308_v5 = vpop.f32.mrf.mxu1 }
 0xc9a   : > { %v8881_v45 = vadd.f32 %v7308_v5, %v8727_v6  ;;  %v3410_v5 = vpop.f32.mrf.mxu0 }
 0xc9b   : > { %v8883_v60 = vpop.f32.mrf.mxu1 }
 0xc9c   : > { %v7359_v40 = vpop.f32.mrf.mxu0 }
 0xc9d   : > { %v7311_v43 = vpop.f32.mrf.mxu1 }
 0xc9e   : > { %v8886_v1 = vadd.f32 %v7311_v43, %v8735_v13  ;;  %v6345_v13 = vld [vmem:[%s9526_s5 + $0x4] ss:$0 sm:$0xff]  ;;  %v3432_v43 = vadd.f32 %v7359_v40, %v6363_v61 }
 0xc9f   : > { %v3097_v12 = vpop.f32.mrf.mxu1 }
 0xca0   : > { %v8889_v29 = vadd.f32 %v3097_v12, %v8739_v14 }
 0xca1   : > { %v7312_v57 = vpop.f32.mrf.mxu1 }
 0xca2   : > { %v8892_v9 = vadd.f32 %v7312_v57, %v8741_v11 }
 0xca3   : > { %v8894_v4 = vpop.f32.mrf.mxu1 }
 0xca5   : > { %v7339_v38 = vpop.f32.mrf.mxu1 }
 0xca6   : > { %v3310_v21 = vadd.f32 %v7339_v38, %v6345_v13 }
 0xca7   : > { %v3301_v51 = vpop.f32.mrf.mxu1 }
 0xca8   : > { %v3302_v28 = vadd.f32 %v6345_v13, %v3301_v51  ;;  %v3416_v51 = vadd.f32 %v7355_v53, %v6363_v61 }
 0xca9   : > { %v7340_v6 = vpop.f32.mrf.mxu1 }
 0xcaa   : > { %v3313_v36 = vadd.f32 %v7340_v6, %v6345_v13  ;;  %v3419_v6 = vadd.f32 %v7356_v58, %v6363_v61 }
 0xcab   : > { %v3304_v10 = vpop.f32.mrf.mxu1 }
 0xcac   : > { %v3443_v44 = vpack.c.bf16 %v3313_v36, %v3310_v21  ;;  %v3305_v54 = vadd.f32 %v6345_v13, %v3304_v10 }
 0xcad   : > { %v7343_v24 = vpop.f32.mrf.mxu1 }
 0xcae   : > { %v3326_v18 = vadd.f32 %v7343_v24, %v6345_v13  ;;  %v3442_v30 = vpack.c.bf16 %v3305_v54, %v3302_v28  ;;  %v3462_v31 = vsel %vm733_vm1, %v3443_v44, 0 }
 0xcaf   : > { %v3317_v25 = vpop.f32.mrf.mxu1 }
 0xcb0   : > { %v3318_v41 = vadd.f32 %v6345_v13, %v3317_v25  ;;  %v3459_v62 = vsel %vm733_vm1, %v3442_v30, 0 }
 0xcb1   : > { %v7344_v34 = vpop.f32.mrf.mxu1 }
 0xcb2   : > { %v3329_v14 = vadd.f32 %v7344_v34, %v6345_v13  ;;  %v3612_v34 = vpack.c.bf16 %v3419_v6, %v3416_v51 }
 0xcb3   : > { %v3320_v26 = vpop.f32.mrf.mxu1 }
 0xcb4   : > { %v3445_v35 = vpack.c.bf16 %v3329_v14, %v3326_v18  ;;  %v3321_v11 = vadd.f32 %v6345_v13, %v3320_v26  ;;  %v3408_v13 = vadd.f32 %v6363_v61, %v3407_v55  ;;  %v3411_v18 = vadd.f32 %v6363_v61, %v3410_v5 }
 0xcb6   : > { %v3444_v20 = vpack.c.bf16 %v3321_v11, %v3318_v41  ;;  %7693 = vmatprep.subr.msk.bf16.mxu1 %vm733_vm1, %v3445_v35  ;;  %v3468_v27 = vsel %vm733_vm1, %v3445_v35, 0  ;;  %v3611_v14 = vpack.c.bf16 %v3411_v18, %v3408_v13 }
 0xcb7   : > { %7362 = vmatpush3.bf16.xpose.msra.mxu1 %v3468_v27 }
 0xcb8   : > { %7694 = vmatprep.subr.msk.bf16.mxu1 %vm733_vm1, %v3444_v20  ;;  %v3465_v42 = vsel %vm733_vm1, %v3444_v20, 0 }
 0xcbf   : > { %7364 = vmatpush3.bf16.xpose.msra.mxu1 %v3465_v42 }
 0xcc0   : > { %7695 = vmatprep.subr.msk.bf16.mxu1 %vm733_vm1, %v3443_v44 }
 0xcc7   : > { %7366 = vmatpush3.bf16.xpose.msra.mxu1 %v3462_v31 }
 0xcc8   : > { %7696 = vmatprep.subr.msk.bf16.mxu1 %vm733_vm1, %v3442_v30 }
 0xccf   : > { %7368 = vmatpush3.bf16.xpose.msra.mxu1 %v3459_v62 }
 0xcd6   : > { %7370 = vmatmul.mubr.msk.bf16.vlgmr.msra.gmra.mxu1 %vm733_vm1, %v3439_v3  ;;  %v3423_v3 = vpop.f32.mrf.mxu0 }
 0xcd7   : > { %7373 = vmatprep.mubr.msk.bf16.mxu1 %vm733_vm1, %v3440_v2  ;;  %v3424_v57 = vadd.f32 %v6363_v61, %v3423_v3 }
 0xcd8   : > { %v7360_v12 = vpop.f32.mrf.mxu0 }
 0xcd9   : > { %v3435_v32 = vadd.f32 %v7360_v12, %v6363_v61 }
 0xcda   : > { %v3426_v38 = vpop.f32.mrf.mxu0 }
 0xcdb   : > { %v3614_v10 = vpack.c.bf16 %v3435_v32, %v3432_v43  ;;  %v3427_v24 = vadd.f32 %v6363_v61, %v3426_v38 }
 0xcdd   : > { %v3613_v25 = vpack.c.bf16 %v3427_v24, %v3424_v57  ;;  %7377 = vmatprep.subr.bf16.mxu0 %v3614_v10 }
 0xcde   : > { %7374 = vmatmul.mubr.msk.bf16.gmra.mxu1 %vm733_vm1, %v3441_v52  ;;  %7378 = vmatpush3.bf16.msra.mxu0 %v3614_v10 }
 0xcdf   : > { %7411 = vmatprep.mubr.msk.bf16.mxu1 %vm439_vm0, %v8200_v7  ;;  %7379 = vmatprep.subr.bf16.mxu0 %v3613_v25 }
 0xce2   : > { %7380 = vmatpush3.bf16.msra.mxu0 %v3613_v25 }
 0xce3   : > { %7381 = vmatprep.subr.bf16.mxu0 %v3612_v34 }
 0xce6   : > { %7382 = vmatpush3.bf16.msra.mxu0 %v3612_v34 }
 0xce7   : > { %7383 = vmatprep.subr.bf16.mxu0 %v3611_v14 }
 0xcea   : > { %7384 = vmatpush3.bf16.msra.mxu0 %v3611_v14 }
 0xd96   : > { %v7371_v26 = vpop.f32.mrf.mxu1 }
 0xd97   : > { %v3541_v27 = vsel %vm439_vm0, %v7371_v26, -inf }
 0xd98   : > { %v3504_v41 = vpop.f32.mrf.mxu1 }
 0xd99   : > { %v3535_v35 = vsel %vm439_vm0, %v3504_v41, -inf }
 0xd9a   : > { %3536 = vmax.xlane.f32.xlu0 %v3535_v35  ;;  %v7372_v11 = vpop.f32.mrf.mxu1 }
 0xd9b   : > { %v3544_v42 = vsel %vm439_vm0, %v7372_v11, -inf }
 0xd9c   : > { %v3507_v20 = vpop.f32.mrf.mxu1 }
 0xd9d   : > { %v3538_v36 = vsel %vm439_vm0, %v3507_v20, -inf }
 0xd9e   : > { %3542 = vmax.xlane.f32.xlu0 %v3541_v27  ;;  %3539 = vmax.xlane.f32.xlu1 %v3538_v36  ;;  %v7375_v21 = vpop.f32.mrf.mxu1 }
 0xd9f   : > { %v3553_v50 = vsel %vm439_vm0, %v7375_v21, -inf }
 0xda0   : > { %v3520_v44 = vpop.f32.mrf.mxu1 }
 0xda1   : > { %v3547_v49 = vsel %vm439_vm0, %v3520_v44, -inf }
 0xda2   : > { %3545 = vmax.xlane.f32.xlu1 %v3544_v42  ;;  %3548 = vmax.xlane.f32.xlu0 %v3547_v49  ;;  %v7376_v54 = vpop.f32.mrf.mxu1 }
 0xda3   : > { %v3556_v31 = vsel %vm439_vm0, %v7376_v54, -inf }
 0xda4   : > { %v3523_v28 = vpop.f32.mrf.mxu1 }
 0xda5   : > { %v3550_v30 = vsel %vm439_vm0, %v3523_v28, -inf }
 0xda6   : > { %3554 = vmax.xlane.f32.xlu0 %v3553_v50  ;;  %3551 = vmax.xlane.f32.xlu1 %v3550_v30  ;;  %v6380_v30 = vld [vmem:[%s9528_s7 + $0x10] sm:$0xf] }
 0xda7   : > { %7697 = vmatprep.subr.msk.bf16.mxu0 %vm1607_vm2, %v6380_v30 }
 0xdaa   : > { %3557 = vmax.xlane.f32.xlu1 %v3556_v31  ;;  %v3727_v31 = vsel %vm1607_vm2, %v6380_v30, 0 }
 0xe23   : > { %v3537_v63 = vpop.xlane.xlu0 %3536 }
 0xe24   : > { %v3559_v39 = vsub.f32 %v3504_v41, %v3537_v63  ;;  %v7781_v63 = vld [vmem:[%s9523_s2 + $0xb8] sm:$0xff]  }
 0xe26   : > { %v3567_v62 = vmul.f32 1.442695, %v3559_v39  ;;  %v7785_v39 = vld [vmem:[%s9522_s1 + $0xb8] sm:$0xff]  }
 0xe27   : > { %v3543_v47 = vpop.xlane.xlu0 %3542  ;;  %v3540_v0 = vpop.xlane.xlu1 %3539  ;;  %7403 = vmatprep.subr.bf16.mxu1 %v7785_v39 }
 0xe28   : > { %7945 = vpow2.f32 %v3567_v62  ;;  %v3561_v2 = vsub.f32 %v7371_v26, %v3543_v47  ;;  %v3560_v46 = vsub.f32 %v3507_v20, %v3540_v0  ;;  %v7786_v62 = vld [vmem:[%s9522_s1 + $0xb0] sm:$0xff]   ;;  %7404 = vmatpush3.bf16.msra.mxu1 %v7785_v39  ;;  %v7787_v47 = vld [vmem:[%s9522_s1 + $0xa8] sm:$0xff]   ;;  %v7788_v0 = vld [vmem:[%s9522_s1 + $0xa0] sm:$0xff]  }
 0xe29   : > { %7405 = vmatprep.subr.bf16.mxu1 %v7786_v62 }
 0xe2a   : > { %v3571_v48 = vmul.f32 1.442695, %v3561_v2  ;;  %v3569_v52 = vmul.f32 1.442695, %v3560_v46 }
 0xe2b   : > { %v3546_v53 = vpop.xlane.xlu1 %3545  ;;  %v3549_v55 = vpop.xlane.xlu0 %3548 }
 0xe2c   : > { %7947 = vpow2.f32 %v3571_v48  ;;  %v3562_v58 = vsub.f32 %v7372_v11, %v3546_v53  ;;  %v3563_v5 = vsub.f32 %v3520_v44, %v3549_v55  ;;  %7406 = vmatpush3.bf16.msra.mxu1 %v7786_v62 }
 0xe2d   : > { %7949 = vpow2.f32 %v3569_v52  ;;  %7407 = vmatprep.subr.bf16.mxu1 %v7787_v47 }
 0xe2e   : > { %v3573_v61 = vmul.f32 1.442695, %v3562_v58  ;;  %v3575_v40 = vmul.f32 1.442695, %v3563_v5 }
 0xe2f   : > { %v3555_v3 = vpop.xlane.xlu0 %3554  ;;  %v3552_v43 = vpop.xlane.xlu1 %3551 }
 0xe30   : > { %7951 = vpow2.f32 %v3573_v61  ;;  %v3565_v12 = vsub.f32 %v7375_v21, %v3555_v3  ;;  %v3564_v57 = vsub.f32 %v3523_v28, %v3552_v43  ;;  %7408 = vmatpush3.bf16.msra.mxu1 %v7787_v47 }
 0xe31   : > { %7953 = vpow2.f32 %v3575_v40  ;;  %7409 = vmatprep.subr.bf16.mxu1 %v7788_v0 }
 0xe32   : > { %v3579_v32 = vmul.f32 1.442695, %v3565_v12  ;;  %v3577_v38 = vmul.f32 1.442695, %v3564_v57 }
 0xe33   : > { %v3558_v51 = vpop.xlane.xlu1 %3557 }
 0xe34   : > { %7955 = vpow2.f32 %v3579_v32  ;;  %v3566_v6 = vsub.f32 %v7376_v54, %v3558_v51  ;;  %7410 = vmatpush3.bf16.msra.mxu1 %v7788_v0 }
 0xe35   : > { %v7946_v10 = vpop.eup %7945  ;;  %7957 = vpow2.f32 %v3577_v38 }
 0xe36   : > { %v3581_v24 = vmul.f32 1.442695, %v3566_v6  ;;  %v3583_v25 = vsel %vm439_vm0, %v7946_v10, 0.0 }
 0xe37   : > { %3584 = vadd.xlane.f32.xlu0 %v3583_v25  ;;  %7412 = vmatmul.mubr.msk.bf16.vlgmr.msra.gmra.mxu1 %vm439_vm0, %v8219_v15 }
 0xe38   : > { %7959 = vpow2.f32 %v3581_v24  ;;  %7415 = vmatprep.mubr.msk.bf16.mxu1 %vm439_vm0, %v8221_v16 }
 0xe39   : > { %v7948_v13 = vpop.eup %7947 }
 0xe3a   : > { %v7950_v34 = vpop.eup %7949  ;;  %v3589_v18 = vsel %vm439_vm0, %v7948_v13, 0.0 }
 0xe3b   : > { %3590 = vadd.xlane.f32.xlu0 %v3589_v18  ;;  %v3586_v14 = vsel %vm439_vm0, %v7950_v34, 0.0  ;;  %v3607_v26 = vpack.c.bf16 %v7950_v34, %v7946_v10 }
 0xe3c   : > { %3587 = vadd.xlane.f32.xlu1 %v3586_v14  ;;  %v7782_v14 = vld [vmem:[%s9523_s2 + $0xb0] sm:$0xff]  }
 0xe3d   : > { %v7952_v41 = vpop.eup %7951  ;;  %7385 = vmatprep.mubr.msk.bf16.mxu0 %vm439_vm0, %v3607_v26 }
 0xe3e   : > { %v7954_v35 = vpop.eup %7953  ;;  %v3608_v11 = vpack.c.bf16 %v7952_v41, %v7948_v13  ;;  %v3592_v20 = vsel %vm439_vm0, %v7952_v41, 0.0 }
 0xe3f   : > { %v3595_v27 = vsel %vm439_vm0, %v7954_v35, 0.0  ;;  %7416 = vmatmul.mubr.msk.bf16.gmra.mxu1 %vm439_vm0, %v8229_v19 }
 0xe40   : > { %3596 = vadd.xlane.f32.xlu0 %v3595_v27  ;;  %3593 = vadd.xlane.f32.xlu1 %v3592_v20 }
 0xe41   : > { %v7956_v36 = vpop.eup %7955  ;;  %7386 = vmatmul.mubr.msk.bf16.vlgmr.msra.gmra.mxu0 %vm439_vm0, %v3608_v11  ;;  %7443 = vmatprep.mubr.msk.bf16.mxu1 %vm439_vm0, %v8200_v7 }
 0xe42   : > { %v7958_v21 = vpop.eup %7957  ;;  %v3601_v44 = vsel %vm439_vm0, %v7956_v36, 0.0  ;;  %7394 = vmatpush3.bf16.msra.mxu0 %v3727_v31  ;;  %v8994_v31 = vld [vmem:[%s9525_s4 + $0x5] ss:$0 sm:$0xff] }
 0xe43   : > { %v3598_v42 = vsel %vm439_vm0, %v7958_v21, 0.0  ;;  %v3609_v49 = vpack.c.bf16 %v7958_v21, %v7954_v35  ;;  %7419 = vmatprep.subr.bf16.mxu0 %v7781_v63 }
 0xe44   : > { %3602 = vadd.xlane.f32.xlu0 %v3601_v44  ;;  %3599 = vadd.xlane.f32.xlu1 %v3598_v42 }
 0xe45   : > { %v7960_v54 = vpop.eup %7959  ;;  %7389 = vmatprep.mubr.msk.bf16.mxu0 %vm439_vm0, %v3609_v49 }
 0xe46   : > { %v3604_v28 = vsel %vm439_vm0, %v7960_v54, 0.0  ;;  %v3610_v50 = vpack.c.bf16 %v7960_v54, %v7956_v36  ;;  %v7783_v36 = vld [vmem:[%s9523_s2 + $0xa8] sm:$0xff]  }
 0xe48   : > { %3605 = vadd.xlane.f32.xlu1 %v3604_v28 }
 0xe49   : > { %7390 = vmatmul.mubr.msk.bf16.gmra.mxu0 %vm439_vm0, %v3610_v50  ;;  %v7784_v50 = vld [vmem:[%s9523_s2 + $0xa0] sm:$0xff]  }
 0xec0   : > { %v3585_v46 = vpop.xlane.xlu0 %3584 }
 0xec1   : > { %7961 = vrcp.f32 %v3585_v46 }
 0xec4   : > { %v3591_v52 = vpop.xlane.xlu0 %3590 }
 0xec5   : > { %v3588_v2 = vpop.xlane.xlu1 %3587 }
 0xec9   : > { %v3594_v48 = vpop.xlane.xlu1 %3593  ;;  %v3597_v55 = vpop.xlane.xlu0 %3596 }
 0xeca   : > { %7963 = vrcp.f32 %v3594_v48 }
 0xecb   : > { %7965 = vrcp.f32 %v3588_v2 }
 0xecc   : > { %7967 = vrcp.f32 %v3591_v52 }
 0xecd   : > { %v3600_v53 = vpop.xlane.xlu1 %3599  ;;  %7969 = vrcp.f32 %v3597_v55  ;;  %v3603_v5 = vpop.xlane.xlu0 %3602  ;;  %v7790_v55 = vld [vmem:[%s9524_s3 + $0xb0] sm:$0xff]  }
 0xece   : > { %v7962_v3 = vpop.eup %7961 }
 0xed1   : > { %v3606_v58 = vpop.xlane.xlu1 %3605 }
 0xed2   : > { %7971 = vrcp.f32 %v3606_v58  ;;  %v7791_v58 = vld [vmem:[%s9524_s3 + $0xa8] sm:$0xff]  }
 0xed3   : > { %7973 = vrcp.f32 %v3600_v53  ;;  %v7789_v53 = vld [vmem:[%s9524_s3 + $0xb8] sm:$0xff]  }
 0xed4   : > { %7975 = vrcp.f32 %v3603_v5  ;;  %7435 = vmatprep.subr.bf16.mxu1 %v7789_v53  ;;  %v7792_v5 = vld [vmem:[%s9524_s3 + $0xa0] sm:$0xff]  }
 0xed5   : > { %7436 = vmatpush3.bf16.msra.mxu1 %v7789_v53 }
 0xed6   : > { %7437 = vmatprep.subr.bf16.mxu1 %v7790_v55 }
 0xed7   : > { %v7964_v12 = vpop.eup %7963 }
 0xed8   : > { %v7966_v57 = vpop.eup %7965 }
 0xed9   : > { %v7968_v51 = vpop.eup %7967  ;;  %7438 = vmatpush3.bf16.msra.mxu1 %v7790_v55 }
 0xeda   : > { %v7970_v26 = vpop.eup %7969  ;;  %7439 = vmatprep.subr.bf16.mxu1 %v7791_v58 }
 0xedd   : > { %7440 = vmatpush3.bf16.msra.mxu1 %v7791_v58 }
 0xede   : > { %7441 = vmatprep.subr.bf16.mxu1 %v7792_v5 }
 0xedf   : > { %v7972_v35 = vpop.eup %7971 }
 0xee0   : > { %v7974_v11 = vpop.eup %7973 }
 0xee1   : > { %v7976_v21 = vpop.eup %7975  ;;  %7442 = vmatpush3.bf16.msra.mxu1 %v7792_v5 }
 0xee4   : > { %7444 = vmatmul.mubr.msk.bf16.vlgmr.msra.gmra.mxu1 %vm439_vm0, %v8219_v15 }
 0xee5   : > { %7447 = vmatprep.mubr.msk.bf16.mxu1 %vm439_vm0, %v8221_v16 }
 0xeec   : > { %7448 = vmatmul.mubr.msk.bf16.gmra.mxu1 %vm439_vm0, %v8229_v19 }
 0xef7   : > { %v7413_v30 = vpop.f32.mrf.mxu1 }
 0xef9   : > { %v3877_v39 = vpop.f32.mrf.mxu1 }
 0xefa   : > { %v3878_v47 = vadd.f32 %v8994_v31, %v3877_v39 }
 0xefb   : > { %v7414_v62 = vpop.f32.mrf.mxu1 }
 0xefc   : > { %v9001_v0 = vadd.f32 %v7414_v62, %v8994_v31 }
 0xefd   : > { %v3880_v2 = vpop.f32.mrf.mxu1 }
 0xefe   : > { %v3881_v48 = vadd.f32 %v8994_v31, %v3880_v2 }
 0xf00   : > { %v4120_v52 = vpack.c.bf16 %v3881_v48, %v3878_v47 }
 0xf01   : > { %v7387_v61 = vpop.f32.mrf.mxu0 }
 0xf02   : > { %v3702_v24 = vmul.f32 %v7968_v51, %v7387_v61 }
 0xf03   : > { %v3661_v40 = vpop.f32.mrf.mxu0 }
 0xf04   : > { %v3700_v6 = vmul.f32 %v7962_v3, %v3661_v40  ;;  %v1729_v40 = vadd.f32 %v8537_v33, %v8592_v17  ;;  %v1745_v33 = vadd.f32 %v8547_v37, %v8600_v22 }
 0xf05   : > { %v7388_v43 = vpop.f32.mrf.mxu0 }
 0xf06   : > { %v3703_v32 = vmul.f32 %v7964_v12, %v7388_v43  ;;  %v2431_v12 = vadd.f32 %v8729_v8, %v1729_v40 }
 0xf07   : > { %v3664_v38 = vpop.f32.mrf.mxu0 }
 0xf08   : > { %v3701_v10 = vmul.f32 %v7966_v57, %v3664_v38  ;;  %v3709_v34 = vpack.c.bf16 %v3703_v32, %v3702_v24  ;;  %v3113_v38 = vadd.f32 %v8883_v60, %v2431_v12 }
 0xf09   : > { %v7391_v25 = vpop.f32.mrf.mxu0 }
 0xf0a   : > { %v3708_v13 = vpack.c.bf16 %v3701_v10, %v3700_v6  ;;  %v3706_v49 = vmul.f32 %v7976_v21, %v7391_v25 }
 0xf0b   : > { %v3677_v18 = vpop.f32.mrf.mxu0 }
 0xf0c   : > { %7395 = vmatprep.mubr.msk.bf16.mxu0 %vm733_vm1, %v3708_v13  ;;  %v3704_v44 = vmul.f32 %v7970_v26, %v3677_v18 }
 0xf0d   : > { %v7392_v41 = vpop.f32.mrf.mxu0  ;;  %7396 = vmatmul.mubr.msk.bf16.vlgmr.msra.gmra.mxu0 %vm733_vm1, %v3709_v34 }
 0xf0e   : > { %7420 = vmatpush3.bf16.msra.mxu0 %v7781_v63  ;;  %v3707_v20 = vmul.f32 %v7972_v35, %v7392_v41  ;;  %v8997_v63 = vadd.f32 %v7413_v30, %v8994_v31 }
 0xf0f   : > { %v3680_v27 = vpop.f32.mrf.mxu0  ;;  %7421 = vmatprep.subr.bf16.mxu0 %v7782_v14 }
 0xf10   : > { %v3705_v42 = vmul.f32 %v7974_v11, %v3680_v27  ;;  %v3711_v28 = vpack.c.bf16 %v3707_v20, %v3706_v49  ;;  %v4121_v46 = vpack.c.bf16 %v9001_v0, %v8997_v63  ;;  %v6430_v63 = vld [vmem:[%s9527_s6 + $0x5] ss:$0 sm:$0xff] }
 0xf12   : > { %v3710_v54 = vpack.c.bf16 %v3705_v42, %v3704_v44  ;;  %7422 = vmatpush3.bf16.msra.mxu0 %v7782_v14 }
 0xf13   : > { %7423 = vmatprep.subr.bf16.mxu0 %v7783_v36 }
 0xf14   : > { %7399 = vmatprep.mubr.msk.bf16.mxu0 %vm733_vm1, %v3710_v54  ;;  %v7417_v54 = vpop.f32.mrf.mxu1 }
 0xf15   : > { %7400 = vmatmul.mubr.msk.bf16.gmra.mxu0 %vm733_vm1, %v3711_v28  ;;  %v3902_v58 = vadd.f32 %v7417_v54, %v8994_v31 }
 0xf16   : > { %7424 = vmatpush3.bf16.msra.mxu0 %v7783_v36  ;;  %7427 = vmatprep.mubr.msk.bf16.mxu0 %vm439_vm0, %v8200_v7  ;;  %v3893_v30 = vpop.f32.mrf.mxu1 }
 0xf17   : > { %7425 = vmatprep.subr.bf16.mxu0 %v7784_v50 }
 0xf18   : > { %v7418_v47 = vpop.f32.mrf.mxu1 }
 0xf19   : > { %v3905_v5 = vadd.f32 %v7418_v47, %v8994_v31 }
 0xf1a   : > { %7426 = vmatpush3.bf16.msra.mxu0 %v7784_v50  ;;  %v3896_v2 = vpop.f32.mrf.mxu1 }
 0xf1b   : > { %v3897_v53 = vadd.f32 %v8994_v31, %v3896_v2 }
 0xf1d   : > { %7428 = vmatmul.mubr.msk.bf16.vlgmr.msra.gmra.mxu0 %vm439_vm0, %v8219_v15 }
 0xf1e   : > { %7431 = vmatprep.mubr.msk.bf16.mxu0 %vm439_vm0, %v8221_v16 }
 0xf25   : > { %7432 = vmatmul.mubr.msk.bf16.gmra.mxu0 %vm439_vm0, %v8229_v19 }
 0xf26   : > { %7459 = vmatprep.mubr.msk.bf16.mxu0 %vm733_vm1, %v4120_v52  ;;  %v3894_v52 = vadd.f32 %v8994_v31, %v3893_v30 }
 0xf28   : > { %v4122_v55 = vpack.c.bf16 %v3897_v53, %v3894_v52 }
 0xfa4   : > { %v7445_v40 = vpop.f32.mrf.mxu1 }
 0xfcd   : > { %v7397_v61 = vpop.f32.mrf.mxu0 }
 0xfce   : > { %v9028_v3 = vadd.f32 %v7397_v61, %v8875_v56  ;;  %v2435_v56 = vadd.f32 %v8743_v23, %v1745_v33  ;;  %v6412_v23 = vld [vmem:[%s9526_s5 + $0x5] ss:$0 sm:$0xff]  ;;  %v4123_v61 = vpack.c.bf16 %v3905_v5, %v3902_v58 }
 0xfcf   : > { %v3763_v43 = vpop.f32.mrf.mxu0 }
 0xfd0   : > { %v9032_v57 = vadd.f32 %v3763_v43, %v8878_v59  ;;  %v4089_v43 = vpop.f32.mrf.mxu1 }
 0xfd1   : > { %v7398_v32 = vpop.f32.mrf.mxu0 }
 0xfd2   : > { %v9036_v51 = vadd.f32 %v7398_v32, %v8881_v45  ;;  %v3117_v45 = vadd.f32 %v8894_v4, %v2435_v56  ;;  %v7446_v12 = vpop.f32.mrf.mxu1 }
 0xfd3   : > { %v3766_v6 = vpop.f32.mrf.mxu0  ;;  %v4101_v56 = vadd.f32 %v7446_v12, %v6430_v63 }
 0xfd4   : > { %v9038_v10 = vadd.f32 %v3766_v6, %v3113_v38  ;;  %v4092_v32 = vpop.f32.mrf.mxu1 }
 0xfd5   : > { %v7401_v24 = vpop.f32.mrf.mxu0 }
 0xfd6   : > { %v9043_v17 = vadd.f32 %v7401_v24, %v8886_v1  ;;  %v7449_v0 = vpop.f32.mrf.mxu1 }
 0xfd7   : > { %v3779_v8 = vpop.f32.mrf.mxu0  ;;  %v4114_v38 = vadd.f32 %v7449_v0, %v6430_v63 }
 0xfd8   : > { %v9047_v59 = vadd.f32 %v3779_v8, %v8889_v29  ;;  %v4098_v8 = vadd.f32 %v7445_v40, %v6430_v63 }
 0xfd9   : > { %v7402_v60 = vpop.f32.mrf.mxu0 }
 0xfda   : > { %v9051_v25 = vadd.f32 %v7402_v60, %v8892_v9 }
 0xfdb   : > { %v3782_v13 = vpop.f32.mrf.mxu0 }
 0xfdc   : > { %v9053_v34 = vadd.f32 %v3782_v13, %v3117_v45 }
 0xfdd   : > { %v7429_v18 = vpop.f32.mrf.mxu0 }
 0xfde   : > { %v3992_v44 = vadd.f32 %v7429_v18, %v6412_v23  ;;  %v4090_v18 = vadd.f32 %v6430_v63, %v4089_v43 }
 0xfdf   : > { %v3983_v37 = vpop.f32.mrf.mxu0 }
 0xfe0   : > { %v3984_v50 = vadd.f32 %v6412_v23, %v3983_v37  ;;  %v4294_v37 = vpack.c.bf16 %v4101_v56, %v4098_v8 }
 0xfe1   : > { %v7430_v22 = vpop.f32.mrf.mxu0 }
 0xfe2   : > { %v3995_v21 = vadd.f32 %v7430_v22, %v6412_v23  ;;  %v4093_v22 = vadd.f32 %v6430_v63, %v4092_v32 }
 0xfe3   : > { %v3986_v1 = vpop.f32.mrf.mxu0 }
 0xfe4   : > { %v4125_v42 = vpack.c.bf16 %v3995_v21, %v3992_v44  ;;  %v3987_v28 = vadd.f32 %v6412_v23, %v3986_v1  ;;  %v4293_v1 = vpack.c.bf16 %v4093_v22, %v4090_v18 }
 0xfe5   : > { %v7433_v14 = vpop.f32.mrf.mxu0 }
 0xfe6   : > { %v4008_v41 = vadd.f32 %v7433_v14, %v6412_v23  ;;  %v4124_v39 = vpack.c.bf16 %v3987_v28, %v3984_v50  ;;  %v4144_v62 = vsel %vm733_vm1, %v4125_v42, 0 }
 0xfe7   : > { %v3999_v26 = vpop.f32.mrf.mxu0 }
 0xfe8   : > { %v4000_v11 = vadd.f32 %v6412_v23, %v3999_v26  ;;  %v4141_v48 = vsel %vm733_vm1, %v4124_v39, 0 }
 0xfe9   : > { %v7434_v29 = vpop.f32.mrf.mxu0 }
 0xfea   : > { %v4011_v35 = vadd.f32 %v7434_v29, %v6412_v23 }
 0xfeb   : > { %v4002_v4 = vpop.f32.mrf.mxu0 }
 0xfec   : > { %v4127_v9 = vpack.c.bf16 %v4011_v35, %v4008_v41  ;;  %v4003_v20 = vadd.f32 %v6412_v23, %v4002_v4 }
 0xfee   : > { %v4126_v27 = vpack.c.bf16 %v4003_v20, %v4000_v11  ;;  %7698 = vmatprep.subr.msk.bf16.mxu0 %vm733_vm1, %v4127_v9  ;;  %v4150_v36 = vsel %vm733_vm1, %v4127_v9, 0 }
 0xfef   : > { %7452 = vmatpush3.bf16.xpose.msra.mxu0 %v4150_v36 }
 0xff0   : > { %7699 = vmatprep.subr.msk.bf16.mxu0 %vm733_vm1, %v4126_v27  ;;  %v4147_v49 = vsel %vm733_vm1, %v4126_v27, 0 }
 0xff7   : > { %7454 = vmatpush3.bf16.xpose.msra.mxu0 %v4147_v49 }
 0xff8   : > { %7700 = vmatprep.subr.msk.bf16.mxu0 %vm733_vm1, %v4125_v42 }
 0xfff   : > { %7456 = vmatpush3.bf16.xpose.msra.mxu0 %v4144_v62 }
0x1000   : > { %7701 = vmatprep.subr.msk.bf16.mxu0 %vm733_vm1, %v4124_v39 }
0x1007   : > { %7458 = vmatpush3.bf16.xpose.msra.mxu0 %v4141_v48 }
0x100e   : > { %7460 = vmatmul.mubr.msk.bf16.vlgmr.msra.gmra.mxu0 %vm733_vm1, %v4121_v46  ;;  %v4105_v46 = vpop.f32.mrf.mxu1 }
0x100f   : > { %7463 = vmatprep.mubr.msk.bf16.mxu0 %vm733_vm1, %v4122_v55  ;;  %v4106_v24 = vadd.f32 %v6430_v63, %v4105_v46 }
0x1010   : > { %v7450_v6 = vpop.f32.mrf.mxu1 }
0x1011   : > { %v4117_v31 = vadd.f32 %v7450_v6, %v6430_v63 }
0x1012   : > { %v4108_v33 = vpop.f32.mrf.mxu1 }
0x1013   : > { %v4296_v60 = vpack.c.bf16 %v4117_v31, %v4114_v38  ;;  %v4109_v45 = vadd.f32 %v6430_v63, %v4108_v33 }
0x1015   : > { %v4295_v13 = vpack.c.bf16 %v4109_v45, %v4106_v24  ;;  %7467 = vmatprep.subr.bf16.mxu1 %v4296_v60 }
0x1016   : > { %7464 = vmatmul.mubr.msk.bf16.gmra.mxu0 %vm733_vm1, %v4123_v61  ;;  %7468 = vmatpush3.bf16.msra.mxu1 %v4296_v60 }
0x1017   : > { %7501 = vmatprep.mubr.msk.bf16.mxu0 %vm439_vm0, %v8200_v7  ;;  %7469 = vmatprep.subr.bf16.mxu1 %v4295_v13 }
0x101a   : > { %7470 = vmatpush3.bf16.msra.mxu1 %v4295_v13 }
0x101b   : > { %7471 = vmatprep.subr.bf16.mxu1 %v4294_v37 }
0x101e   : > { %7472 = vmatpush3.bf16.msra.mxu1 %v4294_v37 }
0x101f   : > { %7473 = vmatprep.subr.bf16.mxu1 %v4293_v1 }
0x1022   : > { %7474 = vmatpush3.bf16.msra.mxu1 %v4293_v1 }
0x10ce   : > { %v7461_v14 = vpop.f32.mrf.mxu0 }
0x10cf   : > { %v4223_v35 = vsel %vm439_vm0, %v7461_v14, -inf }
0x10d0   : > { %v4186_v26 = vpop.f32.mrf.mxu0 }
0x10d1   : > { %v4217_v23 = vsel %vm439_vm0, %v4186_v26, -inf }
0x10d2   : > { %4218 = vmax.xlane.f32.xlu0 %v4217_v23  ;;  %v7462_v29 = vpop.f32.mrf.mxu0 }
0x10d3   : > { %v4226_v20 = vsel %vm439_vm0, %v7462_v29, -inf }
0x10d4   : > { %v4189_v41 = vpop.f32.mrf.mxu0 }
0x10d5   : > { %v4220_v4 = vsel %vm439_vm0, %v4189_v41, -inf }
0x10d6   : > { %4224 = vmax.xlane.f32.xlu0 %v4223_v35  ;;  %4221 = vmax.xlane.f32.xlu1 %v4220_v4  ;;  %v7465_v11 = vpop.f32.mrf.mxu0 }
0x10d7   : > { %v4235_v44 = vsel %vm439_vm0, %v7465_v11, -inf }
0x10d8   : > { %v4202_v9 = vpop.f32.mrf.mxu0 }
0x10d9   : > { %v4229_v27 = vsel %vm439_vm0, %v4202_v9, -inf }
0x10da   : > { %4227 = vmax.xlane.f32.xlu1 %v4226_v20  ;;  %4230 = vmax.xlane.f32.xlu0 %v4229_v27  ;;  %v7466_v36 = vpop.f32.mrf.mxu0  ;;  %v7793_v27 = vld [vmem:[%s9523_s2 + $0xd8] sm:$0xff]  }
0x10db   : > { %v4238_v49 = vsel %vm439_vm0, %v7466_v36, -inf }
0x10dc   : > { %v4205_v21 = vpop.f32.mrf.mxu0 }
0x10dd   : > { %v4232_v42 = vsel %vm439_vm0, %v4205_v21, -inf }
0x10de   : > { %4236 = vmax.xlane.f32.xlu0 %v4235_v44  ;;  %4233 = vmax.xlane.f32.xlu1 %v4232_v42  ;;  %v7799_v44 = vld [vmem:[%s9522_s1 + $0xc8] sm:$0xff]   ;;  %v7800_v42 = vld [vmem:[%s9522_s1 + $0xc0] sm:$0xff]  }
0x10e2   : > { %4239 = vmax.xlane.f32.xlu1 %v4238_v49 }
0x115b   : > { %v4219_v54 = vpop.xlane.xlu0 %4218 }
0x115c   : > { %v4241_v28 = vsub.f32 %v4186_v26, %v4219_v54 }
0x115e   : > { %v4249_v50 = vmul.f32 1.442695, %v4241_v28 }
0x115f   : > { %v4225_v30 = vpop.xlane.xlu0 %4224  ;;  %v4222_v39 = vpop.xlane.xlu1 %4221 }
0x1160   : > { %7977 = vpow2.f32 %v4249_v50  ;;  %v4243_v62 = vsub.f32 %v7461_v14, %v4225_v30  ;;  %v4242_v47 = vsub.f32 %v4189_v41, %v4222_v39 }
0x1162   : > { %v4253_v2 = vmul.f32 1.442695, %v4243_v62  ;;  %v4251_v48 = vmul.f32 1.442695, %v4242_v47 }
0x1163   : > { %v4228_v52 = vpop.xlane.xlu1 %4227  ;;  %v4231_v53 = vpop.xlane.xlu0 %4230 }
0x1164   : > { %7979 = vpow2.f32 %v4253_v2  ;;  %v4244_v55 = vsub.f32 %v7462_v29, %v4228_v52  ;;  %v4245_v58 = vsub.f32 %v4202_v9, %v4231_v53  ;;  %v6447_v9 = vld [vmem:[%s9528_s7 + $0x14] sm:$0xf] }
0x1165   : > { %7981 = vpow2.f32 %v4251_v48  ;;  %7702 = vmatprep.subr.msk.bf16.mxu1 %vm1607_vm2, %v6447_v9  ;;  %v4409_v20 = vsel %vm1607_vm2, %v6447_v9, 0 }
0x1166   : > { %v4255_v5 = vmul.f32 1.442695, %v4244_v55  ;;  %v4257_v61 = vmul.f32 1.442695, %v4245_v58 }
0x1167   : > { %v4237_v40 = vpop.xlane.xlu0 %4236  ;;  %v4234_v43 = vpop.xlane.xlu1 %4233 }
0x1168   : > { %7983 = vpow2.f32 %v4255_v5  ;;  %v4247_v12 = vsub.f32 %v7465_v11, %v4237_v40  ;;  %v4246_v32 = vsub.f32 %v4205_v21, %v4234_v43  ;;  %v7798_v21 = vld [vmem:[%s9522_s1 + $0xd0] sm:$0xff]  }
0x1169   : > { %7985 = vpow2.f32 %v4257_v61 }
0x116a   : > { %v4261_v63 = vmul.f32 1.442695, %v4247_v12  ;;  %v4259_v0 = vmul.f32 1.442695, %v4246_v32 }
0x116b   : > { %v4240_v46 = vpop.xlane.xlu1 %4239 }
0x116c   : > { %7987 = vpow2.f32 %v4261_v63  ;;  %v4248_v38 = vsub.f32 %v7466_v36, %v4240_v46  ;;  %v7797_v36 = vld [vmem:[%s9522_s1 + $0xd8] sm:$0xff]  }
0x116d   : > { %v7978_v6 = vpop.eup %7977  ;;  %7989 = vpow2.f32 %v4259_v0  ;;  %7493 = vmatprep.subr.bf16.mxu0 %v7797_v36 }
0x116e   : > { %v4263_v24 = vmul.f32 1.442695, %v4248_v38  ;;  %v4265_v31 = vsel %vm439_vm0, %v7978_v6, 0.0  ;;  %7494 = vmatpush3.bf16.msra.mxu0 %v7797_v36 }
0x116f   : > { %4266 = vadd.xlane.f32.xlu0 %v4265_v31  ;;  %7495 = vmatprep.subr.bf16.mxu0 %v7798_v21 }
0x1170   : > { %7991 = vpow2.f32 %v4263_v24 }
0x1171   : > { %v7980_v33 = vpop.eup %7979 }
0x1172   : > { %v7982_v8 = vpop.eup %7981  ;;  %v4271_v56 = vsel %vm439_vm0, %v7980_v33, 0.0  ;;  %7496 = vmatpush3.bf16.msra.mxu0 %v7798_v21 }
0x1173   : > { %4272 = vadd.xlane.f32.xlu0 %v4271_v56  ;;  %v4268_v60 = vsel %vm439_vm0, %v7982_v8, 0.0  ;;  %v4289_v45 = vpack.c.bf16 %v7982_v8, %v7978_v6  ;;  %7497 = vmatprep.subr.bf16.mxu0 %v7799_v44  ;;  %v7794_v6 = vld [vmem:[%s9523_s2 + $0xd0] sm:$0xff]  }
0x1174   : > { %4269 = vadd.xlane.f32.xlu1 %v4268_v60 }
0x1175   : > { %v7984_v13 = vpop.eup %7983  ;;  %7475 = vmatprep.mubr.msk.bf16.mxu1 %vm439_vm0, %v4289_v45  ;;  %v7795_v45 = vld [vmem:[%s9523_s2 + $0xc8] sm:$0xff]  }
0x1176   : > { %v7986_v18 = vpop.eup %7985  ;;  %v4290_v37 = vpack.c.bf16 %v7984_v13, %v7980_v33  ;;  %v4274_v22 = vsel %vm439_vm0, %v7984_v13, 0.0  ;;  %7498 = vmatpush3.bf16.msra.mxu0 %v7799_v44  ;;  %v7801_v44 = vld [vmem:[%s9524_s3 + $0xd8] sm:$0xff]  }
0x1177   : > { %v4277_v1 = vsel %vm439_vm0, %v7986_v18, 0.0  ;;  %7499 = vmatprep.subr.bf16.mxu0 %v7800_v42 }
0x1178   : > { %4278 = vadd.xlane.f32.xlu0 %v4277_v1  ;;  %4275 = vadd.xlane.f32.xlu1 %v4274_v22 }
0x1179   : > { %v7988_v14 = vpop.eup %7987  ;;  %7476 = vmatmul.mubr.msk.bf16.vlgmr.msra.gmra.mxu1 %vm439_vm0, %v4290_v37 }
0x117a   : > { %v7990_v26 = vpop.eup %7989  ;;  %v4283_v23 = vsel %vm439_vm0, %v7988_v14, 0.0  ;;  %7484 = vmatpush3.bf16.msra.mxu1 %v4409_v20  ;;  %7500 = vmatpush3.bf16.msra.mxu0 %v7800_v42  ;;  %v7802_v42 = vld [vmem:[%s9524_s3 + $0xd0] sm:$0xff]  }
0x117b   : > { %v4280_v29 = vsel %vm439_vm0, %v7990_v26, 0.0  ;;  %v4291_v41 = vpack.c.bf16 %v7990_v26, %v7986_v18  ;;  %7509 = vmatprep.subr.bf16.mxu1 %v7793_v27  ;;  %v7796_v26 = vld [vmem:[%s9523_s2 + $0xc0] sm:$0xff]   ;;  %7525 = vmatprep.subr.bf16.mxu0 %v7801_v44 }
0x117c   : > { %4284 = vadd.xlane.f32.xlu0 %v4283_v23  ;;  %4281 = vadd.xlane.f32.xlu1 %v4280_v29  ;;  %v9153_v29 = vld [vmem:[%s9525_s4 + $0x6] ss:$0 sm:$0xff] }
0x117d   : > { %v7992_v35 = vpop.eup %7991  ;;  %7479 = vmatprep.mubr.msk.bf16.mxu1 %vm439_vm0, %v4291_v41  ;;  %7502 = vmatmul.mubr.msk.bf16.vlgmr.msra.gmra.mxu0 %vm439_vm0, %v8219_v15 }
0x117e   : > { %v4286_v4 = vsel %vm439_vm0, %v7992_v35, 0.0  ;;  %v4292_v11 = vpack.c.bf16 %v7992_v35, %v7988_v14  ;;  %7505 = vmatprep.mubr.msk.bf16.mxu0 %vm439_vm0, %v8221_v16  ;;  %7526 = vmatpush3.bf16.msra.mxu0 %v7801_v44 }
0x117f   : > { %7527 = vmatprep.subr.bf16.mxu0 %v7802_v42 }
0x1180   : > { %4287 = vadd.xlane.f32.xlu1 %v4286_v4 }
0x1181   : > { %7480 = vmatmul.mubr.msk.bf16.gmra.mxu1 %vm439_vm0, %v4292_v11 }
0x1182   : > { %7528 = vmatpush3.bf16.msra.mxu0 %v7802_v42 }
0x1185   : > { %7506 = vmatmul.mubr.msk.bf16.gmra.mxu0 %vm439_vm0, %v8229_v19 }
0x1186   : > { %7533 = vmatprep.mubr.msk.bf16.mxu0 %vm439_vm0, %v8200_v7 }
0x11f8   : > { %v4267_v54 = vpop.xlane.xlu0 %4266 }
0x11f9   : > { %7993 = vrcp.f32 %v4267_v54  ;;  %v7804_v54 = vld [vmem:[%s9524_s3 + $0xc0] sm:$0xff]  }
0x11fc   : > { %v4273_v50 = vpop.xlane.xlu0 %4272 }
0x11fd   : > { %v4270_v49 = vpop.xlane.xlu1 %4269 }
0x1201   : > { %v4276_v28 = vpop.xlane.xlu1 %4275  ;;  %v4279_v39 = vpop.xlane.xlu0 %4278 }
0x1202   : > { %7995 = vrcp.f32 %v4276_v28 }
0x1203   : > { %7997 = vrcp.f32 %v4270_v49  ;;  %v7803_v49 = vld [vmem:[%s9524_s3 + $0xc8] sm:$0xff]  }
0x1204   : > { %7999 = vrcp.f32 %v4273_v50  ;;  %7529 = vmatprep.subr.bf16.mxu0 %v7803_v49 }
0x1205   : > { %v4282_v30 = vpop.xlane.xlu1 %4281  ;;  %8001 = vrcp.f32 %v4279_v39  ;;  %v4285_v47 = vpop.xlane.xlu0 %4284  ;;  %7530 = vmatpush3.bf16.msra.mxu0 %v7803_v49 }
0x1206   : > { %v7994_v52 = vpop.eup %7993  ;;  %7531 = vmatprep.subr.bf16.mxu0 %v7804_v54 }
0x1209   : > { %v4288_v62 = vpop.xlane.xlu1 %4287  ;;  %7532 = vmatpush3.bf16.msra.mxu0 %v7804_v54 }
0x120a   : > { %8003 = vrcp.f32 %v4288_v62 }
0x120b   : > { %8005 = vrcp.f32 %v4282_v30 }
0x120c   : > { %8007 = vrcp.f32 %v4285_v47  ;;  %7534 = vmatmul.mubr.msk.bf16.vlgmr.msra.gmra.mxu0 %vm439_vm0, %v8219_v15 }
0x120d   : > { %7537 = vmatprep.mubr.msk.bf16.mxu0 %vm439_vm0, %v8221_v16 }
0x120f   : > { %v7996_v55 = vpop.eup %7995 }
0x1210   : > { %v7998_v58 = vpop.eup %7997 }
0x1211   : > { %v8000_v40 = vpop.eup %7999 }
0x1212   : > { %v8002_v24 = vpop.eup %8001 }
0x1214   : > { %7538 = vmatmul.mubr.msk.bf16.gmra.mxu0 %vm439_vm0, %v8229_v19 }
0x1217   : > { %v8004_v33 = vpop.eup %8003 }
0x1218   : > { %v8006_v8 = vpop.eup %8005 }
0x1219   : > { %v8008_v13 = vpop.eup %8007 }
0x1239   : > { %v7477_v2 = vpop.f32.mrf.mxu1 }
0x123a   : > { %v4384_v32 = vmul.f32 %v8000_v40, %v7477_v2 }
0x123b   : > { %v4343_v48 = vpop.f32.mrf.mxu1 }
0x123c   : > { %v4382_v43 = vmul.f32 %v7994_v52, %v4343_v48 }
0x123d   : > { %v7478_v53 = vpop.f32.mrf.mxu1  ;;  %v7503_v23 = vpop.f32.mrf.mxu0 }
0x123e   : > { %v4385_v5 = vmul.f32 %v7996_v55, %v7478_v53  ;;  %v9156_v41 = vadd.f32 %v7503_v23, %v9153_v29 }
0x123f   : > { %v4346_v61 = vpop.f32.mrf.mxu1  ;;  %v4559_v35 = vpop.f32.mrf.mxu0 }
0x1240   : > { %v4383_v12 = vmul.f32 %v7998_v58, %v4346_v61  ;;  %v4391_v46 = vpack.c.bf16 %v4385_v5, %v4384_v32  ;;  %v4560_v11 = vadd.f32 %v9153_v29, %v4559_v35 }
0x1241   : > { %v7481_v63 = vpop.f32.mrf.mxu1  ;;  %v7504_v4 = vpop.f32.mrf.mxu0 }
0x1242   : > { %v4390_v0 = vpack.c.bf16 %v4383_v12, %v4382_v43  ;;  %v4388_v22 = vmul.f32 %v8008_v13, %v7481_v63  ;;  %v9160_v9 = vadd.f32 %v7504_v4, %v9153_v29 }
0x1243   : > { %v4359_v38 = vpop.f32.mrf.mxu1  ;;  %v4562_v20 = vpop.f32.mrf.mxu0 }
0x1244   : > { %7485 = vmatprep.mubr.msk.bf16.mxu1 %vm733_vm1, %v4390_v0  ;;  %v4386_v18 = vmul.f32 %v8002_v24, %v4359_v38  ;;  %v4563_v36 = vadd.f32 %v9153_v29, %v4562_v20 }
0x1245   : > { %v7482_v31 = vpop.f32.mrf.mxu1  ;;  %7486 = vmatmul.mubr.msk.bf16.vlgmr.msra.gmra.mxu1 %vm733_vm1, %v4391_v46 }
0x1246   : > { %7510 = vmatpush3.bf16.msra.mxu1 %v7793_v27  ;;  %v4389_v56 = vmul.f32 %v8004_v33, %v7482_v31  ;;  %v4803_v27 = vpack.c.bf16 %v9160_v9, %v9156_v41  ;;  %v4802_v21 = vpack.c.bf16 %v4563_v36, %v4560_v11  ;;  %v6497_v41 = vld [vmem:[%s9527_s6 + $0x6] ss:$0 sm:$0xff] }
0x1247   : > { %v4362_v60 = vpop.f32.mrf.mxu1  ;;  %7511 = vmatprep.subr.bf16.mxu1 %v7794_v6 }
0x1248   : > { %v4387_v37 = vmul.f32 %v8006_v8, %v4362_v60  ;;  %v4393_v14 = vpack.c.bf16 %v4389_v56, %v4388_v22  ;;  %v7507_v60 = vpop.f32.mrf.mxu0 }
0x1249   : > { %v4584_v11 = vadd.f32 %v7507_v60, %v9153_v29 }
0x124a   : > { %v4392_v1 = vpack.c.bf16 %v4387_v37, %v4386_v18  ;;  %7512 = vmatpush3.bf16.msra.mxu1 %v7794_v6  ;;  %v4575_v18 = vpop.f32.mrf.mxu0 }
0x124b   : > { %7513 = vmatprep.subr.bf16.mxu1 %v7795_v45  ;;  %v4576_v23 = vadd.f32 %v9153_v29, %v4575_v18 }
0x124c   : > { %7489 = vmatprep.mubr.msk.bf16.mxu1 %vm733_vm1, %v4392_v1  ;;  %v7508_v1 = vpop.f32.mrf.mxu0 }
0x124d   : > { %7490 = vmatmul.mubr.msk.bf16.gmra.mxu1 %vm733_vm1, %v4393_v14  ;;  %v4587_v20 = vadd.f32 %v7508_v1, %v9153_v29 }
0x124e   : > { %7514 = vmatpush3.bf16.msra.mxu1 %v7795_v45  ;;  %7517 = vmatprep.mubr.msk.bf16.mxu1 %vm439_vm0, %v8200_v7  ;;  %v4578_v14 = vpop.f32.mrf.mxu0 }
0x124f   : > { %7515 = vmatprep.subr.bf16.mxu1 %v7796_v26  ;;  %v4579_v35 = vadd.f32 %v9153_v29, %v4578_v14  ;;  %v4805_v36 = vpack.c.bf16 %v4587_v20, %v4584_v11 }
0x1251   : > { %v4804_v4 = vpack.c.bf16 %v4579_v35, %v4576_v23 }
0x1252   : > { %7516 = vmatpush3.bf16.msra.mxu1 %v7796_v26 }
0x1255   : > { %7518 = vmatmul.mubr.msk.bf16.vlgmr.msra.gmra.mxu1 %vm439_vm0, %v8219_v15 }
0x1256   : > { %7521 = vmatprep.mubr.msk.bf16.mxu1 %vm439_vm0, %v8221_v16 }
0x125d   : > { %7522 = vmatmul.mubr.msk.bf16.gmra.mxu1 %vm439_vm0, %v8229_v19 }
0x125e   : > { %7549 = vmatprep.mubr.msk.bf16.mxu1 %vm733_vm1, %v4802_v21 }
0x12cc   : > { %v7535_v21 = vpop.f32.mrf.mxu0 }
0x12ce   : > { %v4771_v44 = vpop.f32.mrf.mxu0 }
0x12d0   : > { %v7536_v42 = vpop.f32.mrf.mxu0 }
0x12d2   : > { %v4774_v49 = vpop.f32.mrf.mxu0 }
0x12d4   : > { %v7539_v9 = vpop.f32.mrf.mxu0 }
0x12d5   : > { %v4796_v54 = vadd.f32 %v7539_v9, %v6497_v41 }
0x1305   : > { %v7487_v28 = vpop.f32.mrf.mxu1 }
0x1306   : > { %v9185_v50 = vadd.f32 %v7487_v28, %v9028_v3 }
0x1307   : > { %v4445_v30 = vpop.f32.mrf.mxu1 }
0x1308   : > { %v9188_v39 = vadd.f32 %v4445_v30, %v9032_v57 }
0x1309   : > { %v7488_v62 = vpop.f32.mrf.mxu1 }
0x130a   : > { %v9191_v47 = vadd.f32 %v7488_v62, %v9036_v51 }
0x130b   : > { %v4448_v2 = vpop.f32.mrf.mxu1 }
0x130c   : > { %v9194_v48 = vadd.f32 %v4448_v2, %v9038_v10  ;;  %v4780_v2 = vadd.f32 %v7535_v21, %v6497_v41 }
0x130d   : > { %v7491_v52 = vpop.f32.mrf.mxu1 }
0x130e   : > { %v9197_v53 = vadd.f32 %v7491_v52, %v9043_v17  ;;  %v6479_v17 = vld [vmem:[%s9526_s5 + $0x6] ss:$0 sm:$0xff]  ;;  %v4783_v52 = vadd.f32 %v7536_v42, %v6497_v41 }
0x130f   : > { %v4461_v55 = vpop.f32.mrf.mxu1 }
0x1310   : > { %v9200_v3 = vadd.f32 %v4461_v55, %v9047_v59 }
0x1311   : > { %v7492_v58 = vpop.f32.mrf.mxu1 }
0x1312   : > { %v9203_v57 = vadd.f32 %v7492_v58, %v9051_v25 }
0x1313   : > { %v4464_v5 = vpop.f32.mrf.mxu1 }
0x1314   : > { %v9206_v51 = vadd.f32 %v4464_v5, %v9053_v34 }
0x1315   : > { %v7519_v61 = vpop.f32.mrf.mxu1 }
0x1316   : > { %v4674_v33 = vadd.f32 %v7519_v61, %v6479_v17  ;;  %v4772_v61 = vadd.f32 %v6497_v41, %v4771_v44 }
0x1317   : > { %v4665_v40 = vpop.f32.mrf.mxu1 }
0x1318   : > { %v4666_v13 = vadd.f32 %v6479_v17, %v4665_v40  ;;  %v4976_v40 = vpack.c.bf16 %v4783_v52, %v4780_v2 }
0x1319   : > { %v7520_v10 = vpop.f32.mrf.mxu1 }
0x131a   : > { %v4677_v31 = vadd.f32 %v7520_v10, %v6479_v17  ;;  %v4775_v10 = vadd.f32 %v6497_v41, %v4774_v49 }
0x131b   : > { %v4668_v43 = vpop.f32.mrf.mxu1 }
0x131c   : > { %v4807_v8 = vpack.c.bf16 %v4677_v31, %v4674_v33  ;;  %v4669_v45 = vadd.f32 %v6479_v17, %v4668_v43  ;;  %v4975_v43 = vpack.c.bf16 %v4775_v10, %v4772_v61 }
0x131d   : > { %v7523_v12 = vpop.f32.mrf.mxu1 }
0x131e   : > { %v4690_v63 = vadd.f32 %v7523_v12, %v6479_v17  ;;  %v4806_v37 = vpack.c.bf16 %v4669_v45, %v4666_v13  ;;  %v4826_v22 = vsel %vm733_vm1, %v4807_v8, 0 }
0x131f   : > { %v4681_v32 = vpop.f32.mrf.mxu1 }
0x1320   : > { %v4682_v25 = vadd.f32 %v6479_v17, %v4681_v32  ;;  %v4823_v26 = vsel %vm733_vm1, %v4806_v37, 0 }
0x1321   : > { %v7524_v59 = vpop.f32.mrf.mxu1 }
0x1322   : > { %v4693_v0 = vadd.f32 %v7524_v59, %v6479_v17 }
0x1323   : > { %v4684_v46 = vpop.f32.mrf.mxu1 }
0x1324   : > { %v4809_v38 = vpack.c.bf16 %v4693_v0, %v4690_v63  ;;  %v4685_v6 = vadd.f32 %v6479_v17, %v4684_v46 }
0x1326   : > { %v4808_v24 = vpack.c.bf16 %v4685_v6, %v4682_v25  ;;  %7703 = vmatprep.subr.msk.bf16.mxu1 %vm733_vm1, %v4809_v38  ;;  %v4832_v34 = vsel %vm733_vm1, %v4809_v38, 0 }
0x1327   : > { %7542 = vmatpush3.bf16.xpose.msra.mxu1 %v4832_v34 }
0x1328   : > { %7704 = vmatprep.subr.msk.bf16.mxu1 %vm733_vm1, %v4808_v24  ;;  %v4829_v56 = vsel %vm733_vm1, %v4808_v24, 0 }
0x132f   : > { %7544 = vmatpush3.bf16.xpose.msra.mxu1 %v4829_v56 }
0x1330   : > { %7705 = vmatprep.subr.msk.bf16.mxu1 %vm733_vm1, %v4807_v8 }
0x1337   : > { %7546 = vmatpush3.bf16.xpose.msra.mxu1 %v4826_v22 }
0x1338   : > { %7706 = vmatprep.subr.msk.bf16.mxu1 %vm733_vm1, %v4806_v37 }
0x133f   : > { %7548 = vmatpush3.bf16.xpose.msra.mxu1 %v4823_v26 }
0x1346   : > { %7550 = vmatmul.mubr.msk.bf16.vlgmr.msra.gmra.mxu1 %vm733_vm1, %v4803_v27  ;;  %v4787_v27 = vpop.f32.mrf.mxu0 }
0x1347   : > { %7553 = vmatprep.mubr.msk.bf16.mxu1 %vm733_vm1, %v4804_v4  ;;  %v4788_v30 = vadd.f32 %v6497_v41, %v4787_v27 }
0x1348   : > { %v7540_v28 = vpop.f32.mrf.mxu0 }
0x1349   : > { %v4799_v29 = vadd.f32 %v7540_v28, %v6497_v41 }
0x134a   : > { %v4790_v62 = vpop.f32.mrf.mxu0 }
0x134b   : > { %v4978_v55 = vpack.c.bf16 %v4799_v29, %v4796_v54  ;;  %v4791_v58 = vadd.f32 %v6497_v41, %v4790_v62 }
0x134d   : > { %v4977_v5 = vpack.c.bf16 %v4791_v58, %v4788_v30  ;;  %7557 = vmatprep.subr.bf16.mxu0 %v4978_v55 }
0x134e   : > { %7554 = vmatmul.mubr.msk.bf16.gmra.mxu1 %vm733_vm1, %v4805_v36  ;;  %7558 = vmatpush3.bf16.msra.mxu0 %v4978_v55 }
0x134f   : > { %7591 = vmatprep.mubr.msk.bf16.mxu1 %vm439_vm0, %v8200_v7  ;;  %7559 = vmatprep.subr.bf16.mxu0 %v4977_v5 }
0x1352   : > { %7560 = vmatpush3.bf16.msra.mxu0 %v4977_v5 }
0x1353   : > { %7561 = vmatprep.subr.bf16.mxu0 %v4976_v40 }
0x1356   : > { %7562 = vmatpush3.bf16.msra.mxu0 %v4976_v40 }
0x1357   : > { %7563 = vmatprep.subr.bf16.mxu0 %v4975_v43 }
0x135a   : > { %7564 = vmatpush3.bf16.msra.mxu0 %v4975_v43 }
0x1406   : > { %v7551_v12 = vpop.f32.mrf.mxu1 }
0x1407   : > { %v4905_v0 = vsel %vm439_vm0, %v7551_v12, -inf }
0x1408   : > { %v4868_v32 = vpop.f32.mrf.mxu1 }
0x1409   : > { %v4899_v17 = vsel %vm439_vm0, %v4868_v32, -inf }
0x140a   : > { %4900 = vmax.xlane.f32.xlu0 %v4899_v17  ;;  %v7552_v59 = vpop.f32.mrf.mxu1 }
0x140b   : > { %v4908_v6 = vsel %vm439_vm0, %v7552_v59, -inf }
0x140c   : > { %v4871_v63 = vpop.f32.mrf.mxu1 }
0x140d   : > { %v4902_v46 = vsel %vm439_vm0, %v4871_v63, -inf }
0x140e   : > { %4906 = vmax.xlane.f32.xlu0 %v4905_v0  ;;  %4903 = vmax.xlane.f32.xlu1 %v4902_v46  ;;  %v7555_v25 = vpop.f32.mrf.mxu1 }
0x140f   : > { %v4917_v33 = vsel %vm439_vm0, %v7555_v25, -inf }
0x1410   : > { %v4884_v38 = vpop.f32.mrf.mxu1 }
0x1411   : > { %v4911_v24 = vsel %vm439_vm0, %v4884_v38, -inf }
0x1412   : > { %4909 = vmax.xlane.f32.xlu1 %v4908_v6  ;;  %4912 = vmax.xlane.f32.xlu0 %v4911_v24  ;;  %v7556_v34 = vpop.f32.mrf.mxu1  ;;  %v7805_v24 = vld [vmem:[%s9523_s2 + $0xf8] sm:$0xff]  }
0x1413   : > { %v4920_v56 = vsel %vm439_vm0, %v7556_v34, -inf }
0x1414   : > { %v4887_v31 = vpop.f32.mrf.mxu1 }
0x1415   : > { %v4914_v8 = vsel %vm439_vm0, %v4887_v31, -inf }
0x1416   : > { %4918 = vmax.xlane.f32.xlu0 %v4917_v33  ;;  %4915 = vmax.xlane.f32.xlu1 %v4914_v8  ;;  %v7811_v33 = vld [vmem:[%s9522_s1 + $0xe8] sm:$0xff]   ;;  %v7812_v8 = vld [vmem:[%s9522_s1 + $0xe0] sm:$0xff]  }
0x141a   : > { %4921 = vmax.xlane.f32.xlu1 %v4920_v56 }
0x1493   : > { %v4901_v60 = vpop.xlane.xlu0 %4900 }
0x1494   : > { %v4923_v45 = vsub.f32 %v4868_v32, %v4901_v60 }
0x1496   : > { %v4931_v13 = vmul.f32 1.442695, %v4923_v45 }
0x1497   : > { %v4907_v18 = vpop.xlane.xlu0 %4906  ;;  %v4904_v37 = vpop.xlane.xlu1 %4903 }
0x1498   : > { %8009 = vpow2.f32 %v4931_v13  ;;  %v4925_v22 = vsub.f32 %v7551_v12, %v4907_v18  ;;  %v4924_v1 = vsub.f32 %v4871_v63, %v4904_v37 }
0x149a   : > { %v4935_v14 = vmul.f32 1.442695, %v4925_v22  ;;  %v4933_v26 = vmul.f32 1.442695, %v4924_v1 }
0x149b   : > { %v4910_v23 = vpop.xlane.xlu1 %4909  ;;  %v4913_v35 = vpop.xlane.xlu0 %4912 }
0x149c   : > { %8011 = vpow2.f32 %v4935_v14  ;;  %v4926_v4 = vsub.f32 %v7552_v59, %v4910_v23  ;;  %v4927_v11 = vsub.f32 %v4884_v38, %v4913_v35  ;;  %v6514_v38 = vld [vmem:[%s9528_s7 + $0x18] sm:$0xf] }
0x149d   : > { %8013 = vpow2.f32 %v4933_v26  ;;  %7707 = vmatprep.subr.msk.bf16.mxu0 %vm1607_vm2, %v6514_v38  ;;  %v5091_v6 = vsel %vm1607_vm2, %v6514_v38, 0 }
0x149e   : > { %v4937_v20 = vmul.f32 1.442695, %v4926_v4  ;;  %v4939_v36 = vmul.f32 1.442695, %v4927_v11 }
0x149f   : > { %v4919_v21 = vpop.xlane.xlu0 %4918  ;;  %v4916_v44 = vpop.xlane.xlu1 %4915 }
0x14a0   : > { %8015 = vpow2.f32 %v4937_v20  ;;  %v4929_v42 = vsub.f32 %v7555_v25, %v4919_v21  ;;  %v4928_v49 = vsub.f32 %v4887_v31, %v4916_v44  ;;  %v7810_v31 = vld [vmem:[%s9522_s1 + $0xf0] sm:$0xff]  }
0x14a1   : > { %8017 = vpow2.f32 %v4939_v36 }
0x14a2   : > { %v4943_v41 = vmul.f32 1.442695, %v4929_v42  ;;  %v4941_v9 = vmul.f32 1.442695, %v4928_v49 }
0x14a3   : > { %v4922_v27 = vpop.xlane.xlu1 %4921 }
0x14a4   : > { %8019 = vpow2.f32 %v4943_v41  ;;  %v4930_v54 = vsub.f32 %v7556_v34, %v4922_v27  ;;  %v7809_v34 = vld [vmem:[%s9522_s1 + $0xf8] sm:$0xff]  }
0x14a5   : > { %v8010_v28 = vpop.eup %8009  ;;  %8021 = vpow2.f32 %v4941_v9  ;;  %7583 = vmatprep.subr.bf16.mxu1 %v7809_v34 }
0x14a6   : > { %v4945_v30 = vmul.f32 1.442695, %v4930_v54  ;;  %v4947_v29 = vsel %vm439_vm0, %v8010_v28, 0.0  ;;  %7584 = vmatpush3.bf16.msra.mxu1 %v7809_v34 }
0x14a7   : > { %4948 = vadd.xlane.f32.xlu0 %v4947_v29  ;;  %7585 = vmatprep.subr.bf16.mxu1 %v7810_v31 }
0x14a8   : > { %8023 = vpow2.f32 %v4945_v30 }
0x14a9   : > { %v8012_v62 = vpop.eup %8011 }
0x14aa   : > { %v8014_v2 = vpop.eup %8013  ;;  %v4953_v52 = vsel %vm439_vm0, %v8012_v62, 0.0  ;;  %7586 = vmatpush3.bf16.msra.mxu1 %v7810_v31  ;;  %v7813_v31 = vld [vmem:[%s9524_s3 + $0xf8] sm:$0xff]  }
0x14ab   : > { %4954 = vadd.xlane.f32.xlu0 %v4953_v52  ;;  %v4950_v55 = vsel %vm439_vm0, %v8014_v2, 0.0  ;;  %v4971_v58 = vpack.c.bf16 %v8014_v2, %v8010_v28  ;;  %7587 = vmatprep.subr.bf16.mxu1 %v7811_v33  ;;  %v7806_v28 = vld [vmem:[%s9523_s2 + $0xf0] sm:$0xff]  }
0x14ac   : > { %4951 = vadd.xlane.f32.xlu1 %v4950_v55 }
0x14ad   : > { %v8016_v5 = vpop.eup %8015  ;;  %7565 = vmatprep.mubr.msk.bf16.mxu0 %vm439_vm0, %v4971_v58  ;;  %v7807_v58 = vld [vmem:[%s9523_s2 + $0xe8] sm:$0xff]  }
0x14ae   : > { %v8018_v61 = vpop.eup %8017  ;;  %v4972_v40 = vpack.c.bf16 %v8016_v5, %v8012_v62  ;;  %v4956_v10 = vsel %vm439_vm0, %v8016_v5, 0.0  ;;  %7588 = vmatpush3.bf16.msra.mxu1 %v7811_v33  ;;  %v7814_v33 = vld [vmem:[%s9524_s3 + $0xf0] sm:$0xff]  }
0x14af   : > { %v4959_v43 = vsel %vm439_vm0, %v8018_v61, 0.0  ;;  %7589 = vmatprep.subr.bf16.mxu1 %v7812_v8 }
0x14b0   : > { %4960 = vadd.xlane.f32.xlu0 %v4959_v43  ;;  %4957 = vadd.xlane.f32.xlu1 %v4956_v10 }
0x14b1   : > { %v8020_v12 = vpop.eup %8019  ;;  %7566 = vmatmul.mubr.msk.bf16.vlgmr.msra.gmra.mxu0 %vm439_vm0, %v4972_v40 }
0x14b2   : > { %v8022_v32 = vpop.eup %8021  ;;  %v4965_v17 = vsel %vm439_vm0, %v8020_v12, 0.0  ;;  %7574 = vmatpush3.bf16.msra.mxu0 %v5091_v6  ;;  %7590 = vmatpush3.bf16.msra.mxu1 %v7812_v8  ;;  %v7815_v8 = vld [vmem:[%s9524_s3 + $0xe8] sm:$0xff]  }
0x14b3   : > { %v4962_v59 = vsel %vm439_vm0, %v8022_v32, 0.0  ;;  %v4973_v63 = vpack.c.bf16 %v8022_v32, %v8018_v61  ;;  %7599 = vmatprep.subr.bf16.mxu0 %v7805_v24  ;;  %v7808_v32 = vld [vmem:[%s9523_s2 + $0xe0] sm:$0xff]   ;;  %7615 = vmatprep.subr.bf16.mxu1 %v7813_v31 }
0x14b4   : > { %4966 = vadd.xlane.f32.xlu0 %v4965_v17  ;;  %4963 = vadd.xlane.f32.xlu1 %v4962_v59  ;;  %v9306_v59 = vld [vmem:[%s9525_s4 + $0x7] ss:$0 sm:$0xff] }
0x14b5   : > { %v8024_v0 = vpop.eup %8023  ;;  %7569 = vmatprep.mubr.msk.bf16.mxu0 %vm439_vm0, %v4973_v63  ;;  %7592 = vmatmul.mubr.msk.bf16.vlgmr.msra.gmra.mxu1 %vm439_vm0, %v8219_v15 }
0x14b6   : > { %v4968_v46 = vsel %vm439_vm0, %v8024_v0, 0.0  ;;  %v4974_v25 = vpack.c.bf16 %v8024_v0, %v8020_v12  ;;  %7595 = vmatprep.mubr.msk.bf16.mxu1 %vm439_vm0, %v8221_v16  ;;  %7616 = vmatpush3.bf16.msra.mxu1 %v7813_v31 }
0x14b7   : > { %7617 = vmatprep.subr.bf16.mxu1 %v7814_v33 }
0x14b8   : > { %4969 = vadd.xlane.f32.xlu1 %v4968_v46 }
0x14b9   : > { %7570 = vmatmul.mubr.msk.bf16.gmra.mxu0 %vm439_vm0, %v4974_v25 }
0x14ba   : > { %7618 = vmatpush3.bf16.msra.mxu1 %v7814_v33 }
0x14bb   : > { %7619 = vmatprep.subr.bf16.mxu1 %v7815_v8 }
0x14bd   : > { %7596 = vmatmul.mubr.msk.bf16.gmra.mxu1 %vm439_vm0, %v8229_v19 }
0x14be   : > { %7623 = vmatprep.mubr.msk.bf16.mxu1 %vm439_vm0, %v8200_v7  ;;  %7620 = vmatpush3.bf16.msra.mxu1 %v7815_v8 }
0x1530   : > { %v4949_v60 = vpop.xlane.xlu0 %4948 }
0x1531   : > { %8025 = vrcp.f32 %v4949_v60 }
0x1534   : > { %v4955_v13 = vpop.xlane.xlu0 %4954 }
0x1535   : > { %v4952_v56 = vpop.xlane.xlu1 %4951 }
0x1539   : > { %v4958_v45 = vpop.xlane.xlu1 %4957  ;;  %v4961_v37 = vpop.xlane.xlu0 %4960 }
0x153a   : > { %8027 = vrcp.f32 %v4958_v45 }
0x153b   : > { %8029 = vrcp.f32 %v4952_v56  ;;  %v7816_v56 = vld [vmem:[%s9524_s3 + $0xe0] sm:$0xff]  }
0x153c   : > { %8031 = vrcp.f32 %v4955_v13  ;;  %7621 = vmatprep.subr.bf16.mxu1 %v7816_v56 }
0x153d   : > { %v4964_v18 = vpop.xlane.xlu1 %4963  ;;  %8033 = vrcp.f32 %v4961_v37  ;;  %v4967_v1 = vpop.xlane.xlu0 %4966  ;;  %7622 = vmatpush3.bf16.msra.mxu1 %v7816_v56 }
0x153e   : > { %v8026_v23 = vpop.eup %8025 }
0x1540   : > { %7624 = vmatmul.mubr.msk.bf16.vlgmr.msra.gmra.mxu1 %vm439_vm0, %v8219_v15 }
0x1541   : > { %v4970_v22 = vpop.xlane.xlu1 %4969  ;;  %7627 = vmatprep.mubr.msk.bf16.mxu1 %vm439_vm0, %v8221_v16 }
0x1542   : > { %8035 = vrcp.f32 %v4970_v22 }
0x1543   : > { %8037 = vrcp.f32 %v4964_v18 }
0x1544   : > { %8039 = vrcp.f32 %v4967_v1 }
0x1547   : > { %v8028_v4 = vpop.eup %8027 }
0x1548   : > { %v8030_v11 = vpop.eup %8029  ;;  %7628 = vmatmul.mubr.msk.bf16.gmra.mxu1 %vm439_vm0, %v8229_v19 }
0x1549   : > { %v8032_v21 = vpop.eup %8031 }
0x154a   : > { %v8034_v30 = vpop.eup %8033 }
0x154f   : > { %v8036_v62 = vpop.eup %8035 }
0x1550   : > { %v8038_v2 = vpop.eup %8037 }
0x1551   : > { %v8040_v5 = vpop.eup %8039 }
0x1571   : > { %v7567_v14 = vpop.f32.mrf.mxu0 }
0x1572   : > { %v5066_v49 = vmul.f32 %v8032_v21, %v7567_v14 }
0x1573   : > { %v5025_v26 = vpop.f32.mrf.mxu0 }
0x1574   : > { %v5064_v44 = vmul.f32 %v8026_v23, %v5025_v26 }
0x1575   : > { %v7568_v35 = vpop.f32.mrf.mxu0  ;;  %v7593_v17 = vpop.f32.mrf.mxu1 }
0x1576   : > { %v5067_v20 = vmul.f32 %v8028_v4, %v7568_v35  ;;  %v9309_v63 = vadd.f32 %v7593_v17, %v9306_v59 }
0x1577   : > { %v5028_v36 = vpop.f32.mrf.mxu0 }
0x1578   : > { %v5065_v42 = vmul.f32 %v8030_v11, %v5028_v36  ;;  %v5073_v27 = vpack.c.bf16 %v5067_v20, %v5066_v49 }
0x1579   : > { %v7571_v41 = vpop.f32.mrf.mxu0 }
0x157a   : > { %v5072_v9 = vpack.c.bf16 %v5065_v42, %v5064_v44  ;;  %v5070_v10 = vmul.f32 %v8040_v5, %v7571_v41 }
0x157b   : > { %v5041_v54 = vpop.f32.mrf.mxu0 }
0x157c   : > { %7575 = vmatprep.mubr.msk.bf16.mxu0 %vm733_vm1, %v5072_v9  ;;  %v5068_v61 = vmul.f32 %v8034_v30, %v5041_v54 }
0x157d   : > { %v7572_v29 = vpop.f32.mrf.mxu0  ;;  %7576 = vmatmul.mubr.msk.bf16.vlgmr.msra.gmra.mxu0 %vm733_vm1, %v5073_v27 }
0x157e   : > { %7600 = vmatpush3.bf16.msra.mxu0 %v7805_v24  ;;  %v5071_v52 = vmul.f32 %v8036_v62, %v7572_v29 }
0x157f   : > { %v5044_v55 = vpop.f32.mrf.mxu0  ;;  %7601 = vmatprep.subr.bf16.mxu0 %v7806_v28 }
0x1580   : > { %v5069_v40 = vmul.f32 %v8038_v2, %v5044_v55  ;;  %v5075_v12 = vpack.c.bf16 %v5071_v52, %v5070_v10 }
0x1582   : > { %v5074_v43 = vpack.c.bf16 %v5069_v40, %v5068_v61  ;;  %7602 = vmatpush3.bf16.msra.mxu0 %v7806_v28 }
0x1583   : > { %7603 = vmatprep.subr.bf16.mxu0 %v7807_v58 }
0x1584   : > { %7579 = vmatprep.mubr.msk.bf16.mxu0 %vm733_vm1, %v5074_v43 }
0x1585   : > { %7580 = vmatmul.mubr.msk.bf16.gmra.mxu0 %vm733_vm1, %v5075_v12 }
0x1586   : > { %7604 = vmatpush3.bf16.msra.mxu0 %v7807_v58  ;;  %7607 = vmatprep.mubr.msk.bf16.mxu0 %vm439_vm0, %v8200_v7  ;;  %v5241_v7 = vpop.f32.mrf.mxu1 }
0x1587   : > { %7605 = vmatprep.subr.bf16.mxu0 %v7808_v32  ;;  %v5242_v46 = vadd.f32 %v9306_v59, %v5241_v7 }
0x1588   : > { %v7594_v0 = vpop.f32.mrf.mxu1 }
0x1589   : > { %v9313_v25 = vadd.f32 %v7594_v0, %v9306_v59 }
0x158a   : > { %7606 = vmatpush3.bf16.msra.mxu0 %v7808_v32  ;;  %v5244_v38 = vpop.f32.mrf.mxu1 }
0x158b   : > { %v5485_v6 = vpack.c.bf16 %v9313_v25, %v9309_v63  ;;  %v5245_v24 = vadd.f32 %v9306_v59, %v5244_v38 }
0x158c   : > { %v7597_v29 = vpop.f32.mrf.mxu1 }
0x158d   : > { %7608 = vmatmul.mubr.msk.bf16.vlgmr.msra.gmra.mxu0 %vm439_vm0, %v8219_v15  ;;  %v5484_v34 = vpack.c.bf16 %v5245_v24, %v5242_v46  ;;  %v5266_v32 = vadd.f32 %v7597_v29, %v9306_v59 }
0x158e   : > { %7611 = vmatprep.mubr.msk.bf16.mxu0 %vm439_vm0, %v8221_v16  ;;  %v5257_v52 = vpop.f32.mrf.mxu1 }
0x158f   : > { %v5258_v10 = vadd.f32 %v9306_v59, %v5257_v52 }
0x1590   : > { %v7598_v5 = vpop.f32.mrf.mxu1 }
0x1591   : > { %v5269_v17 = vadd.f32 %v7598_v5, %v9306_v59 }
0x1592   : > { %v5260_v61 = vpop.f32.mrf.mxu1 }
0x1593   : > { %v5261_v43 = vadd.f32 %v9306_v59, %v5260_v61  ;;  %v5487_v7 = vpack.c.bf16 %v5269_v17, %v5266_v32 }
0x1595   : > { %7612 = vmatmul.mubr.msk.bf16.gmra.mxu0 %vm439_vm0, %v8229_v19  ;;  %v5486_v12 = vpack.c.bf16 %v5261_v43, %v5258_v10 }
0x1596   : > { %7639 = vmatprep.mubr.msk.bf16.mxu0 %vm733_vm1, %v5484_v34  ;;  %v6564_v34 = vld [vmem:[%s9527_s6 + $0x7] ss:$0 sm:$0xff] }
0x1600   : > { %v7625_v0 = vpop.f32.mrf.mxu1 }
0x1602   : > { %v5453_v46 = vpop.f32.mrf.mxu1 }
0x1604   : > { %v7626_v38 = vpop.f32.mrf.mxu1 }
0x1605   : > { %v5465_v59 = vadd.f32 %v7626_v38, %v6564_v34 }
0x1606   : > { %v5456_v24 = vpop.f32.mrf.mxu1 }
0x1608   : > { %v7629_v63 = vpop.f32.mrf.mxu1 }
0x160a   : > { %v5469_v25 = vpop.f32.mrf.mxu1 }
0x160b   : > { %v5470_v33 = vadd.f32 %v6564_v34, %v5469_v25 }
0x160c   : > { %v7630_v31 = vpop.f32.mrf.mxu1 }
0x160d   : > { %v5481_v8 = vadd.f32 %v7630_v31, %v6564_v34 }
0x160e   : > { %v5472_v56 = vpop.f32.mrf.mxu1 }
0x163d   : > { %v7577_v60 = vpop.f32.mrf.mxu0 }
0x163e   : > { %v9338_v45 = vadd.f32 %v7577_v60, %v9185_v50  ;;  %v5462_v60 = vadd.f32 %v7625_v0, %v6564_v34 }
0x163f   : > { %v5127_v13 = vpop.f32.mrf.mxu0 }
0x1640   : > { %v9341_v18 = vadd.f32 %v5127_v13, %v9188_v39 }
0x1641   : > { %v7578_v37 = vpop.f32.mrf.mxu0 }
0x1642   : > { %v9344_v22 = vadd.f32 %v7578_v37, %v9191_v47  ;;  %v5473_v37 = vadd.f32 %v6564_v34, %v5472_v56 }
0x1643   : > { %v5130_v1 = vpop.f32.mrf.mxu0 }
0x1644   : > { %v9347_v15 = vadd.f32 %v5130_v1, %v9194_v48  ;;  %v5659_v1 = vpack.c.bf16 %v5473_v37, %v5470_v33 }
0x1645   : > { %v7581_v16 = vpop.f32.mrf.mxu0 }
0x1646   : > { %v9350_v14 = vadd.f32 %v7581_v16, %v9197_v53  ;;  %v6546_v53 = vld [vmem:[%s9526_s5 + $0x7] ss:$0 sm:$0xff]  ;;  %v5454_v16 = vadd.f32 %v6564_v34, %v5453_v46 }
0x1647   : > { %v5143_v19 = vpop.f32.mrf.mxu0 }
0x1648   : > { %v9353_v50 = vadd.f32 %v5143_v19, %v9200_v3  ;;  %v5658_v19 = vpack.c.bf16 %v5465_v59, %v5462_v60 }
0x1649   : > { %v7582_v26 = vpop.f32.mrf.mxu0 }
0x164a   : > { %v9356_v39 = vadd.f32 %v7582_v26, %v9203_v57  ;;  %v5457_v26 = vadd.f32 %v6564_v34, %v5456_v24 }
0x164b   : > { %v5146_v23 = vpop.f32.mrf.mxu0 }
0x164c   : > { %v9359_v47 = vadd.f32 %v5146_v23, %v9206_v51  ;;  %v5657_v23 = vpack.c.bf16 %v5457_v26, %v5454_v16 }
0x164d   : > { %v7609_v35 = vpop.f32.mrf.mxu0 }
0x164e   : > { %v5356_v54 = vadd.f32 %v7609_v35, %v6546_v53 }
0x164f   : > { %v5347_v4 = vpop.f32.mrf.mxu0 }
0x1650   : > { %v5348_v2 = vadd.f32 %v6546_v53, %v5347_v4 }
0x1651   : > { %v7610_v48 = vpop.f32.mrf.mxu0 }
0x1652   : > { %v5359_v27 = vadd.f32 %v7610_v48, %v6546_v53 }
0x1653   : > { %v5350_v11 = vpop.f32.mrf.mxu0 }
0x1654   : > { %v5489_v28 = vpack.c.bf16 %v5359_v27, %v5356_v54  ;;  %v5351_v62 = vadd.f32 %v6546_v53, %v5350_v11 }
0x1655   : > { %v7613_v20 = vpop.f32.mrf.mxu0 }
0x1656   : > { %v5372_v21 = vadd.f32 %v7613_v20, %v6546_v53  ;;  %v5488_v55 = vpack.c.bf16 %v5351_v62, %v5348_v2  ;;  %v5508_v58 = vsel %vm733_vm1, %v5489_v28, 0 }
0x1657   : > { %v5363_v36 = vpop.f32.mrf.mxu0 }
0x1658   : > { %v5364_v57 = vadd.f32 %v6546_v53, %v5363_v36  ;;  %v5505_v40 = vsel %vm733_vm1, %v5488_v55, 0 }
0x1659   : > { %v7614_v3 = vpop.f32.mrf.mxu0 }
0x165a   : > { %v5375_v44 = vadd.f32 %v7614_v3, %v6546_v53 }
0x165b   : > { %v5366_v42 = vpop.f32.mrf.mxu0 }
0x165c   : > { %v5491_v49 = vpack.c.bf16 %v5375_v44, %v5372_v21  ;;  %v5367_v41 = vadd.f32 %v6546_v53, %v5366_v42 }
0x165e   : > { %v5490_v9 = vpack.c.bf16 %v5367_v41, %v5364_v57  ;;  %7708 = vmatprep.subr.msk.bf16.mxu0 %vm733_vm1, %v5491_v49  ;;  %v5514_v51 = vsel %vm733_vm1, %v5491_v49, 0 }
0x165f   : > { %7632 = vmatpush3.bf16.xpose.msra.mxu0 %v5514_v51 }
0x1660   : > { %7709 = vmatprep.subr.msk.bf16.mxu0 %vm733_vm1, %v5490_v9  ;;  %v5511_v30 = vsel %vm733_vm1, %v5490_v9, 0 }
0x1667   : > { %7634 = vmatpush3.bf16.xpose.msra.mxu0 %v5511_v30 }
0x1668   : > { %7710 = vmatprep.subr.msk.bf16.mxu0 %vm733_vm1, %v5489_v28 }
0x166f   : > { %7636 = vmatpush3.bf16.xpose.msra.mxu0 %v5508_v58 }
0x1670   : > { %7711 = vmatprep.subr.msk.bf16.mxu0 %vm733_vm1, %v5488_v55 }
0x1677   : > { %7638 = vmatpush3.bf16.xpose.msra.mxu0 %v5505_v40 }
0x167e   : > { %7640 = vmatmul.mubr.msk.bf16.vlgmr.msra.gmra.mxu0 %vm733_vm1, %v5485_v6  ;;  %v5478_v6 = vadd.f32 %v7629_v63, %v6564_v34 }
0x167f   : > { %7643 = vmatprep.mubr.msk.bf16.mxu0 %vm733_vm1, %v5486_v12 }
0x1680   : > { %v5660_v13 = vpack.c.bf16 %v5481_v8, %v5478_v6 }
0x1682   : > { %7647 = vmatprep.subr.bf16.mxu1 %v5660_v13 }
0x1683   : > { %7648 = vmatpush3.bf16.msra.mxu1 %v5660_v13 }
0x1684   : > { %7649 = vmatprep.subr.bf16.mxu1 %v5659_v1 }
0x1686   : > { %7644 = vmatmul.mubr.msk.bf16.gmra.mxu0 %vm733_vm1, %v5487_v7 }
0x1687   : > { %7650 = vmatpush3.bf16.msra.mxu1 %v5659_v1 }
0x1688   : > { %7651 = vmatprep.subr.bf16.mxu1 %v5658_v19 }
0x168b   : > { %7652 = vmatpush3.bf16.msra.mxu1 %v5658_v19 }
0x168c   : > { %7653 = vmatprep.subr.bf16.mxu1 %v5657_v23 }
0x168f   : > { %7654 = vmatpush3.bf16.msra.mxu1 %v5657_v23 }
0x173e   : > { %v7641_v35 = vpop.f32.mrf.mxu0 }
0x173f   : > { %v5587_v36 = vsel %vm439_vm0, %v7641_v35, -inf }
0x1740   : > { %v5550_v4 = vpop.f32.mrf.mxu0 }
0x1741   : > { %v5581_v48 = vsel %vm439_vm0, %v5550_v4, -inf }
0x1742   : > { %5582 = vmax.xlane.f32.xlu0 %v5581_v48  ;;  %v7642_v11 = vpop.f32.mrf.mxu0 }
0x1743   : > { %v5590_v44 = vsel %vm439_vm0, %v7642_v11, -inf }
0x1744   : > { %v5553_v20 = vpop.f32.mrf.mxu0 }
0x1745   : > { %v5584_v53 = vsel %vm439_vm0, %v5553_v20, -inf }
0x1746   : > { %5588 = vmax.xlane.f32.xlu0 %v5587_v36  ;;  %5585 = vmax.xlane.f32.xlu1 %v5584_v53  ;;  %v7645_v3 = vpop.f32.mrf.mxu0 }
0x1747   : > { %v5599_v9 = vsel %vm439_vm0, %v7645_v3, -inf }
0x1748   : > { %v5566_v21 = vpop.f32.mrf.mxu0 }
0x1749   : > { %v5593_v42 = vsel %vm439_vm0, %v5566_v21, -inf }
0x174a   : > { %5591 = vmax.xlane.f32.xlu1 %v5590_v44  ;;  %5594 = vmax.xlane.f32.xlu0 %v5593_v42  ;;  %v7646_v57 = vpop.f32.mrf.mxu0 }
0x174b   : > { %v5602_v51 = vsel %vm439_vm0, %v7646_v57, -inf }
0x174c   : > { %v5569_v49 = vpop.f32.mrf.mxu0 }
0x174d   : > { %v5596_v41 = vsel %vm439_vm0, %v5569_v49, -inf }
0x174e   : > { %5600 = vmax.xlane.f32.xlu0 %v5599_v9  ;;  %5597 = vmax.xlane.f32.xlu1 %v5596_v41 }
0x1752   : > { %5603 = vmax.xlane.f32.xlu1 %v5602_v51 }
0x17cb   : > { %v5583_v27 = vpop.xlane.xlu0 %5582 }
0x17cc   : > { %v5605_v54 = vsub.f32 %v5550_v4, %v5583_v27 }
0x17ce   : > { %v5613_v28 = vmul.f32 1.442695, %v5605_v54 }
0x17cf   : > { %v5589_v30 = vpop.xlane.xlu0 %5588  ;;  %v5586_v29 = vpop.xlane.xlu1 %5585 }
0x17d0   : > { %8041 = vpow2.f32 %v5613_v28  ;;  %v5607_v62 = vsub.f32 %v7641_v35, %v5589_v30  ;;  %v5606_v2 = vsub.f32 %v5553_v20, %v5586_v29  ;;  %v6581_v20 = vld [vmem:[%s9528_s7 + $0x1c] sm:$0xf] }
0x17d1   : > { %7712 = vmatprep.subr.msk.bf16.mxu1 %vm1607_vm2, %v6581_v20  ;;  %v5773_v36 = vsel %vm1607_vm2, %v6581_v20, 0  ;;  %v8092_v20 = vld [vmem:[%s8193_s30 + $0x8] sm:$0xff] }
0x17d2   : > { %v5617_v52 = vmul.f32 1.442695, %v5607_v62  ;;  %v5615_v55 = vmul.f32 1.442695, %v5606_v2 }
0x17d3   : > { %v5592_v58 = vpop.xlane.xlu1 %5591  ;;  %v5595_v5 = vpop.xlane.xlu0 %5594 }
0x17d4   : > { %8043 = vpow2.f32 %v5617_v52  ;;  %v5608_v61 = vsub.f32 %v7642_v11, %v5592_v58  ;;  %v5609_v40 = vsub.f32 %v5566_v21, %v5595_v5 }
0x17d5   : > { %8045 = vpow2.f32 %v5615_v55 }
0x17d6   : > { %v5619_v10 = vmul.f32 1.442695, %v5608_v61  ;;  %v5621_v43 = vmul.f32 1.442695, %v5609_v40 }
0x17d7   : > { %v5601_v12 = vpop.xlane.xlu0 %5600  ;;  %v5598_v32 = vpop.xlane.xlu1 %5597 }
0x17d8   : > { %8047 = vpow2.f32 %v5619_v10  ;;  %v5611_v17 = vsub.f32 %v7645_v3, %v5601_v12  ;;  %v5610_v7 = vsub.f32 %v5569_v49, %v5598_v32 }
0x17d9   : > { %8049 = vpow2.f32 %v5621_v43 }
0x17da   : > { %v5625_v0 = vmul.f32 1.442695, %v5611_v17  ;;  %v5623_v46 = vmul.f32 1.442695, %v5610_v7 }
0x17db   : > { %v5604_v38 = vpop.xlane.xlu1 %5603 }
0x17dc   : > { %8051 = vpow2.f32 %v5625_v0  ;;  %v5612_v24 = vsub.f32 %v7646_v57, %v5604_v38 }
0x17dd   : > { %v8042_v34 = vpop.eup %8041  ;;  %8053 = vpow2.f32 %v5623_v46 }
0x17de   : > { %v5627_v63 = vmul.f32 1.442695, %v5612_v24  ;;  %v5629_v25 = vsel %vm439_vm0, %v8042_v34, 0.0 }
0x17df   : > { %5630 = vadd.xlane.f32.xlu0 %v5629_v25 }
0x17e0   : > { %8055 = vpow2.f32 %v5627_v63 }
0x17e1   : > { %v8044_v6 = vpop.eup %8043 }
0x17e2   : > { %v8046_v31 = vpop.eup %8045  ;;  %v5635_v33 = vsel %vm439_vm0, %v8044_v6, 0.0 }
0x17e3   : > { %5636 = vadd.xlane.f32.xlu0 %v5635_v33  ;;  %v5632_v8 = vsel %vm439_vm0, %v8046_v31, 0.0  ;;  %v5653_v56 = vpack.c.bf16 %v8046_v31, %v8042_v34 }
0x17e4   : > { %5633 = vadd.xlane.f32.xlu1 %v5632_v8  ;;  %v6586_v8 = vld [vmem:[%s9529_s8] ss:$0 sm:$0xff] }
0x17e5   : > { %v8048_v60 = vpop.eup %8047  ;;  %7655 = vmatprep.mubr.msk.bf16.mxu1 %vm439_vm0, %v5653_v56  ;;  %v8089_v56 = vld [vmem:[%s8193_s30 + $0x10] sm:$0xff] }
0x17e6   : > { %v8050_v59 = vpop.eup %8049  ;;  %v5654_v13 = vpack.c.bf16 %v8048_v60, %v8044_v6  ;;  %v5638_v37 = vsel %vm439_vm0, %v8048_v60, 0.0 }
0x17e7   : > { %v5641_v1 = vsel %vm439_vm0, %v8050_v59, 0.0 }
0x17e8   : > { %5642 = vadd.xlane.f32.xlu0 %v5641_v1  ;;  %5639 = vadd.xlane.f32.xlu1 %v5638_v37  ;;  %v8090_v37 = vld [vmem:[%s8193_s30] sm:$0xff] }
0x17e9   : > { %v8052_v16 = vpop.eup %8051  ;;  %7656 = vmatmul.mubr.msk.bf16.vlgmr.msra.gmra.mxu1 %vm439_vm0, %v5654_v13 }
0x17ea   : > { %v8054_v19 = vpop.eup %8053  ;;  %v5647_v26 = vsel %vm439_vm0, %v8052_v16, 0.0  ;;  %7664 = vmatpush3.bf16.msra.mxu1 %v5773_v36 }
0x17eb   : > { %v5644_v23 = vsel %vm439_vm0, %v8054_v19, 0.0  ;;  %v5655_v35 = vpack.c.bf16 %v8054_v19, %v8050_v59 }
0x17ec   : > { %5648 = vadd.xlane.f32.xlu0 %v5647_v26  ;;  %5645 = vadd.xlane.f32.xlu1 %v5644_v23  ;;  %v8091_v23 = vld [vmem:[%s8193_s30 + $0x18] sm:$0xff] }
0x17ed   : > { %v8056_v4 = vpop.eup %8055  ;;  %7659 = vmatprep.mubr.msk.bf16.mxu1 %vm439_vm0, %v5655_v35 }
0x17ee   : > { %v5650_v48 = vsel %vm439_vm0, %v8056_v4, 0.0  ;;  %v5656_v11 = vpack.c.bf16 %v8056_v4, %v8052_v16 }
0x17f0   : > { %5651 = vadd.xlane.f32.xlu1 %v5650_v48 }
0x17f1   : > { %7660 = vmatmul.mubr.msk.bf16.gmra.mxu1 %vm439_vm0, %v5656_v11 }
0x1868   : > { %v5631_v3 = vpop.xlane.xlu0 %5630 }
0x1869   : > { %8057 = vrcp.f32 %v5631_v3 }
0x186c   : > { %v5637_v44 = vpop.xlane.xlu0 %5636 }
0x186d   : > { %v5634_v53 = vpop.xlane.xlu1 %5633 }
0x1871   : > { %v5640_v21 = vpop.xlane.xlu1 %5639  ;;  %v5643_v57 = vpop.xlane.xlu0 %5642 }
0x1872   : > { %8059 = vrcp.f32 %v5640_v21 }
0x1873   : > { %8061 = vrcp.f32 %v5634_v53 }
0x1874   : > { %8063 = vrcp.f32 %v5637_v44 }
0x1875   : > { %v5646_v42 = vpop.xlane.xlu1 %5645  ;;  %8065 = vrcp.f32 %v5643_v57  ;;  %v5649_v41 = vpop.xlane.xlu0 %5648  ;;  %v8093_v57 = vld [vmem:[%s8193_s30 + $0x30] sm:$0xff] }
0x1876   : > { %v8058_v27 = vpop.eup %8057 }
0x1879   : > { %v5652_v49 = vpop.xlane.xlu1 %5651 }
0x187a   : > { %8067 = vrcp.f32 %v5652_v49 }
0x187b   : > { %8069 = vrcp.f32 %v5646_v42 }
0x187c   : > { %8071 = vrcp.f32 %v5649_v41  ;;  %v8094_v41 = vld [vmem:[%s8193_s30 + $0x20] sm:$0xff] }
0x187f   : > { %v8060_v28 = vpop.eup %8059 }
0x1880   : > { %v8062_v30 = vpop.eup %8061 }
0x1881   : > { %v8064_v2 = vpop.eup %8063 }
0x1882   : > { %v8066_v43 = vpop.eup %8065 }
0x1887   : > { %v8068_v32 = vpop.eup %8067 }
0x1888   : > { %v8070_v17 = vpop.eup %8069 }
0x1889   : > { %v8072_v46 = vpop.eup %8071 }
0x18a9   : > { %v7657_v9 = vpop.f32.mrf.mxu1 }
0x18aa   : > { %v5748_v58 = vmul.f32 %v8064_v2, %v7657_v9 }
0x18ab   : > { %v5707_v51 = vpop.f32.mrf.mxu1 }
0x18ac   : > { %v5746_v52 = vmul.f32 %v8058_v27, %v5707_v51 }
0x18ad   : > { %v7658_v54 = vpop.f32.mrf.mxu1 }
0x18ae   : > { %v5749_v29 = vmul.f32 %v8060_v28, %v7658_v54  ;;  %v8095_v28 = vld [vmem:[%s8193_s30 + $0x38] sm:$0xff] }
0x18af   : > { %v5710_v62 = vpop.f32.mrf.mxu1 }
0x18b0   : > { %v5747_v55 = vmul.f32 %v8062_v30, %v5710_v62  ;;  %v5755_v40 = vpack.c.bf16 %v5749_v29, %v5748_v58  ;;  %v8096_v29 = vld [vmem:[%s8193_s30 + $0x28] sm:$0xff] }
0x18b1   : > { %v7661_v5 = vpop.f32.mrf.mxu1 }
0x18b2   : > { %v5754_v61 = vpack.c.bf16 %v5747_v55, %v5746_v52  ;;  %v5752_v34 = vmul.f32 %v8072_v46, %v7661_v5 }
0x18b3   : > { %v5723_v10 = vpop.f32.mrf.mxu1 }
0x18b4   : > { %7665 = vmatprep.mubr.msk.bf16.mxu1 %vm733_vm1, %v5754_v61  ;;  %v5750_v38 = vmul.f32 %v8066_v43, %v5723_v10 }
0x18b5   : > { %v7662_v12 = vpop.f32.mrf.mxu1  ;;  %7666 = vmatmul.mubr.msk.bf16.vlgmr.msra.gmra.mxu1 %vm733_vm1, %v5755_v40 }
0x18b6   : > { %v5753_v7 = vmul.f32 %v8068_v32, %v7662_v12 }
0x18b7   : > { %v5726_v0 = vpop.f32.mrf.mxu1 }
0x18b8   : > { %v5751_v24 = vmul.f32 %v8070_v17, %v5726_v0  ;;  %v5757_v25 = vpack.c.bf16 %v5753_v7, %v5752_v34 }
0x18ba   : > { %v5756_v63 = vpack.c.bf16 %v5751_v24, %v5750_v38 }
0x18bc   : > { %7669 = vmatprep.mubr.msk.bf16.mxu1 %vm733_vm1, %v5756_v63 }
0x18bd   : > { %7670 = vmatmul.mubr.msk.bf16.gmra.mxu1 %vm733_vm1, %v5757_v25 }
0x1975   : > { %v7667_v6 = vpop.f32.mrf.mxu1 }
0x1976   : > { %v5842_v31 = vadd.f32 %v7667_v6, %v9338_v45 }
0x1977   : > { %v5809_v33 = vpop.f32.mrf.mxu1 }
0x1978   : > { %v5850_v60 = vadd.f32 %v8089_v56, %v5842_v31  ;;  %v5840_v59 = vadd.f32 %v5809_v33, %v9341_v18 }
0x1979   : > { %v7668_v13 = vpop.f32.mrf.mxu1 }
0x197a   : > { %v5848_v1 = vadd.f32 %v8090_v37, %v5840_v59  ;;  %v5843_v16 = vadd.f32 %v7668_v13, %v9344_v22  ;;  %v5865_v19 = vadd.f32 %v6586_v8, %v5850_v60 }
0x197b   : > { %v5812_v26 = vpop.f32.mrf.mxu1 }
0x197c   : > { %v5851_v35 = vadd.f32 %v8091_v23, %v5843_v16  ;;  %v5841_v45 = vadd.f32 %v5812_v26, %v9347_v15  ;;  %v5879_v4 = vsel %vm439_vm0, %v5865_v19, 0.0  ;;  %v5863_v48 = vadd.f32 %v6586_v8, %v5848_v1 }
0x197d   : > { %5880 = vadd.xlane.f32.xlu0 %v5879_v4  ;;  %v7671_v11 = vpop.f32.mrf.mxu1 }
0x197e   : > { %v5849_v18 = vadd.f32 %v8092_v20, %v5841_v45  ;;  %v5846_v36 = vadd.f32 %v7671_v11, %v9350_v14  ;;  %v5866_v53 = vadd.f32 %v6586_v8, %v5851_v35  ;;  %v5873_v21 = vsel %vm439_vm0, %v5863_v48, 0.0 }
0x197f   : > { %v5825_v3 = vpop.f32.mrf.mxu1 }
0x1980   : > { %v5844_v22 = vadd.f32 %v5825_v3, %v9353_v50  ;;  %v5882_v15 = vsel %vm439_vm0, %v5866_v53, 0.0  ;;  %v5864_v44 = vadd.f32 %v6586_v8, %v5849_v18  ;;  %v5854_v49 = vadd.f32 %v8093_v57, %v5846_v36 }
0x1981   : > { %5874 = vadd.xlane.f32.xlu0 %v5873_v21  ;;  %5883 = vadd.xlane.f32.xlu1 %v5882_v15  ;;  %v7672_v42 = vpop.f32.mrf.mxu1 }
0x1982   : > { %v5852_v9 = vadd.f32 %v8094_v41, %v5844_v22  ;;  %v5847_v14 = vadd.f32 %v7672_v42, %v9356_v39  ;;  %v5876_v50 = vsel %vm439_vm0, %v5864_v44, 0.0  ;;  %v5869_v52 = vadd.f32 %v6586_v8, %v5854_v49 }
0x1983   : > { %v5828_v51 = vpop.f32.mrf.mxu1 }
0x1984   : > { %v5845_v27 = vadd.f32 %v5828_v51, %v9359_v47  ;;  %v5867_v54 = vadd.f32 %v6586_v8, %v5852_v9  ;;  %v5855_v30 = vadd.f32 %v8095_v28, %v5847_v14  ;;  %v5891_v58 = vsel %vm439_vm0, %v5869_v52, 0.0 }
0x1985   : > { %5877 = vadd.xlane.f32.xlu1 %v5876_v50 }
0x1986   : > { %v5853_v62 = vadd.f32 %v8096_v29, %v5845_v27  ;;  %v5885_v2 = vsel %vm439_vm0, %v5867_v54, 0.0  ;;  %v5870_v5 = vadd.f32 %v6586_v8, %v5855_v30 }
0x1987   : > { %5886 = vadd.xlane.f32.xlu0 %v5885_v2 }
0x1988   : > { %v5868_v55 = vadd.f32 %v6586_v8, %v5853_v62  ;;  %v5894_v47 = vsel %vm439_vm0, %v5870_v5, 0.0 }
0x198a   : > { %v5888_v39 = vsel %vm439_vm0, %v5868_v55, 0.0 }
0x198b   : > { %5892 = vadd.xlane.f32.xlu0 %v5891_v58  ;;  %5889 = vadd.xlane.f32.xlu1 %v5888_v39 }
0x198f   : > { %5895 = vadd.xlane.f32.xlu1 %v5894_v47 }
0x1a06   : > { %v5881_v61 = vpop.xlane.xlu0 %5880 }
0x1a07   : > { %v5900_v40 = vmul.f32 0.015625, %v5881_v61 }
0x1a09   : > { %v9441_v10 = vsub.f32 %v5865_v19, %v5900_v40 }
0x1a0a   : > { %v5875_v43 = vpop.xlane.xlu0 %5874  ;;  %v5884_v12 = vpop.xlane.xlu1 %5883 }
0x1a0b   : > { %v5898_v32 = vmul.f32 0.015625, %v5875_v43  ;;  %v5901_v17 = vmul.f32 0.015625, %v5884_v12  ;;  %v5916_v7 = vmul.f32 %v9441_v10, %v9441_v10  ;;  %v6588_v43 = vld [vmem:[%s9531_s10] ss:$0 sm:$0xff] }
0x1a0d   : > { %v9445_v0 = vsub.f32 %v5863_v48, %v5898_v32  ;;  %v9447_v46 = vsub.f32 %v5866_v53, %v5901_v17  ;;  %v5928_v38 = vsel %vm439_vm0, %v5916_v7, 0.0 }
0x1a0e   : > { %5929 = vadd.xlane.f32.xlu0 %v5928_v38  ;;  %v5878_v24 = vpop.xlane.xlu1 %5877 }
0x1a0f   : > { %v5899_v34 = vmul.f32 0.015625, %v5878_v24  ;;  %v5914_v63 = vmul.f32 %v9445_v0, %v9445_v0  ;;  %v5917_v25 = vmul.f32 %v9447_v46, %v9447_v46 }
0x1a10   : > { %v5887_v6 = vpop.xlane.xlu0 %5886 }
0x1a11   : > { %v9454_v31 = vsub.f32 %v5864_v44, %v5899_v34  ;;  %v5902_v33 = vmul.f32 0.015625, %v5887_v6  ;;  %v5922_v8 = vsel %vm439_vm0, %v5914_v63, 0.0  ;;  %v5931_v56 = vsel %vm439_vm0, %v5917_v25, 0.0 }
0x1a12   : > { %5923 = vadd.xlane.f32.xlu0 %v5922_v8  ;;  %5932 = vadd.xlane.f32.xlu1 %v5931_v56 }
0x1a13   : > { %v9458_v60 = vsub.f32 %v5867_v54, %v5902_v33  ;;  %v5915_v59 = vmul.f32 %v9454_v31, %v9454_v31 }
0x1a14   : > { %v5893_v13 = vpop.xlane.xlu0 %5892  ;;  %v5890_v37 = vpop.xlane.xlu1 %5889 }
0x1a15   : > { %v5904_v1 = vmul.f32 0.015625, %v5893_v13  ;;  %v5903_v16 = vmul.f32 0.015625, %v5890_v37  ;;  %v5925_v19 = vsel %vm439_vm0, %v5915_v59, 0.0  ;;  %v5918_v26 = vmul.f32 %v9458_v60, %v9458_v60 }
0x1a16   : > { %5926 = vadd.xlane.f32.xlu1 %v5925_v19 }
0x1a17   : > { %v9465_v23 = vsub.f32 %v5869_v52, %v5904_v1  ;;  %v9467_v35 = vsub.f32 %v5868_v55, %v5903_v16  ;;  %v5934_v45 = vsel %vm439_vm0, %v5918_v26, 0.0 }
0x1a18   : > { %5935 = vadd.xlane.f32.xlu0 %v5934_v45  ;;  %v5896_v4 = vpop.xlane.xlu1 %5895 }
0x1a19   : > { %v5905_v48 = vmul.f32 0.015625, %v5896_v4  ;;  %v5920_v11 = vmul.f32 %v9465_v23, %v9465_v23  ;;  %v5919_v20 = vmul.f32 %v9467_v35, %v9467_v35 }
0x1a1b   : > { %v9474_v18 = vsub.f32 %v5870_v5, %v5905_v48  ;;  %v5940_v36 = vsel %vm439_vm0, %v5920_v11, 0.0  ;;  %v5937_v53 = vsel %vm439_vm0, %v5919_v20, 0.0  ;;  %v6587_v5 = vld [vmem:[%s9530_s9] ss:$0 sm:$0xff] }
0x1a1c   : > { %5941 = vadd.xlane.f32.xlu0 %v5940_v36  ;;  %5938 = vadd.xlane.f32.xlu1 %v5937_v53 }
0x1a1d   : > { %v5921_v3 = vmul.f32 %v9474_v18, %v9474_v18 }
0x1a1f   : > { %v5943_v22 = vsel %vm439_vm0, %v5921_v3, 0.0 }
0x1a20   : > { %5944 = vadd.xlane.f32.xlu1 %v5943_v22 }
0x1a97   : > { %v5930_v21 = vpop.xlane.xlu0 %5929 }
0x1a98   : > { %v5948_v15 = vmul.f32 0.015625, %v5930_v21 }
0x1a9a   : > { %v5956_v44 = vadd.f32 1e-05, %v5948_v15 }
0x1a9b   : > { %v5924_v42 = vpop.xlane.xlu0 %5923  ;;  %v5933_v57 = vpop.xlane.xlu1 %5932 }
0x1a9c   : > { %8073 = vrsqrt.f32 %v5956_v44  ;;  %v5946_v49 = vmul.f32 0.015625, %v5924_v42  ;;  %v5949_v41 = vmul.f32 0.015625, %v5933_v57 }
0x1a9e   : > { %v5954_v9 = vadd.f32 1e-05, %v5946_v49  ;;  %v5957_v14 = vadd.f32 1e-05, %v5949_v41 }
0x1a9f   : > { %v5927_v51 = vpop.xlane.xlu1 %5926 }
0x1aa0   : > { %8075 = vrsqrt.f32 %v5954_v9  ;;  %v5947_v27 = vmul.f32 0.015625, %v5927_v51 }
0x1aa1   : > { %8077 = vrsqrt.f32 %v5957_v14  ;;  %v5936_v50 = vpop.xlane.xlu0 %5935 }
0x1aa2   : > { %v5955_v54 = vadd.f32 1e-05, %v5947_v27  ;;  %v5950_v28 = vmul.f32 0.015625, %v5936_v50 }
0x1aa4   : > { %8079 = vrsqrt.f32 %v5955_v54  ;;  %v5958_v30 = vadd.f32 1e-05, %v5950_v28 }
0x1aa5   : > { %v5942_v29 = vpop.xlane.xlu0 %5941  ;;  %v5939_v62 = vpop.xlane.xlu1 %5938 }
0x1aa6   : > { %8081 = vrsqrt.f32 %v5958_v30  ;;  %v5952_v2 = vmul.f32 0.015625, %v5942_v29  ;;  %v5951_v52 = vmul.f32 0.015625, %v5939_v62 }
0x1aa8   : > { %v5960_v55 = vadd.f32 1e-05, %v5952_v2  ;;  %v5959_v58 = vadd.f32 1e-05, %v5951_v52 }
0x1aa9   : > { %v8074_v39 = vpop.eup %8073  ;;  %v5945_v47 = vpop.xlane.xlu1 %5944 }
0x1aaa   : > { %v5972_v61 = vmul.f32 %v8074_v39, %v9441_v10  ;;  %8083 = vrsqrt.f32 %v5960_v55  ;;  %v5953_v40 = vmul.f32 0.015625, %v5945_v47 }
0x1aab   : > { %8085 = vrsqrt.f32 %v5959_v58 }
0x1aac   : > { %v5986_v12 = vmul.f32 %v6587_v5, %v5972_v61  ;;  %v5961_v32 = vadd.f32 1e-05, %v5953_v40 }
0x1aad   : > { %v8076_v17 = vpop.eup %8075 }
0x1aae   : > { %v8078_v7 = vpop.eup %8077  ;;  %v6000_v10 = vadd.f32 %v6588_v43, %v5986_v12  ;;  %v5970_v38 = vmul.f32 %v8076_v17, %v9445_v0  ;;  %8087 = vrsqrt.f32 %v5961_v32 }
0x1aaf   : > { %v5973_v24 = vmul.f32 %v8078_v7, %v9447_v46 }
0x1ab0   : > { %6008 = vst.msk [vmem:[%s9493_s12 + $0x10] sm:$0xff] %vm439_vm0, %v6000_v10  ;;  %v5984_v34 = vmul.f32 %v6587_v5, %v5970_v38 }
0x1ab1   : > { %v8080_v63 = vpop.eup %8079  ;;  %v5987_v25 = vmul.f32 %v6587_v5, %v5973_v24 }
0x1ab2   : > { %v5998_v6 = vadd.f32 %v6588_v43, %v5984_v34  ;;  %v5971_v33 = vmul.f32 %v8080_v63, %v9454_v31 }
0x1ab3   : > { %v8082_v8 = vpop.eup %8081  ;;  %v6001_v56 = vadd.f32 %v6588_v43, %v5987_v25 }
0x1ab4   : > { %6006 = vst.msk [vmem:[%s9493_s12] sm:$0xff] %vm439_vm0, %v5998_v6  ;;  %v5985_v59 = vmul.f32 %v6587_v5, %v5971_v33  ;;  %v5974_v0 = vmul.f32 %v8082_v8, %v9458_v60 }
0x1ab5   : > { %6009 = vst.msk [vmem:[%s9493_s12 + $0x18] sm:$0xff] %vm439_vm0, %v6001_v56 }
0x1ab6   : > { %v5999_v46 = vadd.f32 %v6588_v43, %v5985_v59  ;;  %v5988_v13 = vmul.f32 %v6587_v5, %v5974_v0 }
0x1ab7   : > { %v8084_v37 = vpop.eup %8083 }
0x1ab8   : > { %v8086_v1 = vpop.eup %8085  ;;  %6007 = vst.msk [vmem:[%s9493_s12 + $0x8] sm:$0xff] %vm439_vm0, %v5999_v46  ;;  %v6002_v16 = vadd.f32 %v6588_v43, %v5988_v13  ;;  %v5976_v31 = vmul.f32 %v8084_v37, %v9465_v23 }
0x1ab9   : > { %v5975_v19 = vmul.f32 %v8086_v1, %v9467_v35 }
0x1aba   : > { %6010 = vst.msk [vmem:[%s9493_s12 + $0x20] sm:$0xff] %vm439_vm0, %v6002_v16  ;;  %v5990_v26 = vmul.f32 %v6587_v5, %v5976_v31 }
0x1abb   : > { %v8088_v60 = vpop.eup %8087  ;;  %v5989_v45 = vmul.f32 %v6587_v5, %v5975_v19 }
0x1abc   : > { %v6004_v4 = vadd.f32 %v6588_v43, %v5990_v26  ;;  %v5977_v48 = vmul.f32 %v8088_v60, %v9474_v18 }
0x1abd   : > { %v6003_v11 = vadd.f32 %v6588_v43, %v5989_v45 }
0x1abe   : > { %6012 = vst.msk [vmem:[%s9493_s12 + $0x30] sm:$0xff] %vm439_vm0, %v6004_v4  ;;  %v5991_v20 = vmul.f32 %v6587_v5, %v5977_v48 }
0x1abf   : > { %6011 = vst.msk [vmem:[%s9493_s12 + $0x28] sm:$0xff] %vm439_vm0, %v6003_v11 }
0x1ac0   : > { %v6005_v36 = vadd.f32 %v6588_v43, %v5991_v20 }
0x1ac2   : > { %6013 = vst.msk [vmem:[%s9493_s12 + $0x38] sm:$0xff] %vm439_vm0, %v6005_v36 }
0x1ac3 PF: > { %s21_s17 = sadd.s32 1, %s8103_s17  }
0x1ac4   : > { %p18_p4 = scmp.ge.s32.totalorder %s21_s17, 4  }
0x1ac6   :  { %20 = sbr.rel (!%p18_p4) target bundleno = 1 (0x1), region = 143 }

// kernel: _lambda_.25
= control target key start
LH: loop header
LB: loop body
LE: loop exit
PB: predicated region body
PF: predicated region fallthrough
CT: control target
= control target key end

     0   :  { %8 = vsyncpa [#allocation3], 0  ;;  %s1103_s0 = inlined_call_operand.vmem [shape: f32[2,64,64], index: 0, kind: input, shape index: {}]   ;;  %s1104_s1 = inlined_call_operand.vmem [shape: f32[2,64,4], index: 1, kind: input, shape index: {}]   ;;  %s1105_s2 = inlined_call_operand.vmem [shape: f32[2,64,4], index: 2, kind: input, shape index: {}]   ;;  %s1106_s3 = inlined_call_operand.hbm [shape: f32[2,64,64], index: 3, kind: output, shape index: {}]  }
   0x1   :  { %10 = vsyncpa [#allocation3 + $0x1], 0  ;;  %s901_s12 = smov 0   ;;  %s903_s13 = smov 0  }
   0x2   :  { %s905_s14 = smov 0   ;;  %s907_s15 = smov 0  }
   0x3   :  { %s909_s16 = smov 0   ;;  %s911_s17 = smov 0  }
   0x4   :  { %s913_s18 = smov 0   ;;  %s915_s19 = smov 0  }
   0x5 LB: > { %s606_s20 = sadd.s32 4294967295, %s876_s19   ;;  %s607_s21 = sadd.s32 4294967294, %s876_s19   ;;  %s876_s19 = sphi %s915_s19, %s16_s19   ;;  %s872_s18 = sphi %s913_s18, %s1115_s18   ;;  %s868_s17 = sphi %s911_s17, %s1114_s17   ;;  %s864_s16 = sphi %s909_s16, %s1113_s16   ;;  %s860_s15 = sphi %s907_s15, %s1112_s15   ;;  %s856_s14 = sphi %s905_s14, %s1111_s14   ;;  %s852_s13 = sphi %s903_s13, %s1110_s13   ;;  %s848_s12 = sphi %s901_s12, %s1109_s12  }
   0x6   : > { %s25_s22 = sadd.s32 1, %s868_s17  ;;  %s28_s23 = sadd.s32 1, %s872_s18 }
   0x7   : > { %p26_p0 = scmp.ge.s32.totalorder %s25_s22, 2  ;;  %p127_p1 = scmp.ne.s32.totalorder %s856_s14, %s852_s13 }
   0x8   : > { %p128_p2 = scmp.eq.s32.totalorder %s606_s20, 3  ;;  %p133_p5 = scmp.ne.s32.totalorder %s852_s13, %s848_s12 }
   0x9   : > { %s1117_s22 = smov (%p26_p0, %s25_s22), 0  ;;  %s1119_s23 = smov (!%p26_p0, %s28_s23), %s872_s18 }
   0xa   : > { %s113_s24 = ssub.s32 %s868_s17, %s1117_s22  ;;  %p952_p3 = por %p128_p2, %p127_p1 }
   0xb   : > { %p30_p4 = scmp.ge.s32.totalorder %s1119_s23, 2  ;;  %p134_p6 = scmp.eq.s32.totalorder %s607_s21, 3 }
   0xc   : > { %p610_p7 = scmp.ge.s32.totalorder %s876_s19, 1  ;;  %p181_p9 = scmp.lt.s32.totalorder %s876_s19, 5 }
   0xd   : > { %s1121_s23 = smov (%p30_p4, %s1119_s23), 0  ;;  %p961_p8 = por %p134_p6, %p133_p5 }
   0xe   : > { %s112_s27 = ssub.s32 %s872_s18, %s1121_s23  ;;  %s117_s28 = sadd.s32 1, %s856_s14 }
   0xf   : > { %s114_s29 = sor.u32 %s113_s24, %s112_s27  ;;  %p182_p10 = pnand %p610_p7, %p181_p9 }
  0x10   : > { %p115_p11 = scmp.eq.s32.totalorder %s114_s29, 0  ;;  %p220_p12 = scmp.lt.s32.totalorder (!%p182_p10), %s864_s16, 1 }
  0x11   : > { %185 = sbr.rel (%p182_p10) target bundleno = 452 (0x1c4), region = 32  ;;  %s974_s4 = sshll.u32 (!%p182_p10), %s860_s15, 2 }
  0x12   : > { %s970_s30 = scalar_select %p115_p11, %s856_s14, %s117_s28  }
  0x13   : > { %p222_p13 = scmp.lt.s32.totalorder (!%p182_p10), %s974_s4, 7 }
  0x16   : > { %s221_s5 = scalar_select %p220_p12, %s864_s16, 1  ;;  %vm260_vm0 = vcmask 523264   ;;  %vm358_vm1 = vcmask 31744  }
  0x17   : > { %s223_s6 = scalar_select %p222_p13, %s974_s4, 7 }
  0x18   : > { %s641_s7 = sshll.u32 %s221_s5, 6  ;;  %s613_s8 = sshll.u32 %s221_s5, 3 }
  0x19   : > { %s982_s11 = scalar_lea.vmem %s1104_s1, %s641_s7  ;;  %s225_s20 = sadd.s32 %s613_s8, %s223_s6 }
  0x1a   : > { %v251_v0 = vld [vmem:[%s982_s11 + $0x38] sm:$0xff]  ;;  %v250_v1 = vld [vmem:[%s982_s11 + $0x30] sm:$0xff]  ;;  %s614_s15 = sshll.u32 %s225_s20, 3  ;;  %v249_v2 = vld [vmem:[%s982_s11 + $0x28] sm:$0xff]  ;;  %s996_s5 = scalar_lea.vmem %s1105_s2, %s641_s7 }
  0x1b   : > { %667 = vmatprep.subr.mxu0 %v251_v0  ;;  %s989_s27 = scalar_lea.vmem %s1103_s0, %s614_s15  ;;  %v248_v4 = vld [vmem:[%s982_s11 + $0x20] sm:$0xff]  ;;  %v259_v5 = vld [vmem:[%s996_s5 + $0x38] sm:$0xff]  ;;  %v258_v6 = vld [vmem:[%s996_s5 + $0x30] sm:$0xff]  ;;  %s216_s6 = sand.u32 1, %s852_s13  }
  0x1c   : > { %668 = vmatpush3.msra.mxu0 %v251_v0  ;;  %v240_v3 = vld [vmem:[%s989_s27] sm:$0xff]  ;;  %689 = vmatprep.subr.msk.mxu1 %vm358_vm1, %v259_v5  ;;  %v247_v7 = vld [vmem:[%s982_s11 + $0x18] sm:$0xff]  ;;  %v246_v8 = vld [vmem:[%s982_s11 + $0x10] sm:$0xff]  ;;  %s637_s7 = sshll.u32 %s864_s16, 3  ;;  %s611_s8 = sshll.u32 %s216_s6, 5 }
  0x1d   : > { %669 = vmatprep.subr.mxu0 %v250_v1  ;;  %683 = vmatprep.mubr.msk.f32.mxu0 %vm260_vm0, %v240_v3  ;;  %v257_v9 = vld [vmem:[%s996_s5 + $0x28] sm:$0xff]  ;;  %v244_v11 = vld [vmem:[%s982_s11] sm:$0xff]  ;;  %v242_v14 = vld [vmem:[%s989_s27 + $0x10] sm:$0xff]  ;;  %s497_s9 = sadd.s32 %s637_s7, %s974_s4  ;;  %s1052_s16 = scalar_lea.sflag [#allocation3], %s216_s6 }
  0x1e   : > { %670 = vmatpush3.msra.mxu0 %v250_v1  ;;  %690 = vmatpush3.xpose.msk.msra.mxu1 %vm358_vm1, %v259_v5  ;;  %v245_v10 = vld [vmem:[%s982_s11 + $0x8] sm:$0xff]  ;;  %v256_v12 = vld [vmem:[%s996_s5 + $0x20] sm:$0xff]  ;;  %v255_v15 = vld [vmem:[%s996_s5 + $0x18] sm:$0xff]  ;;  %s638_s10 = sshll.u32 %s497_s9, 7  ;;  %s218_s11 = scalar_lea.vmem [#allocation2], %s611_s8 }
  0x1f   : > { %671 = vmatprep.subr.mxu0 %v249_v2  ;;  %691 = vmatprep.subr.msk.mxu1 %vm358_vm1, %v258_v6  ;;  %v241_v13 = vld [vmem:[%s989_s27 + $0x8] sm:$0xff]  ;;  %v243_v16 = vld [vmem:[%s989_s27 + $0x18] sm:$0xff]  ;;  %v254_v17 = vld [vmem:[%s996_s5 + $0x10] sm:$0xff]  ;;  %s500_s20 = sshll.u32 %s218_s11, 4  ;;  %s1045_s24 = scalar_lea.hbm %s1106_s3, %s638_s10  ;;  %s1048_s20 = int_to_ptr.vmem [resolvable:$true] %s500_s20 }
  0x20   : > { %672 = vmatpush3.msra.mxu0 %v249_v2  ;;  %v253_v18 = vld [vmem:[%s996_s5 + $0x8] sm:$0xff]  ;;  %v252_v19 = vld [vmem:[%s996_s5] sm:$0xff]  ;;  %s784_s4 = scalar_lea.vmem %s1048_s20, 512  ;;  %s878_s27 = smov [#allocation2]  }
  0x21   : > { %673 = vmatprep.subr.mxu0 %v248_v4  ;;  %p785_p0 = scmp.ne.s32.totalorder %s1048_s20, %s784_s4  ;;  %s788_s28 = sshll.u32 %s878_s27, 4  ;;  %s789_s28 = int_to_ptr.vmem [resolvable:$false] %s788_s28 }
  0x22   : > { %674 = vmatpush3.msra.mxu0 %v248_v4  ;;  %692 = vmatpush3.xpose.msk.msra.mxu1 %vm358_vm1, %v258_v6  ;;  %s790_s29 = scalar_lea.vmem %s789_s28, 1024  ;;  %p791_p4 = scmp.lt.s32.totalorder %s1048_s20, %s789_s28 }
  0x23   : > { %675 = vmatprep.subr.mxu0 %v247_v7  ;;  %693 = vmatprep.subr.msk.mxu1 %vm358_vm1, %v257_v9  ;;  %p786_p1 = pnand %p785_p0, %p952_p3  ;;  %p792_p5 = scmp.lt.s32.totalorder %s790_s29, %s784_s4 }
  0x24   : > { %676 = vmatpush3.msra.mxu0 %v247_v7 }
  0x25   : > { %677 = vmatprep.subr.mxu0 %v246_v8  ;;  %p787_p2 = pneg %p786_p1  ;;  %p793_p6 = por %p792_p5, %p791_p4 }
  0x26   : > { %678 = vmatpush3.msra.mxu0 %v246_v8  ;;  %694 = vmatpush3.xpose.msk.msra.mxu1 %vm358_vm1, %v257_v9 }
  0x27   : > { %679 = vmatprep.subr.mxu0 %v245_v10  ;;  %695 = vmatprep.subr.msk.mxu1 %vm358_vm1, %v256_v12  ;;  %p794_p7 = pnand %p793_p6, %p787_p2 }
  0x28   : > { %680 = vmatpush3.msra.mxu0 %v245_v10 }
  0x29   : > { %681 = vmatprep.subr.mxu0 %v244_v11 }
  0x2a   : > { %682 = vmatpush3.msra.mxu0 %v244_v11  ;;  %696 = vmatpush3.xpose.msk.msra.mxu1 %vm358_vm1, %v256_v12 }
  0x2b   : > { %684 = vmatmul.mubr.msk.f32.vlgmr.msra.gmra.mxu0 %vm260_vm0, %v241_v13  ;;  %697 = vmatprep.subr.msk.mxu1 %vm358_vm1, %v255_v15 }
  0x2c   : > { %686 = vmatprep.mubr.msk.f32.mxu0 %vm260_vm0, %v242_v14 }
  0x2e   : > { %698 = vmatpush3.xpose.msk.msra.mxu1 %vm358_vm1, %v255_v15 }
  0x2f   : > { %687 = vmatmul.mubr.msk.f32.gmra.mxu0 %vm260_vm0, %v243_v16  ;;  %699 = vmatprep.subr.msk.mxu1 %vm358_vm1, %v254_v17 }
  0x32   : > { %700 = vmatpush3.xpose.msk.msra.mxu1 %vm358_vm1, %v254_v17 }
  0x33   : > { %701 = vmatprep.subr.msk.mxu1 %vm358_vm1, %v253_v18 }
  0x36   : > { %702 = vmatpush3.xpose.msk.msra.mxu1 %vm358_vm1, %v253_v18 }
  0x37   : > { %703 = vmatprep.subr.msk.mxu1 %vm358_vm1, %v252_v19 }
  0x3a   : > { %704 = vmatpush3.xpose.msk.msra.mxu1 %vm358_vm1, %v252_v19 }
  0xeb   : > { %v685_v20 = vpop.f32.mrf.mxu0 }
  0xed   : > { %v339_v21 = vpop.f32.mrf.mxu0 }
  0xee   : > { %705 = vmatprep.mubr.msk.f32.mxu1 %vm358_vm1, %v339_v21 }
  0xef   : > { %v688_v22 = vpop.f32.mrf.mxu0  ;;  %706 = vmatmul.mubr.msk.f32.vlgmr.msra.gmra.mxu1 %vm358_vm1, %v685_v20 }
  0xf1   : > { %v349_v23 = vpop.f32.mrf.mxu0 }
  0xf2   : > { %708 = vmatprep.mubr.msk.f32.mxu1 %vm358_vm1, %v349_v23 }
  0xf3   : > { %709 = vmatmul.mubr.msk.f32.gmra.mxu1 %vm358_vm1, %v688_v22 }
 0x1af   : > { %v707_v24 = vpop.f32.mrf.mxu1 }
 0x1b0   : > { %481 = vst.msk [vmem:[%s218_s11 + $0x8] sm:$0xff] %vm260_vm0, %v707_v24 }
 0x1b1   : > { %v461_v25 = vpop.f32.mrf.mxu1 }
 0x1b2   : > { %480 = vst.msk [vmem:[%s218_s11] sm:$0xff] %vm260_vm0, %v461_v25 }
 0x1b3   : > { %v710_v26 = vpop.f32.mrf.mxu1 }
 0x1b4   : > { %483 = vst.msk [vmem:[%s218_s11 + $0x18] sm:$0xff] %vm260_vm0, %v710_v26 }
 0x1b5   : > { %v471_v27 = vpop.f32.mrf.mxu1 }
 0x1b6   : > { %482 = vst.msk [vmem:[%s218_s11 + $0x10] sm:$0xff] %vm260_vm0, %v471_v27 }
 0x1b7   : > { %797 = shalt.err (!%p794_p7)
}
 0x1b8   : > { %s798_s5 = scalar_lea.hbm %s1045_s24, 512  ;;  %s802_s8 = scalar_lea.hbm %s1106_s3, 2048 }
 0x1b9   : > { %p799_p9 = scmp.ne.s32.totalorder %s1045_s24, %s798_s5  ;;  %p803_p12 = scmp.lt.s32.totalorder %s1045_s24, %s1106_s3 }
 0x1ba   : > { %p804_p13 = scmp.lt.s32.totalorder %s802_s8, %s798_s5 }
 0x1bb   : > { %p800_p10 = pnand %p799_p9, %p952_p3 }
 0x1bc   : > { %p805_p0 = por %p804_p13, %p803_p12 }
 0x1bd   : > { %p801_p11 = pneg %p800_p10 }
 0x1bf   : > { %p806_p1 = pnand %p805_p0, %p801_p11 }
 0x1c1   : > { %809 = shalt.err (!%p806_p1)
}
 0x1c2   : > { %s879_s11 = smov 128   ;;  %s880_s15 = smov 8  }
 0x1c3   : > { %711 = dma.vmem_to_hbm [thread:$0]  (%p952_p3), %s1048_s20, 512, %s1045_s24, %s1052_s16, %s879_s11, %s879_s11, %s880_s15  }
 0x1c4 PF: > { %p717_p2 = scmp.ge.s32.totalorder %s876_s19, 2  ;;  %s515_s21 = sand.u32 1, %s848_s12  }
 0x1c5   : > { %s516_s4 = scalar_lea.sflag [#allocation3], %s515_s21 }
 0x1c6   : > { %p714_p4 = pnand %p717_p2, %p961_p8 }
 0x1c8   : > { %p715_p5 = pneg %p714_p4 }
 0x1ca   : > { %843 = dma.done.wait (%p715_p5), %s516_s4, 512  }
 0x1cb   : > { %845 = vsyncadd (%p715_p5), %s516_s4, 4294966784  ;;  %s16_s19 = sadd.s32 1, %s876_s19   ;;  %s1109_s12 = smov %s852_s13 }
 0x1cc   : > { %p13_p6 = scmp.ge.s32.totalorder %s16_s19, 6   ;;  %s1110_s13 = smov %s856_s14 }
 0x1cd   : > { %s1111_s14 = smov %s970_s30  ;;  %s1112_s15 = smov %s868_s17 }
 0x1ce   : > { %s1113_s16 = smov %s872_s18  ;;  %s1114_s17 = smov %s1117_s22 }
 0x1cf   : > { %s1115_s18 = smov %s1121_s23  ;;  %15 = sbr.rel (!%p13_p6) target bundleno = 5 (0x5), region = 73 }
 0x1d4   :  { %521 = vsyncpa [#allocation3], 1 }
 0x1d5   :  { %523 = vsyncpa [#allocation3 + $0x1], 1 }

</bundles_post_ra>
